<compile_context>
chip_gen: v7x
topology: tpu7x:2x2x1
jax: 0.10.0
libtpu: 0.0.40
codegen_flags: <defaults>
</compile_context>

<pallas_src>
import functools

import jax
import jax.numpy as jnp
from jax import lax
from jax.experimental import pallas as pl
from jax.experimental.pallas import tpu as pltpu

_VMEM_LIMIT = 32 * 1024 * 1024  # explicit scoped-VMEM cap, safe on v5e/v6e/v7x


# ----------------------------------------------------------------------------
# Fused 3x3 "same" conv + bias + ReLU + 2x2/2 max-pool, row-banded grid (N, H//band)
# ----------------------------------------------------------------------------
def _conv_band_kernel(x_ref, w_ref, b_ref, o_ref, scr_ref, *, n_dy):
    """
    x_ref  : (1, 1, (band + n_dy - 1)*W, Kd)  band slab (rows flattened h-major)
    w_ref  : (n_dy, Kd, Cout)                 per-dy weight slabs
    b_ref  : (1, Cout)
    o_ref  : (1, band//2, Wo, Cout)           pooled rows of this band
    scr_ref: (2, W, Cout) f32                 double-buffered vertical-max scratch
    n_dy   : 1 (full 3x3 im2col, Kd = 9*Cin) or 3 (dx-folded, Kd = 3*Cin)
    """
    _, hob, Wo, Cout = o_ref.shape
    W = 2 * Wo
    # Bias broadcast hoisted out of the (traced) loop body: emitted once per band.
    bias = jnp.broadcast_to(b_ref[...], (Wo, Cout))

    def body(p, carry):
        base = 2 * p                                   # first conv row of this pair
        # Accumulator initialised by the dy=0 dot (no zeros + add).
        start0 = pl.multiple_of(base * W, 8)
        acc = jnp.dot(x_ref[0, 0, pl.ds(start0, 2 * W), :], w_ref[0],
                      preferred_element_type=jnp.float32)
        for dy in range(1, n_dy):
            start = pl.multiple_of((base + dy) * W, 8)
            acc = acc + jnp.dot(x_ref[0, 0, pl.ds(start, 2 * W), :], w_ref[dy],
                                preferred_element_type=jnp.float32)
        # 2x2 max-pool; bias-add and ReLU commute with max, so they are applied to the
        # (smaller) pooled result -- identical math to maxpool(relu(conv + bias)).
        slot = p & 1                                   # double-buffered scratch slot
        scr_ref[slot] = jnp.maximum(acc[:W, :], acc[W:, :])        # vertical max
        even = scr_ref[slot, pl.ds(0, Wo, stride=2), :]
        odd = scr_ref[slot, pl.ds(1, Wo, stride=2), :]
        o_ref[0, p, :, :] = jnp.maximum(jnp.maximum(even, odd) + bias, 0.0)
        return carry

    lax.fori_loop(0, hob, body, 0)


def conv3x3_relu_pool(x_nhwc, w_hwio, b, *, band, full_im2col):
    N, H, W, Cin = x_nhwc.shape
    Cout = w_hwio.shape[-1]
    Ho, Wo = H // 2, W // 2
    assert band % 2 == 0 and H % band == 0
    nb = H // band

    xp = jnp.pad(x_nhwc, ((0, 0), (1, 1), (1, 1), (0, 0)))          # "same" pad = 1
    if full_im2col:
        # Full 3x3 im2col (K = 9*Cin): no inter-band halo needed.  Used for conv1,
        # where 9 vs 27 channels is free (both pad to 128 lanes).
        # NOTE(v5e): casting xcol (and w) to bf16 would halve the ~26 MB/img HBM
        # stream; kept f32 to preserve exact numerics.
        xcol = jnp.concatenate(
            [xp[:, dy:dy + H, dx:dx + W, :] for dy in range(3) for dx in range(3)],
            axis=-1)                                                # (N, H, W, 9*Cin)
        kd = 9 * Cin
        slabs = xcol.reshape(N, nb, band * W, kd)                   # free reshape
        wk = w_hwio.reshape(1, kd, Cout)                            # (dy,dx,cin) minor
        n_dy, srows = 1, band
    else:
        # dx-folded im2col (K = 3*Cin per dy tap): bands carry a 2-row halo, which the
        # wrapper bakes into per-band slabs so a plain Blocked index_map works.
        xdx = jnp.concatenate([xp[:, :, d:d + W, :] for d in range(3)], axis=-1)
        kd = 3 * Cin                                                # (N, H+2, W, 3*Cin)
        slabs = jnp.stack(
            [xdx[:, i * band:i * band + band + 2] for i in range(nb)], axis=1)
        slabs = slabs.reshape(N, nb, (band + 2) * W, kd)
        wk = w_hwio.reshape(3, kd, Cout)                            # (dx,cin) minor
        n_dy, srows = 3, band + 2

    kernel = functools.partial(_conv_band_kernel, n_dy=n_dy)
    return pl.pallas_call(
        kernel,
        out_shape=jax.ShapeDtypeStruct((N, Ho, Wo, Cout), jnp.float32),
        grid_spec=pltpu.PrefetchScalarGridSpec(
            num_scalar_prefetch=0,
            grid=(N, nb),                                           # image, row band
            in_specs=[
                pl.BlockSpec((1, 1, srows * W, kd), lambda n, bnd: (n, bnd, 0, 0)),
                pl.BlockSpec((n_dy, kd, Cout), lambda n, bnd: (0, 0, 0)),
                pl.BlockSpec((1, Cout), lambda n, bnd: (0, 0)),
            ],
            out_specs=pl.BlockSpec((1, band // 2, Wo, Cout),
                                   lambda n, bnd: (n, bnd, 0, 0)),
            scratch_shapes=[pltpu.VMEM((2, W, Cout), jnp.float32)],
        ),
        compiler_params=pltpu.CompilerParams(
            dimension_semantics=("parallel", "parallel"),           # both TCs on v7x
            vmem_limit_bytes=_VMEM_LIMIT),
    )(slabs, wk, b.reshape(1, Cout))


# ----------------------------------------------------------------------------
# Tiled linear: K-accumulating, N-tiled (parallel), + bias + activation  (fc1)
# ----------------------------------------------------------------------------
def _linear_kernel(x_ref, w_ref, b_ref, o_ref, acc_ref, *, activation):
    k = pl.program_id(1)

    @pl.when(k == 0)
    def _():
        acc_ref[...] = jnp.zeros_like(acc_ref)

    acc_ref[...] += jnp.dot(x_ref[...], w_ref[...],
                            preferred_element_type=jnp.float32)

    @pl.when(k == pl.num_programs(1) - 1)
    def _():
        z = acc_ref[...] + b_ref[...]
        if activation == "relu":
            z = jnp.maximum(z, 0.0)
        elif activation == "sigmoid":
            z = jax.nn.sigmoid(z)
        o_ref[...] = z.astype(o_ref.dtype)


def linear(x, w, b, *, activation="none", tk=None, tn=None, vmem_limit_bytes=None):
    B, K = x.shape
    Nout = w.shape[1]
    tk = K if tk is None else tk
    tn = Nout if tn is None else tn
    assert K % tk == 0 and Nout % tn == 0
    nk, nj = K // tk, Nout // tn
    return pl.pallas_call(
        functools.partial(_linear_kernel, activation=activation),
        out_shape=jax.ShapeDtypeStruct((B, Nout), jnp.float32),
        grid_spec=pltpu.PrefetchScalarGridSpec(
            num_scalar_prefetch=0,
            grid=(nj, nk),                       # N tiles (parallel), K tiles (reduction, last)
            in_specs=[
                pl.BlockSpec((B, tk), lambda j, k: (0, k)),
                pl.BlockSpec((tk, tn), lambda j, k: (k, j)),
                pl.BlockSpec((1, tn), lambda j, k: (0, j)),
            ],
            out_specs=pl.BlockSpec((B, tn), lambda j, k: (0, j)),
            scratch_shapes=[pltpu.VMEM((B, tn), jnp.float32)],
        ),
        compiler_params=pltpu.CompilerParams(
            dimension_semantics=("parallel", "arbitrary"),
            vmem_limit_bytes=vmem_limit_bytes),
    )(x, w, b.reshape(1, Nout))


# ----------------------------------------------------------------------------
# Parameters (deterministic, synthetic), one-time repack, and forward pass
# ----------------------------------------------------------------------------
def init_params(key):
    ks = jax.random.split(key, 10)

    def conv_w(k, cin, cout):
        return jax.random.normal(k, (3, 3, cin, cout), jnp.float32) * jnp.sqrt(2.0 / (9 * cin))

    return {
        "conv1_w": conv_w(ks[0], 3, 32),
        "conv1_b": 0.01 * jax.random.normal(ks[1], (32,), jnp.float32),
        "conv2_w": conv_w(ks[2], 32, 64),
        "conv2_b": 0.01 * jax.random.normal(ks[3], (64,), jnp.float32),
        "conv3_w": conv_w(ks[4], 64, 128),
        "conv3_b": 0.01 * jax.random.normal(ks[5], (128,), jnp.float32),
        "fc1_w": jax.random.normal(ks[6], (128 * 28 * 28, 512), jnp.float32)
                 * jnp.sqrt(2.0 / (128 * 28 * 28)),
        "fc1_b": 0.01 * jax.random.normal(ks[7], (512,), jnp.float32),
        "fc2_w": jax.random.normal(ks[8], (512, 1), jnp.float32) * jnp.sqrt(2.0 / 512),
        "fc2_b": 0.01 * jax.random.normal(ks[9], (1,), jnp.float32),
    }


def prepare_params(raw):
    """One-time (outside jit) repack of PyTorch-layout weights for the Pallas kernels."""
    p = dict(raw)
    # Fold PyTorch's (C, H, W) flatten order into fc1's weight rows so the kernel can
    # consume the NHWC activation flattened directly (no runtime transpose).
    p["fc1_w"] = (raw["fc1_w"].reshape(128, 28, 28, 512)
                  .transpose(1, 2, 0, 3).reshape(128 * 28 * 28, 512))
    # Optional (perf review): p["fc1_w"] = p["fc1_w"].astype(jnp.bfloat16) halves the
    # HBM-bound fc1 weight stream; kept f32 to preserve exact numerics.
    return p


def simple_cnn_forward(params, x_nchw):
    # Accept PyTorch NCHW, run kernels in NHWC (channels on the 128-lane axis).
    x = jnp.transpose(x_nchw, (0, 2, 3, 1))                                       # (N,224,224,3)
    x = conv3x3_relu_pool(x, params["conv1_w"], params["conv1_b"],
                          band=16, full_im2col=True)                              # (N,112,112,32)
    x = conv3x3_relu_pool(x, params["conv2_w"], params["conv2_b"],
                          band=16, full_im2col=False)                             # (N, 56, 56,64)
    x = conv3x3_relu_pool(x, params["conv3_w"], params["conv3_b"],
                          band=8, full_im2col=False)                              # (N, 28, 28,128)
    # fc1_w rows were pre-permuted to NHWC order, so flatten NHWC directly.
    x = x.reshape(x.shape[0], -1)                                                 # (N, 100352)
    x = linear(x, params["fc1_w"], params["fc1_b"], activation="relu",
               tk=7168, tn=256, vmem_limit_bytes=_VMEM_LIMIT)                     # (N, 512)
    # fc2 (512 -> 1) is a ~0.13 MFLOP matvec: a dedicated pallas_call is pure dispatch
    # overhead (perf review), so it stays a plain XLA dot + sigmoid.
    y = jax.nn.sigmoid(x @ params["fc2_w"] + params["fc2_b"])                     # (N, 1)
    return y


if __name__ == "__main__":
    key = jax.random.PRNGKey(0)
    pkey, xkey = jax.random.split(key)
    params = prepare_params(init_params(pkey))
    # fc1 (128*28*28 -> 512) implies 3x224x224 inputs; batch kept small (2).
    x = jax.random.normal(xkey, (2, 3, 224, 224), jnp.float32)                    # NCHW, like PyTorch
    fwd = jax.jit(simple_cnn_forward)
    y = jax.block_until_ready(fwd(params, x))
    assert y.shape == (2, 1) and y.dtype == jnp.float32
    print("KERNEL_OK")
</pallas_src>

<mosaic_0001>
module attributes {stable_mosaic.version = 11 : i64} {
  func.func @_conv_band_kernel(%arg0: i32, %arg1: i32, %arg2: memref<1x1x3584x27xf32, #tpu.memory_space<vmem>>, %arg3: memref<1x27x32xf32, #tpu.memory_space<vmem>>, %arg4: memref<1x32xf32, #tpu.memory_space<vmem>>, %arg5: memref<1x8x112x32xf32, #tpu.memory_space<vmem>>, %arg6: memref<2x224x32xf32, #tpu.memory_space<vmem>>) attributes {dimension_semantics = [#tpu.dimension_semantics<parallel>, #tpu.dimension_semantics<parallel>], iteration_bounds = array<i64: 2, 14>, scalar_prefetch = 0 : i64, scratch_operands = 1 : i64, tpu.core_type = #tpu.core_type<tc>, window_params = [{transform_indices = @transform_0, window_bounds = array<i64: 1, 1, 3584, 27>}, {pipeline_mode = #tpu.pipeline_mode<synchronous>, transform_indices = @transform_1, window_bounds = array<i64: 1, 27, 32>}, {pipeline_mode = #tpu.pipeline_mode<synchronous>, transform_indices = @transform_2, window_bounds = array<i64: 1, 32>}, {transform_indices = @transform_3, window_bounds = array<i64: 1, 8, 112, 32>}]} {
    %c0 = arith.constant 0 : index
    %c0_0 = arith.constant 0 : index
    %0 = vector.load %arg4[%c0, %c0_0] : memref<1x32xf32, #tpu.memory_space<vmem>>, vector<1x32xf32>
    %1 = vector.shape_cast %0 : vector<1x32xf32> to vector<1x32xf32>
    %2 = vector.broadcast %1 : vector<1x32xf32> to vector<112x32xf32>
    %c0_i32 = arith.constant 0 : i32
    %c8_i32 = arith.constant 8 : i32
    %3 = arith.addi %c0_i32, %c8_i32 : i32
    %c1_i32 = arith.constant 1 : i32
    scf.for %arg7 = %c0_i32 to %3 step %c1_i32  : i32 {
      %c2_i32 = arith.constant 2 : i32
      %4 = arith.muli %c2_i32, %arg7 : i32
      %c224_i32 = arith.constant 224 : i32
      %5 = arith.muli %4, %c224_i32 : i32
      %6 = tpu.assume_multiple %5, 8 : i32
      %c0_2 = arith.constant 0 : index
      %c0_3 = arith.constant 0 : index
      %7 = arith.index_cast %6 : i32 to index
      %c0_4 = arith.constant 0 : index
      %8 = vector.load %arg2[%c0_2, %c0_3, %7, %c0_4] : memref<1x1x3584x27xf32, #tpu.memory_space<vmem>>, vector<1x1x448x27xf32>
      %9 = vector.shape_cast %8 : vector<1x1x448x27xf32> to vector<448x27xf32>
      %c0_5 = arith.constant 0 : index
      %c0_6 = arith.constant 0 : index
      %c0_7 = arith.constant 0 : index
      %10 = vector.load %arg3[%c0_5, %c0_6, %c0_7] : memref<1x27x32xf32, #tpu.memory_space<vmem>>, vector<1x27x32xf32>
      %11 = vector.shape_cast %10 : vector<1x27x32xf32> to vector<27x32xf32>
      %cst = arith.constant dense<0.000000e+00> : vector<448x32xf32>
      %12 = tpu.matmul %9, %11, %cst {dimension_numbers = #tpu.dot_dimension_numbers<[1], [0], [0], [1], [0, 0, 1, 1], [], []>} : vector<448x27xf32>, vector<27x32xf32>, vector<448x32xf32> -> vector<448x32xf32>
      %c1_i32_8 = arith.constant 1 : i32
      %13 = arith.andi %arg7, %c1_i32_8 : i32
      %14 = vector.extract_strided_slice %12 {offsets = [0, 0], sizes = [224, 32], strides = [1, 1]} : vector<448x32xf32> to vector<224x32xf32>
      %15 = vector.extract_strided_slice %12 {offsets = [224, 0], sizes = [224, 32], strides = [1, 1]} : vector<448x32xf32> to vector<224x32xf32>
      %16 = arith.maximumf %14, %15 : vector<224x32xf32>
      %17 = arith.index_cast %13 : i32 to index
      %c0_9 = arith.constant 0 : index
      %c0_10 = arith.constant 0 : index
      %18 = vector.load %arg6[%17, %c0_9, %c0_10] : memref<2x224x32xf32, #tpu.memory_space<vmem>>, vector<1x224x32xf32>
      %19 = vector.shape_cast %18 : vector<1x224x32xf32> to vector<224x32xf32>
      %20 = vector.shape_cast %16 : vector<224x32xf32> to vector<1x224x32xf32>
      tpu.vector_store %arg6[%17, %c0_9, %c0_10], %20 {strides = array<i32>} : memref<2x224x32xf32, #tpu.memory_space<vmem>>, vector<1x224x32xf32>,
      %21 = arith.index_cast %13 : i32 to index
      %c0_11 = arith.constant 0 : index
      %c0_12 = arith.constant 0 : index
      %22 = tpu.strided_load %arg6[%21, %c0_11, %c0_12] {strides = array<i32: 1, 2, 1>} : memref<2x224x32xf32, #tpu.memory_space<vmem>>, vector<1x112x32xf32>
      %23 = vector.shape_cast %22 : vector<1x112x32xf32> to vector<112x32xf32>
      %24 = arith.index_cast %13 : i32 to index
      %c1 = arith.constant 1 : index
      %c0_13 = arith.constant 0 : index
      %25 = tpu.strided_load %arg6[%24, %c1, %c0_13] {strides = array<i32: 1, 2, 1>} : memref<2x224x32xf32, #tpu.memory_space<vmem>>, vector<1x112x32xf32>
      %26 = vector.shape_cast %25 : vector<1x112x32xf32> to vector<112x32xf32>
      %27 = arith.maximumf %23, %26 : vector<112x32xf32>
      %28 = arith.addf %27, %2 : vector<112x32xf32>
      %cst_14 = arith.constant 0.000000e+00 : f32
      %29 = vector.broadcast %cst_14 : f32 to vector<112x32xf32>
      %30 = arith.maximumf %28, %29 : vector<112x32xf32>
      %c0_15 = arith.constant 0 : index
      %31 = arith.index_cast %arg7 : i32 to index
      %c0_16 = arith.constant 0 : index
      %c0_17 = arith.constant 0 : index
      %32 = vector.load %arg5[%c0_15, %31, %c0_16, %c0_17] : memref<1x8x112x32xf32, #tpu.memory_space<vmem>>, vector<1x1x112x32xf32>
      %33 = vector.shape_cast %32 : vector<1x1x112x32xf32> to vector<112x32xf32>
      %34 = vector.shape_cast %30 : vector<112x32xf32> to vector<1x1x112x32xf32>
      tpu.vector_store %arg5[%c0_15, %31, %c0_16, %c0_17], %34 {strides = array<i32>} : memref<1x8x112x32xf32, #tpu.memory_space<vmem>>, vector<1x1x112x32xf32>,
    }
    %c8_i32_1 = arith.constant 8 : i32
    return
  }
  func.func @transform_0(%arg0: i32, %arg1: i32) -> (i32, i32, i32, i32) {
    %c0_i32 = arith.constant 0 : i32
    %c0_i32_0 = arith.constant 0 : i32
    %c0_i32_1 = arith.constant 0 : i32
    return %arg0, %arg1, %c0_i32, %c0_i32_0 : i32, i32, i32, i32
  }
  func.func @transform_1(%arg0: i32, %arg1: i32) -> (i32, i32, i32) {
    %c0_i32 = arith.constant 0 : i32
    %c0_i32_0 = arith.constant 0 : i32
    %c0_i32_1 = arith.constant 0 : i32
    %c0_i32_2 = arith.constant 0 : i32
    return %c0_i32, %c0_i32_0, %c0_i32_1 : i32, i32, i32
  }
  func.func @transform_2(%arg0: i32, %arg1: i32) -> (i32, i32) {
    %c0_i32 = arith.constant 0 : i32
    %c0_i32_0 = arith.constant 0 : i32
    %c0_i32_1 = arith.constant 0 : i32
    return %c0_i32, %c0_i32_0 : i32, i32
  }
  func.func @transform_3(%arg0: i32, %arg1: i32) -> (i32, i32, i32, i32) {
    %c0_i32 = arith.constant 0 : i32
    %c0_i32_0 = arith.constant 0 : i32
    %c0_i32_1 = arith.constant 0 : i32
    return %arg0, %arg1, %c0_i32, %c0_i32_0 : i32, i32, i32, i32
  }
}

module attributes {stable_mosaic.version = 11 : i64} {
  func.func @_conv_band_kernel(%arg0: i32, %arg1: i32, %arg2: memref<1x1x2016x96xf32, #tpu.memory_space<vmem>>, %arg3: memref<3x96x64xf32, #tpu.memory_space<vmem>>, %arg4: memref<1x64xf32, #tpu.memory_space<vmem>>, %arg5: memref<1x8x56x64xf32, #tpu.memory_space<vmem>>, %arg6: memref<2x112x64xf32, #tpu.memory_space<vmem>>) attributes {dimension_semantics = [#tpu.dimension_semantics<parallel>, #tpu.dimension_semantics<parallel>], iteration_bounds = array<i64: 2, 7>, scalar_prefetch = 0 : i64, scratch_operands = 1 : i64, tpu.core_type = #tpu.core_type<tc>, window_params = [{transform_indices = @transform_0, window_bounds = array<i64: 1, 1, 2016, 96>}, {pipeline_mode = #tpu.pipeline_mode<synchronous>, transform_indices = @transform_1, window_bounds = array<i64: 3, 96, 64>}, {pipeline_mode = #tpu.pipeline_mode<synchronous>, transform_indices = @transform_2, window_bounds = array<i64: 1, 64>}, {transform_indices = @transform_3, window_bounds = array<i64: 1, 8, 56, 64>}]} {
    %c0 = arith.constant 0 : index
    %c0_0 = arith.constant 0 : index
    %0 = vector.load %arg4[%c0, %c0_0] : memref<1x64xf32, #tpu.memory_space<vmem>>, vector<1x64xf32>
    %1 = vector.shape_cast %0 : vector<1x64xf32> to vector<1x64xf32>
    %2 = vector.broadcast %1 : vector<1x64xf32> to vector<56x64xf32>
    %c0_i32 = arith.constant 0 : i32
    %c8_i32 = arith.constant 8 : i32
    %3 = arith.addi %c0_i32, %c8_i32 : i32
    %c1_i32 = arith.constant 1 : i32
    scf.for %arg7 = %c0_i32 to %3 step %c1_i32  : i32 {
      %c2_i32 = arith.constant 2 : i32
      %4 = arith.muli %c2_i32, %arg7 : i32
      %c112_i32 = arith.constant 112 : i32
      %5 = arith.muli %4, %c112_i32 : i32
      %6 = tpu.assume_multiple %5, 8 : i32
      %c0_2 = arith.constant 0 : index
      %c0_3 = arith.constant 0 : index
      %7 = arith.index_cast %6 : i32 to index
      %c0_4 = arith.constant 0 : index
      %8 = vector.load %arg2[%c0_2, %c0_3, %7, %c0_4] : memref<1x1x2016x96xf32, #tpu.memory_space<vmem>>, vector<1x1x224x96xf32>
      %9 = vector.shape_cast %8 : vector<1x1x224x96xf32> to vector<224x96xf32>
      %c0_5 = arith.constant 0 : index
      %c0_6 = arith.constant 0 : index
      %c0_7 = arith.constant 0 : index
      %10 = vector.load %arg3[%c0_5, %c0_6, %c0_7] : memref<3x96x64xf32, #tpu.memory_space<vmem>>, vector<1x96x64xf32>
      %11 = vector.shape_cast %10 : vector<1x96x64xf32> to vector<96x64xf32>
      %cst = arith.constant dense<0.000000e+00> : vector<224x64xf32>
      %12 = tpu.matmul %9, %11, %cst {dimension_numbers = #tpu.dot_dimension_numbers<[1], [0], [0], [1], [0, 0, 1, 1], [], []>} : vector<224x96xf32>, vector<96x64xf32>, vector<224x64xf32> -> vector<224x64xf32>
      %c1_i32_8 = arith.constant 1 : i32
      %13 = arith.addi %4, %c1_i32_8 : i32
      %c112_i32_9 = arith.constant 112 : i32
      %14 = arith.muli %13, %c112_i32_9 : i32
      %15 = tpu.assume_multiple %14, 8 : i32
      %c0_10 = arith.constant 0 : index
      %c0_11 = arith.constant 0 : index
      %16 = arith.index_cast %15 : i32 to index
      %c0_12 = arith.constant 0 : index
      %17 = vector.load %arg2[%c0_10, %c0_11, %16, %c0_12] : memref<1x1x2016x96xf32, #tpu.memory_space<vmem>>, vector<1x1x224x96xf32>
      %18 = vector.shape_cast %17 : vector<1x1x224x96xf32> to vector<224x96xf32>
      %c1 = arith.constant 1 : index
      %c0_13 = arith.constant 0 : index
      %c0_14 = arith.constant 0 : index
      %19 = vector.load %arg3[%c1, %c0_13, %c0_14] : memref<3x96x64xf32, #tpu.memory_space<vmem>>, vector<1x96x64xf32>
      %20 = vector.shape_cast %19 : vector<1x96x64xf32> to vector<96x64xf32>
      %cst_15 = arith.constant dense<0.000000e+00> : vector<224x64xf32>
      %21 = tpu.matmul %18, %20, %cst_15 {dimension_numbers = #tpu.dot_dimension_numbers<[1], [0], [0], [1], [0, 0, 1, 1], [], []>} : vector<224x96xf32>, vector<96x64xf32>, vector<224x64xf32> -> vector<224x64xf32>
      %22 = arith.addf %12, %21 : vector<224x64xf32>
      %c2_i32_16 = arith.constant 2 : i32
      %23 = arith.addi %4, %c2_i32_16 : i32
      %c112_i32_17 = arith.constant 112 : i32
      %24 = arith.muli %23, %c112_i32_17 : i32
      %25 = tpu.assume_multiple %24, 8 : i32
      %c0_18 = arith.constant 0 : index
      %c0_19 = arith.constant 0 : index
      %26 = arith.index_cast %25 : i32 to index
      %c0_20 = arith.constant 0 : index
      %27 = vector.load %arg2[%c0_18, %c0_19, %26, %c0_20] : memref<1x1x2016x96xf32, #tpu.memory_space<vmem>>, vector<1x1x224x96xf32>
      %28 = vector.shape_cast %27 : vector<1x1x224x96xf32> to vector<224x96xf32>
      %c2 = arith.constant 2 : index
      %c0_21 = arith.constant 0 : index
      %c0_22 = arith.constant 0 : index
      %29 = vector.load %arg3[%c2, %c0_21, %c0_22] : memref<3x96x64xf32, #tpu.memory_space<vmem>>, vector<1x96x64xf32>
      %30 = vector.shape_cast %29 : vector<1x96x64xf32> to vector<96x64xf32>
      %cst_23 = arith.constant dense<0.000000e+00> : vector<224x64xf32>
      %31 = tpu.matmul %28, %30, %cst_23 {dimension_numbers = #tpu.dot_dimension_numbers<[1], [0], [0], [1], [0, 0, 1, 1], [], []>} : vector<224x96xf32>, vector<96x64xf32>, vector<224x64xf32> -> vector<224x64xf32>
      %32 = arith.addf %22, %31 : vector<224x64xf32>
      %c1_i32_24 = arith.constant 1 : i32
      %33 = arith.andi %arg7, %c1_i32_24 : i32
      %34 = vector.extract_strided_slice %32 {offsets = [0, 0], sizes = [112, 64], strides = [1, 1]} : vector<224x64xf32> to vector<112x64xf32>
      %35 = vector.extract_strided_slice %32 {offsets = [112, 0], sizes = [112, 64], strides = [1, 1]} : vector<224x64xf32> to vector<112x64xf32>
      %36 = arith.maximumf %34, %35 : vector<112x64xf32>
      %37 = arith.index_cast %33 : i32 to index
      %c0_25 = arith.constant 0 : index
      %c0_26 = arith.constant 0 : index
      %38 = vector.load %arg6[%37, %c0_25, %c0_26] : memref<2x112x64xf32, #tpu.memory_space<vmem>>, vector<1x112x64xf32>
      %39 = vector.shape_cast %38 : vector<1x112x64xf32> to vector<112x64xf32>
      %40 = vector.shape_cast %36 : vector<112x64xf32> to vector<1x112x64xf32>
      tpu.vector_store %arg6[%37, %c0_25, %c0_26], %40 {strides = array<i32>} : memref<2x112x64xf32, #tpu.memory_space<vmem>>, vector<1x112x64xf32>,
      %41 = arith.index_cast %33 : i32 to index
      %c0_27 = arith.constant 0 : index
      %c0_28 = arith.constant 0 : index
      %42 = tpu.strided_load %arg6[%41, %c0_27, %c0_28] {strides = array<i32: 1, 2, 1>} : memref<2x112x64xf32, #tpu.memory_space<vmem>>, vector<1x56x64xf32>
      %43 = vector.shape_cast %42 : vector<1x56x64xf32> to vector<56x64xf32>
      %44 = arith.index_cast %33 : i32 to index
      %c1_29 = arith.constant 1 : index
      %c0_30 = arith.constant 0 : index
      %45 = tpu.strided_load %arg6[%44, %c1_29, %c0_30] {strides = array<i32: 1, 2, 1>} : memref<2x112x64xf32, #tpu.memory_space<vmem>>, vector<1x56x64xf32>
      %46 = vector.shape_cast %45 : vector<1x56x64xf32> to vector<56x64xf32>
      %47 = arith.maximumf %43, %46 : vector<56x64xf32>
      %48 = arith.addf %47, %2 : vector<56x64xf32>
      %cst_31 = arith.constant 0.000000e+00 : f32
      %49 = vector.broadcast %cst_31 : f32 to vector<56x64xf32>
      %50 = arith.maximumf %48, %49 : vector<56x64xf32>
      %c0_32 = arith.constant 0 : index
      %51 = arith.index_cast %arg7 : i32 to index
      %c0_33 = arith.constant 0 : index
      %c0_34 = arith.constant 0 : index
      %52 = vector.load %arg5[%c0_32, %51, %c0_33, %c0_34] : memref<1x8x56x64xf32, #tpu.memory_space<vmem>>, vector<1x1x56x64xf32>
      %53 = vector.shape_cast %52 : vector<1x1x56x64xf32> to vector<56x64xf32>
      %54 = vector.shape_cast %50 : vector<56x64xf32> to vector<1x1x56x64xf32>
      tpu.vector_store %arg5[%c0_32, %51, %c0_33, %c0_34], %54 {strides = array<i32>} : memref<1x8x56x64xf32, #tpu.memory_space<vmem>>, vector<1x1x56x64xf32>,
    }
    %c8_i32_1 = arith.constant 8 : i32
    return
  }
  func.func @transform_0(%arg0: i32, %arg1: i32) -> (i32, i32, i32, i32) {
    %c0_i32 = arith.constant 0 : i32
    %c0_i32_0 = arith.constant 0 : i32
    %c0_i32_1 = arith.constant 0 : i32
    return %arg0, %arg1, %c0_i32, %c0_i32_0 : i32, i32, i32, i32
  }
  func.func @transform_1(%arg0: i32, %arg1: i32) -> (i32, i32, i32) {
    %c0_i32 = arith.constant 0 : i32
    %c0_i32_0 = arith.constant 0 : i32
    %c0_i32_1 = arith.constant 0 : i32
    %c0_i32_2 = arith.constant 0 : i32
    return %c0_i32, %c0_i32_0, %c0_i32_1 : i32, i32, i32
  }
  func.func @transform_2(%arg0: i32, %arg1: i32) -> (i32, i32) {
    %c0_i32 = arith.constant 0 : i32
    %c0_i32_0 = arith.constant 0 : i32
    %c0_i32_1 = arith.constant 0 : i32
    return %c0_i32, %c0_i32_0 : i32, i32
  }
  func.func @transform_3(%arg0: i32, %arg1: i32) -> (i32, i32, i32, i32) {
    %c0_i32 = arith.constant 0 : i32
    %c0_i32_0 = arith.constant 0 : i32
    %c0_i32_1 = arith.constant 0 : i32
    return %arg0, %arg1, %c0_i32, %c0_i32_0 : i32, i32, i32, i32
  }
}

module attributes {stable_mosaic.version = 11 : i64} {
  func.func @_conv_band_kernel(%arg0: i32, %arg1: i32, %arg2: memref<1x1x560x192xf32, #tpu.memory_space<vmem>>, %arg3: memref<3x192x128xf32, #tpu.memory_space<vmem>>, %arg4: memref<1x128xf32, #tpu.memory_space<vmem>>, %arg5: memref<1x4x28x128xf32, #tpu.memory_space<vmem>>, %arg6: memref<2x56x128xf32, #tpu.memory_space<vmem>>) attributes {dimension_semantics = [#tpu.dimension_semantics<parallel>, #tpu.dimension_semantics<parallel>], iteration_bounds = array<i64: 2, 7>, scalar_prefetch = 0 : i64, scratch_operands = 1 : i64, tpu.core_type = #tpu.core_type<tc>, window_params = [{transform_indices = @transform_0, window_bounds = array<i64: 1, 1, 560, 192>}, {pipeline_mode = #tpu.pipeline_mode<synchronous>, transform_indices = @transform_1, window_bounds = array<i64: 3, 192, 128>}, {pipeline_mode = #tpu.pipeline_mode<synchronous>, transform_indices = @transform_2, window_bounds = array<i64: 1, 128>}, {transform_indices = @transform_3, window_bounds = array<i64: 1, 4, 28, 128>}]} {
    %c0 = arith.constant 0 : index
    %c0_0 = arith.constant 0 : index
    %0 = vector.load %arg4[%c0, %c0_0] : memref<1x128xf32, #tpu.memory_space<vmem>>, vector<1x128xf32>
    %1 = vector.shape_cast %0 : vector<1x128xf32> to vector<1x128xf32>
    %2 = vector.broadcast %1 : vector<1x128xf32> to vector<28x128xf32>
    %c0_i32 = arith.constant 0 : i32
    %c4_i32 = arith.constant 4 : i32
    %3 = arith.addi %c0_i32, %c4_i32 : i32
    %c1_i32 = arith.constant 1 : i32
    scf.for %arg7 = %c0_i32 to %3 step %c1_i32  : i32 {
      %c2_i32 = arith.constant 2 : i32
      %4 = arith.muli %c2_i32, %arg7 : i32
      %c56_i32 = arith.constant 56 : i32
      %5 = arith.muli %4, %c56_i32 : i32
      %6 = tpu.assume_multiple %5, 8 : i32
      %c0_2 = arith.constant 0 : index
      %c0_3 = arith.constant 0 : index
      %7 = arith.index_cast %6 : i32 to index
      %c0_4 = arith.constant 0 : index
      %8 = vector.load %arg2[%c0_2, %c0_3, %7, %c0_4] : memref<1x1x560x192xf32, #tpu.memory_space<vmem>>, vector<1x1x112x192xf32>
      %9 = vector.shape_cast %8 : vector<1x1x112x192xf32> to vector<112x192xf32>
      %c0_5 = arith.constant 0 : index
      %c0_6 = arith.constant 0 : index
      %c0_7 = arith.constant 0 : index
      %10 = vector.load %arg3[%c0_5, %c0_6, %c0_7] : memref<3x192x128xf32, #tpu.memory_space<vmem>>, vector<1x192x128xf32>
      %11 = vector.shape_cast %10 : vector<1x192x128xf32> to vector<192x128xf32>
      %cst = arith.constant dense<0.000000e+00> : vector<112x128xf32>
      %12 = tpu.matmul %9, %11, %cst {dimension_numbers = #tpu.dot_dimension_numbers<[1], [0], [0], [1], [0, 0, 1, 1], [], []>} : vector<112x192xf32>, vector<192x128xf32>, vector<112x128xf32> -> vector<112x128xf32>
      %c1_i32_8 = arith.constant 1 : i32
      %13 = arith.addi %4, %c1_i32_8 : i32
      %c56_i32_9 = arith.constant 56 : i32
      %14 = arith.muli %13, %c56_i32_9 : i32
      %15 = tpu.assume_multiple %14, 8 : i32
      %c0_10 = arith.constant 0 : index
      %c0_11 = arith.constant 0 : index
      %16 = arith.index_cast %15 : i32 to index
      %c0_12 = arith.constant 0 : index
      %17 = vector.load %arg2[%c0_10, %c0_11, %16, %c0_12] : memref<1x1x560x192xf32, #tpu.memory_space<vmem>>, vector<1x1x112x192xf32>
      %18 = vector.shape_cast %17 : vector<1x1x112x192xf32> to vector<112x192xf32>
      %c1 = arith.constant 1 : index
      %c0_13 = arith.constant 0 : index
      %c0_14 = arith.constant 0 : index
      %19 = vector.load %arg3[%c1, %c0_13, %c0_14] : memref<3x192x128xf32, #tpu.memory_space<vmem>>, vector<1x192x128xf32>
      %20 = vector.shape_cast %19 : vector<1x192x128xf32> to vector<192x128xf32>
      %cst_15 = arith.constant dense<0.000000e+00> : vector<112x128xf32>
      %21 = tpu.matmul %18, %20, %cst_15 {dimension_numbers = #tpu.dot_dimension_numbers<[1], [0], [0], [1], [0, 0, 1, 1], [], []>} : vector<112x192xf32>, vector<192x128xf32>, vector<112x128xf32> -> vector<112x128xf32>
      %22 = arith.addf %12, %21 : vector<112x128xf32>
      %c2_i32_16 = arith.constant 2 : i32
      %23 = arith.addi %4, %c2_i32_16 : i32
      %c56_i32_17 = arith.constant 56 : i32
      %24 = arith.muli %23, %c56_i32_17 : i32
      %25 = tpu.assume_multiple %24, 8 : i32
      %c0_18 = arith.constant 0 : index
      %c0_19 = arith.constant 0 : index
      %26 = arith.index_cast %25 : i32 to index
      %c0_20 = arith.constant 0 : index
      %27 = vector.load %arg2[%c0_18, %c0_19, %26, %c0_20] : memref<1x1x560x192xf32, #tpu.memory_space<vmem>>, vector<1x1x112x192xf32>
      %28 = vector.shape_cast %27 : vector<1x1x112x192xf32> to vector<112x192xf32>
      %c2 = arith.constant 2 : index
      %c0_21 = arith.constant 0 : index
      %c0_22 = arith.constant 0 : index
      %29 = vector.load %arg3[%c2, %c0_21, %c0_22] : memref<3x192x128xf32, #tpu.memory_space<vmem>>, vector<1x192x128xf32>
      %30 = vector.shape_cast %29 : vector<1x192x128xf32> to vector<192x128xf32>
      %cst_23 = arith.constant dense<0.000000e+00> : vector<112x128xf32>
      %31 = tpu.matmul %28, %30, %cst_23 {dimension_numbers = #tpu.dot_dimension_numbers<[1], [0], [0], [1], [0, 0, 1, 1], [], []>} : vector<112x192xf32>, vector<192x128xf32>, vector<112x128xf32> -> vector<112x128xf32>
      %32 = arith.addf %22, %31 : vector<112x128xf32>
      %c1_i32_24 = arith.constant 1 : i32
      %33 = arith.andi %arg7, %c1_i32_24 : i32
      %34 = vector.extract_strided_slice %32 {offsets = [0, 0], sizes = [56, 128], strides = [1, 1]} : vector<112x128xf32> to vector<56x128xf32>
      %35 = vector.extract_strided_slice %32 {offsets = [56, 0], sizes = [56, 128], strides = [1, 1]} : vector<112x128xf32> to vector<56x128xf32>
      %36 = arith.maximumf %34, %35 : vector<56x128xf32>
      %37 = arith.index_cast %33 : i32 to index
      %c0_25 = arith.constant 0 : index
      %c0_26 = arith.constant 0 : index
      %38 = vector.load %arg6[%37, %c0_25, %c0_26] : memref<2x56x128xf32, #tpu.memory_space<vmem>>, vector<1x56x128xf32>
      %39 = vector.shape_cast %38 : vector<1x56x128xf32> to vector<56x128xf32>
      %40 = vector.shape_cast %36 : vector<56x128xf32> to vector<1x56x128xf32>
      tpu.vector_store %arg6[%37, %c0_25, %c0_26], %40 {strides = array<i32>} : memref<2x56x128xf32, #tpu.memory_space<vmem>>, vector<1x56x128xf32>,
      %41 = arith.index_cast %33 : i32 to index
      %c0_27 = arith.constant 0 : index
      %c0_28 = arith.constant 0 : index
      %42 = tpu.strided_load %arg6[%41, %c0_27, %c0_28] {strides = array<i32: 1, 2, 1>} : memref<2x56x128xf32, #tpu.memory_space<vmem>>, vector<1x28x128xf32>
      %43 = vector.shape_cast %42 : vector<1x28x128xf32> to vector<28x128xf32>
      %44 = arith.index_cast %33 : i32 to index
      %c1_29 = arith.constant 1 : index
      %c0_30 = arith.constant 0 : index
      %45 = tpu.strided_load %arg6[%44, %c1_29, %c0_30] {strides = array<i32: 1, 2, 1>} : memref<2x56x128xf32, #tpu.memory_space<vmem>>, vector<1x28x128xf32>
      %46 = vector.shape_cast %45 : vector<1x28x128xf32> to vector<28x128xf32>
      %47 = arith.maximumf %43, %46 : vector<28x128xf32>
      %48 = arith.addf %47, %2 : vector<28x128xf32>
      %cst_31 = arith.constant 0.000000e+00 : f32
      %49 = vector.broadcast %cst_31 : f32 to vector<28x128xf32>
      %50 = arith.maximumf %48, %49 : vector<28x128xf32>
      %c0_32 = arith.constant 0 : index
      %51 = arith.index_cast %arg7 : i32 to index
      %c0_33 = arith.constant 0 : index
      %c0_34 = arith.constant 0 : index
      %52 = vector.load %arg5[%c0_32, %51, %c0_33, %c0_34] : memref<1x4x28x128xf32, #tpu.memory_space<vmem>>, vector<1x1x28x128xf32>
      %53 = vector.shape_cast %52 : vector<1x1x28x128xf32> to vector<28x128xf32>
      %54 = vector.shape_cast %50 : vector<28x128xf32> to vector<1x1x28x128xf32>
      tpu.vector_store %arg5[%c0_32, %51, %c0_33, %c0_34], %54 {strides = array<i32>} : memref<1x4x28x128xf32, #tpu.memory_space<vmem>>, vector<1x1x28x128xf32>,
    }
    %c4_i32_1 = arith.constant 4 : i32
    return
  }
  func.func @transform_0(%arg0: i32, %arg1: i32) -> (i32, i32, i32, i32) {
    %c0_i32 = arith.constant 0 : i32
    %c0_i32_0 = arith.constant 0 : i32
    %c0_i32_1 = arith.constant 0 : i32
    return %arg0, %arg1, %c0_i32, %c0_i32_0 : i32, i32, i32, i32
  }
  func.func @transform_1(%arg0: i32, %arg1: i32) -> (i32, i32, i32) {
    %c0_i32 = arith.constant 0 : i32
    %c0_i32_0 = arith.constant 0 : i32
    %c0_i32_1 = arith.constant 0 : i32
    %c0_i32_2 = arith.constant 0 : i32
    return %c0_i32, %c0_i32_0, %c0_i32_1 : i32, i32, i32
  }
  func.func @transform_2(%arg0: i32, %arg1: i32) -> (i32, i32) {
    %c0_i32 = arith.constant 0 : i32
    %c0_i32_0 = arith.constant 0 : i32
    %c0_i32_1 = arith.constant 0 : i32
    return %c0_i32, %c0_i32_0 : i32, i32
  }
  func.func @transform_3(%arg0: i32, %arg1: i32) -> (i32, i32, i32, i32) {
    %c0_i32 = arith.constant 0 : i32
    %c0_i32_0 = arith.constant 0 : i32
    %c0_i32_1 = arith.constant 0 : i32
    return %arg0, %arg1, %c0_i32, %c0_i32_0 : i32, i32, i32, i32
  }
}

module attributes {stable_mosaic.version = 11 : i64} {
  func.func @_linear_kernel(%arg0: i32, %arg1: i32, %arg2: memref<2x7168xf32, #tpu.memory_space<vmem>>, %arg3: memref<7168x256xf32, #tpu.memory_space<vmem>>, %arg4: memref<1x256xf32, #tpu.memory_space<vmem>>, %arg5: memref<2x256xf32, #tpu.memory_space<vmem>>, %arg6: memref<2x256xf32, #tpu.memory_space<vmem>>) attributes {dimension_semantics = [#tpu.dimension_semantics<parallel>, #tpu.dimension_semantics<arbitrary>], iteration_bounds = array<i64: 2, 14>, scalar_prefetch = 0 : i64, scratch_operands = 1 : i64, tpu.core_type = #tpu.core_type<tc>, window_params = [{transform_indices = @transform_0, window_bounds = array<i64: 2, 7168>}, {transform_indices = @transform_1, window_bounds = array<i64: 7168, 256>}, {transform_indices = @transform_2, window_bounds = array<i64: 1, 256>}, {transform_indices = @transform_3, window_bounds = array<i64: 2, 256>}]} {
    %c0_i32 = arith.constant 0 : i32
    %0 = arith.cmpi eq, %arg1, %c0_i32 : i32
    %1 = arith.extui %0 : i1 to i32
    %c0_i32_0 = arith.constant 0 : i32
    %2 = arith.cmpi ne, %1, %c0_i32_0 : i32
    scf.if %2 {
      %cst_9 = arith.constant 0.000000e+00 : f32
      %12 = vector.broadcast %cst_9 : f32 to vector<2x256xf32>
      %c0_10 = arith.constant 0 : index
      %c0_11 = arith.constant 0 : index
      %13 = vector.load %arg6[%c0_10, %c0_11] : memref<2x256xf32, #tpu.memory_space<vmem>>, vector<2x256xf32>
      tpu.vector_store %arg6[%c0_10, %c0_11], %12 {strides = array<i32>} : memref<2x256xf32, #tpu.memory_space<vmem>>, vector<2x256xf32>,
    } else {
    }
    %c0 = arith.constant 0 : index
    %c0_1 = arith.constant 0 : index
    %3 = vector.load %arg6[%c0, %c0_1] : memref<2x256xf32, #tpu.memory_space<vmem>>, vector<2x256xf32>
    %c0_2 = arith.constant 0 : index
    %c0_3 = arith.constant 0 : index
    %4 = vector.load %arg2[%c0_2, %c0_3] : memref<2x7168xf32, #tpu.memory_space<vmem>>, vector<2x7168xf32>
    %c0_4 = arith.constant 0 : index
    %c0_5 = arith.constant 0 : index
    %5 = vector.load %arg3[%c0_4, %c0_5] : memref<7168x256xf32, #tpu.memory_space<vmem>>, vector<7168x256xf32>
    %cst = arith.constant dense<0.000000e+00> : vector<2x256xf32>
    %6 = tpu.matmul %4, %5, %cst {dimension_numbers = #tpu.dot_dimension_numbers<[1], [0], [0], [1], [0, 0, 1, 1], [], []>} : vector<2x7168xf32>, vector<7168x256xf32>, vector<2x256xf32> -> vector<2x256xf32>
    %7 = arith.addf %3, %6 : vector<2x256xf32>
    %c0_6 = arith.constant 0 : index
    %c0_7 = arith.constant 0 : index
    %8 = vector.load %arg6[%c0_6, %c0_7] : memref<2x256xf32, #tpu.memory_space<vmem>>, vector<2x256xf32>
    tpu.vector_store %arg6[%c0_6, %c0_7], %7 {strides = array<i32>} : memref<2x256xf32, #tpu.memory_space<vmem>>, vector<2x256xf32>,
    %c13_i32 = arith.constant 13 : i32
    %9 = arith.cmpi eq, %arg1, %c13_i32 : i32
    %10 = arith.extui %9 : i1 to i32
    %c0_i32_8 = arith.constant 0 : i32
    %11 = arith.cmpi ne, %10, %c0_i32_8 : i32
    scf.if %11 {
      %c0_9 = arith.constant 0 : index
      %c0_10 = arith.constant 0 : index
      %12 = vector.load %arg6[%c0_9, %c0_10] : memref<2x256xf32, #tpu.memory_space<vmem>>, vector<2x256xf32>
      %c0_11 = arith.constant 0 : index
      %c0_12 = arith.constant 0 : index
      %13 = vector.load %arg4[%c0_11, %c0_12] : memref<1x256xf32, #tpu.memory_space<vmem>>, vector<1x256xf32>
      %14 = vector.broadcast %13 : vector<1x256xf32> to vector<2x256xf32>
      %15 = arith.addf %12, %14 : vector<2x256xf32>
      %cst_13 = arith.constant 0.000000e+00 : f32
      %16 = vector.broadcast %cst_13 : f32 to vector<2x256xf32>
      %17 = arith.maximumf %15, %16 : vector<2x256xf32>
      %c0_14 = arith.constant 0 : index
      %c0_15 = arith.constant 0 : index
      %18 = vector.load %arg5[%c0_14, %c0_15] : memref<2x256xf32, #tpu.memory_space<vmem>>, vector<2x256xf32>
      tpu.vector_store %arg5[%c0_14, %c0_15], %17 {strides = array<i32>} : memref<2x256xf32, #tpu.memory_space<vmem>>, vector<2x256xf32>,
    } else {
    }
    return
  }
  func.func @transform_0(%arg0: i32, %arg1: i32) -> (i32, i32) {
    %c0_i32 = arith.constant 0 : i32
    %c0_i32_0 = arith.constant 0 : i32
    return %c0_i32, %arg1 : i32, i32
  }
  func.func @transform_1(%arg0: i32, %arg1: i32) -> (i32, i32) {
    %c0_i32 = arith.constant 0 : i32
    return %arg1, %arg0 : i32, i32
  }
  func.func @transform_2(%arg0: i32, %arg1: i32) -> (i32, i32) {
    %c0_i32 = arith.constant 0 : i32
    %c0_i32_0 = arith.constant 0 : i32
    return %c0_i32, %arg0 : i32, i32
  }
  func.func @transform_3(%arg0: i32, %arg1: i32) -> (i32, i32) {
    %c0_i32 = arith.constant 0 : i32
    %c0_i32_0 = arith.constant 0 : i32
    return %c0_i32, %arg0 : i32, i32
  }
}

</mosaic_0001>

<bundles_post_ra>
// kernel: simple_cnn_forward.4
= control target key start
LH: loop header
LB: loop body
LE: loop exit
PB: predicated region body
PF: predicated region fallthrough
CT: control target
= control target key end

     0   :  { %8 = vsyncpa [#allocation4], 0  ;;  %s2004_s0 = inlined_call_operand.hbm [shape: f32[2,14,3584,27], index: 0, kind: input, shape index: {}]   ;;  %s2005_s1 = inlined_call_operand.vmem [shape: f32[1,27,32], index: 1, kind: input, shape index: {}]   ;;  %s2006_s2 = inlined_call_operand.vmem [shape: f32[1,32], index: 2, kind: input, shape index: {}]   ;;  %s2007_s3 = inlined_call_operand.vmem [shape: f32[2,112,112,32], index: 3, kind: output, shape index: {}]  }
   0x1   :  { %10 = vsyncpa [#allocation4 + $0x1], 0  ;;  %s1580_s12 = smov 0   ;;  %s1582_s13 = smov 0  }
   0x2   :  { %s1584_s14 = smov 0   ;;  %s1586_s15 = smov 0  }
   0x3   :  { %s1588_s16 = smov 0   ;;  %s1590_s17 = smov 0  }
   0x4   :  { %s1592_s18 = smov 0   ;;  %s1594_s19 = smov 0  }
   0x5 LB: > { %s1101_s20 = sadd.s32 4294967295, %s1550_s19   ;;  %s25_s21 = sadd.s32 1, %s1542_s17  ;;  %s1550_s19 = sphi %s1594_s19, %s16_s19   ;;  %s1546_s18 = sphi %s1592_s18, %s2017_s18   ;;  %s1542_s17 = sphi %s1590_s17, %s2016_s17   ;;  %s1538_s16 = sphi %s1588_s16, %s2015_s16   ;;  %s1534_s15 = sphi %s1586_s15, %s2014_s15   ;;  %s1530_s14 = sphi %s1584_s14, %s2013_s14   ;;  %s1526_s13 = sphi %s1582_s13, %s2012_s13   ;;  %s1522_s12 = sphi %s1580_s12, %s2011_s12  }
   0x6   : > { %p26_p0 = scmp.ge.s32.totalorder %s25_s21, 14  ;;  %s28_s22 = sadd.s32 1, %s1546_s18 }
   0x7   : > { %s37_s23 = sadd.s32 1, %s1530_s14  ;;  %p44_p1 = scmp.ne.s32.totalorder %s1530_s14, %s1526_s13 }
   0x8   : > { %s2019_s21 = smov (%p26_p0, %s25_s21), 0  ;;  %s2021_s22 = smov (!%p26_p0, %s28_s22), %s1546_s18 }
   0x9   : > { %s33_s24 = ssub.s32 %s1542_s17, %s2019_s21  ;;  %p45_p2 = scmp.eq.s32.totalorder %s1550_s19, 0 }
   0xa   : > { %p30_p3 = scmp.ge.s32.totalorder %s2021_s22, 2  ;;  %p50_p4 = scmp.ne.s32.totalorder %s1526_s13, %s1522_s12 }
   0xb   : > { %p46_p5 = por %p45_p2, %p44_p1  ;;  %p51_p6 = scmp.eq.s32.totalorder %s1101_s20, 0 }
   0xc   : > { %s2023_s22 = smov (%p30_p3, %s2021_s22), 0  ;;  %p1374_p8 = scmp.lt.s32.totalorder %s1550_s19, 28 }
   0xd   : > { %p1633_p7 = por %p51_p6, %p50_p4  ;;  %s32_s26 = ssub.s32 %s1546_s18, %s2023_s22 }
   0xe   : > { %s34_s27 = sor.u32 %s33_s24, %s32_s26  ;;  %s150_s28 = sand.u32 1, %s1530_s14  }
   0xf   : > { %p35_p9 = scmp.eq.s32.totalorder %s34_s27, 0  ;;  %s1362_s29 = smul.u32 3584, %s150_s28 }
  0x10   : > { %p1641_p10 = pnand %p1374_p8, %p46_p5  ;;  %s1363_s5 = smul.u32 448, %s1542_s17 }
  0x11   : > { %s1646_s4 = scalar_select %p35_p9, %s1530_s14, %s37_s23  }
  0x12   : > { %s1364_s6 = smul.u32 6272, %s1546_s18  ;;  %s154_s7 = scalar_lea.vmem [#allocation3], %s1362_s29 }
  0x13   : > { %s163_s8 = sshll.u32 %s154_s7, 4  ;;  %s1658_s23 = scalar_lea.sflag [#allocation4], %s150_s28  ;;  %s1650_s8 = int_to_ptr.vmem [resolvable:$true] %s163_s8 }
  0x14   : > { %s160_s9 = sadd.s32 %s1364_s6, %s1363_s5  ;;  %p1452_p13 = pneg %p1641_p10 }
  0x15   : > { %s1105_s10 = sshll.u32 %s160_s9, 7  ;;  %s1455_s29 = scalar_lea.hbm %s2004_s0, 1605632 }
  0x16   : > { %s1655_s20 = scalar_lea.hbm %s2004_s0, %s1105_s10 }
  0x17   : > { %s1450_s24 = scalar_lea.hbm %s1655_s20, 57344  ;;  %p1456_p2 = scmp.lt.u32.totalorder %s1655_s20, %s2004_s0 }
  0x18   : > { %p1451_p12 = scmp.ne.s32.totalorder %s1655_s20, %s1450_s24  ;;  %p1457_p3 = scmp.lt.u32.totalorder %s1455_s29, %s1450_s24 }
  0x19   : > { %p1459_p5 = scmp.lt.u32.totalorder %s1450_s24, %s1655_s20 }
  0x1a   : > { %p1453_p0 = pnand %p1452_p13, %p1451_p12  ;;  %p1458_p4 = por %p1457_p3, %p1456_p2 }
  0x1c   : > { %p1454_p1 = pneg %p1453_p0  ;;  %p1460_p6 = por %p1459_p5, %p1458_p4 }
  0x1e   : > { %p1461_p8 = pnand %p1460_p6, %p1454_p1 }
  0x20   : > { %1464 = shalt.err (!%p1461_p8)
}
  0x21   : > { %s1465_s28 = scalar_lea.vmem %s1650_s8, 57344  ;;  %s1556_s7 = smov [#allocation3]  }
  0x22   : > { %p1466_p9 = scmp.ne.s32.totalorder %s1650_s8, %s1465_s28  ;;  %s1470_s9 = sshll.u32 %s1556_s7, 4  ;;  %s1471_s9 = int_to_ptr.vmem [resolvable:$false] %s1470_s9 }
  0x23   : > { %s1472_s10 = scalar_lea.vmem %s1471_s9, 114688  ;;  %p1473_p11 = scmp.lt.s32.totalorder %s1650_s8, %s1471_s9 }
  0x24   : > { %p1468_p12 = pnand %p1466_p9, %p1452_p13  ;;  %p1474_p2 = scmp.lt.s32.totalorder %s1472_s10, %s1465_s28 }
  0x26   : > { %p1469_p0 = pneg %p1468_p12  ;;  %p1475_p3 = por %p1474_p2, %p1473_p11 }
  0x28   : > { %p1476_p4 = pnand %p1475_p3, %p1469_p0 }
  0x2a   : > { %1479 = shalt.err (!%p1476_p4)
}
  0x2b   : > { %s1557_s11 = smov 128   ;;  %s1558_s12 = smov 8  }
  0x2c   : > { %1373 = dma.hbm_to_vmem [thread:$0]  (!%p1641_p10), %s1655_s20, 57344, %s1650_s8, %s1658_s23, %s1557_s11, %s1557_s11, %s1558_s12  }
  0x2d   : > { %p171_p13 = scmp.lt.s32.totalorder %s1550_s19, 29  ;;  %p2010_p1 = scmp.ge.s32.totalorder %s1550_s19, 1 }
  0x2f   : > { %p172_p5 = pnand %p2010_p1, %p171_p13 }
  0x30   : > { %s177_s24 = sand.u32 (!%p172_p5), 1, %s1526_s13  }
  0x31   : > { %175 = sbr.rel (%p172_p5) target bundleno = 359 (0x167), region = 32  ;;  %s178_s27 = scalar_lea.sflag (!%p172_p5), [#allocation4], %s177_s24 }
  0x32   : > { %s1690_s26 = smul.u32 (!%p172_p5), 3584, %s177_s24 }
  0x34   : > { %s181_s29 = scalar_lea.vmem (!%p172_p5), [#allocation3], %s1690_s26 }
  0x38   : > { %1517 = dma.done.wait (%p1633_p7), %s178_s27, 57344  }
  0x39   : > { %1519 = vsyncadd (%p1633_p7), %s178_s27, 4294909952  ;;  %s1107_s30 = sshll.u32 %s1534_s15, 3  ;;  %p210_p10 = scmp.lt.s32.totalorder %s1538_s16, 1  ;;  %v1703_v0 = vld [vmem:[%s2006_s2] ss:$0 sm:$0xff] }
  0x3a   : > { %p212_p11 = scmp.lt.s32.totalorder %s1107_s30, 111  ;;  %s1710_s10 = smov 0  }
  0x3b   : > { %s2025_s16 = smov (!%p210_p10, %s1538_s16), 1 }
  0x3c   : > { %s2027_s30 = smov (!%p212_p11, %s1107_s30), 111  ;;  %s1367_s8 = smul.u32 1568, %s2025_s16 }
  0x3d   : > { %s1366_s20 = smul.u32 14, %s2027_s30 }
  0x3f   : > { %s216_s6 = sadd.s32 %s1367_s8, %s1366_s20 }
  0x40   : > { %s1108_s28 = sshll.u32 %s216_s6, 3 }
  0x41   : > { %s1708_s9 = scalar_lea.vmem %s2007_s3, %s1108_s28 }
  0x42 LB: >> { %v291_v1 = vld [vmem:[%s2005_s1] sm:$0xff]  ;;  %v292_v2 = vld [vmem:[%s2005_s1 + $0x8] sm:$0xff]  ;;  %v293_v3 = vld [vmem:[%s2005_s1 + $0x10] sm:$0xff]  ;;  %vm464_vm0 = vcmask 1042432   ;;  %vm1559_vm1 = vmmov 1   ;;  %s233_s20 = smul.u32 448, %s1554_s10  ;;  %s1554_s10 = sphi %s1710_s10, %s232_s10  }
  0x43   : >> { %v1348_v4 = vpack.c.bf16 %v292_v2, %v291_v1  ;;  %v294_v5 = vld [vmem:[%s2005_s1 + $0x18] sm:$0x7]  ;;  %vm1353_vm2 = vmpackc.low %vm464_vm0, %vm1559_vm1  ;;  %vm295_vm3 = vcmask 220160   ;;  %s813_s5 = sand.u32 1, %s1554_s10  ;;  %vm844_vm4 = vcmask 261120   ;;  %s970_s7 = smul.u32 112, %s1554_s10 }
  0x44   : >> { %v1352_v6 = vpack.c.bf16 %v294_v5, %v293_v3  ;;  %s1730_s23 = scalar_lea.vmem %s181_s29, %s233_s20 [#allocation3]  ;;  %s842_s6 = smul.u32 224, %s813_s5 }
  0x45   : >> { %1349 = vmatprep.subr.bf16.mxu0 %v1348_v4  ;;  %1358 = vmatprep.subr.bf16.mxu1 %v1348_v4  ;;  %v235_v7 = vld [vmem:[%s1730_s23] sm:$0xff]  ;;  %v236_v9 = vld [vmem:[%s1730_s23 + $0x8] sm:$0xff]  ;;  %v237_v11 = vld [vmem:[%s1730_s23 + $0x10] sm:$0xff]  ;;  %s1864_s25 = scalar_lea.vmem %s1708_s9, %s970_s7  ;;  %s232_s10 = sadd.s32 1, %s1554_s10  }
  0x46   : >> { %1351 = vmatpush3.bf16.msra.mxu0 %v1348_v4  ;;  %1360 = vmatpush3.bf16.msra.mxu1 %v1348_v4  ;;  %v263_v8 = vld [vmem:[%s1730_s23 + $0xe0] sm:$0xff]  ;;  %v264_v10 = vld [vmem:[%s1730_s23 + $0xe8] sm:$0xff]  ;;  %v265_v12 = vld [vmem:[%s1730_s23 + $0xf0] sm:$0xff]  ;;  %s1845_s28 = scalar_lea.vmem [#allocation2], %s842_s6  ;;  %p229_p7 = scmp.ge.s32.totalorder %s232_s10, 8  }
  0x47   : >> { %1354 = vmatprep.subr.msk.bf16.mxu0 %vm1353_vm2, %v1352_v6  ;;  %1359 = vmatprep.subr.msk.bf16.mxu1 %vm1353_vm2, %v1352_v6  ;;  %v238_v13 = vld [vmem:[%s1730_s23 + $0x18] sm:$0xff]  ;;  %v239_v15 = vld [vmem:[%s1730_s23 + $0x20] sm:$0xff]  ;;  %v240_v17 = vld [vmem:[%s1730_s23 + $0x28] sm:$0xff] }
  0x48   : >> { %1264 = vmatprep.mubr.msk.f32.mxu0 %vm295_vm3, %v235_v7  ;;  %1306 = vmatprep.mubr.msk.f32.mxu1 %vm295_vm3, %v263_v8  ;;  %v266_v14 = vld [vmem:[%s1730_s23 + $0xf8] sm:$0xff]  ;;  %v267_v16 = vld [vmem:[%s1730_s23 + $0x100] sm:$0xff]  ;;  %v268_v18 = vld [vmem:[%s1730_s23 + $0x108] sm:$0xff] }
  0x49   : >> { %v241_v19 = vld [vmem:[%s1730_s23 + $0x30] sm:$0xff]  ;;  %v242_v21 = vld [vmem:[%s1730_s23 + $0x38] sm:$0xff]  ;;  %v243_v23 = vld [vmem:[%s1730_s23 + $0x40] sm:$0xff] }
  0x4a   : >> { %1357 = vmatpush3.bf16.msk.msra.mxu0 %vm1353_vm2, %v1352_v6  ;;  %1361 = vmatpush3.bf16.msk.msra.mxu1 %vm1353_vm2, %v1352_v6  ;;  %v269_v20 = vld [vmem:[%s1730_s23 + $0x110] sm:$0xff]  ;;  %v270_v22 = vld [vmem:[%s1730_s23 + $0x118] sm:$0xff]  ;;  %v271_v24 = vld [vmem:[%s1730_s23 + $0x120] sm:$0xff] }
  0x4b   : >> { %v244_v25 = vld [vmem:[%s1730_s23 + $0x48] sm:$0xff]  ;;  %v245_v27 = vld [vmem:[%s1730_s23 + $0x50] sm:$0xff]  ;;  %v246_v29 = vld [vmem:[%s1730_s23 + $0x58] sm:$0xff] }
  0x4c   : >> { %v272_v26 = vld [vmem:[%s1730_s23 + $0x128] sm:$0xff]  ;;  %v273_v28 = vld [vmem:[%s1730_s23 + $0x130] sm:$0xff]  ;;  %v274_v30 = vld [vmem:[%s1730_s23 + $0x138] sm:$0xff] }
  0x4d   : >> { %1265 = vmatmul.mubr.msk.f32.vlgmr.msra.gmra.mrb[0].mxu0 %vm295_vm3, %v236_v9  ;;  %1307 = vmatmul.mubr.msk.f32.vlgmr.msra.gmra.mrb[0].mxu1 %vm295_vm3, %v264_v10  ;;  %v247_v31 = vld [vmem:[%s1730_s23 + $0x60] sm:$0xff]  ;;  %v248_v33 = vld [vmem:[%s1730_s23 + $0x68] sm:$0xff]  ;;  %v249_v35 = vld [vmem:[%s1730_s23 + $0x70] sm:$0xff] }
  0x4e   : >> { %1267 = vmatprep.mubr.msk.f32.mxu0 %vm295_vm3, %v237_v11  ;;  %1309 = vmatprep.mubr.msk.f32.mxu1 %vm295_vm3, %v265_v12  ;;  %v275_v32 = vld [vmem:[%s1730_s23 + $0x140] sm:$0xff]  ;;  %v276_v34 = vld [vmem:[%s1730_s23 + $0x148] sm:$0xff]  ;;  %v277_v36 = vld [vmem:[%s1730_s23 + $0x150] sm:$0xff] }
  0x4f   : >> { %v250_v37 = vld [vmem:[%s1730_s23 + $0x78] sm:$0xff]  ;;  %v251_v39 = vld [vmem:[%s1730_s23 + $0x80] sm:$0xff]  ;;  %v252_v41 = vld [vmem:[%s1730_s23 + $0x88] sm:$0xff] }
  0x50   : >> { %v278_v38 = vld [vmem:[%s1730_s23 + $0x158] sm:$0xff]  ;;  %v279_v40 = vld [vmem:[%s1730_s23 + $0x160] sm:$0xff]  ;;  %v280_v42 = vld [vmem:[%s1730_s23 + $0x168] sm:$0xff] }
  0x51   : >> { %1268 = vmatmul.mubr.msk.f32.gmra.mrb[2].mxu0 %vm295_vm3, %v238_v13  ;;  %1310 = vmatmul.mubr.msk.f32.gmra.mrb[2].mxu1 %vm295_vm3, %v266_v14  ;;  %v253_v43 = vld [vmem:[%s1730_s23 + $0x90] sm:$0xff]  ;;  %v254_v45 = vld [vmem:[%s1730_s23 + $0x98] sm:$0xff]  ;;  %v255_v47 = vld [vmem:[%s1730_s23 + $0xa0] sm:$0xff] }
  0x52   : >> { %1270 = vmatprep.mubr.msk.f32.mxu0 %vm295_vm3, %v239_v15  ;;  %1312 = vmatprep.mubr.msk.f32.mxu1 %vm295_vm3, %v267_v16  ;;  %v281_v44 = vld [vmem:[%s1730_s23 + $0x170] sm:$0xff]  ;;  %v282_v46 = vld [vmem:[%s1730_s23 + $0x178] sm:$0xff]  ;;  %v283_v48 = vld [vmem:[%s1730_s23 + $0x180] sm:$0xff] }
  0x53   : >> { %v256_v49 = vld [vmem:[%s1730_s23 + $0xa8] sm:$0xff]  ;;  %v257_v51 = vld [vmem:[%s1730_s23 + $0xb0] sm:$0xff]  ;;  %v258_v53 = vld [vmem:[%s1730_s23 + $0xb8] sm:$0xff] }
  0x54   : >> { %v284_v50 = vld [vmem:[%s1730_s23 + $0x188] sm:$0xff]  ;;  %v285_v52 = vld [vmem:[%s1730_s23 + $0x190] sm:$0xff]  ;;  %v286_v54 = vld [vmem:[%s1730_s23 + $0x198] sm:$0xff] }
  0x55   : >> { %1271 = vmatmul.mubr.msk.f32.gmra.mrb[4].mxu0 %vm295_vm3, %v240_v17  ;;  %1313 = vmatmul.mubr.msk.f32.gmra.mrb[4].mxu1 %vm295_vm3, %v268_v18  ;;  %v259_v55 = vld [vmem:[%s1730_s23 + $0xc0] sm:$0xff]  ;;  %v260_v57 = vld [vmem:[%s1730_s23 + $0xc8] sm:$0xff]  ;;  %v261_v59 = vld [vmem:[%s1730_s23 + $0xd0] sm:$0xff] }
  0x56   : >> { %1273 = vmatprep.mubr.msk.f32.mxu0 %vm295_vm3, %v241_v19  ;;  %1315 = vmatprep.mubr.msk.f32.mxu1 %vm295_vm3, %v269_v20  ;;  %v287_v56 = vld [vmem:[%s1730_s23 + $0x1a0] sm:$0xff]  ;;  %v288_v58 = vld [vmem:[%s1730_s23 + $0x1a8] sm:$0xff]  ;;  %v289_v60 = vld [vmem:[%s1730_s23 + $0x1b0] sm:$0xff] }
  0x57   : >> { %v262_v61 = vld [vmem:[%s1730_s23 + $0xd8] sm:$0xff] }
  0x58   : >> { %v290_v62 = vld [vmem:[%s1730_s23 + $0x1b8] sm:$0xff] }
  0x59   : >> { %1274 = vmatmul.mubr.msk.f32.gmra.mrb[6].mxu0 %vm295_vm3, %v242_v21  ;;  %1316 = vmatmul.mubr.msk.f32.gmra.mrb[6].mxu1 %vm295_vm3, %v270_v22 }
  0x5a   : >> { %1276 = vmatprep.mubr.msk.f32.mxu0 %vm295_vm3, %v243_v23  ;;  %1318 = vmatprep.mubr.msk.f32.mxu1 %vm295_vm3, %v271_v24 }
  0x5d   : >> { %1277 = vmatmul.mubr.msk.f32.gmra.mrb[8].mxu0 %vm295_vm3, %v244_v25  ;;  %1319 = vmatmul.mubr.msk.f32.gmra.mrb[8].mxu1 %vm295_vm3, %v272_v26 }
  0x5e   : >> { %1279 = vmatprep.mubr.msk.f32.mxu0 %vm295_vm3, %v245_v27  ;;  %1321 = vmatprep.mubr.msk.f32.mxu1 %vm295_vm3, %v273_v28 }
  0x61   : >> { %1280 = vmatmul.mubr.msk.f32.gmra.mrb[10].mxu0 %vm295_vm3, %v246_v29  ;;  %1322 = vmatmul.mubr.msk.f32.gmra.mrb[10].mxu1 %vm295_vm3, %v274_v30 }
  0x62   : >> { %1282 = vmatprep.mubr.msk.f32.mxu0 %vm295_vm3, %v247_v31  ;;  %1324 = vmatprep.mubr.msk.f32.mxu1 %vm295_vm3, %v275_v32 }
  0x65   : >> { %1283 = vmatmul.mubr.msk.f32.gmra.mrb[12].mxu0 %vm295_vm3, %v248_v33  ;;  %1325 = vmatmul.mubr.msk.f32.gmra.mrb[12].mxu1 %vm295_vm3, %v276_v34 }
  0x66   : >> { %1285 = vmatprep.mubr.msk.f32.mxu0 %vm295_vm3, %v249_v35  ;;  %1327 = vmatprep.mubr.msk.f32.mxu1 %vm295_vm3, %v277_v36 }
  0x69   : >> { %1286 = vmatmul.mubr.msk.f32.gmra.mrb[14].mxu0 %vm295_vm3, %v250_v37  ;;  %1328 = vmatmul.mubr.msk.f32.gmra.mrb[14].mxu1 %vm295_vm3, %v278_v38 }
  0x6a   : >> { %1288 = vmatprep.mubr.msk.f32.mxu0 %vm295_vm3, %v251_v39  ;;  %1330 = vmatprep.mubr.msk.f32.mxu1 %vm295_vm3, %v279_v40 }
  0x6d   : >> { %1289 = vmatmul.mubr.msk.f32.gmra.mrb[16].mxu0 %vm295_vm3, %v252_v41  ;;  %1331 = vmatmul.mubr.msk.f32.gmra.mrb[16].mxu1 %vm295_vm3, %v280_v42 }
  0x6e   : >> { %1291 = vmatprep.mubr.msk.f32.mxu0 %vm295_vm3, %v253_v43  ;;  %1333 = vmatprep.mubr.msk.f32.mxu1 %vm295_vm3, %v281_v44 }
  0x71   : >> { %1292 = vmatmul.mubr.msk.f32.gmra.mrb[18].mxu0 %vm295_vm3, %v254_v45  ;;  %1334 = vmatmul.mubr.msk.f32.gmra.mrb[18].mxu1 %vm295_vm3, %v282_v46 }
  0x72   : >> { %1294 = vmatprep.mubr.msk.f32.mxu0 %vm295_vm3, %v255_v47  ;;  %1336 = vmatprep.mubr.msk.f32.mxu1 %vm295_vm3, %v283_v48 }
  0x75   : >> { %1295 = vmatmul.mubr.msk.f32.gmra.mrb[20].mxu0 %vm295_vm3, %v256_v49  ;;  %1337 = vmatmul.mubr.msk.f32.gmra.mrb[20].mxu1 %vm295_vm3, %v284_v50 }
  0x76   : >> { %1297 = vmatprep.mubr.msk.f32.mxu0 %vm295_vm3, %v257_v51  ;;  %1339 = vmatprep.mubr.msk.f32.mxu1 %vm295_vm3, %v285_v52 }
  0x79   : >> { %1298 = vmatmul.mubr.msk.f32.gmra.mrb[22].mxu0 %vm295_vm3, %v258_v53  ;;  %1340 = vmatmul.mubr.msk.f32.gmra.mrb[22].mxu1 %vm295_vm3, %v286_v54 }
  0x7a   : >> { %1300 = vmatprep.mubr.msk.f32.mxu0 %vm295_vm3, %v259_v55  ;;  %1342 = vmatprep.mubr.msk.f32.mxu1 %vm295_vm3, %v287_v56 }
  0x7d   : >> { %1301 = vmatmul.mubr.msk.f32.gmra.mrb[24].mxu0 %vm295_vm3, %v260_v57  ;;  %1343 = vmatmul.mubr.msk.f32.gmra.mrb[24].mxu1 %vm295_vm3, %v288_v58 }
  0x7e   : >> { %1303 = vmatprep.mubr.msk.f32.mxu0 %vm295_vm3, %v261_v59  ;;  %1345 = vmatprep.mubr.msk.f32.mxu1 %vm295_vm3, %v289_v60 }
  0x81   : >> { %1304 = vmatmul.mubr.msk.f32.gmra.mrb[26].mxu0 %vm295_vm3, %v262_v61  ;;  %1346 = vmatmul.mubr.msk.f32.gmra.mrb[26].mxu1 %vm295_vm3, %v290_v62 }
 0x120   : >> { %v1266_v63 = vpop.f32.mrb[0].mxu0  ;;  %v1308_v1 = vpop.f32.mrb[0].mxu1 }
 0x121   : >> { %v815_v2 = vmax.f32 %v1266_v63, %v1308_v1  ;;  %v534_v3 = vpop.f32.mrb[1].mxu0  ;;  %v674_v4 = vpop.f32.mrb[1].mxu1 }
 0x122   : >> { %v814_v5 = vmax.f32 %v534_v3, %v674_v4 }
 0x123   : >> { %846 = vst.msk [vmem:[%s1845_s28 + $0x8] sm:$0xff] %vm844_vm4, %v815_v2 }
 0x124   : >> { %845 = vst.msk [vmem:[%s1845_s28] sm:$0xff] %vm844_vm4, %v814_v5  ;;  %v1269_v6 = vpop.f32.mrb[2].mxu0  ;;  %v1311_v7 = vpop.f32.mrb[2].mxu1 }
 0x125   : >> { %v817_v8 = vmax.f32 %v1269_v6, %v1311_v7  ;;  %v544_v9 = vpop.f32.mrb[3].mxu0  ;;  %v684_v10 = vpop.f32.mrb[3].mxu1 }
 0x126   : >> { %v816_v11 = vmax.f32 %v544_v9, %v684_v10 }
 0x127   : >> { %848 = vst.msk [vmem:[%s1845_s28 + $0x18] sm:$0xff] %vm844_vm4, %v817_v8 }
 0x128   : >> { %847 = vst.msk [vmem:[%s1845_s28 + $0x10] sm:$0xff] %vm844_vm4, %v816_v11  ;;  %v1272_v12 = vpop.f32.mrb[4].mxu0  ;;  %v1314_v13 = vpop.f32.mrb[4].mxu1 }
 0x129   : >> { %v819_v14 = vmax.f32 %v1272_v12, %v1314_v13  ;;  %v554_v15 = vpop.f32.mrb[5].mxu0  ;;  %v694_v16 = vpop.f32.mrb[5].mxu1 }
 0x12a   : >> { %v818_v17 = vmax.f32 %v554_v15, %v694_v16 }
 0x12b   : >> { %v873_v18 = vld [vmem:[%s1845_s28] ss:$2 sm:$0xff]  ;;  %v1180_v19 = vld [vmem:[%s1845_s28 + $0x1] ss:$2 sm:$0xff]  ;;  %850 = vst.msk [vmem:[%s1845_s28 + $0x28] sm:$0xff] %vm844_vm4, %v819_v14 }
 0x12c   : >> { %v928_v20 = vmax.f32 %v873_v18, %v1180_v19  ;;  %849 = vst.msk [vmem:[%s1845_s28 + $0x20] sm:$0xff] %vm844_vm4, %v818_v17  ;;  %v1275_v21 = vpop.f32.mrb[6].mxu0  ;;  %v1317_v22 = vpop.f32.mrb[6].mxu1 }
 0x12d   : >> { %v821_v23 = vmax.f32 %v1275_v21, %v1317_v22  ;;  %v564_v24 = vpop.f32.mrb[7].mxu0  ;;  %v704_v25 = vpop.f32.mrb[7].mxu1 }
 0x12e   : >> { %v942_v26 = vadd.f32 %v1703_v0, %v928_v20  ;;  %v820_v27 = vmax.f32 %v564_v24, %v704_v25 }
 0x12f   : >> { %v1167_v28 = vld [vmem:[%s1845_s28 + $0x10] ss:$2 sm:$0xff]  ;;  %v1181_v29 = vld [vmem:[%s1845_s28 + $0x11] ss:$2 sm:$0xff]  ;;  %852 = vst.msk [vmem:[%s1845_s28 + $0x38] sm:$0xff] %vm844_vm4, %v821_v23 }
 0x130   : >> { %v956_v30 = vmax.f32 %v942_v26, 0.0  ;;  %v929_v31 = vmax.f32 %v1167_v28, %v1181_v29  ;;  %851 = vst.msk [vmem:[%s1845_s28 + $0x30] sm:$0xff] %vm844_vm4, %v820_v27  ;;  %v1278_v32 = vpop.f32.mrb[8].mxu0  ;;  %v1320_v33 = vpop.f32.mrb[8].mxu1 }
 0x131   : >> { %v823_v34 = vmax.f32 %v1278_v32, %v1320_v33  ;;  %v574_v35 = vpop.f32.mrb[9].mxu0  ;;  %v714_v36 = vpop.f32.mrb[9].mxu1 }
 0x132   : >> { %972 = vst.msk [vmem:[%s1864_s25] sm:$0xff] %vm844_vm4, %v956_v30  ;;  %v943_v37 = vadd.f32 %v1703_v0, %v929_v31  ;;  %v822_v38 = vmax.f32 %v574_v35, %v714_v36 }
 0x133   : >> { %v1168_v39 = vld [vmem:[%s1845_s28 + $0x20] ss:$2 sm:$0xff]  ;;  %v1182_v40 = vld [vmem:[%s1845_s28 + $0x21] ss:$2 sm:$0xff]  ;;  %854 = vst.msk [vmem:[%s1845_s28 + $0x48] sm:$0xff] %vm844_vm4, %v823_v34 }
 0x134   : >> { %v957_v41 = vmax.f32 %v943_v37, 0.0  ;;  %v930_v42 = vmax.f32 %v1168_v39, %v1182_v40  ;;  %853 = vst.msk [vmem:[%s1845_s28 + $0x40] sm:$0xff] %vm844_vm4, %v822_v38  ;;  %v1281_v43 = vpop.f32.mrb[10].mxu0  ;;  %v1323_v44 = vpop.f32.mrb[10].mxu1 }
 0x135   : >> { %v825_v45 = vmax.f32 %v1281_v43, %v1323_v44  ;;  %v584_v46 = vpop.f32.mrb[11].mxu0  ;;  %v724_v47 = vpop.f32.mrb[11].mxu1 }
 0x136   : >> { %973 = vst.msk [vmem:[%s1864_s25 + $0x8] sm:$0xff] %vm844_vm4, %v957_v41  ;;  %v944_v48 = vadd.f32 %v1703_v0, %v930_v42  ;;  %v824_v49 = vmax.f32 %v584_v46, %v724_v47 }
 0x137   : >> { %v1169_v50 = vld [vmem:[%s1845_s28 + $0x30] ss:$2 sm:$0xff]  ;;  %v1183_v51 = vld [vmem:[%s1845_s28 + $0x31] ss:$2 sm:$0xff]  ;;  %856 = vst.msk [vmem:[%s1845_s28 + $0x58] sm:$0xff] %vm844_vm4, %v825_v45 }
 0x138   : >> { %v958_v52 = vmax.f32 %v944_v48, 0.0  ;;  %v931_v53 = vmax.f32 %v1169_v50, %v1183_v51  ;;  %855 = vst.msk [vmem:[%s1845_s28 + $0x50] sm:$0xff] %vm844_vm4, %v824_v49  ;;  %v1284_v54 = vpop.f32.mrb[12].mxu0  ;;  %v1326_v55 = vpop.f32.mrb[12].mxu1 }
 0x139   : >> { %v827_v56 = vmax.f32 %v1284_v54, %v1326_v55  ;;  %v594_v57 = vpop.f32.mrb[13].mxu0  ;;  %v734_v58 = vpop.f32.mrb[13].mxu1 }
 0x13a   : >> { %974 = vst.msk [vmem:[%s1864_s25 + $0x10] sm:$0xff] %vm844_vm4, %v958_v52  ;;  %v945_v59 = vadd.f32 %v1703_v0, %v931_v53  ;;  %v826_v60 = vmax.f32 %v594_v57, %v734_v58 }
 0x13b   : >> { %v1170_v61 = vld [vmem:[%s1845_s28 + $0x40] ss:$2 sm:$0xff]  ;;  %v1184_v62 = vld [vmem:[%s1845_s28 + $0x41] ss:$2 sm:$0xff]  ;;  %858 = vst.msk [vmem:[%s1845_s28 + $0x68] sm:$0xff] %vm844_vm4, %v827_v56 }
 0x13c   : >> { %v959_v63 = vmax.f32 %v945_v59, 0.0  ;;  %v932_v1 = vmax.f32 %v1170_v61, %v1184_v62  ;;  %857 = vst.msk [vmem:[%s1845_s28 + $0x60] sm:$0xff] %vm844_vm4, %v826_v60  ;;  %v1287_v2 = vpop.f32.mrb[14].mxu0  ;;  %v1329_v3 = vpop.f32.mrb[14].mxu1 }
 0x13d   : >> { %v829_v4 = vmax.f32 %v1287_v2, %v1329_v3  ;;  %v604_v5 = vpop.f32.mrb[15].mxu0  ;;  %v744_v6 = vpop.f32.mrb[15].mxu1 }
 0x13e   : >> { %975 = vst.msk [vmem:[%s1864_s25 + $0x18] sm:$0xff] %vm844_vm4, %v959_v63  ;;  %v946_v7 = vadd.f32 %v1703_v0, %v932_v1  ;;  %v828_v8 = vmax.f32 %v604_v5, %v744_v6 }
 0x13f   : >> { %v1171_v9 = vld [vmem:[%s1845_s28 + $0x50] ss:$2 sm:$0xff]  ;;  %v1185_v10 = vld [vmem:[%s1845_s28 + $0x51] ss:$2 sm:$0xff]  ;;  %860 = vst.msk [vmem:[%s1845_s28 + $0x78] sm:$0xff] %vm844_vm4, %v829_v4 }
 0x140   : >> { %v960_v11 = vmax.f32 %v946_v7, 0.0  ;;  %v933_v12 = vmax.f32 %v1171_v9, %v1185_v10  ;;  %859 = vst.msk [vmem:[%s1845_s28 + $0x70] sm:$0xff] %vm844_vm4, %v828_v8  ;;  %v1290_v13 = vpop.f32.mrb[16].mxu0  ;;  %v1332_v14 = vpop.f32.mrb[16].mxu1 }
 0x141   : >> { %v831_v15 = vmax.f32 %v1290_v13, %v1332_v14  ;;  %v614_v16 = vpop.f32.mrb[17].mxu0  ;;  %v754_v17 = vpop.f32.mrb[17].mxu1 }
 0x142   : >> { %976 = vst.msk [vmem:[%s1864_s25 + $0x20] sm:$0xff] %vm844_vm4, %v960_v11  ;;  %v947_v18 = vadd.f32 %v1703_v0, %v933_v12  ;;  %v830_v19 = vmax.f32 %v614_v16, %v754_v17 }
 0x143   : >> { %v1172_v20 = vld [vmem:[%s1845_s28 + $0x60] ss:$2 sm:$0xff]  ;;  %v1186_v21 = vld [vmem:[%s1845_s28 + $0x61] ss:$2 sm:$0xff]  ;;  %862 = vst.msk [vmem:[%s1845_s28 + $0x88] sm:$0xff] %vm844_vm4, %v831_v15 }
 0x144   : >> { %v961_v22 = vmax.f32 %v947_v18, 0.0  ;;  %v934_v23 = vmax.f32 %v1172_v20, %v1186_v21  ;;  %861 = vst.msk [vmem:[%s1845_s28 + $0x80] sm:$0xff] %vm844_vm4, %v830_v19  ;;  %v1293_v24 = vpop.f32.mrb[18].mxu0  ;;  %v1335_v25 = vpop.f32.mrb[18].mxu1 }
 0x145   : >> { %v833_v26 = vmax.f32 %v1293_v24, %v1335_v25  ;;  %v624_v27 = vpop.f32.mrb[19].mxu0  ;;  %v764_v28 = vpop.f32.mrb[19].mxu1 }
 0x146   : >> { %977 = vst.msk [vmem:[%s1864_s25 + $0x28] sm:$0xff] %vm844_vm4, %v961_v22  ;;  %v948_v29 = vadd.f32 %v1703_v0, %v934_v23  ;;  %v832_v30 = vmax.f32 %v624_v27, %v764_v28 }
 0x147   : >> { %v1173_v31 = vld [vmem:[%s1845_s28 + $0x70] ss:$2 sm:$0xff]  ;;  %v1187_v32 = vld [vmem:[%s1845_s28 + $0x71] ss:$2 sm:$0xff]  ;;  %864 = vst.msk [vmem:[%s1845_s28 + $0x98] sm:$0xff] %vm844_vm4, %v833_v26 }
 0x148   : >> { %v962_v33 = vmax.f32 %v948_v29, 0.0  ;;  %v935_v34 = vmax.f32 %v1173_v31, %v1187_v32  ;;  %863 = vst.msk [vmem:[%s1845_s28 + $0x90] sm:$0xff] %vm844_vm4, %v832_v30  ;;  %v1296_v35 = vpop.f32.mrb[20].mxu0  ;;  %v1338_v36 = vpop.f32.mrb[20].mxu1 }
 0x149   : >> { %v835_v37 = vmax.f32 %v1296_v35, %v1338_v36  ;;  %v634_v38 = vpop.f32.mrb[21].mxu0  ;;  %v774_v39 = vpop.f32.mrb[21].mxu1 }
 0x14a   : >> { %978 = vst.msk [vmem:[%s1864_s25 + $0x30] sm:$0xff] %vm844_vm4, %v962_v33  ;;  %v949_v40 = vadd.f32 %v1703_v0, %v935_v34  ;;  %v834_v41 = vmax.f32 %v634_v38, %v774_v39 }
 0x14b   : >> { %v1174_v42 = vld [vmem:[%s1845_s28 + $0x80] ss:$2 sm:$0xff]  ;;  %v1188_v43 = vld [vmem:[%s1845_s28 + $0x81] ss:$2 sm:$0xff]  ;;  %866 = vst.msk [vmem:[%s1845_s28 + $0xa8] sm:$0xff] %vm844_vm4, %v835_v37 }
 0x14c   : >> { %v963_v44 = vmax.f32 %v949_v40, 0.0  ;;  %v936_v45 = vmax.f32 %v1174_v42, %v1188_v43  ;;  %865 = vst.msk [vmem:[%s1845_s28 + $0xa0] sm:$0xff] %vm844_vm4, %v834_v41  ;;  %v1299_v46 = vpop.f32.mrb[22].mxu0  ;;  %v1341_v47 = vpop.f32.mrb[22].mxu1 }
 0x14d   : >> { %v837_v48 = vmax.f32 %v1299_v46, %v1341_v47  ;;  %v644_v49 = vpop.f32.mrb[23].mxu0  ;;  %v784_v50 = vpop.f32.mrb[23].mxu1 }
 0x14e   : >> { %979 = vst.msk [vmem:[%s1864_s25 + $0x38] sm:$0xff] %vm844_vm4, %v963_v44  ;;  %v950_v51 = vadd.f32 %v1703_v0, %v936_v45  ;;  %v836_v52 = vmax.f32 %v644_v49, %v784_v50 }
 0x14f   : >> { %v1175_v53 = vld [vmem:[%s1845_s28 + $0x90] ss:$2 sm:$0xff]  ;;  %v1189_v54 = vld [vmem:[%s1845_s28 + $0x91] ss:$2 sm:$0xff]  ;;  %868 = vst.msk [vmem:[%s1845_s28 + $0xb8] sm:$0xff] %vm844_vm4, %v837_v48 }
 0x150   : >> { %v964_v55 = vmax.f32 %v950_v51, 0.0  ;;  %v937_v56 = vmax.f32 %v1175_v53, %v1189_v54  ;;  %867 = vst.msk [vmem:[%s1845_s28 + $0xb0] sm:$0xff] %vm844_vm4, %v836_v52  ;;  %v1302_v57 = vpop.f32.mrb[24].mxu0  ;;  %v1344_v58 = vpop.f32.mrb[24].mxu1 }
 0x151   : >> { %v839_v59 = vmax.f32 %v1302_v57, %v1344_v58  ;;  %v654_v60 = vpop.f32.mrb[25].mxu0  ;;  %v794_v61 = vpop.f32.mrb[25].mxu1 }
 0x152   : >> { %980 = vst.msk [vmem:[%s1864_s25 + $0x40] sm:$0xff] %vm844_vm4, %v964_v55  ;;  %v951_v62 = vadd.f32 %v1703_v0, %v937_v56  ;;  %v838_v63 = vmax.f32 %v654_v60, %v794_v61 }
 0x153   : >> { %v1176_v1 = vld [vmem:[%s1845_s28 + $0xa0] ss:$2 sm:$0xff]  ;;  %v1190_v2 = vld [vmem:[%s1845_s28 + $0xa1] ss:$2 sm:$0xff]  ;;  %870 = vst.msk [vmem:[%s1845_s28 + $0xc8] sm:$0xff] %vm844_vm4, %v839_v59 }
 0x154   : >> { %v965_v3 = vmax.f32 %v951_v62, 0.0  ;;  %v938_v4 = vmax.f32 %v1176_v1, %v1190_v2  ;;  %869 = vst.msk [vmem:[%s1845_s28 + $0xc0] sm:$0xff] %vm844_vm4, %v838_v63  ;;  %v1305_v5 = vpop.f32.mrb[26].mxu0  ;;  %v1347_v6 = vpop.f32.mrb[26].mxu1 }
 0x155   : >> { %v841_v7 = vmax.f32 %v1305_v5, %v1347_v6  ;;  %v664_v8 = vpop.f32.mrb[27].mxu0  ;;  %v804_v9 = vpop.f32.mrb[27].mxu1 }
 0x156   : >> { %981 = vst.msk [vmem:[%s1864_s25 + $0x48] sm:$0xff] %vm844_vm4, %v965_v3  ;;  %v952_v10 = vadd.f32 %v1703_v0, %v938_v4  ;;  %v840_v11 = vmax.f32 %v664_v8, %v804_v9 }
 0x157   : >> { %v1177_v12 = vld [vmem:[%s1845_s28 + $0xb0] ss:$2 sm:$0xff]  ;;  %v1191_v13 = vld [vmem:[%s1845_s28 + $0xb1] ss:$2 sm:$0xff]  ;;  %872 = vst.msk [vmem:[%s1845_s28 + $0xd8] sm:$0xff] %vm844_vm4, %v841_v7 }
 0x158   : >> { %v966_v14 = vmax.f32 %v952_v10, 0.0  ;;  %v939_v15 = vmax.f32 %v1177_v12, %v1191_v13  ;;  %871 = vst.msk [vmem:[%s1845_s28 + $0xd0] sm:$0xff] %vm844_vm4, %v840_v11 }
 0x15a   : >> { %982 = vst.msk [vmem:[%s1864_s25 + $0x50] sm:$0xff] %vm844_vm4, %v966_v14  ;;  %v953_v16 = vadd.f32 %v1703_v0, %v939_v15 }
 0x15b   : >> { %v1178_v17 = vld [vmem:[%s1845_s28 + $0xc0] ss:$2 sm:$0xff]  ;;  %v1192_v18 = vld [vmem:[%s1845_s28 + $0xc1] ss:$2 sm:$0xff] }
 0x15c   : >> { %v967_v19 = vmax.f32 %v953_v16, 0.0  ;;  %v940_v20 = vmax.f32 %v1178_v17, %v1192_v18 }
 0x15e   : >> { %983 = vst.msk [vmem:[%s1864_s25 + $0x58] sm:$0xff] %vm844_vm4, %v967_v19  ;;  %v954_v21 = vadd.f32 %v1703_v0, %v940_v20 }
 0x15f   : >> { %v1179_v22 = vld [vmem:[%s1845_s28 + $0xd0] ss:$2 sm:$0xff]  ;;  %v1193_v23 = vld [vmem:[%s1845_s28 + $0xd1] ss:$2 sm:$0xff] }
 0x160   : >> { %v968_v24 = vmax.f32 %v954_v21, 0.0  ;;  %v941_v25 = vmax.f32 %v1179_v22, %v1193_v23  ;;  %231 = sbr.rel (!%p229_p7) target bundleno = 66 (0x42), region = 109 }
 0x162   : >> { %984 = vst.msk [vmem:[%s1864_s25 + $0x60] sm:$0xff] %vm844_vm4, %v968_v24  ;;  %v955_v26 = vadd.f32 %v1703_v0, %v941_v25 }
 0x164   : >> { %v969_v27 = vmax.f32 %v955_v26, 0.0 }
 0x166   : >> { %985 = vst.msk [vmem:[%s1864_s25 + $0x68] sm:$0xff] %vm844_vm4, %v969_v27 }
 0x167 PF: > { %s16_s19 = sadd.s32 1, %s1550_s19   ;;  %s2011_s12 = smov %s1526_s13 }
 0x168   : > { %p13_p6 = scmp.ge.s32.totalorder %s16_s19, 30   ;;  %s2012_s13 = smov %s1530_s14 }
 0x169   : > { %s2013_s14 = smov %s1646_s4  ;;  %s2014_s15 = smov %s1542_s17 }
 0x16a   : > { %s2015_s16 = smov %s1546_s18  ;;  %s2016_s17 = smov %s2019_s21 }
 0x16b   : > { %s2017_s18 = smov %s2023_s22  ;;  %15 = sbr.rel (!%p13_p6) target bundleno = 5 (0x5), region = 120 }
 0x172   :  { %1018 = vsyncpa [#allocation4], 1 }
 0x173   :  { %1020 = vsyncpa [#allocation4 + $0x1], 1 }

// kernel: simple_cnn_forward.5
= control target key start
LH: loop header
LB: loop body
LE: loop exit
PB: predicated region body
PF: predicated region fallthrough
CT: control target
= control target key end

     0   :  { %s2227_s12 = smov 0   ;;  %s2229_s13 = smov 0   ;;  %s2733_s0 = inlined_call_operand.vmem [shape: f32[2,7,2016,96], index: 0, kind: input, shape index: {}]   ;;  %s2734_s1 = inlined_call_operand.vmem [shape: f32[3,96,64], index: 1, kind: input, shape index: {}]   ;;  %s2735_s2 = inlined_call_operand.vmem [shape: f32[1,64], index: 2, kind: input, shape index: {}]   ;;  %s2736_s3 = inlined_call_operand.vmem [shape: f32[2,56,56,64], index: 3, kind: output, shape index: {}]  }
   0x1   :  { %s2231_s14 = smov 0   ;;  %s2233_s15 = smov 0  }
   0x2   :  { %s2235_s16 = smov 0  }
   0x3 LB: > { %s22_s17 = sadd.s32 1, %s2193_s14  ;;  %s25_s18 = sadd.s32 1, %s2197_s15  ;;  %s2201_s16 = sphi %s2235_s16, %s13_s16   ;;  %s2197_s15 = sphi %s2233_s15, %s2740_s15   ;;  %s2193_s14 = sphi %s2231_s14, %s2739_s14   ;;  %s2189_s13 = sphi %s2229_s13, %s2738_s13   ;;  %s2185_s12 = sphi %s2227_s12, %s2737_s12  }
   0x4   : > { %p23_p0 = scmp.ge.s32.totalorder %s22_s17, 7  ;;  %p1461_p1 = scmp.ge.s32.totalorder %s2201_s16, 1 }
   0x5   : > { %p157_p2 = scmp.lt.s32.totalorder %s2201_s16, 15 }
   0x6   : > { %s2742_s17 = smov (%p23_p0, %s22_s17), 0  ;;  %s2744_s18 = smov (!%p23_p0, %s25_s18), %s2197_s15 }
   0x7   : > { %p158_p3 = pnand %p1461_p1, %p157_p2  ;;  %p27_p4 = scmp.ge.s32.totalorder %s2744_s18, 2 }
   0x8   : > { %p190_p5 = scmp.lt.s32.totalorder (!%p158_p3), %s2189_s13, 1  ;;  %p192_p6 = scmp.lt.s32.totalorder (!%p158_p3), %s2185_s12, 6  ;;  %v2260_v0 = vld [vmem:[%s2735_s2] ss:$0 sm:$0xff] (!%p158_p3) }
   0x9   : > { %s2746_s18 = smov (%p27_p4, %s2744_s18), 0  ;;  %161 = sbr.rel (%p158_p3) target bundleno = 365 (0x16d), region = 32 }
   0xa   : > { %s1463_s21 = sshll.u32 (!%p158_p3), %s2185_s12, 3  ;;  %s2272_s9 = smov (!%p158_p3), 0  }
   0xb   : > { %p202_p7 = scmp.lt.s32.totalorder (!%p158_p3), %s1463_s21, 55 }
  0x10   : > { %s2748_s13 = smov (!%p190_p5, %s2189_s13), 1  ;;  %s2750_s12 = smov (!%p192_p6, %s2185_s12), 6 }
  0x11   : > { %s2108_s22 = smul.u32 1764, %s2748_s13  ;;  %s2752_s21 = smov (!%p202_p7, %s1463_s21), 55 }
  0x12   : > { %s2107_s23 = smul.u32 252, %s2750_s12 }
  0x13   : > { %s2110_s25 = smul.u32 392, %s2748_s13 }
  0x14   : > { %s196_s24 = sadd.s32 %s2108_s22, %s2107_s23  ;;  %s2109_s27 = smul.u32 7, %s2752_s21 }
  0x15   : > { %s1462_s26 = sshll.u32 %s196_s24, 3 }
  0x16   : > { %s2265_s30 = scalar_lea.vmem %s2733_s0, %s1462_s26  ;;  %s206_s4 = sadd.s32 %s2110_s25, %s2109_s27 }
  0x17   : > { %s1464_s5 = sshll.u32 %s206_s4, 3 }
  0x18   : > { %s2270_s8 = scalar_lea.vmem %s2736_s3, %s1464_s5 }
  0x19 LB: >> { %v1496_v1 = vld [vmem:[%s2734_s1 + $0x60] sm:$0xff]  ;;  %v1497_v2 = vld [vmem:[%s2734_s1 + $0x68] sm:$0xff]  ;;  %v1498_v6 = vld [vmem:[%s2734_s1 + $0x70] sm:$0xff]  ;;  %s224_s7 = smul.u32 224, %s2205_s9  ;;  %vm310_vm0 = vcmask 785408   ;;  %vm1267_vm1 = vcmask 523264   ;;  %s2205_s9 = sphi %s2272_s9, %s222_s9  }
  0x1a   : >> { %v254_v3 = vld [vmem:[%s2734_s1] sm:$0xff]  ;;  %v1967_v4 = vpack.c.bf16 %v1497_v2, %v1496_v1  ;;  %v255_v5 = vld [vmem:[%s2734_s1 + $0x8] sm:$0xff]  ;;  %v1499_v7 = vld [vmem:[%s2734_s1 + $0x78] sm:$0xff]  ;;  %s1330_s12 = smul.u32 56, %s2205_s9 }
  0x1b   : >> { %v2295_v8 = vpack.c.bf16 %v255_v5, %v254_v3  ;;  %v1971_v9 = vpack.c.bf16 %v1499_v7, %v1498_v6  ;;  %v256_v10 = vld [vmem:[%s2734_s1 + $0x10] sm:$0xff]  ;;  %v257_v11 = vld [vmem:[%s2734_s1 + $0x18] sm:$0xff]  ;;  %v1500_v12 = vld [vmem:[%s2734_s1 + $0x80] sm:$0xff]  ;;  %s2321_s21 = scalar_lea.vmem %s2265_s30, %s224_s7 }
  0x1c   : >> { %1968 = vmatprep.subr.bf16.mxu1 %v1967_v4  ;;  %v2307_v13 = vpack.c.bf16 %v257_v11, %v256_v10  ;;  %v1501_v14 = vld [vmem:[%s2734_s1 + $0x88] sm:$0xff]  ;;  %v258_v15 = vld [vmem:[%s2734_s1 + $0x20] sm:$0xff]  ;;  %v1502_v19 = vld [vmem:[%s2734_s1 + $0x90] sm:$0xff]  ;;  %s2659_s13 = scalar_lea.vmem %s2270_s8, %s1330_s12 }
  0x1d   : >> { %v259_v16 = vld [vmem:[%s2734_s1 + $0x28] sm:$0xff]  ;;  %1992 = vmatprep.subr.bf16.mxu0 %v2295_v8  ;;  %1970 = vmatpush3.bf16.msra.mxu1 %v1967_v4  ;;  %v1975_v17 = vpack.c.bf16 %v1501_v14, %v1500_v12  ;;  %v1503_v20 = vld [vmem:[%s2734_s1 + $0x98] sm:$0xff]  ;;  %v260_v21 = vld [vmem:[%s2734_s1 + $0x30] sm:$0xff] }
  0x1e   : >> { %1994 = vmatpush3.bf16.msra.mxu0 %v2295_v8  ;;  %1972 = vmatprep.subr.bf16.mxu1 %v1971_v9  ;;  %v2324_v18 = vpack.c.bf16 %v259_v16, %v258_v15  ;;  %v261_v22 = vld [vmem:[%s2734_s1 + $0x38] sm:$0xff]  ;;  %v2339_v23 = vld [vmem:[%s2321_s21 + $0x70] sm:$0xff]  ;;  %v226_v24 = vld [vmem:[%s2321_s21] sm:$0xff]  ;;  %v1979_v25 = vpack.c.bf16 %v1503_v20, %v1502_v19 }
  0x1f   : >> { %1996 = vmatprep.subr.bf16.mxu0 %v2307_v13  ;;  %v2344_v26 = vpack.c.bf16 %v261_v22, %v260_v21  ;;  %v1504_v27 = vld [vmem:[%s2734_s1 + $0xa0] sm:$0xff]  ;;  %v1505_v28 = vld [vmem:[%s2734_s1 + $0xa8] sm:$0xff]  ;;  %1793 = vmatprep.mubr.msk.f32.mxu1 %vm310_vm0, %v2339_v23  ;;  %v1506_v33 = vld [vmem:[%s2734_s1 + $0xb0] sm:$0xff] }
  0x20   : >> { %v262_v29 = vld [vmem:[%s2734_s1 + $0x40] sm:$0xff]  ;;  %v263_v30 = vld [vmem:[%s2734_s1 + $0x48] sm:$0xff]  ;;  %1859 = vmatprep.mubr.msk.f32.mxu0 %vm310_vm0, %v226_v24  ;;  %v1983_v31 = vpack.c.bf16 %v1505_v28, %v1504_v27  ;;  %v1507_v34 = vld [vmem:[%s2734_s1 + $0xb8] sm:$0xff] }
  0x21   : >> { %1974 = vmatpush3.bf16.msra.mxu1 %v1971_v9  ;;  %v2363_v32 = vpack.c.bf16 %v263_v30, %v262_v29  ;;  %v264_v35 = vld [vmem:[%s2734_s1 + $0x50] sm:$0xff]  ;;  %v265_v36 = vld [vmem:[%s2734_s1 + $0x58] sm:$0xff]  ;;  %v1987_v37 = vpack.c.bf16 %v1507_v34, %v1506_v33  ;;  %v1594_v39 = vld [vmem:[%s2734_s1 + $0xc0] sm:$0xff] }
  0x22   : >> { %1998 = vmatpush3.bf16.msra.mxu0 %v2307_v13  ;;  %1976 = vmatprep.subr.bf16.mxu1 %v1975_v17  ;;  %v2379_v38 = vpack.c.bf16 %v265_v36, %v264_v35  ;;  %v1595_v40 = vld [vmem:[%s2734_s1 + $0xc8] sm:$0xff]  ;;  %v1596_v42 = vld [vmem:[%s2734_s1 + $0xd0] sm:$0xff]  ;;  %v1597_v43 = vld [vmem:[%s2734_s1 + $0xd8] sm:$0xff] }
  0x23   : >> { %2000 = vmatprep.subr.bf16.mxu0 %v2324_v18  ;;  %v2015_v41 = vpack.c.bf16 %v1595_v40, %v1594_v39  ;;  %v2396_v44 = vld [vmem:[%s2321_s21 + $0x78] sm:$0xff]  ;;  %v227_v45 = vld [vmem:[%s2321_s21 + $0x8] sm:$0xff]  ;;  %v2402_v46 = vld [vmem:[%s2321_s21 + $0x80] sm:$0xff]  ;;  %v2019_v47 = vpack.c.bf16 %v1597_v43, %v1596_v42 }
  0x24   : >> { %v228_v48 = vld [vmem:[%s2321_s21 + $0x10] sm:$0xff]  ;;  %v1598_v49 = vld [vmem:[%s2734_s1 + $0xe0] sm:$0xff]  ;;  %v1599_v50 = vld [vmem:[%s2734_s1 + $0xe8] sm:$0xff] }
  0x25   : >> { %1978 = vmatpush3.bf16.msra.mxu1 %v1975_v17  ;;  %v2416_v51 = vld [vmem:[%s2321_s21 + $0x88] sm:$0xff]  ;;  %v229_v52 = vld [vmem:[%s2321_s21 + $0x18] sm:$0xff]  ;;  %v2422_v53 = vld [vmem:[%s2321_s21 + $0x90] sm:$0xff]  ;;  %v2023_v55 = vpack.c.bf16 %v1599_v50, %v1598_v49 }
  0x26   : >> { %2002 = vmatpush3.bf16.msra.mxu0 %v2324_v18  ;;  %1980 = vmatprep.subr.bf16.mxu1 %v1979_v25  ;;  %v230_v54 = vld [vmem:[%s2321_s21 + $0x20] sm:$0xff]  ;;  %v1600_v56 = vld [vmem:[%s2734_s1 + $0xf0] sm:$0xff]  ;;  %v1601_v57 = vld [vmem:[%s2734_s1 + $0xf8] sm:$0xff] }
  0x27   : >> { %2004 = vmatprep.subr.bf16.mxu0 %v2344_v26  ;;  %v2439_v58 = vld [vmem:[%s2321_s21 + $0x98] sm:$0xff]  ;;  %v231_v59 = vld [vmem:[%s2321_s21 + $0x28] sm:$0xff]  ;;  %v2444_v60 = vld [vmem:[%s2321_s21 + $0xa0] sm:$0xff]  ;;  %v2027_v62 = vpack.c.bf16 %v1601_v57, %v1600_v56 }
  0x28   : >> { %v232_v61 = vld [vmem:[%s2321_s21 + $0x30] sm:$0xff]  ;;  %v1602_v63 = vld [vmem:[%s2734_s1 + $0x100] sm:$0xff]  ;;  %v1603_v1 = vld [vmem:[%s2734_s1 + $0x108] sm:$0xff] }
  0x29   : >> { %1982 = vmatpush3.bf16.msra.mxu1 %v1979_v25  ;;  %v2461_v2 = vld [vmem:[%s2321_s21 + $0xa8] sm:$0xff]  ;;  %v233_v3 = vld [vmem:[%s2321_s21 + $0x38] sm:$0xff]  ;;  %v2466_v4 = vld [vmem:[%s2321_s21 + $0xb0] sm:$0xff]  ;;  %v2031_v6 = vpack.c.bf16 %v1603_v1, %v1602_v63 }
  0x2a   : >> { %2006 = vmatpush3.bf16.msra.mxu0 %v2344_v26  ;;  %1984 = vmatprep.subr.bf16.mxu1 %v1983_v31  ;;  %v234_v5 = vld [vmem:[%s2321_s21 + $0x40] sm:$0xff]  ;;  %v1604_v7 = vld [vmem:[%s2734_s1 + $0x110] sm:$0xff]  ;;  %v2483_v9 = vld [vmem:[%s2321_s21 + $0xb8] sm:$0xff] }
  0x2b   : >> { %2008 = vmatprep.subr.bf16.mxu0 %v2363_v32  ;;  %v235_v10 = vld [vmem:[%s2321_s21 + $0x48] sm:$0xff]  ;;  %v2488_v11 = vld [vmem:[%s2321_s21 + $0xc0] sm:$0xff]  ;;  %v236_v12 = vld [vmem:[%s2321_s21 + $0x50] sm:$0xff] }
  0x2c   : >> { %v2499_v14 = vld [vmem:[%s2321_s21 + $0xc8] sm:$0xff]  ;;  %v237_v15 = vld [vmem:[%s2321_s21 + $0x58] sm:$0xff]  ;;  %v2504_v16 = vld [vmem:[%s2321_s21 + $0xd0] sm:$0xff] }
  0x2d   : >> { %1986 = vmatpush3.bf16.msra.mxu1 %v1983_v31  ;;  %v238_v17 = vld [vmem:[%s2321_s21 + $0x60] sm:$0xff]  ;;  %v239_v19 = vld [vmem:[%s2321_s21 + $0x68] sm:$0xff]  ;;  %v1484_v22 = vld [vmem:[%s2321_s21 + $0xf0] sm:$0xff] }
  0x2e   : >> { %2010 = vmatpush3.bf16.msra.mxu0 %v2363_v32  ;;  %1988 = vmatprep.subr.bf16.mxu1 %v1987_v37  ;;  %v1482_v20 = vld [vmem:[%s2321_s21 + $0xe0] sm:$0xff]  ;;  %v1483_v21 = vld [vmem:[%s2321_s21 + $0xe8] sm:$0xff]  ;;  %v1485_v24 = vld [vmem:[%s2321_s21 + $0xf8] sm:$0xff] }
  0x2f   : >> { %2012 = vmatprep.subr.bf16.mxu0 %v2379_v38  ;;  %v1486_v25 = vld [vmem:[%s2321_s21 + $0x100] sm:$0xff]  ;;  %v1488_v27 = vld [vmem:[%s2321_s21 + $0x110] sm:$0xff]  ;;  %v1489_v28 = vld [vmem:[%s2321_s21 + $0x118] sm:$0xff] }
  0x30   : >> { %v1490_v29 = vld [vmem:[%s2321_s21 + $0x120] sm:$0xff]  ;;  %v1491_v30 = vld [vmem:[%s2321_s21 + $0x128] sm:$0xff]  ;;  %v1492_v31 = vld [vmem:[%s2321_s21 + $0x130] sm:$0xff] }
  0x31   : >> { %1990 = vmatpush3.bf16.msra.mxu1 %v1987_v37  ;;  %v1494_v33 = vld [vmem:[%s2321_s21 + $0x140] sm:$0xff]  ;;  %v1495_v34 = vld [vmem:[%s2321_s21 + $0x148] sm:$0xff]  ;;  %v1580_v35 = vld [vmem:[%s2321_s21 + $0x150] sm:$0xff] }
  0x32   : >> { %2014 = vmatpush3.bf16.msra.mxu0 %v2379_v38  ;;  %2039 = vmatprep.subr.bf16.mxu1 %v2295_v8  ;;  %v1581_v36 = vld [vmem:[%s2321_s21 + $0x158] sm:$0xff]  ;;  %v1582_v37 = vld [vmem:[%s2321_s21 + $0x160] sm:$0xff]  ;;  %v1584_v39 = vld [vmem:[%s2321_s21 + $0x170] sm:$0xff] }
  0x33   : >> { %2016 = vmatprep.subr.bf16.mxu0 %v2015_v41  ;;  %v1586_v40 = vld [vmem:[%s2321_s21 + $0x180] sm:$0xff]  ;;  %v1588_v42 = vld [vmem:[%s2321_s21 + $0x190] sm:$0xff]  ;;  %v1589_v43 = vld [vmem:[%s2321_s21 + $0x198] sm:$0xff] }
  0x34   : >> { %1794 = vmatmul.mubr.msk.f32.vlgmr.msra.gmra.mrb[0].mxu1 %vm310_vm0, %v2396_v44 }
  0x35   : >> { %1860 = vmatmul.mubr.msk.f32.vlgmr.msra.gmra.mrb[0].mxu0 %vm310_vm0, %v227_v45  ;;  %2045 = vmatpush3.bf16.msra.mxu1 %v2295_v8  ;;  %v1605_v8 = vld [vmem:[%s2734_s1 + $0x118] sm:$0xff]  ;;  %v1591_v45 = vld [vmem:[%s2321_s21 + $0x1a8] sm:$0xff] }
  0x36   : >> { %2018 = vmatpush3.bf16.msra.mxu0 %v2015_v41  ;;  %1796 = vmatprep.mubr.msk.f32.mxu1 %vm310_vm0, %v2402_v46  ;;  %v1587_v41 = vld [vmem:[%s2321_s21 + $0x188] sm:$0xff] }
  0x37   : >> { %1862 = vmatprep.mubr.msk.f32.mxu0 %vm310_vm0, %v228_v48  ;;  %2020 = vmatprep.subr.bf16.mxu0 %v2019_v47 }
  0x38   : >> { %1797 = vmatmul.mubr.msk.f32.gmra.mrb[2].mxu1 %vm310_vm0, %v2416_v51  ;;  %2040 = vmatprep.subr.bf16.mxu1 %v2307_v13 }
  0x39   : >> { %1863 = vmatmul.mubr.msk.f32.gmra.mrb[2].mxu0 %vm310_vm0, %v229_v52  ;;  %1799 = vmatprep.mubr.msk.f32.mxu1 %vm310_vm0, %v2422_v53 }
  0x3a   : >> { %2022 = vmatpush3.bf16.msra.mxu0 %v2019_v47  ;;  %1865 = vmatprep.mubr.msk.f32.mxu0 %vm310_vm0, %v230_v54  ;;  %v1593_v47 = vld [vmem:[%s2321_s21 + $0x1b8] sm:$0xff] }
  0x3b   : >> { %2024 = vmatprep.subr.bf16.mxu0 %v2023_v55  ;;  %2046 = vmatpush3.bf16.msra.mxu1 %v2307_v13  ;;  %v2035_v13 = vpack.c.bf16 %v1605_v8, %v1604_v7 }
  0x3c   : >> { %1800 = vmatmul.mubr.msk.f32.gmra.mrb[4].mxu1 %vm310_vm0, %v2439_v58  ;;  %2041 = vmatprep.subr.bf16.mxu1 %v2324_v18 }
  0x3d   : >> { %1866 = vmatmul.mubr.msk.f32.gmra.mrb[4].mxu0 %vm310_vm0, %v231_v59  ;;  %1802 = vmatprep.mubr.msk.f32.mxu1 %vm310_vm0, %v2444_v60 }
  0x3e   : >> { %1868 = vmatprep.mubr.msk.f32.mxu0 %vm310_vm0, %v232_v61  ;;  %2026 = vmatpush3.bf16.msra.mxu0 %v2023_v55 }
  0x3f   : >> { %2028 = vmatprep.subr.bf16.mxu0 %v2027_v62  ;;  %2047 = vmatpush3.bf16.msra.mxu1 %v2324_v18  ;;  %v2515_v18 = vld [vmem:[%s2321_s21 + $0xd8] sm:$0xff] }
  0x40   : >> { %1803 = vmatmul.mubr.msk.f32.gmra.mrb[6].mxu1 %vm310_vm0, %v2461_v2  ;;  %2042 = vmatprep.subr.bf16.mxu1 %v2344_v26 }
  0x41   : >> { %1869 = vmatmul.mubr.msk.f32.gmra.mrb[6].mxu0 %vm310_vm0, %v233_v3  ;;  %1805 = vmatprep.mubr.msk.f32.mxu1 %vm310_vm0, %v2466_v4 }
  0x42   : >> { %1871 = vmatprep.mubr.msk.f32.mxu0 %vm310_vm0, %v234_v5  ;;  %2030 = vmatpush3.bf16.msra.mxu0 %v2027_v62 }
  0x43   : >> { %2032 = vmatprep.subr.bf16.mxu0 %v2031_v6  ;;  %2048 = vmatpush3.bf16.msra.mxu1 %v2344_v26  ;;  %v1487_v26 = vld [vmem:[%s2321_s21 + $0x108] sm:$0xff] }
  0x44   : >> { %1806 = vmatmul.mubr.msk.f32.gmra.mrb[8].mxu1 %vm310_vm0, %v2483_v9  ;;  %2043 = vmatprep.subr.bf16.mxu1 %v2363_v32 }
  0x45   : >> { %1872 = vmatmul.mubr.msk.f32.gmra.mrb[8].mxu0 %vm310_vm0, %v235_v10  ;;  %1808 = vmatprep.mubr.msk.f32.mxu1 %vm310_vm0, %v2488_v11 }
  0x46   : >> { %1874 = vmatprep.mubr.msk.f32.mxu0 %vm310_vm0, %v236_v12  ;;  %2034 = vmatpush3.bf16.msra.mxu0 %v2031_v6 }
  0x47   : >> { %2036 = vmatprep.subr.bf16.mxu0 %v2035_v13  ;;  %2049 = vmatpush3.bf16.msra.mxu1 %v2363_v32  ;;  %v1493_v32 = vld [vmem:[%s2321_s21 + $0x138] sm:$0xff] }
  0x48   : >> { %1809 = vmatmul.mubr.msk.f32.gmra.mrb[10].mxu1 %vm310_vm0, %v2499_v14  ;;  %2044 = vmatprep.subr.bf16.mxu1 %v2379_v38 }
  0x49   : >> { %1875 = vmatmul.mubr.msk.f32.gmra.mrb[10].mxu0 %vm310_vm0, %v237_v15  ;;  %1811 = vmatprep.mubr.msk.f32.mxu1 %vm310_vm0, %v2504_v16 }
  0x4a   : >> { %1877 = vmatprep.mubr.msk.f32.mxu0 %vm310_vm0, %v238_v17  ;;  %2038 = vmatpush3.bf16.msra.mxu0 %v2035_v13 }
  0x4b   : >> { %2050 = vmatpush3.bf16.msra.mxu1 %v2379_v38  ;;  %v1583_v38 = vld [vmem:[%s2321_s21 + $0x168] sm:$0xff] }
  0x4c   : >> { %1812 = vmatmul.mubr.msk.f32.gmra.mrb[12].mxu1 %vm310_vm0, %v2515_v18 }
  0x4d   : >> { %1878 = vmatmul.mubr.msk.f32.gmra.mrb[12].mxu0 %vm310_vm0, %v239_v19  ;;  %1814 = vmatprep.mubr.msk.f32.mxu1 %vm310_vm0, %v1482_v20 }
  0x4e   : >> { %1925 = vmatprep.mubr.msk.f32.mxu0 %vm310_vm0, %v1482_v20 }
  0x50   : >> { %1815 = vmatmul.mubr.msk.f32.gmra.mrb[14].mxu1 %vm310_vm0, %v1483_v21 }
  0x51   : >> { %1926 = vmatmul.mubr.msk.f32.vlgmr.msra.gmra.mrb[0].mxu0 %vm310_vm0, %v1483_v21  ;;  %1817 = vmatprep.mubr.msk.f32.mxu1 %vm310_vm0, %v1484_v22 }
  0x52   : >> { %1928 = vmatprep.mubr.msk.f32.mxu0 %vm310_vm0, %v1484_v22 }
  0x54   : >> { %1818 = vmatmul.mubr.msk.f32.gmra.mrb[16].mxu1 %vm310_vm0, %v1485_v24 }
  0x55   : >> { %1929 = vmatmul.mubr.msk.f32.gmra.mrb[2].mxu0 %vm310_vm0, %v1485_v24  ;;  %1820 = vmatprep.mubr.msk.f32.mxu1 %vm310_vm0, %v1486_v25 }
  0x56   : >> { %1931 = vmatprep.mubr.msk.f32.mxu0 %vm310_vm0, %v1486_v25 }
  0x58   : >> { %1821 = vmatmul.mubr.msk.f32.gmra.mrb[18].mxu1 %vm310_vm0, %v1487_v26 }
  0x59   : >> { %1932 = vmatmul.mubr.msk.f32.gmra.mrb[4].mxu0 %vm310_vm0, %v1487_v26  ;;  %1823 = vmatprep.mubr.msk.f32.mxu1 %vm310_vm0, %v1488_v27 }
  0x5a   : >> { %1934 = vmatprep.mubr.msk.f32.mxu0 %vm310_vm0, %v1488_v27 }
  0x5c   : >> { %1824 = vmatmul.mubr.msk.f32.gmra.mrb[20].mxu1 %vm310_vm0, %v1489_v28 }
  0x5d   : >> { %1935 = vmatmul.mubr.msk.f32.gmra.mrb[6].mxu0 %vm310_vm0, %v1489_v28  ;;  %1826 = vmatprep.mubr.msk.f32.mxu1 %vm310_vm0, %v1490_v29 }
  0x5e   : >> { %1937 = vmatprep.mubr.msk.f32.mxu0 %vm310_vm0, %v1490_v29 }
  0x60   : >> { %1827 = vmatmul.mubr.msk.f32.gmra.mrb[22].mxu1 %vm310_vm0, %v1491_v30 }
  0x61   : >> { %1938 = vmatmul.mubr.msk.f32.gmra.mrb[8].mxu0 %vm310_vm0, %v1491_v30  ;;  %1829 = vmatprep.mubr.msk.f32.mxu1 %vm310_vm0, %v1492_v31 }
  0x62   : >> { %1940 = vmatprep.mubr.msk.f32.mxu0 %vm310_vm0, %v1492_v31 }
  0x64   : >> { %1830 = vmatmul.mubr.msk.f32.gmra.mrb[24].mxu1 %vm310_vm0, %v1493_v32 }
  0x65   : >> { %1941 = vmatmul.mubr.msk.f32.gmra.mrb[10].mxu0 %vm310_vm0, %v1493_v32  ;;  %1832 = vmatprep.mubr.msk.f32.mxu1 %vm310_vm0, %v1494_v33 }
  0x66   : >> { %1943 = vmatprep.mubr.msk.f32.mxu0 %vm310_vm0, %v1494_v33 }
  0x68   : >> { %1833 = vmatmul.mubr.msk.f32.gmra.mrb[26].mxu1 %vm310_vm0, %v1495_v34 }
  0x69   : >> { %1944 = vmatmul.mubr.msk.f32.gmra.mrb[12].mxu0 %vm310_vm0, %v1495_v34  ;;  %1880 = vmatprep.mubr.msk.f32.mxu1 %vm310_vm0, %v2339_v23  ;;  %v1585_v23 = vld [vmem:[%s2321_s21 + $0x178] sm:$0xff] }
  0x6a   : >> { %1946 = vmatprep.mubr.msk.f32.mxu0 %vm310_vm0, %v1580_v35 }
  0x6c   : >> { %1881 = vmatmul.mubr.msk.f32.vlgmr.msra.gmra.mrb[14].mxu1 %vm310_vm0, %v2396_v44  ;;  %v1590_v44 = vld [vmem:[%s2321_s21 + $0x1a0] sm:$0xff] }
  0x6d   : >> { %1947 = vmatmul.mubr.msk.f32.gmra.mrb[14].mxu0 %vm310_vm0, %v1581_v36  ;;  %1883 = vmatprep.mubr.msk.f32.mxu1 %vm310_vm0, %v2402_v46  ;;  %v1592_v46 = vld [vmem:[%s2321_s21 + $0x1b0] sm:$0xff]  ;;  %s1250_s21 = sand.u32 1, %s2205_s9  ;;  %s222_s9 = sadd.s32 1, %s2205_s9  }
  0x6e   : >> { %1949 = vmatprep.mubr.msk.f32.mxu0 %vm310_vm0, %v1582_v37  ;;  %s1265_s10 = smul.u32 112, %s1250_s21  ;;  %p219_p8 = scmp.ge.s32.totalorder %s222_s9, 8  }
  0x70   : >> { %1884 = vmatmul.mubr.msk.f32.gmra.mrb[16].mxu1 %vm310_vm0, %v2416_v51  ;;  %s2638_s11 = scalar_lea.vmem [#allocation2], %s1265_s10 }
  0x71   : >> { %1950 = vmatmul.mubr.msk.f32.gmra.mrb[16].mxu0 %vm310_vm0, %v1583_v38  ;;  %1886 = vmatprep.mubr.msk.f32.mxu1 %vm310_vm0, %v2422_v53 }
  0x72   : >> { %1952 = vmatprep.mubr.msk.f32.mxu0 %vm310_vm0, %v1584_v39 }
  0x74   : >> { %1887 = vmatmul.mubr.msk.f32.gmra.mrb[18].mxu1 %vm310_vm0, %v2439_v58 }
  0x75   : >> { %1953 = vmatmul.mubr.msk.f32.gmra.mrb[18].mxu0 %vm310_vm0, %v1585_v23  ;;  %1889 = vmatprep.mubr.msk.f32.mxu1 %vm310_vm0, %v2444_v60 }
  0x76   : >> { %1955 = vmatprep.mubr.msk.f32.mxu0 %vm310_vm0, %v1586_v40 }
  0x78   : >> { %1890 = vmatmul.mubr.msk.f32.gmra.mrb[20].mxu1 %vm310_vm0, %v2461_v2 }
  0x79   : >> { %1956 = vmatmul.mubr.msk.f32.gmra.mrb[20].mxu0 %vm310_vm0, %v1587_v41  ;;  %1892 = vmatprep.mubr.msk.f32.mxu1 %vm310_vm0, %v2466_v4 }
  0x7a   : >> { %1958 = vmatprep.mubr.msk.f32.mxu0 %vm310_vm0, %v1588_v42 }
  0x7c   : >> { %1893 = vmatmul.mubr.msk.f32.gmra.mrb[22].mxu1 %vm310_vm0, %v2483_v9 }
  0x7d   : >> { %1959 = vmatmul.mubr.msk.f32.gmra.mrb[22].mxu0 %vm310_vm0, %v1589_v43  ;;  %1895 = vmatprep.mubr.msk.f32.mxu1 %vm310_vm0, %v2488_v11 }
  0x7e   : >> { %1961 = vmatprep.mubr.msk.f32.mxu0 %vm310_vm0, %v1590_v44 }
  0x80   : >> { %1896 = vmatmul.mubr.msk.f32.gmra.mrb[24].mxu1 %vm310_vm0, %v2499_v14 }
  0x81   : >> { %1962 = vmatmul.mubr.msk.f32.gmra.mrb[24].mxu0 %vm310_vm0, %v1591_v45  ;;  %1898 = vmatprep.mubr.msk.f32.mxu1 %vm310_vm0, %v2504_v16 }
  0x82   : >> { %1964 = vmatprep.mubr.msk.f32.mxu0 %vm310_vm0, %v1592_v46 }
  0x84   : >> { %1899 = vmatmul.mubr.msk.f32.gmra.mrb[26].mxu1 %vm310_vm0, %v2515_v18 }
  0x85   : >> { %1965 = vmatmul.mubr.msk.f32.gmra.mrb[26].mxu0 %vm310_vm0, %v1593_v47 }
 0x107   : >> { %v1795_v48 = vpop.f32.mrb[0].mxu1 }
 0x108   : >> { %v461_v49 = vpop.f32.mrb[1].mxu1 }
 0x10b   : >> { %v1798_v50 = vpop.f32.mrb[2].mxu1 }
 0x10c   : >> { %v471_v51 = vpop.f32.mrb[3].mxu1 }
 0x10f   : >> { %v1801_v52 = vpop.f32.mrb[4].mxu1 }
 0x110   : >> { %v481_v53 = vpop.f32.mrb[5].mxu1 }
 0x113   : >> { %v1804_v54 = vpop.f32.mrb[6].mxu1 }
 0x114   : >> { %v491_v55 = vpop.f32.mrb[7].mxu1 }
 0x117   : >> { %v1807_v56 = vpop.f32.mrb[8].mxu1 }
 0x118   : >> { %v501_v57 = vpop.f32.mrb[9].mxu1 }
 0x11b   : >> { %v1810_v58 = vpop.f32.mrb[10].mxu1 }
 0x11c   : >> { %v511_v59 = vpop.f32.mrb[11].mxu1 }
 0x11f   : >> { %v1813_v60 = vpop.f32.mrb[12].mxu1 }
 0x120   : >> { %v521_v61 = vpop.f32.mrb[13].mxu1 }
 0x124   : >> { %v1927_v62 = vpop.f32.mrb[0].mxu0 }
 0x125   : >> { %v2051_v63 = vadd.f32 %v1927_v62, %v1795_v48  ;;  %v1083_v1 = vpop.f32.mrb[1].mxu0 }
 0x126   : >> { %v2052_v2 = vadd.f32 %v1083_v1, %v461_v49 }
 0x128   : >> { %v1930_v3 = vpop.f32.mrb[2].mxu0 }
 0x129   : >> { %v2053_v4 = vadd.f32 %v1930_v3, %v1798_v50  ;;  %v1093_v5 = vpop.f32.mrb[3].mxu0 }
 0x12a   : >> { %v2054_v6 = vadd.f32 %v1093_v5, %v471_v51 }
 0x12c   : >> { %v1933_v7 = vpop.f32.mrb[4].mxu0 }
 0x12d   : >> { %v2055_v8 = vadd.f32 %v1933_v7, %v1801_v52  ;;  %v1103_v9 = vpop.f32.mrb[5].mxu0 }
 0x12e   : >> { %v2056_v10 = vadd.f32 %v1103_v9, %v481_v53 }
 0x130   : >> { %v1936_v11 = vpop.f32.mrb[6].mxu0 }
 0x131   : >> { %v2621_v12 = vadd.f32 %v1936_v11, %v1804_v54  ;;  %v1113_v13 = vpop.f32.mrb[7].mxu0 }
 0x132   : >> { %v2623_v14 = vadd.f32 %v1113_v13, %v491_v55 }
 0x134   : >> { %v1939_v15 = vpop.f32.mrb[8].mxu0 }
 0x135   : >> { %v2625_v16 = vadd.f32 %v1939_v15, %v1807_v56  ;;  %v1123_v17 = vpop.f32.mrb[9].mxu0 }
 0x136   : >> { %v2627_v18 = vadd.f32 %v1123_v17, %v501_v57 }
 0x138   : >> { %v1942_v19 = vpop.f32.mrb[10].mxu0 }
 0x139   : >> { %v2629_v20 = vadd.f32 %v1942_v19, %v1810_v58  ;;  %v1133_v21 = vpop.f32.mrb[11].mxu0 }
 0x13a   : >> { %v2631_v22 = vadd.f32 %v1133_v21, %v511_v59 }
 0x13c   : >> { %v1945_v24 = vpop.f32.mrb[12].mxu0 }
 0x13d   : >> { %v2634_v25 = vadd.f32 %v1945_v24, %v1813_v60  ;;  %v1143_v26 = vpop.f32.mrb[13].mxu0 }
 0x13e   : >> { %v2636_v27 = vadd.f32 %v1143_v26, %v521_v61 }
 0x13f   : >> { %v1882_v28 = vpop.f32.mrb[14].mxu1 }
 0x140   : >> { %v1948_v29 = vpop.f32.mrb[14].mxu0  ;;  %v820_v30 = vpop.f32.mrb[15].mxu1 }
 0x141   : >> { %v2065_v31 = vadd.f32 %v1948_v29, %v1882_v28  ;;  %v1153_v32 = vpop.f32.mrb[15].mxu0 }
 0x142   : >> { %v2066_v33 = vadd.f32 %v1153_v32, %v820_v30 }
 0x143   : >> { %v1252_v34 = vmax.f32 %v2051_v63, %v2065_v31  ;;  %v1885_v35 = vpop.f32.mrb[16].mxu1 }
 0x144   : >> { %v1251_v36 = vmax.f32 %v2052_v2, %v2066_v33  ;;  %v1951_v37 = vpop.f32.mrb[16].mxu0  ;;  %v830_v38 = vpop.f32.mrb[17].mxu1 }
 0x145   : >> { %1269 = vst.msk [vmem:[%s2638_s11 + $0x8] sm:$0xff] %vm1267_vm1, %v1252_v34  ;;  %v2067_v39 = vadd.f32 %v1951_v37, %v1885_v35  ;;  %v1163_v23 = vpop.f32.mrb[17].mxu0 }
 0x146   : >> { %1268 = vst.msk [vmem:[%s2638_s11] sm:$0xff] %vm1267_vm1, %v1251_v36  ;;  %v2068_v40 = vadd.f32 %v1163_v23, %v830_v38 }
 0x147   : >> { %v1254_v41 = vmax.f32 %v2053_v4, %v2067_v39  ;;  %v1888_v42 = vpop.f32.mrb[18].mxu1 }
 0x148   : >> { %v1253_v43 = vmax.f32 %v2054_v6, %v2068_v40  ;;  %v1954_v44 = vpop.f32.mrb[18].mxu0  ;;  %v840_v45 = vpop.f32.mrb[19].mxu1 }
 0x149   : >> { %1271 = vst.msk [vmem:[%s2638_s11 + $0x18] sm:$0xff] %vm1267_vm1, %v1254_v41  ;;  %v2069_v46 = vadd.f32 %v1954_v44, %v1888_v42  ;;  %v1173_v47 = vpop.f32.mrb[19].mxu0 }
 0x14a   : >> { %1270 = vst.msk [vmem:[%s2638_s11 + $0x10] sm:$0xff] %vm1267_vm1, %v1253_v43  ;;  %v2070_v48 = vadd.f32 %v1173_v47, %v840_v45 }
 0x14b   : >> { %v1256_v49 = vmax.f32 %v2055_v8, %v2069_v46  ;;  %v1891_v50 = vpop.f32.mrb[20].mxu1 }
 0x14c   : >> { %v1255_v51 = vmax.f32 %v2056_v10, %v2070_v48  ;;  %v1957_v52 = vpop.f32.mrb[20].mxu0  ;;  %v850_v53 = vpop.f32.mrb[21].mxu1 }
 0x14d   : >> { %v1282_v54 = vld [vmem:[%s2638_s11] ss:$2 sm:$0xff]  ;;  %v1640_v55 = vld [vmem:[%s2638_s11 + $0x1] ss:$2 sm:$0xff]  ;;  %1273 = vst.msk [vmem:[%s2638_s11 + $0x28] sm:$0xff] %vm1267_vm1, %v1256_v49  ;;  %v2071_v56 = vadd.f32 %v1957_v52, %v1891_v50  ;;  %v1183_v57 = vpop.f32.mrb[21].mxu0 }
 0x14e   : >> { %v1309_v58 = vmax.f32 %v1282_v54, %v1640_v55  ;;  %1272 = vst.msk [vmem:[%s2638_s11 + $0x20] sm:$0xff] %vm1267_vm1, %v1255_v51  ;;  %v2072_v59 = vadd.f32 %v1183_v57, %v850_v53 }
 0x14f   : >> { %v1258_v60 = vmax.f32 %v2621_v12, %v2071_v56  ;;  %v1894_v61 = vpop.f32.mrb[22].mxu1 }
 0x150   : >> { %v1316_v62 = vadd.f32 %v2260_v0, %v1309_v58  ;;  %v1257_v63 = vmax.f32 %v2623_v14, %v2072_v59  ;;  %v1960_v1 = vpop.f32.mrb[22].mxu0  ;;  %v860_v2 = vpop.f32.mrb[23].mxu1 }
 0x151   : >> { %v1634_v3 = vld [vmem:[%s2638_s11 + $0x10] ss:$2 sm:$0xff]  ;;  %v1641_v4 = vld [vmem:[%s2638_s11 + $0x11] ss:$2 sm:$0xff]  ;;  %1275 = vst.msk [vmem:[%s2638_s11 + $0x38] sm:$0xff] %vm1267_vm1, %v1258_v60  ;;  %v2073_v5 = vadd.f32 %v1960_v1, %v1894_v61  ;;  %v1193_v6 = vpop.f32.mrb[23].mxu0 }
 0x152   : >> { %v1323_v7 = vmax.f32 %v1316_v62, 0.0  ;;  %v1310_v8 = vmax.f32 %v1634_v3, %v1641_v4  ;;  %1274 = vst.msk [vmem:[%s2638_s11 + $0x30] sm:$0xff] %vm1267_vm1, %v1257_v63  ;;  %v2074_v9 = vadd.f32 %v1193_v6, %v860_v2 }
 0x153   : >> { %v1260_v10 = vmax.f32 %v2625_v16, %v2073_v5  ;;  %v1897_v11 = vpop.f32.mrb[24].mxu1 }
 0x154   : >> { %1332 = vst.msk [vmem:[%s2659_s13] sm:$0xff] %vm1267_vm1, %v1323_v7  ;;  %v1317_v12 = vadd.f32 %v2260_v0, %v1310_v8  ;;  %v1259_v13 = vmax.f32 %v2627_v18, %v2074_v9  ;;  %v1963_v14 = vpop.f32.mrb[24].mxu0  ;;  %v870_v15 = vpop.f32.mrb[25].mxu1 }
 0x155   : >> { %v1635_v17 = vld [vmem:[%s2638_s11 + $0x20] ss:$2 sm:$0xff]  ;;  %v1642_v19 = vld [vmem:[%s2638_s11 + $0x21] ss:$2 sm:$0xff]  ;;  %1277 = vst.msk [vmem:[%s2638_s11 + $0x48] sm:$0xff] %vm1267_vm1, %v1260_v10  ;;  %v2075_v21 = vadd.f32 %v1963_v14, %v1897_v11  ;;  %v1203_v24 = vpop.f32.mrb[25].mxu0 }
 0x156   : >> { %v1324_v16 = vmax.f32 %v1317_v12, 0.0  ;;  %v1311_v26 = vmax.f32 %v1635_v17, %v1642_v19  ;;  %1276 = vst.msk [vmem:[%s2638_s11 + $0x40] sm:$0xff] %vm1267_vm1, %v1259_v13  ;;  %v2076_v28 = vadd.f32 %v1203_v24, %v870_v15 }
 0x157   : >> { %v1262_v29 = vmax.f32 %v2629_v20, %v2075_v21  ;;  %v1900_v18 = vpop.f32.mrb[26].mxu1 }
 0x158   : >> { %1333 = vst.msk [vmem:[%s2659_s13 + $0x8] sm:$0xff] %vm1267_vm1, %v1324_v16  ;;  %v1318_v30 = vadd.f32 %v2260_v0, %v1311_v26  ;;  %v1261_v31 = vmax.f32 %v2631_v22, %v2076_v28  ;;  %v1966_v32 = vpop.f32.mrb[26].mxu0  ;;  %v880_v33 = vpop.f32.mrb[27].mxu1 }
 0x159   : >> { %v1636_v34 = vld [vmem:[%s2638_s11 + $0x30] ss:$2 sm:$0xff]  ;;  %v1643_v35 = vld [vmem:[%s2638_s11 + $0x31] ss:$2 sm:$0xff]  ;;  %1279 = vst.msk [vmem:[%s2638_s11 + $0x58] sm:$0xff] %vm1267_vm1, %v1262_v29  ;;  %v2077_v36 = vadd.f32 %v1966_v32, %v1900_v18  ;;  %v1213_v20 = vpop.f32.mrb[27].mxu0 }
 0x15a   : >> { %v1325_v37 = vmax.f32 %v1318_v30, 0.0  ;;  %v1312_v38 = vmax.f32 %v1636_v34, %v1643_v35  ;;  %1278 = vst.msk [vmem:[%s2638_s11 + $0x50] sm:$0xff] %vm1267_vm1, %v1261_v31  ;;  %v2078_v22 = vadd.f32 %v1213_v20, %v880_v33 }
 0x15b   : >> { %v1264_v39 = vmax.f32 %v2634_v25, %v2077_v36 }
 0x15c   : >> { %1334 = vst.msk [vmem:[%s2659_s13 + $0x10] sm:$0xff] %vm1267_vm1, %v1325_v37  ;;  %v1319_v23 = vadd.f32 %v2260_v0, %v1312_v38  ;;  %v1263_v40 = vmax.f32 %v2636_v27, %v2078_v22 }
 0x15d   : >> { %v1637_v41 = vld [vmem:[%s2638_s11 + $0x40] ss:$2 sm:$0xff]  ;;  %v1644_v42 = vld [vmem:[%s2638_s11 + $0x41] ss:$2 sm:$0xff]  ;;  %1281 = vst.msk [vmem:[%s2638_s11 + $0x68] sm:$0xff] %vm1267_vm1, %v1264_v39 }
 0x15e   : >> { %v1326_v43 = vmax.f32 %v1319_v23, 0.0  ;;  %v1313_v44 = vmax.f32 %v1637_v41, %v1644_v42  ;;  %1280 = vst.msk [vmem:[%s2638_s11 + $0x60] sm:$0xff] %vm1267_vm1, %v1263_v40 }
 0x160   : >> { %1335 = vst.msk [vmem:[%s2659_s13 + $0x18] sm:$0xff] %vm1267_vm1, %v1326_v43  ;;  %v1320_v25 = vadd.f32 %v2260_v0, %v1313_v44 }
 0x161   : >> { %v1638_v45 = vld [vmem:[%s2638_s11 + $0x50] ss:$2 sm:$0xff]  ;;  %v1645_v46 = vld [vmem:[%s2638_s11 + $0x51] ss:$2 sm:$0xff] }
 0x162   : >> { %v1327_v47 = vmax.f32 %v1320_v25, 0.0  ;;  %v1314_v48 = vmax.f32 %v1638_v45, %v1645_v46 }
 0x164   : >> { %1336 = vst.msk [vmem:[%s2659_s13 + $0x20] sm:$0xff] %vm1267_vm1, %v1327_v47  ;;  %v1321_v27 = vadd.f32 %v2260_v0, %v1314_v48 }
 0x165   : >> { %v1639_v49 = vld [vmem:[%s2638_s11 + $0x60] ss:$2 sm:$0xff]  ;;  %v1646_v50 = vld [vmem:[%s2638_s11 + $0x61] ss:$2 sm:$0xff] }
 0x166   : >> { %v1328_v51 = vmax.f32 %v1321_v27, 0.0  ;;  %v1315_v52 = vmax.f32 %v1639_v49, %v1646_v50  ;;  %221 = sbr.rel (!%p219_p8) target bundleno = 25 (0x19), region = 89 }
 0x168   : >> { %1337 = vst.msk [vmem:[%s2659_s13 + $0x28] sm:$0xff] %vm1267_vm1, %v1328_v51  ;;  %v1322_v53 = vadd.f32 %v2260_v0, %v1315_v52 }
 0x16a   : >> { %v1329_v54 = vmax.f32 %v1322_v53, 0.0 }
 0x16c   : >> { %1338 = vst.msk [vmem:[%s2659_s13 + $0x30] sm:$0xff] %vm1267_vm1, %v1329_v54 }
 0x16d PF: > { %s13_s16 = sadd.s32 1, %s2201_s16   ;;  %s2737_s12 = smov %s2193_s14 }
 0x16e   : > { %p10_p9 = scmp.ge.s32.totalorder %s13_s16, 16   ;;  %s2738_s13 = smov %s2197_s15 }
 0x16f   : > { %s2739_s14 = smov %s2742_s17  ;;  %s2740_s15 = smov %s2746_s18 }
 0x170   :  { %12 = sbr.rel (!%p10_p9) target bundleno = 3 (0x3), region = 100 }

// kernel: simple_cnn_forward.6
= control target key start
LH: loop header
LB: loop body
LE: loop exit
PB: predicated region body
PF: predicated region fallthrough
CT: control target
= control target key end

     0   :  { %s1520_s12 = smov 0   ;;  %s1522_s13 = smov 0   ;;  %s2044_s0 = inlined_call_operand.vmem [shape: f32[2,7,560,192], index: 0, kind: input, shape index: {}]   ;;  %s2045_s1 = inlined_call_operand.vmem [shape: f32[3,192,128], index: 1, kind: input, shape index: {}]   ;;  %s2046_s2 = inlined_call_operand.vmem [shape: f32[1,128], index: 2, kind: input, shape index: {}]   ;;  %s2047_s3 = inlined_call_operand.vmem [shape: f32[2,28,28,128], index: 3, kind: output, shape index: {}]  }
   0x1   :  { %s1524_s14 = smov 0   ;;  %s1526_s15 = smov 0  }
   0x2   :  { %s1528_s16 = smov 0  }
   0x3 LB: > { %s22_s17 = sadd.s32 1, %s1485_s14  ;;  %s25_s18 = sadd.s32 1, %s1489_s15  ;;  %s1493_s16 = sphi %s1528_s16, %s13_s16   ;;  %s1489_s15 = sphi %s1526_s15, %s2051_s15   ;;  %s1485_s14 = sphi %s1524_s14, %s2050_s14   ;;  %s1481_s13 = sphi %s1522_s13, %s2049_s13   ;;  %s1477_s12 = sphi %s1520_s12, %s2048_s12  }
   0x4   : > { %p23_p0 = scmp.ge.s32.totalorder %s22_s17, 7  ;;  %p1116_p1 = scmp.ge.s32.totalorder %s1493_s16, 1 }
   0x5   : > { %p157_p2 = scmp.lt.s32.totalorder %s1493_s16, 15 }
   0x6   : > { %s2053_s17 = smov (%p23_p0, %s22_s17), 0  ;;  %s2055_s18 = smov (!%p23_p0, %s25_s18), %s1489_s15 }
   0x7   : > { %p158_p3 = pnand %p1116_p1, %p157_p2  ;;  %p27_p4 = scmp.ge.s32.totalorder %s2055_s18, 2 }
   0x8   : > { %p190_p5 = scmp.lt.s32.totalorder (!%p158_p3), %s1481_s13, 1  ;;  %p192_p6 = scmp.lt.s32.totalorder (!%p158_p3), %s1477_s12, 6  ;;  %v1553_v0 = vld [vmem:[%s2046_s2] ss:$0 sm:$0xff] (!%p158_p3) }
   0x9   : > { %s2057_s18 = smov (%p27_p4, %s2055_s18), 0  ;;  %161 = sbr.rel (%p158_p3) target bundleno = 386 (0x182), region = 32 }
   0xa   : > { %s1118_s21 = sshll.u32 (!%p158_p3), %s1477_s12, 2  ;;  %s1565_s9 = smov (!%p158_p3), 0  }
   0xb   : > { %p202_p7 = scmp.lt.s32.totalorder (!%p158_p3), %s1118_s21, 27 }
  0x10   : > { %s2059_s13 = smov (!%p190_p5, %s1481_s13), 1  ;;  %s2061_s12 = smov (!%p192_p6, %s1477_s12), 6 }
  0x11   : > { %s1400_s22 = smul.u32 980, %s2059_s13  ;;  %s2063_s21 = smov (!%p202_p7, %s1118_s21), 27 }
  0x12   : > { %s1399_s23 = smul.u32 140, %s2061_s12  ;;  %s1119_s27 = sshll.u32 %s2063_s21, 2 }
  0x13   : > { %s1401_s25 = smul.u32 112, %s2059_s13 }
  0x14   : > { %s196_s24 = sadd.s32 %s1400_s22, %s1399_s23 }
  0x15   : > { %s1117_s26 = sshll.u32 %s196_s24, 3  ;;  %s206_s4 = sadd.s32 %s1401_s25, %s1119_s27 }
  0x16   : > { %s1558_s30 = scalar_lea.vmem %s2044_s0, %s1117_s26  ;;  %s1120_s5 = sshll.u32 %s206_s4, 3 }
  0x17   : > { %s1563_s8 = scalar_lea.vmem %s2047_s3, %s1120_s5 }
  0x18 LB: >> { %v1127_v1 = vld [vmem:[%s2045_s1 + $0xc0] sm:$0xff]  ;;  %v1128_v2 = vld [vmem:[%s2045_s1 + $0xc8] sm:$0xff]  ;;  %v1499_v4 = vmov 0.0|0.0   ;;  %v1129_v7 = vld [vmem:[%s2045_s1 + $0xd0] sm:$0xff]  ;;  %s1122_s5 = sshll.u32 %s1497_s9, 1  ;;  %s224_s7 = smul.u32 112, %s1497_s9  ;;  %s1497_s9 = sphi %s1565_s9, %s222_s9  }
  0x19   : >> { %v258_v3 = vld [vmem:[%s2045_s1] sm:$0xff]  ;;  %1232 = vmatprep.subr.bf16.mxu1 %v1499_v4  ;;  %1268 = vmatprep.subr.bf16.mxu0 %v1499_v4  ;;  %v1233_v5 = vpack.c.bf16 %v1128_v2, %v1127_v1  ;;  %v259_v6 = vld [vmem:[%s2045_s1 + $0x8] sm:$0xff]  ;;  %v1130_v8 = vld [vmem:[%s2045_s1 + $0xd8] sm:$0xff]  ;;  %s282_s6 = sadd.s32 1, %s1122_s5  ;;  %vm342_vm0 = vcmask 523264   ;;  %s1886_s28 = sadd.s32 2, %s1122_s5 }
  0x1a   : >> { %v1269_v9 = vpack.c.bf16 %v259_v6, %v258_v3  ;;  %v260_v10 = vld [vmem:[%s2045_s1 + $0x10] sm:$0xff]  ;;  %v261_v11 = vld [vmem:[%s2045_s1 + $0x18] sm:$0xff]  ;;  %v1236_v12 = vpack.c.bf16 %v1130_v8, %v1129_v7  ;;  %v1131_v14 = vld [vmem:[%s2045_s1 + $0xe0] sm:$0xff]  ;;  %s283_s19 = smul.u32 56, %s282_s6  ;;  %s225_s25 = sshra.s32 %s224_s7, 3 }
  0x1b   : >> { %1234 = vmatpush1.bf16.msra.mxu1 %v1233_v5  ;;  %v1272_v13 = vpack.c.bf16 %v261_v11, %v260_v10  ;;  %v1132_v15 = vld [vmem:[%s2045_s1 + $0xe8] sm:$0xff]  ;;  %v262_v16 = vld [vmem:[%s2045_s1 + $0x20] sm:$0xff]  ;;  %v1133_v20 = vld [vmem:[%s2045_s1 + $0xf0] sm:$0xff]  ;;  %s1229_s12 = sshll.u32 %s225_s25, 4  ;;  %s698_s7 = smul.u32 56, %s1886_s28 }
  0x1c   : >> { %1270 = vmatpush1.bf16.msra.mxu0 %v1269_v9  ;;  %1235 = vmatprep.subr.bf16.mxu1 %v1499_v4  ;;  %v263_v17 = vld [vmem:[%s2045_s1 + $0x28] sm:$0xff]  ;;  %v1239_v18 = vpack.c.bf16 %v1132_v15, %v1131_v14  ;;  %s284_s24 = sshra.s32 %s283_s19, 3  ;;  %v1134_v21 = vld [vmem:[%s2045_s1 + $0xf8] sm:$0xff]  ;;  %v264_v22 = vld [vmem:[%s2045_s1 + $0x30] sm:$0xff]  ;;  %s1646_s27 = scalar_lea.vmem %s1558_s30, %s1229_s12 }
  0x1d   : >> { %1271 = vmatprep.subr.bf16.mxu0 %v1499_v4  ;;  %v1275_v19 = vpack.c.bf16 %v263_v17, %v262_v16  ;;  %v265_v23 = vld [vmem:[%s2045_s1 + $0x38] sm:$0xff]  ;;  %s1230_s11 = sshll.u32 %s284_s24, 4  ;;  %v1242_v24 = vpack.c.bf16 %v1134_v21, %v1133_v20  ;;  %v1135_v26 = vld [vmem:[%s2045_s1 + $0x100] sm:$0xff]  ;;  %v1136_v27 = vld [vmem:[%s2045_s1 + $0x108] sm:$0xff]  ;;  %s699_s19 = sshra.s32 %s698_s7, 3 }
  0x1e   : >> { %v1278_v25 = vpack.c.bf16 %v265_v23, %v264_v22  ;;  %v266_v28 = vld [vmem:[%s2045_s1 + $0x40] sm:$0xff]  ;;  %v267_v29 = vld [vmem:[%s2045_s1 + $0x48] sm:$0xff]  ;;  %s1643_s26 = scalar_lea.vmem %s1558_s30, %s1230_s11  ;;  %v1245_v30 = vpack.c.bf16 %v1136_v27, %v1135_v26  ;;  %v1137_v31 = vld [vmem:[%s2045_s1 + $0x110] sm:$0xff]  ;;  %s1231_s20 = sshll.u32 %s699_s19, 4 }
  0x1f   : >> { %1237 = vmatpush1.bf16.msra.mxu1 %v1236_v12  ;;  %v1281_v32 = vpack.c.bf16 %v267_v29, %v266_v28  ;;  %v1138_v33 = vld [vmem:[%s2045_s1 + $0x118] sm:$0xff]  ;;  %v290_v34 = vld [vmem:[%s1643_s26 + $0x8] sm:$0xff]  ;;  %v268_v36 = vld [vmem:[%s2045_s1 + $0x50] sm:$0xff]  ;;  %s1930_s21 = scalar_lea.vmem %s1558_s30, %s1231_s20  ;;  %s1226_s23 = sshll.u32 %s1497_s9, 5 }
  0x20   : >> { %1273 = vmatpush1.bf16.msra.mxu0 %v1272_v13  ;;  %1238 = vmatprep.subr.bf16.mxu1 %v1499_v4  ;;  %v231_v35 = vld [vmem:[%s1646_s27 + $0x8] sm:$0xff]  ;;  %v269_v37 = vld [vmem:[%s2045_s1 + $0x58] sm:$0xff]  ;;  %v1248_v38 = vpack.c.bf16 %v1138_v33, %v1137_v31  ;;  %v1139_v40 = vld [vmem:[%s2045_s1 + $0x120] sm:$0xff]  ;;  %s2005_s24 = scalar_lea.vmem %s1563_s8, %s1226_s23 }
  0x21   : >> { %1274 = vmatprep.subr.bf16.mxu0 %v1499_v4  ;;  %1151 = vmatprep.mubr.msk.f32.mxu1 %vm342_vm0, %v290_v34  ;;  %v1284_v39 = vpack.c.bf16 %v269_v37, %v268_v36  ;;  %v1140_v41 = vld [vmem:[%s2045_s1 + $0x128] sm:$0xff]  ;;  %v270_v42 = vld [vmem:[%s2045_s1 + $0x60] sm:$0xff]  ;;  %v1141_v46 = vld [vmem:[%s2045_s1 + $0x130] sm:$0xff] }
  0x22   : >> { %1165 = vmatprep.mubr.msk.f32.mxu0 %vm342_vm0, %v231_v35  ;;  %v271_v43 = vld [vmem:[%s2045_s1 + $0x68] sm:$0xff]  ;;  %v1251_v44 = vpack.c.bf16 %v1140_v41, %v1139_v40  ;;  %v1142_v47 = vld [vmem:[%s2045_s1 + $0x138] sm:$0xff]  ;;  %v272_v48 = vld [vmem:[%s2045_s1 + $0x70] sm:$0xff] }
  0x23   : >> { %1240 = vmatpush1.bf16.msra.mxu1 %v1239_v18  ;;  %v1287_v45 = vpack.c.bf16 %v271_v43, %v270_v42  ;;  %v273_v49 = vld [vmem:[%s2045_s1 + $0x78] sm:$0xff]  ;;  %v1254_v50 = vpack.c.bf16 %v1142_v47, %v1141_v46  ;;  %v1143_v52 = vld [vmem:[%s2045_s1 + $0x140] sm:$0xff]  ;;  %v1144_v53 = vld [vmem:[%s2045_s1 + $0x148] sm:$0xff] }
  0x24   : >> { %1276 = vmatpush1.bf16.msra.mxu0 %v1275_v19  ;;  %1241 = vmatprep.subr.bf16.mxu1 %v1499_v4  ;;  %v1290_v51 = vpack.c.bf16 %v273_v49, %v272_v48  ;;  %v274_v54 = vld [vmem:[%s2045_s1 + $0x80] sm:$0xff]  ;;  %v275_v55 = vld [vmem:[%s2045_s1 + $0x88] sm:$0xff]  ;;  %v1257_v56 = vpack.c.bf16 %v1144_v53, %v1143_v52  ;;  %v1145_v58 = vld [vmem:[%s2045_s1 + $0x150] sm:$0xff] }
  0x25   : >> { %1277 = vmatprep.subr.bf16.mxu0 %v1499_v4  ;;  %v1293_v57 = vpack.c.bf16 %v275_v55, %v274_v54  ;;  %v1146_v59 = vld [vmem:[%s2045_s1 + $0x158] sm:$0xff]  ;;  %v276_v60 = vld [vmem:[%s2045_s1 + $0x90] sm:$0xff]  ;;  %v1147_v1 = vld [vmem:[%s2045_s1 + $0x160] sm:$0xff] }
  0x26   : >> { %v277_v61 = vld [vmem:[%s2045_s1 + $0x98] sm:$0xff]  ;;  %v1260_v62 = vpack.c.bf16 %v1146_v59, %v1145_v58  ;;  %v1148_v2 = vld [vmem:[%s2045_s1 + $0x168] sm:$0xff]  ;;  %v278_v3 = vld [vmem:[%s2045_s1 + $0xa0] sm:$0xff] }
  0x27   : >> { %1243 = vmatpush1.bf16.msra.mxu1 %v1242_v24  ;;  %v1296_v63 = vpack.c.bf16 %v277_v61, %v276_v60  ;;  %v279_v5 = vld [vmem:[%s2045_s1 + $0xa8] sm:$0xff]  ;;  %v1263_v6 = vpack.c.bf16 %v1148_v2, %v1147_v1  ;;  %v1149_v8 = vld [vmem:[%s2045_s1 + $0x170] sm:$0xff]  ;;  %v1150_v9 = vld [vmem:[%s2045_s1 + $0x178] sm:$0xff] }
  0x28   : >> { %1279 = vmatpush1.bf16.msra.mxu0 %v1278_v25  ;;  %1244 = vmatprep.subr.bf16.mxu1 %v1499_v4  ;;  %v1299_v7 = vpack.c.bf16 %v279_v5, %v278_v3  ;;  %v280_v10 = vld [vmem:[%s2045_s1 + $0xb0] sm:$0xff]  ;;  %v281_v11 = vld [vmem:[%s2045_s1 + $0xb8] sm:$0xff]  ;;  %v1266_v12 = vpack.c.bf16 %v1150_v9, %v1149_v8  ;;  %v1181_v14 = vld [vmem:[%s2045_s1 + $0x180] sm:$0xff] }
  0x29   : >> { %1280 = vmatprep.subr.bf16.mxu0 %v1499_v4  ;;  %v1302_v13 = vpack.c.bf16 %v281_v11, %v280_v10  ;;  %v1182_v15 = vld [vmem:[%s2045_s1 + $0x188] sm:$0xff]  ;;  %v289_v16 = vld [vmem:[%s1643_s26] sm:$0xff]  ;;  %v1183_v19 = vld [vmem:[%s2045_s1 + $0x190] sm:$0xff] }
  0x2a   : >> { %v1305_v17 = vpack.c.bf16 %v1182_v15, %v1181_v14  ;;  %v230_v18 = vld [vmem:[%s1646_s27] sm:$0xff]  ;;  %v1184_v20 = vld [vmem:[%s2045_s1 + $0x198] sm:$0xff]  ;;  %v291_v23 = vld [vmem:[%s1643_s26 + $0x10] sm:$0xff] }
  0x2b   : >> { %1246 = vmatpush1.bf16.msra.mxu1 %v1245_v30  ;;  %v292_v21 = vld [vmem:[%s1643_s26 + $0x18] sm:$0xff]  ;;  %v1308_v24 = vpack.c.bf16 %v1184_v20, %v1183_v19  ;;  %v232_v25 = vld [vmem:[%s1646_s27 + $0x10] sm:$0xff]  ;;  %v294_v26 = vld [vmem:[%s1643_s26 + $0x28] sm:$0xff] }
  0x2c   : >> { %1282 = vmatpush1.bf16.msra.mxu0 %v1281_v32  ;;  %1247 = vmatprep.subr.bf16.mxu1 %v1499_v4  ;;  %v233_v22 = vld [vmem:[%s1646_s27 + $0x18] sm:$0xff]  ;;  %v1185_v27 = vld [vmem:[%s2045_s1 + $0x1a0] sm:$0xff]  ;;  %v1186_v28 = vld [vmem:[%s2045_s1 + $0x1a8] sm:$0xff] }
  0x2d   : >> { %1283 = vmatprep.subr.bf16.mxu0 %v1499_v4  ;;  %v235_v29 = vld [vmem:[%s1646_s27 + $0x28] sm:$0xff]  ;;  %v293_v30 = vld [vmem:[%s1643_s26 + $0x20] sm:$0xff]  ;;  %v296_v32 = vld [vmem:[%s1643_s26 + $0x38] sm:$0xff]  ;;  %v1311_v33 = vpack.c.bf16 %v1186_v28, %v1185_v27 }
  0x2e   : >> { %v234_v31 = vld [vmem:[%s1646_s27 + $0x20] sm:$0xff]  ;;  %v237_v34 = vld [vmem:[%s1646_s27 + $0x38] sm:$0xff]  ;;  %v1187_v35 = vld [vmem:[%s2045_s1 + $0x1b0] sm:$0xff] }
  0x2f   : >> { %1249 = vmatpush1.bf16.msra.mxu1 %v1248_v38  ;;  %v1188_v36 = vld [vmem:[%s2045_s1 + $0x1b8] sm:$0xff]  ;;  %v295_v37 = vld [vmem:[%s1643_s26 + $0x30] sm:$0xff]  ;;  %v239_v41 = vld [vmem:[%s1646_s27 + $0x48] sm:$0xff] }
  0x30   : >> { %1285 = vmatpush1.bf16.msra.mxu0 %v1284_v39  ;;  %1250 = vmatprep.subr.bf16.mxu1 %v1499_v4  ;;  %v236_v38 = vld [vmem:[%s1646_s27 + $0x30] sm:$0xff]  ;;  %v298_v39 = vld [vmem:[%s1643_s26 + $0x48] sm:$0xff]  ;;  %v1314_v40 = vpack.c.bf16 %v1188_v36, %v1187_v35  ;;  %v1189_v42 = vld [vmem:[%s2045_s1 + $0x1c0] sm:$0xff] }
  0x31   : >> { %1286 = vmatprep.subr.bf16.mxu0 %v1499_v4  ;;  %v1190_v43 = vld [vmem:[%s2045_s1 + $0x1c8] sm:$0xff]  ;;  %v300_v46 = vld [vmem:[%s1643_s26 + $0x58] sm:$0xff]  ;;  %v1191_v49 = vld [vmem:[%s2045_s1 + $0x1d0] sm:$0xff] }
  0x32   : >> { %v1317_v47 = vpack.c.bf16 %v1190_v43, %v1189_v42  ;;  %v241_v48 = vld [vmem:[%s1646_s27 + $0x58] sm:$0xff]  ;;  %v240_v52 = vld [vmem:[%s1646_s27 + $0x50] sm:$0xff]  ;;  %v302_v53 = vld [vmem:[%s1643_s26 + $0x68] sm:$0xff] }
  0x33   : >> { %1252 = vmatpush1.bf16.msra.mxu1 %v1251_v44  ;;  %v297_v44 = vld [vmem:[%s1643_s26 + $0x40] sm:$0xff]  ;;  %v243_v55 = vld [vmem:[%s1646_s27 + $0x68] sm:$0xff]  ;;  %v304_v60 = vld [vmem:[%s1643_s26 + $0x78] sm:$0xff] }
  0x34   : >> { %1288 = vmatpush1.bf16.msra.mxu0 %v1287_v45  ;;  %1253 = vmatprep.subr.bf16.mxu1 %v1499_v4  ;;  %v238_v45 = vld [vmem:[%s1646_s27 + $0x40] sm:$0xff]  ;;  %v1196_v1 = vld [vmem:[%s2045_s1 + $0x1f8] sm:$0xff]  ;;  %v303_v2 = vld [vmem:[%s1643_s26 + $0x70] sm:$0xff] }
  0x35   : >> { %1289 = vmatprep.subr.bf16.mxu0 %v1499_v4  ;;  %v301_v58 = vld [vmem:[%s1643_s26 + $0x60] sm:$0xff]  ;;  %v244_v3 = vld [vmem:[%s1646_s27 + $0x70] sm:$0xff]  ;;  %v306_v5 = vld [vmem:[%s1643_s26 + $0x88] sm:$0xff] }
  0x36   : >> { %v242_v59 = vld [vmem:[%s1646_s27 + $0x60] sm:$0xff]  ;;  %v1198_v9 = vld [vmem:[%s2045_s1 + $0x208] sm:$0xff]  ;;  %v249_v14 = vld [vmem:[%s1646_s27 + $0x98] sm:$0xff] }
  0x37   : >> { %1255 = vmatpush1.bf16.msra.mxu1 %v1254_v50  ;;  %v1192_v50 = vld [vmem:[%s2045_s1 + $0x1d8] sm:$0xff]  ;;  %v1197_v8 = vld [vmem:[%s2045_s1 + $0x200] sm:$0xff]  ;;  %v1199_v15 = vld [vmem:[%s2045_s1 + $0x210] sm:$0xff] }
  0x38   : >> { %1291 = vmatpush1.bf16.msra.mxu0 %v1290_v51  ;;  %1256 = vmatprep.subr.bf16.mxu1 %v1499_v4  ;;  %v299_v51 = vld [vmem:[%s1643_s26 + $0x50] sm:$0xff]  ;;  %v1320_v54 = vpack.c.bf16 %v1192_v50, %v1191_v49  ;;  %v305_v10 = vld [vmem:[%s1643_s26 + $0x80] sm:$0xff]  ;;  %v310_v19 = vld [vmem:[%s1643_s26 + $0xa8] sm:$0xff] }
  0x39   : >> { %1292 = vmatprep.subr.bf16.mxu0 %v1499_v4  ;;  %v246_v11 = vld [vmem:[%s1646_s27 + $0x80] sm:$0xff]  ;;  %v253_v28 = vld [vmem:[%s1646_s27 + $0xb8] sm:$0xff]  ;;  %v255_v35 = vld [vmem:[%s1646_s27 + $0xc8] sm:$0xff] }
  0x3a   : >> { %v313_v36 = vld [vmem:[%s1643_s26 + $0xc0] sm:$0xff]  ;;  %v705_v42 = vld [vmem:[%s1930_s21 + $0x8] sm:$0xff]  ;;  %v718_v43 = vld [vmem:[%s1930_s21 + $0x70] sm:$0xff] }
  0x3b   : >> { %1258 = vmatpush1.bf16.msra.mxu1 %v1257_v56  ;;  %v1193_v56 = vld [vmem:[%s2045_s1 + $0x1e0] sm:$0xff]  ;;  %v723_v49 = vld [vmem:[%s1930_s21 + $0x98] sm:$0xff]  ;;  %v709_v50 = vld [vmem:[%s1930_s21 + $0x28] sm:$0xff] }
  0x3c   : >> { %1294 = vmatpush1.bf16.msra.mxu0 %v1293_v57  ;;  %1259 = vmatprep.subr.bf16.mxu1 %v1499_v4  ;;  %v1194_v57 = vld [vmem:[%s2045_s1 + $0x1e8] sm:$0xff] }
  0x3d   : >> { %1295 = vmatprep.subr.bf16.mxu0 %v1499_v4  ;;  %v1323_v61 = vpack.c.bf16 %v1194_v57, %v1193_v56  ;;  %v710_v56 = vld [vmem:[%s1930_s21 + $0x30] sm:$0xff]  ;;  %v727_v57 = vld [vmem:[%s1930_s21 + $0xb8] sm:$0xff] }
  0x3f   : >> { %1261 = vmatpush1.bf16.msra.mxu1 %v1260_v62  ;;  %v245_v62 = vld [vmem:[%s1646_s27 + $0x78] sm:$0xff] }
  0x40   : >> { %1297 = vmatpush1.bf16.msra.mxu0 %v1296_v63  ;;  %1262 = vmatprep.subr.bf16.mxu1 %v1499_v4  ;;  %v1195_v63 = vld [vmem:[%s2045_s1 + $0x1f0] sm:$0xff] }
  0x41   : >> { %1298 = vmatprep.subr.bf16.mxu0 %v1499_v4 }
  0x43   : >> { %1264 = vmatpush1.bf16.msra.mxu1 %v1263_v6  ;;  %v1326_v6 = vpack.c.bf16 %v1196_v1, %v1195_v63  ;;  %v728_v63 = vld [vmem:[%s1930_s21 + $0xc0] sm:$0xff]  ;;  %v714_v1 = vld [vmem:[%s1930_s21 + $0x50] sm:$0xff] }
  0x44   : >> { %1300 = vmatpush1.bf16.msra.mxu0 %v1299_v7  ;;  %1265 = vmatprep.subr.bf16.mxu1 %v1499_v4  ;;  %v247_v7 = vld [vmem:[%s1646_s27 + $0x88] sm:$0xff] }
  0x45   : >> { %1301 = vmatprep.subr.bf16.mxu0 %v1499_v4 }
  0x47   : >> { %1267 = vmatpush1.bf16.msra.mxu1 %v1266_v12  ;;  %v308_v12 = vld [vmem:[%s1643_s26 + $0x98] sm:$0xff] }
  0x48   : >> { %1303 = vmatpush1.bf16.msra.mxu0 %v1302_v13  ;;  %1340 = vmatprep.subr.bf16.mxu1 %v1499_v4  ;;  %v1329_v13 = vpack.c.bf16 %v1198_v9, %v1197_v8 }
  0x49   : >> { %1304 = vmatprep.subr.bf16.mxu0 %v1499_v4 }
  0x4a   : >> { %450 = vmatmul.mubr.f32.vlgmr.msra.gmra.mrb[0].mxu1 %v289_v16  ;;  %v1200_v16 = vld [vmem:[%s2045_s1 + $0x218] sm:$0xff] }
  0x4b   : >> { %627 = vmatmul.mubr.f32.vlgmr.msra.gmra.mrb[0].mxu0 %v230_v18  ;;  %1352 = vmatpush1.bf16.msra.mxu1 %v1305_v17  ;;  %v248_v18 = vld [vmem:[%s1646_s27 + $0x90] sm:$0xff]  ;;  %v1332_v20 = vpack.c.bf16 %v1200_v16, %v1199_v15 }
  0x4c   : >> { %1306 = vmatpush1.bf16.msra.mxu0 %v1305_v17  ;;  %1152 = vmatprep.mubr.msk.f32.mxu1 %vm342_vm0, %v292_v21  ;;  %v307_v17 = vld [vmem:[%s1643_s26 + $0x90] sm:$0xff]  ;;  %v251_v21 = vld [vmem:[%s1646_s27 + $0xa8] sm:$0xff] }
  0x4d   : >> { %1166 = vmatprep.mubr.msk.f32.mxu0 %vm342_vm0, %v233_v22  ;;  %1307 = vmatprep.subr.bf16.mxu0 %v1499_v4  ;;  %v1201_v22 = vld [vmem:[%s2045_s1 + $0x220] sm:$0xff] }
  0x4e   : >> { %455 = vmatmul.mubr.f32.gmra.mrb[2].mxu1 %v291_v23  ;;  %1341 = vmatprep.subr.bf16.mxu1 %v1499_v4  ;;  %v1202_v23 = vld [vmem:[%s2045_s1 + $0x228] sm:$0xff] }
  0x4f   : >> { %632 = vmatmul.mubr.f32.gmra.mrb[2].mxu0 %v232_v25  ;;  %1353 = vmatpush1.bf16.msra.mxu1 %v1308_v24  ;;  %v250_v25 = vld [vmem:[%s1646_s27 + $0xa0] sm:$0xff]  ;;  %v1335_v27 = vpack.c.bf16 %v1202_v23, %v1201_v22 }
  0x50   : >> { %1309 = vmatpush1.bf16.msra.mxu0 %v1308_v24  ;;  %1153 = vmatprep.mubr.msk.f32.mxu1 %vm342_vm0, %v294_v26  ;;  %v309_v24 = vld [vmem:[%s1643_s26 + $0xa0] sm:$0xff]  ;;  %v312_v26 = vld [vmem:[%s1643_s26 + $0xb8] sm:$0xff] }
  0x51   : >> { %1167 = vmatprep.mubr.msk.f32.mxu0 %vm342_vm0, %v235_v29  ;;  %1310 = vmatprep.subr.bf16.mxu0 %v1499_v4  ;;  %v1203_v29 = vld [vmem:[%s2045_s1 + $0x230] sm:$0xff] }
  0x52   : >> { %460 = vmatmul.mubr.f32.gmra.mrb[4].mxu1 %v293_v30  ;;  %1342 = vmatprep.subr.bf16.mxu1 %v1499_v4  ;;  %v1204_v30 = vld [vmem:[%s2045_s1 + $0x238] sm:$0xff] }
  0x53   : >> { %637 = vmatmul.mubr.f32.gmra.mrb[4].mxu0 %v234_v31  ;;  %1154 = vmatprep.mubr.msk.f32.mxu1 %vm342_vm0, %v296_v32  ;;  %v311_v31 = vld [vmem:[%s1643_s26 + $0xb0] sm:$0xff] }
  0x54   : >> { %1168 = vmatprep.mubr.msk.f32.mxu0 %vm342_vm0, %v237_v34  ;;  %1312 = vmatpush1.bf16.msra.mxu0 %v1311_v33  ;;  %v252_v32 = vld [vmem:[%s1646_s27 + $0xb0] sm:$0xff]  ;;  %v1338_v34 = vpack.c.bf16 %v1204_v30, %v1203_v29 }
  0x55   : >> { %1354 = vmatpush1.bf16.msra.mxu1 %v1311_v33  ;;  %1313 = vmatprep.subr.bf16.mxu0 %v1499_v4  ;;  %v314_v33 = vld [vmem:[%s1643_s26 + $0xc8] sm:$0xff] }
  0x56   : >> { %465 = vmatmul.mubr.f32.gmra.mrb[6].mxu1 %v295_v37  ;;  %1343 = vmatprep.subr.bf16.mxu1 %v1499_v4  ;;  %v254_v37 = vld [vmem:[%s1646_s27 + $0xc0] sm:$0xff] }
  0x57   : >> { %642 = vmatmul.mubr.f32.gmra.mrb[6].mxu0 %v236_v38  ;;  %1155 = vmatprep.mubr.msk.f32.mxu1 %vm342_vm0, %v298_v39  ;;  %v316_v38 = vld [vmem:[%s1643_s26 + $0xd8] sm:$0xff] }
  0x58   : >> { %1169 = vmatprep.mubr.msk.f32.mxu0 %vm342_vm0, %v239_v41  ;;  %1315 = vmatpush1.bf16.msra.mxu0 %v1314_v40  ;;  %v257_v39 = vld [vmem:[%s1646_s27 + $0xd8] sm:$0xff] }
  0x59   : >> { %1355 = vmatpush1.bf16.msra.mxu1 %v1314_v40  ;;  %1316 = vmatprep.subr.bf16.mxu0 %v1499_v4  ;;  %v256_v40 = vld [vmem:[%s1646_s27 + $0xd0] sm:$0xff]  ;;  %v719_v41 = vld [vmem:[%s1930_s21 + $0x78] sm:$0xff] }
  0x5a   : >> { %470 = vmatmul.mubr.f32.gmra.mrb[8].mxu1 %v297_v44  ;;  %1344 = vmatprep.subr.bf16.mxu1 %v1499_v4  ;;  %v704_v44 = vld [vmem:[%s1930_s21] sm:$0xff] }
  0x5b   : >> { %647 = vmatmul.mubr.f32.gmra.mrb[8].mxu0 %v238_v45  ;;  %1156 = vmatprep.mubr.msk.f32.mxu1 %vm342_vm0, %v300_v46  ;;  %v721_v45 = vld [vmem:[%s1930_s21 + $0x88] sm:$0xff]  ;;  %v707_v46 = vld [vmem:[%s1930_s21 + $0x18] sm:$0xff] }
  0x5c   : >> { %1170 = vmatprep.mubr.msk.f32.mxu0 %vm342_vm0, %v241_v48  ;;  %1318 = vmatpush1.bf16.msra.mxu0 %v1317_v47  ;;  %v706_v48 = vld [vmem:[%s1930_s21 + $0x10] sm:$0xff] }
  0x5d   : >> { %1356 = vmatpush1.bf16.msra.mxu1 %v1317_v47  ;;  %1319 = vmatprep.subr.bf16.mxu0 %v1499_v4  ;;  %v720_v47 = vld [vmem:[%s1930_s21 + $0x80] sm:$0xff] }
  0x5e   : >> { %475 = vmatmul.mubr.f32.gmra.mrb[10].mxu1 %v299_v51  ;;  %1345 = vmatprep.subr.bf16.mxu1 %v1499_v4  ;;  %v722_v51 = vld [vmem:[%s1930_s21 + $0x90] sm:$0xff] }
  0x5f   : >> { %652 = vmatmul.mubr.f32.gmra.mrb[10].mxu0 %v240_v52  ;;  %1157 = vmatprep.mubr.msk.f32.mxu1 %vm342_vm0, %v302_v53  ;;  %v708_v52 = vld [vmem:[%s1930_s21 + $0x20] sm:$0xff]  ;;  %v725_v53 = vld [vmem:[%s1930_s21 + $0xa8] sm:$0xff] }
  0x60   : >> { %1171 = vmatprep.mubr.msk.f32.mxu0 %vm342_vm0, %v243_v55  ;;  %1321 = vmatpush1.bf16.msra.mxu0 %v1320_v54  ;;  %v724_v55 = vld [vmem:[%s1930_s21 + $0xa0] sm:$0xff] }
  0x61   : >> { %1357 = vmatpush1.bf16.msra.mxu1 %v1320_v54  ;;  %1322 = vmatprep.subr.bf16.mxu0 %v1499_v4  ;;  %v711_v54 = vld [vmem:[%s1930_s21 + $0x38] sm:$0xff] }
  0x62   : >> { %480 = vmatmul.mubr.f32.gmra.mrb[12].mxu1 %v301_v58  ;;  %1346 = vmatprep.subr.bf16.mxu1 %v1499_v4  ;;  %v713_v58 = vld [vmem:[%s1930_s21 + $0x48] sm:$0xff] }
  0x63   : >> { %657 = vmatmul.mubr.f32.gmra.mrb[12].mxu0 %v242_v59  ;;  %1158 = vmatprep.mubr.msk.f32.mxu1 %vm342_vm0, %v304_v60  ;;  %v726_v59 = vld [vmem:[%s1930_s21 + $0xb0] sm:$0xff]  ;;  %v712_v60 = vld [vmem:[%s1930_s21 + $0x40] sm:$0xff] }
  0x64   : >> { %1172 = vmatprep.mubr.msk.f32.mxu0 %vm342_vm0, %v245_v62  ;;  %1324 = vmatpush1.bf16.msra.mxu0 %v1323_v61  ;;  %v715_v62 = vld [vmem:[%s1930_s21 + $0x58] sm:$0xff] }
  0x65   : >> { %1358 = vmatpush1.bf16.msra.mxu1 %v1323_v61  ;;  %1325 = vmatprep.subr.bf16.mxu0 %v1499_v4  ;;  %v729_v61 = vld [vmem:[%s1930_s21 + $0xc8] sm:$0xff] }
  0x66   : >> { %485 = vmatmul.mubr.f32.gmra.mrb[14].mxu1 %v303_v2  ;;  %1347 = vmatprep.subr.bf16.mxu1 %v1499_v4  ;;  %v731_v2 = vld [vmem:[%s1930_s21 + $0xd8] sm:$0xff] }
  0x67   : >> { %662 = vmatmul.mubr.f32.gmra.mrb[14].mxu0 %v244_v3  ;;  %1159 = vmatprep.mubr.msk.f32.mxu1 %vm342_vm0, %v306_v5  ;;  %v717_v3 = vld [vmem:[%s1930_s21 + $0x68] sm:$0xff]  ;;  %v730_v5 = vld [vmem:[%s1930_s21 + $0xd0] sm:$0xff] }
  0x68   : >> { %1173 = vmatprep.mubr.msk.f32.mxu0 %vm342_vm0, %v247_v7  ;;  %1327 = vmatpush1.bf16.msra.mxu0 %v1326_v6 }
  0x69   : >> { %1359 = vmatpush1.bf16.msra.mxu1 %v1326_v6  ;;  %1328 = vmatprep.subr.bf16.mxu0 %v1499_v4  ;;  %v716_v6 = vld [vmem:[%s1930_s21 + $0x60] sm:$0xff] }
  0x6a   : >> { %490 = vmatmul.mubr.f32.gmra.mrb[16].mxu1 %v305_v10  ;;  %1348 = vmatprep.subr.bf16.mxu1 %v1499_v4 }
  0x6b   : >> { %667 = vmatmul.mubr.f32.gmra.mrb[16].mxu0 %v246_v11  ;;  %1160 = vmatprep.mubr.msk.f32.mxu1 %vm342_vm0, %v308_v12 }
  0x6c   : >> { %1174 = vmatprep.mubr.msk.f32.mxu0 %vm342_vm0, %v249_v14  ;;  %1330 = vmatpush1.bf16.msra.mxu0 %v1329_v13 }
  0x6d   : >> { %1360 = vmatpush1.bf16.msra.mxu1 %v1329_v13  ;;  %1331 = vmatprep.subr.bf16.mxu0 %v1499_v4 }
  0x6e   : >> { %495 = vmatmul.mubr.f32.gmra.mrb[18].mxu1 %v307_v17  ;;  %1349 = vmatprep.subr.bf16.mxu1 %v1499_v4 }
  0x6f   : >> { %672 = vmatmul.mubr.f32.gmra.mrb[18].mxu0 %v248_v18  ;;  %1161 = vmatprep.mubr.msk.f32.mxu1 %vm342_vm0, %v310_v19 }
  0x70   : >> { %1175 = vmatprep.mubr.msk.f32.mxu0 %vm342_vm0, %v251_v21  ;;  %1333 = vmatpush1.bf16.msra.mxu0 %v1332_v20 }
  0x71   : >> { %1361 = vmatpush1.bf16.msra.mxu1 %v1332_v20  ;;  %1334 = vmatprep.subr.bf16.mxu0 %v1499_v4 }
  0x72   : >> { %500 = vmatmul.mubr.f32.gmra.mrb[20].mxu1 %v309_v24  ;;  %1350 = vmatprep.subr.bf16.mxu1 %v1499_v4 }
  0x73   : >> { %677 = vmatmul.mubr.f32.gmra.mrb[20].mxu0 %v250_v25  ;;  %1162 = vmatprep.mubr.msk.f32.mxu1 %vm342_vm0, %v312_v26 }
  0x74   : >> { %1176 = vmatprep.mubr.msk.f32.mxu0 %vm342_vm0, %v253_v28  ;;  %1336 = vmatpush1.bf16.msra.mxu0 %v1335_v27 }
  0x75   : >> { %1362 = vmatpush1.bf16.msra.mxu1 %v1335_v27  ;;  %1337 = vmatprep.subr.bf16.mxu0 %v1499_v4 }
  0x76   : >> { %505 = vmatmul.mubr.f32.gmra.mrb[22].mxu1 %v311_v31  ;;  %1351 = vmatprep.subr.bf16.mxu1 %v1499_v4  ;;  %v315_v4 = vld [vmem:[%s1643_s26 + $0xd0] sm:$0xff]  ;;  %s948_s26 = sand.u32 1, %s1497_s9  ;;  %s222_s9 = sadd.s32 1, %s1497_s9  }
  0x77   : >> { %682 = vmatmul.mubr.f32.gmra.mrb[22].mxu0 %v252_v32  ;;  %1163 = vmatprep.mubr.msk.f32.mxu1 %vm342_vm0, %v314_v33  ;;  %s956_s27 = smul.u32 56, %s948_s26  ;;  %p219_p8 = scmp.ge.s32.totalorder %s222_s9, 4  }
  0x78   : >> { %1177 = vmatprep.mubr.msk.f32.mxu0 %vm342_vm0, %v255_v35  ;;  %1339 = vmatpush1.bf16.msra.mxu0 %v1338_v34 }
  0x79   : >> { %1363 = vmatpush1.bf16.msra.mxu1 %v1338_v34  ;;  %s1991_s22 = scalar_lea.vmem [#allocation2], %s956_s27 }
  0x7a   : >> { %510 = vmatmul.mubr.f32.gmra.mrb[24].mxu1 %v313_v36 }
  0x7b   : >> { %687 = vmatmul.mubr.f32.gmra.mrb[24].mxu0 %v254_v37  ;;  %1164 = vmatprep.mubr.msk.f32.mxu1 %vm342_vm0, %v316_v38 }
  0x7c   : >> { %1178 = vmatprep.mubr.msk.f32.mxu0 %vm342_vm0, %v257_v39 }
  0x7e   : >> { %515 = vmatmul.mubr.f32.gmra.mrb[26].mxu1 %v315_v4 }
  0x7f   : >> { %692 = vmatmul.mubr.f32.gmra.mrb[26].mxu0 %v256_v40  ;;  %1212 = vmatprep.mubr.msk.f32.mxu1 %vm342_vm0, %v719_v41 }
  0x80   : >> { %1205 = vmatprep.mubr.msk.f32.mxu0 %vm342_vm0, %v705_v42 }
  0x82   : >> { %899 = vmatmul.mubr.f32.vlgmr.msra.gmra.mrb[28].mxu1 %v718_v43 }
  0x83   : >> { %864 = vmatmul.mubr.f32.vlgmr.msra.gmra.mrb[0].mxu0 %v704_v44  ;;  %1213 = vmatprep.mubr.msk.f32.mxu1 %vm342_vm0, %v721_v45 }
  0x84   : >> { %1206 = vmatprep.mubr.msk.f32.mxu0 %vm342_vm0, %v707_v46 }
  0x86   : >> { %904 = vmatmul.mubr.f32.gmra.mrb[30].mxu1 %v720_v47 }
  0x87   : >> { %869 = vmatmul.mubr.f32.gmra.mrb[2].mxu0 %v706_v48  ;;  %1214 = vmatprep.mubr.msk.f32.mxu1 %vm342_vm0, %v723_v49 }
  0x88   : >> { %1207 = vmatprep.mubr.msk.f32.mxu0 %vm342_vm0, %v709_v50 }
  0x8a   : >> { %909 = vmatmul.mubr.f32.gmra.mrb[32].mxu1 %v722_v51 }
  0x8b   : >> { %874 = vmatmul.mubr.f32.gmra.mrb[4].mxu0 %v708_v52  ;;  %1215 = vmatprep.mubr.msk.f32.mxu1 %vm342_vm0, %v725_v53 }
  0x8c   : >> { %1208 = vmatprep.mubr.msk.f32.mxu0 %vm342_vm0, %v711_v54 }
  0x8e   : >> { %914 = vmatmul.mubr.f32.gmra.mrb[34].mxu1 %v724_v55 }
  0x8f   : >> { %879 = vmatmul.mubr.f32.gmra.mrb[6].mxu0 %v710_v56  ;;  %1216 = vmatprep.mubr.msk.f32.mxu1 %vm342_vm0, %v727_v57 }
  0x90   : >> { %1209 = vmatprep.mubr.msk.f32.mxu0 %vm342_vm0, %v713_v58 }
  0x92   : >> { %919 = vmatmul.mubr.f32.gmra.mrb[36].mxu1 %v726_v59 }
  0x93   : >> { %884 = vmatmul.mubr.f32.gmra.mrb[8].mxu0 %v712_v60  ;;  %1217 = vmatprep.mubr.msk.f32.mxu1 %vm342_vm0, %v729_v61 }
  0x94   : >> { %1210 = vmatprep.mubr.msk.f32.mxu0 %vm342_vm0, %v715_v62 }
  0x96   : >> { %924 = vmatmul.mubr.f32.gmra.mrb[38].mxu1 %v728_v63 }
  0x97   : >> { %889 = vmatmul.mubr.f32.gmra.mrb[10].mxu0 %v714_v1  ;;  %1218 = vmatprep.mubr.msk.f32.mxu1 %vm342_vm0, %v731_v2 }
  0x98   : >> { %1211 = vmatprep.mubr.msk.f32.mxu0 %vm342_vm0, %v717_v3 }
  0x9a   : >> { %929 = vmatmul.mubr.f32.gmra.mrb[40].mxu1 %v730_v5 }
  0x9b   : >> { %894 = vmatmul.mubr.f32.gmra.mrb[12].mxu0 %v716_v6 }
 0x11d   : >> { %v451_v7 = vpop.f32.mrb[0].mxu1 }
 0x11e   : >> { %v453_v8 = vpop.f32.mrb[1].mxu1 }
 0x121   : >> { %v456_v9 = vpop.f32.mrb[2].mxu1 }
 0x122   : >> { %v458_v10 = vpop.f32.mrb[3].mxu1 }
 0x125   : >> { %v1978_v11 = vpop.f32.mrb[4].mxu1 }
 0x126   : >> { %v463_v12 = vpop.f32.mrb[5].mxu1 }
 0x129   : >> { %v1980_v13 = vpop.f32.mrb[6].mxu1 }
 0x12a   : >> { %v468_v14 = vpop.f32.mrb[7].mxu1 }
 0x12d   : >> { %v1982_v15 = vpop.f32.mrb[8].mxu1 }
 0x12e   : >> { %v473_v16 = vpop.f32.mrb[9].mxu1 }
 0x131   : >> { %v1984_v17 = vpop.f32.mrb[10].mxu1 }
 0x132   : >> { %v478_v18 = vpop.f32.mrb[11].mxu1 }
 0x135   : >> { %v1986_v19 = vpop.f32.mrb[12].mxu1 }
 0x136   : >> { %v483_v20 = vpop.f32.mrb[13].mxu1 }
 0x139   : >> { %v486_v21 = vpop.f32.mrb[14].mxu1 }
 0x13a   : >> { %v663_v22 = vpop.f32.mrb[14].mxu0  ;;  %v488_v23 = vpop.f32.mrb[15].mxu1 }
 0x13b   : >> { %v664_v24 = vadd.f32 %v663_v22, %v486_v21  ;;  %v665_v25 = vpop.f32.mrb[15].mxu0 }
 0x13d   : >> { %v491_v26 = vpop.f32.mrb[16].mxu1 }
 0x13e   : >> { %v668_v27 = vpop.f32.mrb[16].mxu0  ;;  %v493_v28 = vpop.f32.mrb[17].mxu1 }
 0x13f   : >> { %v669_v29 = vadd.f32 %v668_v27, %v491_v26  ;;  %v670_v30 = vpop.f32.mrb[17].mxu0 }
 0x141   : >> { %v496_v31 = vpop.f32.mrb[18].mxu1 }
 0x142   : >> { %v673_v32 = vpop.f32.mrb[18].mxu0  ;;  %v498_v33 = vpop.f32.mrb[19].mxu1 }
 0x143   : >> { %v674_v34 = vadd.f32 %v673_v32, %v496_v31  ;;  %v675_v35 = vpop.f32.mrb[19].mxu0 }
 0x145   : >> { %v501_v36 = vpop.f32.mrb[20].mxu1 }
 0x146   : >> { %v678_v37 = vpop.f32.mrb[20].mxu0  ;;  %v503_v38 = vpop.f32.mrb[21].mxu1 }
 0x147   : >> { %v679_v39 = vadd.f32 %v678_v37, %v501_v36  ;;  %v680_v4 = vpop.f32.mrb[21].mxu0 }
 0x149   : >> { %v506_v40 = vpop.f32.mrb[22].mxu1 }
 0x14a   : >> { %v683_v41 = vpop.f32.mrb[22].mxu0  ;;  %v508_v42 = vpop.f32.mrb[23].mxu1 }
 0x14b   : >> { %v684_v43 = vadd.f32 %v683_v41, %v506_v40  ;;  %v685_v44 = vpop.f32.mrb[23].mxu0 }
 0x14d   : >> { %v511_v45 = vpop.f32.mrb[24].mxu1 }
 0x14e   : >> { %v688_v46 = vpop.f32.mrb[24].mxu0  ;;  %v513_v47 = vpop.f32.mrb[25].mxu1 }
 0x14f   : >> { %v689_v48 = vadd.f32 %v688_v46, %v511_v45  ;;  %v690_v49 = vpop.f32.mrb[25].mxu0 }
 0x151   : >> { %v516_v50 = vpop.f32.mrb[26].mxu1 }
 0x152   : >> { %v693_v51 = vpop.f32.mrb[26].mxu0  ;;  %v518_v52 = vpop.f32.mrb[27].mxu1 }
 0x153   : >> { %v1989_v53 = vadd.f32 %v693_v51, %v516_v50  ;;  %v695_v54 = vpop.f32.mrb[27].mxu0 }
 0x155   : >> { %v900_v55 = vpop.f32.mrb[28].mxu1 }
 0x156   : >> { %v865_v56 = vpop.f32.mrb[0].mxu0  ;;  %v941_v57 = vadd.f32 %v900_v55, %v664_v24  ;;  %v902_v58 = vpop.f32.mrb[29].mxu1 }
 0x157   : >> { %v1364_v59 = vadd.f32 %v865_v56, %v451_v7  ;;  %v867_v60 = vpop.f32.mrb[1].mxu0 }
 0x159   : >> { %v949_v61 = vmax.f32 %v1364_v59, %v941_v57  ;;  %v905_v62 = vpop.f32.mrb[30].mxu1 }
 0x15a   : >> { %v870_v63 = vpop.f32.mrb[2].mxu0  ;;  %v942_v1 = vadd.f32 %v905_v62, %v669_v29  ;;  %v907_v2 = vpop.f32.mrb[31].mxu1 }
 0x15b   : >> { %958 = vst [vmem:[%s1991_s22] sm:$0xff] %v949_v61  ;;  %v1365_v3 = vadd.f32 %v870_v63, %v456_v9  ;;  %v872_v5 = vpop.f32.mrb[3].mxu0 }
 0x15d   : >> { %v950_v6 = vmax.f32 %v1365_v3, %v942_v1  ;;  %v910_v8 = vpop.f32.mrb[32].mxu1 }
 0x15e   : >> { %v875_v10 = vpop.f32.mrb[4].mxu0  ;;  %v943_v12 = vadd.f32 %v910_v8, %v674_v34  ;;  %v912_v7 = vpop.f32.mrb[33].mxu1 }
 0x15f   : >> { %959 = vst [vmem:[%s1991_s22 + $0x8] sm:$0xff] %v950_v6  ;;  %v1366_v14 = vadd.f32 %v875_v10, %v1978_v11  ;;  %v877_v16 = vpop.f32.mrb[5].mxu0 }
 0x161   : >> { %v951_v18 = vmax.f32 %v1366_v14, %v943_v12  ;;  %v915_v20 = vpop.f32.mrb[34].mxu1 }
 0x162   : >> { %v880_v21 = vpop.f32.mrb[6].mxu0  ;;  %v944_v22 = vadd.f32 %v915_v20, %v679_v39  ;;  %v917_v23 = vpop.f32.mrb[35].mxu1 }
 0x163   : >> { %960 = vst [vmem:[%s1991_s22 + $0x10] sm:$0xff] %v951_v18  ;;  %v1367_v9 = vadd.f32 %v880_v21, %v1980_v13  ;;  %v882_v24 = vpop.f32.mrb[7].mxu0 }
 0x165   : >> { %v952_v25 = vmax.f32 %v1367_v9, %v944_v22  ;;  %v920_v26 = vpop.f32.mrb[36].mxu1 }
 0x166   : >> { %v965_v27 = vld [vmem:[%s1991_s22] ss:$2 sm:$0xff]  ;;  %v1222_v28 = vld [vmem:[%s1991_s22 + $0x1] ss:$2 sm:$0xff]  ;;  %v885_v29 = vpop.f32.mrb[8].mxu0  ;;  %v945_v11 = vadd.f32 %v920_v26, %v684_v43  ;;  %v922_v30 = vpop.f32.mrb[37].mxu1 }
 0x167   : >> { %v980_v31 = vmax.f32 %v965_v27, %v1222_v28  ;;  %961 = vst [vmem:[%s1991_s22 + $0x18] sm:$0xff] %v952_v25  ;;  %v1368_v32 = vadd.f32 %v885_v29, %v1982_v15  ;;  %v887_v33 = vpop.f32.mrb[9].mxu0 }
 0x169   : >> { %v984_v13 = vadd.f32 %v1553_v0, %v980_v31  ;;  %v953_v34 = vmax.f32 %v1368_v32, %v945_v11  ;;  %v925_v35 = vpop.f32.mrb[38].mxu1 }
 0x16a   : >> { %v890_v36 = vpop.f32.mrb[10].mxu0  ;;  %v946_v37 = vadd.f32 %v925_v35, %v689_v48  ;;  %v927_v38 = vpop.f32.mrb[39].mxu1 }
 0x16b   : >> { %v988_v39 = vmax.f32 %v984_v13, 0.0  ;;  %962 = vst [vmem:[%s1991_s22 + $0x20] sm:$0xff] %v953_v34  ;;  %v1369_v4 = vadd.f32 %v890_v36, %v1984_v17  ;;  %v892_v40 = vpop.f32.mrb[11].mxu0 }
 0x16d   : >> { %994 = vst [vmem:[%s2005_s24] sm:$0xff] %v988_v39  ;;  %v954_v15 = vmax.f32 %v1369_v4, %v946_v37  ;;  %v930_v41 = vpop.f32.mrb[40].mxu1 }
 0x16e   : >> { %v1219_v42 = vld [vmem:[%s1991_s22 + $0x10] ss:$2 sm:$0xff]  ;;  %v1223_v43 = vld [vmem:[%s1991_s22 + $0x11] ss:$2 sm:$0xff]  ;;  %v895_v44 = vpop.f32.mrb[12].mxu0  ;;  %v947_v45 = vadd.f32 %v930_v41, %v1989_v53  ;;  %v932_v46 = vpop.f32.mrb[41].mxu1 }
 0x16f   : >> { %v981_v47 = vmax.f32 %v1219_v42, %v1223_v43  ;;  %963 = vst [vmem:[%s1991_s22 + $0x28] sm:$0xff] %v954_v15  ;;  %v1370_v17 = vadd.f32 %v895_v44, %v1986_v19  ;;  %v897_v48 = vpop.f32.mrb[13].mxu0 }
 0x171   : >> { %v985_v49 = vadd.f32 %v1553_v0, %v981_v47  ;;  %v955_v50 = vmax.f32 %v1370_v17, %v947_v45 }
 0x173   : >> { %v989_v51 = vmax.f32 %v985_v49, 0.0  ;;  %964 = vst [vmem:[%s1991_s22 + $0x30] sm:$0xff] %v955_v50 }
 0x175   : >> { %995 = vst [vmem:[%s2005_s24 + $0x8] sm:$0xff] %v989_v51 }
 0x176   : >> { %v1220_v52 = vld [vmem:[%s1991_s22 + $0x20] ss:$2 sm:$0xff]  ;;  %v1224_v54 = vld [vmem:[%s1991_s22 + $0x21] ss:$2 sm:$0xff] }
 0x177   : >> { %v982_v55 = vmax.f32 %v1220_v52, %v1224_v54 }
 0x179   : >> { %v986_v53 = vadd.f32 %v1553_v0, %v982_v55 }
 0x17a   : >> { %v1221_v56 = vld [vmem:[%s1991_s22 + $0x30] ss:$2 sm:$0xf]  ;;  %v1225_v57 = vld [vmem:[%s1991_s22 + $0x31] ss:$2 sm:$0xf] }
 0x17b   : >> { %v990_v58 = vmax.f32 %v986_v53, 0.0  ;;  %v983_v59 = vmax.f32 %v1221_v56, %v1225_v57  ;;  %221 = sbr.rel (!%p219_p8) target bundleno = 24 (0x18), region = 83 }
 0x17d   : >> { %996 = vst [vmem:[%s2005_s24 + $0x10] sm:$0xff] %v990_v58  ;;  %v987_v19 = vadd.f32 %v1553_v0, %v983_v59 }
 0x17f   : >> { %v991_v60 = vmax.f32 %v987_v19, 0.0 }
 0x181   : >> { %997 = vst [vmem:[%s2005_s24 + $0x18] sm:$0xf] %v991_v60 }
 0x182 PF: > { %s13_s16 = sadd.s32 1, %s1493_s16   ;;  %s2048_s12 = smov %s1485_s14 }
 0x183   : > { %p10_p9 = scmp.ge.s32.totalorder %s13_s16, 16   ;;  %s2049_s13 = smov %s1489_s15 }
 0x184   : > { %s2050_s14 = smov %s2053_s17  ;;  %s2051_s15 = smov %s2057_s18 }
 0x185   :  { %12 = sbr.rel (!%p10_p9) target bundleno = 3 (0x3), region = 94 }

// kernel: simple_cnn_forward.7
= control target key start
LH: loop header
LB: loop body
LE: loop exit
PB: predicated region body
PF: predicated region fallthrough
CT: control target
= control target key end

     0   :  { %8 = vsyncpa [#allocation4], 0  ;;  %s8806_s0 = inlined_call_operand.vmem [shape: f32[2,100352], index: 0, kind: input, shape index: {}]   ;;  %s8807_s1 = inlined_call_operand.hbm [shape: f32[100352,512], index: 1, kind: input, shape index: {}]   ;;  %s8808_s2 = inlined_call_operand.vmem [shape: f32[1,512], index: 2, kind: input, shape index: {}]   ;;  %s8809_s3 = inlined_call_operand.vmem [shape: f32[2,512], index: 3, kind: output, shape index: {}]  }
   0x1   :  { %10 = vsyncpa [#allocation4 + $0x1], 0  ;;  %s6582_s12 = smov 0   ;;  %s6584_s13 = smov 0  }
   0x2   :  { %s6586_s14 = smov 0   ;;  %s6588_s15 = smov 0  }
   0x3   :  { %s6590_s16 = smov 0   ;;  %s6592_s17 = smov 0  }
   0x4   :  { %s6594_s18 = smov 0   ;;  %s6596_s19 = smov 0  }
   0x5 LB: > { %s4503_s20 = sadd.s32 4294967295, %s6554_s19   ;;  %s25_s21 = sadd.s32 1, %s6546_s17  ;;  %s6554_s19 = sphi %s6596_s19, %s16_s19   ;;  %s6550_s18 = sphi %s6594_s18, %s8819_s18   ;;  %s6546_s17 = sphi %s6592_s17, %s8818_s17   ;;  %s6542_s16 = sphi %s6590_s16, %s8817_s16   ;;  %s6538_s15 = sphi %s6588_s15, %s8816_s15   ;;  %s6534_s14 = sphi %s6586_s14, %s8815_s14   ;;  %s6530_s13 = sphi %s6584_s13, %s8814_s13   ;;  %s6526_s12 = sphi %s6582_s12, %s8813_s12  }
   0x6   : > { %p26_p0 = scmp.ge.s32.totalorder %s25_s21, 14  ;;  %s28_s22 = sadd.s32 1, %s6550_s18 }
   0x7   : > { %s63_s23 = sadd.s32 1, %s6534_s14  ;;  %p70_p1 = scmp.ne.s32.totalorder %s6534_s14, %s6530_s13 }
   0x8   : > { %s8821_s21 = smov (%p26_p0, %s25_s21), 0  ;;  %s8823_s22 = smov (!%p26_p0, %s28_s22), %s6550_s18 }
   0x9   : > { %s58_s24 = ssub.s32 %s6546_s17, %s8821_s21  ;;  %p71_p2 = scmp.eq.s32.totalorder %s6554_s19, 0 }
   0xa   : > { %p30_p3 = scmp.ge.s32.totalorder %s8823_s22, 2  ;;  %p76_p4 = scmp.ne.s32.totalorder %s6530_s13, %s6526_s12 }
   0xb   : > { %p6633_p5 = por %p71_p2, %p70_p1  ;;  %p77_p6 = scmp.eq.s32.totalorder %s4503_s20, 0 }
   0xc   : > { %s8825_s22 = smov (%p30_p3, %s8823_s22), 0  ;;  %p6374_p8 = scmp.lt.s32.totalorder %s6554_s19, 28 }
   0xd   : > { %p6639_p7 = por %p77_p6, %p76_p4  ;;  %s59_s27 = ssub.s32 %s6550_s18, %s8825_s22 }
   0xe   : > { %s60_s28 = sor.u32 %s59_s27, %s58_s24  ;;  %s161_s29 = sand.u32 1, %s6534_s14  }
   0xf   : > { %p61_p9 = scmp.eq.s32.totalorder %s60_s28, 0  ;;  %s6366_s30 = smul.u32 14336, %s161_s29 }
  0x10   : > { %s4507_s4 = sshll.u32 %s6550_s18, 1  ;;  %s4519_s6 = smul.u32 3584, %s6546_s17 }
  0x11   : > { %s6649_s5 = scalar_select %p61_p9, %s6534_s14, %s63_s23  }
  0x12   : > { %s165_s7 = scalar_lea.vmem [#allocation3], %s6366_s30  ;;  %p6654_p10 = pnand %p6374_p8, %p6633_p5 }
  0x13   : > { %s175_s8 = sshll.u32 %s165_s7, 4  ;;  %s172_s10 = sadd.s32 %s4519_s6, %s4507_s4  ;;  %s6658_s8 = int_to_ptr.vmem [resolvable:$true] %s175_s8 }
  0x14   : > { %s4509_s11 = sshll.u32 %s172_s10, 7  ;;  %s6665_s23 = scalar_lea.sflag [#allocation4], %s161_s29 }
  0x15   : > { %s6663_s24 = scalar_lea.hbm %s8807_s1, %s4509_s11  ;;  %p6460_p12 = pneg %p6654_p10 }
  0x16   : > { %s6458_s25 = scalar_lea.hbm %s6663_s24, 229376  ;;  %s6463_s30 = scalar_lea.hbm %s8807_s1, 6422528 }
  0x17   : > { %p6459_p11 = scmp.ne.s32.totalorder %s6663_s24, %s6458_s25  ;;  %p6464_p1 = scmp.lt.u32.totalorder %s6663_s24, %s8807_s1 }
  0x18   : > { %p6465_p2 = scmp.lt.u32.totalorder %s6463_s30, %s6458_s25  ;;  %p6467_p4 = scmp.lt.u32.totalorder %s6458_s25, %s6663_s24 }
  0x19   : > { %p6461_p13 = pnand %p6460_p12, %p6459_p11 }
  0x1a   : > { %p6466_p3 = por %p6465_p2, %p6464_p1 }
  0x1b   : > { %p6462_p0 = pneg %p6461_p13 }
  0x1c   : > { %p6468_p5 = por %p6467_p4, %p6466_p3 }
  0x1e   : > { %p6469_p6 = pnand %p6468_p5, %p6462_p0 }
  0x20   : > { %6472 = shalt.err (!%p6469_p6)
}
  0x21   : > { %s6473_s29 = scalar_lea.vmem %s6658_s8, 229376  ;;  %s6556_s7 = smov [#allocation3]  }
  0x22   : > { %p6474_p8 = scmp.ne.s32.totalorder %s6658_s8, %s6473_s29  ;;  %s6478_s10 = sshll.u32 %s6556_s7, 4  ;;  %s6479_s10 = int_to_ptr.vmem [resolvable:$false] %s6478_s10 }
  0x23   : > { %s6480_s11 = scalar_lea.vmem %s6479_s10, 458752  ;;  %p6481_p13 = scmp.lt.s32.totalorder %s6658_s8, %s6479_s10 }
  0x24   : > { %p6476_p9 = pnand %p6474_p8, %p6460_p12  ;;  %p6482_p1 = scmp.lt.s32.totalorder %s6480_s11, %s6473_s29 }
  0x26   : > { %p6477_p11 = pneg %p6476_p9  ;;  %p6483_p2 = por %p6482_p1, %p6481_p13 }
  0x28   : > { %p6484_p3 = pnand %p6483_p2, %p6477_p11 }
  0x2a   : > { %6487 = shalt.err (!%p6484_p3)
}
  0x2b   : > { %s6557_s12 = smov 512   ;;  %s6558_s20 = smov 256  }
  0x2c   : > { %s6559_s25 = smov 16   ;;  %p4510_p12 = scmp.ge.s32.totalorder %s6554_s19, 1 }
  0x2d   : > { %6373 = dma.hbm_to_vmem [thread:$0]  (!%p6654_p10), %s6663_s24, 229376, %s6658_s8, %s6665_s23, %s6557_s12, %s6558_s20, %s6559_s25  }
  0x2e   : > { %p191_p0 = scmp.lt.s32.totalorder %s6554_s19, 29 }
  0x30   : > { %p192_p4 = pnand %p4510_p12, %p191_p0 }
  0x31   : > { %s197_s27 = sand.u32 (!%p192_p4), 1, %s6530_s13  }
  0x32   : > { %195 = sbr.rel (%p192_p4) target bundleno = 1202 (0x4b2), region = 32  ;;  %s198_s30 = scalar_lea.sflag (!%p192_p4), [#allocation4], %s197_s27 }
  0x33   : > { %s6367_s28 = smul.u32 (!%p192_p4), 14336, %s197_s27 }
  0x35   : > { %s6696_s4 = scalar_lea.vmem (!%p192_p4), [#allocation3], %s6367_s28 }
  0x39   : > { %6521 = dma.done.wait (%p6639_p7), %s198_s30, 229376  }
  0x3a   : > { %6523 = vsyncadd (%p6639_p7), %s198_s30, 4294737920  ;;  %s233_s9 = smul.u32 56, %s6538_s15  ;;  %s4512_s8 = sshll.u32 %s6542_s16, 1 }
  0x3b   : > { %p242_p10 = scmp.lt.s32.totalorder %s4512_s8, 3  ;;  %p4515_p7 = scmp.ne.s32.totalorder %s6538_s15, 0 }
  0x3c   : > { %p234_p5 = scmp.lt.s32.totalorder %s233_s9, 783  ;;  %v6560_v0 = vmov (!%p4515_p7), 0.0  }
  0x3d   : > { %s8827_s8 = smov (!%p242_p10, %s4512_s8), 3  ;;  %255 = sbr.rel (%p4515_p7) target bundleno = 68 (0x44), region = 40 }
  0x3e   : > { %s8829_s9 = smov (!%p234_p5, %s233_s9), 783  ;;  %s244_s6 = scalar_lea.vmem %s8808_s2, %s8827_s8  ;;  %256 = vst [vmem:[#allocation2] sm:$0xf] (!%p4515_p7), %v6560_v0 }
  0x3f   : > { %s4514_s29 = sshll.u32 %s8827_s8, 1  ;;  %s4511_s7 = sshll.u32 %s8829_s9, 1 }
  0x40   : > { %s6714_s11 = scalar_lea.vmem %s8809_s3, %s4514_s29  ;;  %s6719_s20 = scalar_lea.vmem %s8806_s0, %s4511_s7 }
  0x44 PF: > { %v273_v1 = vld [vmem:[%s6696_s4 + $0x8] sm:$0xff]  ;;  %v275_v2 = vld [vmem:[%s6696_s4 + $0x18] sm:$0xff]  ;;  %v272_v6 = vld [vmem:[%s6696_s4] sm:$0xff]  ;;  %p4516_p6 = scmp.ne.s32.totalorder %s6538_s15, 13 }
  0x45   : > { %v1169_v3 = vld [vmem:[%s6696_s4 + $0x1c08] sm:$0xff]  ;;  %v4520_v4 = vpack.c.bf16 %v275_v2, %v273_v1  ;;  %v1171_v5 = vld [vmem:[%s6696_s4 + $0x1c18] sm:$0xff]  ;;  %v274_v7 = vld [vmem:[%s6696_s4 + $0x10] sm:$0xff] }
  0x46   : > { %v5416_v8 = vpack.c.bf16 %v1171_v5, %v1169_v3  ;;  %v4522_v9 = vpack.c.bf16 %v274_v7, %v272_v6  ;;  %v1168_v10 = vld [vmem:[%s6696_s4 + $0x1c00] sm:$0xff]  ;;  %v1170_v11 = vld [vmem:[%s6696_s4 + $0x1c10] sm:$0xff]  ;;  %v277_v12 = vld [vmem:[%s6696_s4 + $0x28] sm:$0xff] }
  0x47   : > { %4521 = vmatprep.subr.bf16.mxu1 %v4520_v4  ;;  %v5418_v13 = vpack.c.bf16 %v1170_v11, %v1168_v10  ;;  %v279_v14 = vld [vmem:[%s6696_s4 + $0x38] sm:$0xff]  ;;  %v1173_v15 = vld [vmem:[%s6696_s4 + $0x1c28] sm:$0xff]  ;;  %v276_v19 = vld [vmem:[%s6696_s4 + $0x20] sm:$0xff] }
  0x48   : > { %v1175_v16 = vld [vmem:[%s6696_s4 + $0x1c38] sm:$0xff]  ;;  %5417 = vmatprep.subr.bf16.mxu0 %v5416_v8  ;;  %4523 = vmatpush1.bf16.msra.mxu1 %v4522_v9  ;;  %v4524_v17 = vpack.c.bf16 %v279_v14, %v277_v12  ;;  %v278_v20 = vld [vmem:[%s6696_s4 + $0x30] sm:$0xff]  ;;  %v1172_v21 = vld [vmem:[%s6696_s4 + $0x1c20] sm:$0xff] }
  0x49   : > { %v5420_v18 = vpack.c.bf16 %v1175_v16, %v1173_v15  ;;  %5419 = vmatpush1.bf16.msra.mxu0 %v5418_v13  ;;  %v4526_v22 = vpack.c.bf16 %v278_v20, %v276_v19  ;;  %v1174_v23 = vld [vmem:[%s6696_s4 + $0x1c30] sm:$0xff]  ;;  %v281_v24 = vld [vmem:[%s6696_s4 + $0x48] sm:$0xff]  ;;  %v283_v25 = vld [vmem:[%s6696_s4 + $0x58] sm:$0xff] }
  0x4a   : > { %4525 = vmatprep.subr.bf16.mxu1 %v4524_v17  ;;  %v5422_v26 = vpack.c.bf16 %v1174_v23, %v1172_v21  ;;  %v4528_v27 = vpack.c.bf16 %v283_v25, %v281_v24  ;;  %v1177_v28 = vld [vmem:[%s6696_s4 + $0x1c48] sm:$0xff]  ;;  %v1179_v29 = vld [vmem:[%s6696_s4 + $0x1c58] sm:$0xff]  ;;  %v280_v30 = vld [vmem:[%s6696_s4 + $0x40] sm:$0xff] }
  0x4b   : > { %5421 = vmatprep.subr.bf16.mxu0 %v5420_v18  ;;  %v5424_v31 = vpack.c.bf16 %v1179_v29, %v1177_v28  ;;  %v282_v32 = vld [vmem:[%s6696_s4 + $0x50] sm:$0xff]  ;;  %v1176_v33 = vld [vmem:[%s6696_s4 + $0x1c40] sm:$0xff]  ;;  %v285_v36 = vld [vmem:[%s6696_s4 + $0x68] sm:$0xff] }
  0x4c   : > { %v1178_v34 = vld [vmem:[%s6696_s4 + $0x1c50] sm:$0xff]  ;;  %4527 = vmatpush1.bf16.msra.mxu1 %v4526_v22  ;;  %v4530_v35 = vpack.c.bf16 %v282_v32, %v280_v30  ;;  %v287_v37 = vld [vmem:[%s6696_s4 + $0x78] sm:$0xff]  ;;  %v1181_v38 = vld [vmem:[%s6696_s4 + $0x1c68] sm:$0xff] }
  0x4d   : > { %5423 = vmatpush1.bf16.msra.mxu0 %v5422_v26  ;;  %4529 = vmatprep.subr.bf16.mxu1 %v4528_v27  ;;  %v5426_v39 = vpack.c.bf16 %v1178_v34, %v1176_v33  ;;  %v4532_v40 = vpack.c.bf16 %v287_v37, %v285_v36  ;;  %v1183_v41 = vld [vmem:[%s6696_s4 + $0x1c78] sm:$0xff]  ;;  %v284_v42 = vld [vmem:[%s6696_s4 + $0x60] sm:$0xff]  ;;  %v286_v43 = vld [vmem:[%s6696_s4 + $0x70] sm:$0xff] }
  0x4e   : > { %5425 = vmatprep.subr.bf16.mxu0 %v5424_v31  ;;  %v5428_v44 = vpack.c.bf16 %v1183_v41, %v1181_v38  ;;  %v1180_v45 = vld [vmem:[%s6696_s4 + $0x1c60] sm:$0xff]  ;;  %v1182_v46 = vld [vmem:[%s6696_s4 + $0x1c70] sm:$0xff]  ;;  %v289_v47 = vld [vmem:[%s6696_s4 + $0x88] sm:$0xff]  ;;  %v4534_v51 = vpack.c.bf16 %v286_v43, %v284_v42 }
  0x4f   : > { %v291_v48 = vld [vmem:[%s6696_s4 + $0x98] sm:$0xff]  ;;  %v1185_v49 = vld [vmem:[%s6696_s4 + $0x1c88] sm:$0xff]  ;;  %v5430_v52 = vpack.c.bf16 %v1182_v46, %v1180_v45  ;;  %v288_v54 = vld [vmem:[%s6696_s4 + $0x80] sm:$0xff] }
  0x50   : > { %v1187_v50 = vld [vmem:[%s6696_s4 + $0x1c98] sm:$0xff]  ;;  %4531 = vmatpush1.bf16.msra.mxu1 %v4530_v35  ;;  %v4536_v53 = vpack.c.bf16 %v291_v48, %v289_v47  ;;  %v290_v55 = vld [vmem:[%s6696_s4 + $0x90] sm:$0xff]  ;;  %v1184_v56 = vld [vmem:[%s6696_s4 + $0x1c80] sm:$0xff]  ;;  %v6561_v47 = vmov 1983009808  }
  0x51   : > { %5427 = vmatpush1.bf16.msra.mxu0 %v5426_v39  ;;  %4533 = vmatprep.subr.bf16.mxu1 %v4532_v40  ;;  %v5432_v57 = vpack.c.bf16 %v1187_v50, %v1185_v49  ;;  %v1186_v58 = vld [vmem:[%s6696_s4 + $0x1c90] sm:$0xff]  ;;  %v293_v59 = vld [vmem:[%s6696_s4 + $0xa8] sm:$0xff]  ;;  %v295_v60 = vld [vmem:[%s6696_s4 + $0xb8] sm:$0xff]  ;;  %v4538_v63 = vpack.c.bf16 %v290_v55, %v288_v54  ;;  %v2080_v48 = vunpack.c.l.s4 %v6561_v47  ;;  %v2082_v49 = vlaneseq }
  0x52   : > { %5429 = vmatprep.subr.bf16.mxu0 %v5428_v44  ;;  %v1189_v61 = vld [vmem:[%s6696_s4 + $0x1ca8] sm:$0xff]  ;;  %v1191_v62 = vld [vmem:[%s6696_s4 + $0x1cb8] sm:$0xff]  ;;  %v5434_v0 = vpack.c.bf16 %v1186_v58, %v1184_v56  ;;  %v4540_v1 = vpack.c.bf16 %v295_v60, %v293_v59  ;;  %v292_v2 = vld [vmem:[%s6696_s4 + $0xa0] sm:$0xff] }
  0x53   : > { %v294_v3 = vld [vmem:[%s6696_s4 + $0xb0] sm:$0xff]  ;;  %v1188_v4 = vld [vmem:[%s6696_s4 + $0x1ca0] sm:$0xff]  ;;  %v5436_v5 = vpack.c.bf16 %v1191_v62, %v1189_v61  ;;  %v297_v7 = vld [vmem:[%s6696_s4 + $0xc8] sm:$0xff]  ;;  %v2081_v62 = vunpack.c.0.s8 %v2080_v48 }
  0x54   : > { %4535 = vmatpush1.bf16.msra.mxu1 %v4534_v51  ;;  %v1190_v6 = vld [vmem:[%s6696_s4 + $0x1cb0] sm:$0xff]  ;;  %v299_v8 = vld [vmem:[%s6696_s4 + $0xd8] sm:$0xff]  ;;  %v1193_v9 = vld [vmem:[%s6696_s4 + $0x1cc8] sm:$0xff]  ;;  %v4542_v11 = vpack.c.bf16 %v294_v3, %v292_v2 }
  0x55   : > { %5431 = vmatpush1.bf16.msra.mxu0 %v5430_v52  ;;  %4537 = vmatprep.subr.bf16.mxu1 %v4536_v53  ;;  %v1195_v10 = vld [vmem:[%s6696_s4 + $0x1cd8] sm:$0xff]  ;;  %v5438_v12 = vpack.c.bf16 %v1190_v6, %v1188_v4  ;;  %v4544_v13 = vpack.c.bf16 %v299_v8, %v297_v7  ;;  %v296_v14 = vld [vmem:[%s6696_s4 + $0xc0] sm:$0xff]  ;;  %v298_v15 = vld [vmem:[%s6696_s4 + $0xd0] sm:$0xff] }
  0x56   : > { %5433 = vmatprep.subr.bf16.mxu0 %v5432_v57  ;;  %v1192_v16 = vld [vmem:[%s6696_s4 + $0x1cc0] sm:$0xff]  ;;  %v5440_v17 = vpack.c.bf16 %v1195_v10, %v1193_v9  ;;  %v1194_v18 = vld [vmem:[%s6696_s4 + $0x1cd0] sm:$0xff]  ;;  %v301_v19 = vld [vmem:[%s6696_s4 + $0xe8] sm:$0xff]  ;;  %v4546_v23 = vpack.c.bf16 %v298_v15, %v296_v14 }
  0x57   : > { %v303_v20 = vld [vmem:[%s6696_s4 + $0xf8] sm:$0xff]  ;;  %v1197_v21 = vld [vmem:[%s6696_s4 + $0x1ce8] sm:$0xff]  ;;  %v5442_v24 = vpack.c.bf16 %v1194_v18, %v1192_v16  ;;  %v300_v26 = vld [vmem:[%s6696_s4 + $0xe0] sm:$0xff] }
  0x58   : > { %4539 = vmatpush1.bf16.msra.mxu1 %v4538_v63  ;;  %v1199_v22 = vld [vmem:[%s6696_s4 + $0x1cf8] sm:$0xff]  ;;  %v4548_v25 = vpack.c.bf16 %v303_v20, %v301_v19  ;;  %v302_v27 = vld [vmem:[%s6696_s4 + $0xf0] sm:$0xff]  ;;  %v1196_v28 = vld [vmem:[%s6696_s4 + $0x1ce0] sm:$0xff]  ;;  %v6806_v63 = vshrl.u32 %v2082_v49, 7 }
  0x59   : > { %5435 = vmatpush1.bf16.msra.mxu0 %v5434_v0  ;;  %4541 = vmatprep.subr.bf16.mxu1 %v4540_v1  ;;  %v5444_v29 = vpack.c.bf16 %v1199_v22, %v1197_v21  ;;  %v1198_v30 = vld [vmem:[%s6696_s4 + $0x1cf0] sm:$0xff]  ;;  %v305_v31 = vld [vmem:[%s6696_s4 + $0x108] sm:$0xff]  ;;  %v307_v32 = vld [vmem:[%s6696_s4 + $0x118] sm:$0xff]  ;;  %v4550_v35 = vpack.c.bf16 %v302_v27, %v300_v26 }
  0x5a   : > { %5437 = vmatprep.subr.bf16.mxu0 %v5436_v5  ;;  %v1201_v33 = vld [vmem:[%s6696_s4 + $0x1d08] sm:$0xff]  ;;  %v1203_v34 = vld [vmem:[%s6696_s4 + $0x1d18] sm:$0xff]  ;;  %v5446_v36 = vpack.c.bf16 %v1198_v30, %v1196_v28  ;;  %v4552_v37 = vpack.c.bf16 %v307_v32, %v305_v31  ;;  %v304_v38 = vld [vmem:[%s6696_s4 + $0x100] sm:$0xff] }
  0x5b   : > { %v306_v39 = vld [vmem:[%s6696_s4 + $0x110] sm:$0xff]  ;;  %v1200_v40 = vld [vmem:[%s6696_s4 + $0x1d00] sm:$0xff]  ;;  %v5448_v41 = vpack.c.bf16 %v1203_v34, %v1201_v33  ;;  %v309_v43 = vld [vmem:[%s6696_s4 + $0x128] sm:$0xff] }
  0x5c   : > { %4543 = vmatpush1.bf16.msra.mxu1 %v4542_v11  ;;  %v1202_v42 = vld [vmem:[%s6696_s4 + $0x1d10] sm:$0xff]  ;;  %v311_v44 = vld [vmem:[%s6696_s4 + $0x138] sm:$0xff]  ;;  %v1205_v45 = vld [vmem:[%s6696_s4 + $0x1d28] sm:$0xff]  ;;  %v4554_v50 = vpack.c.bf16 %v306_v39, %v304_v38 }
  0x5d   : > { %5439 = vmatpush1.bf16.msra.mxu0 %v5438_v12  ;;  %4545 = vmatprep.subr.bf16.mxu1 %v4544_v13  ;;  %v1207_v46 = vld [vmem:[%s6696_s4 + $0x1d38] sm:$0xff]  ;;  %v5450_v51 = vpack.c.bf16 %v1202_v42, %v1200_v40  ;;  %v4556_v52 = vpack.c.bf16 %v311_v44, %v309_v43  ;;  %v308_v53 = vld [vmem:[%s6696_s4 + $0x120] sm:$0xff]  ;;  %v310_v54 = vld [vmem:[%s6696_s4 + $0x130] sm:$0xff]  ;;  %v6817_v12 = vsub.s32 %v2081_v62, %v6806_v63 }
  0x5e   : > { %5441 = vmatprep.subr.bf16.mxu0 %v5440_v17  ;;  %v1204_v55 = vld [vmem:[%s6696_s4 + $0x1d20] sm:$0xff]  ;;  %v5452_v56 = vpack.c.bf16 %v1207_v46, %v1205_v45  ;;  %v1206_v57 = vld [vmem:[%s6696_s4 + $0x1d30] sm:$0xff]  ;;  %v313_v58 = vld [vmem:[%s6696_s4 + $0x148] sm:$0xff]  ;;  %v4558_v0 = vpack.c.bf16 %v310_v54, %v308_v53 }
  0x5f   : > { %v315_v59 = vld [vmem:[%s6696_s4 + $0x158] sm:$0xff]  ;;  %v1209_v60 = vld [vmem:[%s6696_s4 + $0x1d48] sm:$0xff]  ;;  %v5454_v1 = vpack.c.bf16 %v1206_v57, %v1204_v55  ;;  %v312_v3 = vld [vmem:[%s6696_s4 + $0x140] sm:$0xff] }
  0x60   : > { %4547 = vmatpush1.bf16.msra.mxu1 %v4546_v23  ;;  %v1211_v61 = vld [vmem:[%s6696_s4 + $0x1d58] sm:$0xff]  ;;  %v4560_v2 = vpack.c.bf16 %v315_v59, %v313_v58  ;;  %v314_v4 = vld [vmem:[%s6696_s4 + $0x150] sm:$0xff]  ;;  %v1208_v5 = vld [vmem:[%s6696_s4 + $0x1d40] sm:$0xff] }
  0x61   : > { %5443 = vmatpush1.bf16.msra.mxu0 %v5442_v24  ;;  %4549 = vmatprep.subr.bf16.mxu1 %v4548_v25  ;;  %v5456_v6 = vpack.c.bf16 %v1211_v61, %v1209_v60  ;;  %v1210_v7 = vld [vmem:[%s6696_s4 + $0x1d50] sm:$0xff]  ;;  %v317_v8 = vld [vmem:[%s6696_s4 + $0x168] sm:$0xff]  ;;  %v319_v9 = vld [vmem:[%s6696_s4 + $0x178] sm:$0xff]  ;;  %v4562_v13 = vpack.c.bf16 %v314_v4, %v312_v3 }
  0x62   : > { %5445 = vmatprep.subr.bf16.mxu0 %v5444_v29  ;;  %v1213_v10 = vld [vmem:[%s6696_s4 + $0x1d68] sm:$0xff]  ;;  %v1215_v11 = vld [vmem:[%s6696_s4 + $0x1d78] sm:$0xff]  ;;  %v316_v14 = vld [vmem:[%s6696_s4 + $0x160] sm:$0xff]  ;;  %v5458_v15 = vpack.c.bf16 %v1210_v7, %v1208_v5  ;;  %v4564_v16 = vpack.c.bf16 %v319_v9, %v317_v8 }
  0x63   : > { %v318_v17 = vld [vmem:[%s6696_s4 + $0x170] sm:$0xff]  ;;  %v1212_v18 = vld [vmem:[%s6696_s4 + $0x1d60] sm:$0xff]  ;;  %v5460_v20 = vpack.c.bf16 %v1215_v11, %v1213_v10  ;;  %v321_v21 = vld [vmem:[%s6696_s4 + $0x188] sm:$0xff] }
  0x64   : > { %4551 = vmatpush1.bf16.msra.mxu1 %v4550_v35  ;;  %v1214_v19 = vld [vmem:[%s6696_s4 + $0x1d70] sm:$0xff]  ;;  %v323_v22 = vld [vmem:[%s6696_s4 + $0x198] sm:$0xff]  ;;  %v1217_v24 = vld [vmem:[%s6696_s4 + $0x1d88] sm:$0xff]  ;;  %v4566_v28 = vpack.c.bf16 %v318_v17, %v316_v14 }
  0x65   : > { %5447 = vmatpush1.bf16.msra.mxu0 %v5446_v36  ;;  %4553 = vmatprep.subr.bf16.mxu1 %v4552_v37  ;;  %v6826_v23 = vld [vmem:[%s6719_s20] sm:$0xff]  ;;  %v6835_v27 = vld [vmem:[%s6719_s20 + $0x38] sm:$0xff]  ;;  %v5462_v30 = vpack.c.bf16 %v1214_v19, %v1212_v18  ;;  %v4568_v31 = vpack.c.bf16 %v323_v22, %v321_v21  ;;  %v325_v38 = vld [vmem:[%s6696_s4 + $0x1a8] sm:$0xff] }
  0x66   : > { %5449 = vmatprep.subr.bf16.mxu0 %v5448_v41  ;;  %v1219_v25 = vld [vmem:[%s6696_s4 + $0x1d98] sm:$0xff]  ;;  %v6832_v26 = vrot.slane %v6826_v23, %v6817_v12  ;;  %v6839_v29 = vrot.slane %v6835_v27, %v6817_v12  ;;  %v320_v32 = vld [vmem:[%s6696_s4 + $0x180] sm:$0xff]  ;;  %v322_v33 = vld [vmem:[%s6696_s4 + $0x190] sm:$0xff] }
  0x67   : > { %v1216_v34 = vld [vmem:[%s6696_s4 + $0x1d80] sm:$0xff]  ;;  %v5464_v36 = vpack.c.bf16 %v1219_v25, %v1217_v24  ;;  %v1218_v37 = vld [vmem:[%s6696_s4 + $0x1d90] sm:$0xff]  ;;  %v327_v39 = vld [vmem:[%s6696_s4 + $0x1b8] sm:$0xff]  ;;  %v4570_v43 = vpack.c.bf16 %v322_v33, %v320_v32 }
  0x68   : > { %4555 = vmatpush1.bf16.msra.mxu1 %v4554_v50  ;;  %v2093_v35 = vcombine.high %v6832_v26, %v6832_v26  ;;  %v2212_v40 = vcombine.high %v6839_v29, %v6839_v29  ;;  %v1221_v41 = vld [vmem:[%s6696_s4 + $0x1da8] sm:$0xff]  ;;  %v1223_v42 = vld [vmem:[%s6696_s4 + $0x1db8] sm:$0xff]  ;;  %v5466_v44 = vpack.c.bf16 %v1218_v37, %v1216_v34  ;;  %v4572_v45 = vpack.c.bf16 %v327_v39, %v325_v38  ;;  %v324_v46 = vld [vmem:[%s6696_s4 + $0x1a0] sm:$0xff] }
  0x69   : > { %5451 = vmatpush1.bf16.msra.mxu0 %v5450_v51  ;;  %4557 = vmatprep.subr.bf16.mxu1 %v4556_v52  ;;  %v326_v47 = vld [vmem:[%s6696_s4 + $0x1b0] sm:$0xff]  ;;  %v1220_v48 = vld [vmem:[%s6696_s4 + $0x1da0] sm:$0xff]  ;;  %v5468_v49 = vpack.c.bf16 %v1223_v42, %v1221_v41  ;;  %v329_v51 = vld [vmem:[%s6696_s4 + $0x1c8] sm:$0xff] }
  0x6a   : > { %5453 = vmatprep.subr.bf16.mxu0 %v5452_v56  ;;  %2436 = vmatprep.mubr.f32.mxu1 %v2093_v35  ;;  %v1222_v50 = vld [vmem:[%s6696_s4 + $0x1db0] sm:$0xff]  ;;  %v331_v52 = vld [vmem:[%s6696_s4 + $0x1d8] sm:$0xff]  ;;  %v1225_v53 = vld [vmem:[%s6696_s4 + $0x1dc8] sm:$0xff]  ;;  %v4574_v55 = vpack.c.bf16 %v326_v47, %v324_v46 }
  0x6b   : > { %3430 = vmatprep.mubr.f32.mxu0 %v2212_v40  ;;  %v1227_v54 = vld [vmem:[%s6696_s4 + $0x1dd8] sm:$0xff]  ;;  %v5470_v56 = vpack.c.bf16 %v1222_v50, %v1220_v48  ;;  %v4576_v57 = vpack.c.bf16 %v331_v52, %v329_v51  ;;  %v328_v58 = vld [vmem:[%s6696_s4 + $0x1c0] sm:$0xff]  ;;  %v330_v59 = vld [vmem:[%s6696_s4 + $0x1d0] sm:$0xff] }
  0x6c   : > { %4559 = vmatpush1.bf16.msra.mxu1 %v4558_v0  ;;  %v1224_v60 = vld [vmem:[%s6696_s4 + $0x1dc0] sm:$0xff]  ;;  %v5472_v61 = vpack.c.bf16 %v1227_v54, %v1225_v53  ;;  %v1226_v62 = vld [vmem:[%s6696_s4 + $0x1dd0] sm:$0xff]  ;;  %v333_v0 = vld [vmem:[%s6696_s4 + $0x1e8] sm:$0xff]  ;;  %v4578_v4 = vpack.c.bf16 %v330_v59, %v328_v58 }
  0x6d   : > { %5455 = vmatpush1.bf16.msra.mxu0 %v5454_v1  ;;  %4561 = vmatprep.subr.bf16.mxu1 %v4560_v2  ;;  %v335_v1 = vld [vmem:[%s6696_s4 + $0x1f8] sm:$0xff]  ;;  %v1229_v2 = vld [vmem:[%s6696_s4 + $0x1de8] sm:$0xff]  ;;  %v5474_v5 = vpack.c.bf16 %v1226_v62, %v1224_v60  ;;  %v332_v7 = vld [vmem:[%s6696_s4 + $0x1e0] sm:$0xff] }
  0x6e   : > { %5457 = vmatprep.subr.bf16.mxu0 %v5456_v6  ;;  %v1231_v3 = vld [vmem:[%s6696_s4 + $0x1df8] sm:$0xff]  ;;  %v4580_v6 = vpack.c.bf16 %v335_v1, %v333_v0  ;;  %v334_v8 = vld [vmem:[%s6696_s4 + $0x1f0] sm:$0xff]  ;;  %v1228_v9 = vld [vmem:[%s6696_s4 + $0x1de0] sm:$0xff] }
  0x6f   : > { %v5476_v10 = vpack.c.bf16 %v1231_v3, %v1229_v2  ;;  %v1230_v11 = vld [vmem:[%s6696_s4 + $0x1df0] sm:$0xff]  ;;  %v337_v14 = vld [vmem:[%s6696_s4 + $0x208] sm:$0xff]  ;;  %v1235_v18 = vld [vmem:[%s6696_s4 + $0x1e18] sm:$0xff]  ;;  %v4582_v19 = vpack.c.bf16 %v334_v8, %v332_v7 }
  0x70   : > { %4563 = vmatpush1.bf16.msra.mxu1 %v4562_v13  ;;  %v2078_v13 = vcombine.high %v6826_v23, %v6826_v23  ;;  %v1233_v17 = vld [vmem:[%s6696_s4 + $0x1e08] sm:$0xff]  ;;  %v336_v22 = vld [vmem:[%s6696_s4 + $0x200] sm:$0xff]  ;;  %v338_v23 = vld [vmem:[%s6696_s4 + $0x210] sm:$0xff] }
  0x71   : > { %5459 = vmatpush1.bf16.msra.mxu0 %v5458_v15  ;;  %4565 = vmatprep.subr.bf16.mxu1 %v4564_v16  ;;  %v339_v15 = vld [vmem:[%s6696_s4 + $0x218] sm:$0xff]  ;;  %v2197_v16 = vcombine.high %v6835_v27, %v6835_v27  ;;  %v1232_v24 = vld [vmem:[%s6696_s4 + $0x1e00] sm:$0xff]  ;;  %v5480_v25 = vpack.c.bf16 %v1235_v18, %v1233_v17  ;;  %v1234_v27 = vld [vmem:[%s6696_s4 + $0x1e10] sm:$0xff]  ;;  %v4586_v35 = vpack.c.bf16 %v338_v23, %v336_v22 }
  0x72   : > { %5461 = vmatprep.subr.bf16.mxu0 %v5460_v20  ;;  %v5478_v20 = vpack.c.bf16 %v1230_v11, %v1228_v9  ;;  %v4584_v21 = vpack.c.bf16 %v339_v15, %v337_v14  ;;  %v1237_v32 = vld [vmem:[%s6696_s4 + $0x1e28] sm:$0xff]  ;;  %v1239_v33 = vld [vmem:[%s6696_s4 + $0x1e38] sm:$0xff]  ;;  %v340_v38 = vld [vmem:[%s6696_s4 + $0x220] sm:$0xff] }
  0x73   : > { %v6893_v34 = vrot.slane %v2197_v16, %v6817_v12  ;;  %v342_v39 = vld [vmem:[%s6696_s4 + $0x230] sm:$0xff]  ;;  %v1236_v40 = vld [vmem:[%s6696_s4 + $0x1e20] sm:$0xff]  ;;  %v5484_v41 = vpack.c.bf16 %v1239_v33, %v1237_v32  ;;  %v1241_v46 = vld [vmem:[%s6696_s4 + $0x1e48] sm:$0xff] }
  0x74   : > { %4567 = vmatpush1.bf16.msra.mxu1 %v4566_v28  ;;  %v341_v28 = vld [vmem:[%s6696_s4 + $0x228] sm:$0xff]  ;;  %v1238_v42 = vld [vmem:[%s6696_s4 + $0x1e30] sm:$0xff]  ;;  %v1243_v47 = vld [vmem:[%s6696_s4 + $0x1e58] sm:$0xff] }
  0x75   : > { %5463 = vmatpush1.bf16.msra.mxu0 %v5462_v30  ;;  %4569 = vmatprep.subr.bf16.mxu1 %v4568_v31  ;;  %v343_v30 = vld [vmem:[%s6696_s4 + $0x238] sm:$0xff]  ;;  %v6888_v31 = vrot.slane %v2078_v13, %v6817_v12  ;;  %v2213_v48 = vcombine.high %v6893_v34, %v6893_v34  ;;  %v5486_v50 = vpack.c.bf16 %v1238_v42, %v1236_v40  ;;  %v344_v52 = vld [vmem:[%s6696_s4 + $0x240] sm:$0xff]  ;;  %v350_v0 = vld [vmem:[%s6696_s4 + $0x270] sm:$0xff] }
  0x76   : > { %5465 = vmatprep.subr.bf16.mxu0 %v5464_v36  ;;  %v5482_v36 = vpack.c.bf16 %v1234_v27, %v1232_v24  ;;  %v4588_v37 = vpack.c.bf16 %v343_v30, %v341_v28  ;;  %v1240_v53 = vld [vmem:[%s6696_s4 + $0x1e40] sm:$0xff]  ;;  %v5488_v54 = vpack.c.bf16 %v1243_v47, %v1241_v46  ;;  %v1247_v58 = vld [vmem:[%s6696_s4 + $0x1e78] sm:$0xff]  ;;  %v1246_v3 = vld [vmem:[%s6696_s4 + $0x1e70] sm:$0xff] }
  0x77   : > { %v348_v62 = vld [vmem:[%s6696_s4 + $0x260] sm:$0xff]  ;;  %v1251_v7 = vld [vmem:[%s6696_s4 + $0x1e98] sm:$0xff]  ;;  %v354_v13 = vld [vmem:[%s6696_s4 + $0x290] sm:$0xff] }
  0x78   : > { %4571 = vmatpush1.bf16.msra.mxu1 %v4570_v43  ;;  %v345_v43 = vld [vmem:[%s6696_s4 + $0x248] sm:$0xff]  ;;  %v1244_v1 = vld [vmem:[%s6696_s4 + $0x1e60] sm:$0xff]  ;;  %v4598_v8 = vpack.c.bf16 %v350_v0, %v348_v62  ;;  %v1250_v16 = vld [vmem:[%s6696_s4 + $0x1e90] sm:$0xff] }
  0x79   : > { %5467 = vmatpush1.bf16.msra.mxu0 %v5466_v44  ;;  %4573 = vmatprep.subr.bf16.mxu1 %v4572_v45  ;;  %v347_v44 = vld [vmem:[%s6696_s4 + $0x258] sm:$0xff]  ;;  %v2094_v45 = vcombine.high %v6888_v31, %v6888_v31  ;;  %v5494_v9 = vpack.c.bf16 %v1246_v3, %v1244_v1  ;;  %v352_v11 = vld [vmem:[%s6696_s4 + $0x280] sm:$0xff]  ;;  %v357_v17 = vld [vmem:[%s6696_s4 + $0x2a8] sm:$0xff] }
  0x7a   : > { %5469 = vmatprep.subr.bf16.mxu0 %v5468_v49  ;;  %v4590_v49 = vpack.c.bf16 %v342_v39, %v340_v38  ;;  %v4592_v51 = vpack.c.bf16 %v347_v44, %v345_v43  ;;  %v1248_v14 = vld [vmem:[%s6696_s4 + $0x1e80] sm:$0xff]  ;;  %v359_v18 = vld [vmem:[%s6696_s4 + $0x2b8] sm:$0xff]  ;;  %v1254_v30 = vld [vmem:[%s6696_s4 + $0x1eb0] sm:$0xff] }
  0x7b   : > { %v5498_v22 = vpack.c.bf16 %v1250_v16, %v1248_v14  ;;  %v4604_v23 = vpack.c.bf16 %v359_v18, %v357_v17  ;;  %v356_v24 = vld [vmem:[%s6696_s4 + $0x2a0] sm:$0xff]  ;;  %v361_v32 = vld [vmem:[%s6696_s4 + $0x2c8] sm:$0xff]  ;;  %v363_v33 = vld [vmem:[%s6696_s4 + $0x2d8] sm:$0xff] }
  0x7c   : > { %4575 = vmatpush1.bf16.msra.mxu1 %v4574_v55  ;;  %v1242_v55 = vld [vmem:[%s6696_s4 + $0x1e50] sm:$0xff]  ;;  %v1252_v27 = vld [vmem:[%s6696_s4 + $0x1ea0] sm:$0xff]  ;;  %v4608_v39 = vpack.c.bf16 %v363_v33, %v361_v32  ;;  %v367_v46 = vld [vmem:[%s6696_s4 + $0x2f8] sm:$0xff] }
  0x7d   : > { %5471 = vmatpush1.bf16.msra.mxu0 %v5470_v56  ;;  %4577 = vmatprep.subr.bf16.mxu1 %v4576_v57  ;;  %v349_v56 = vld [vmem:[%s6696_s4 + $0x268] sm:$0xff]  ;;  %v351_v57 = vld [vmem:[%s6696_s4 + $0x278] sm:$0xff]  ;;  %v5490_v60 = vpack.c.bf16 %v1242_v55, %v1240_v53  ;;  %v5502_v38 = vpack.c.bf16 %v1254_v30, %v1252_v27  ;;  %v360_v40 = vld [vmem:[%s6696_s4 + $0x2c0] sm:$0xff] }
  0x7e   : > { %5473 = vmatprep.subr.bf16.mxu0 %v5472_v61  ;;  %v4596_v61 = vpack.c.bf16 %v351_v57, %v349_v56  ;;  %v1256_v42 = vld [vmem:[%s6696_s4 + $0x1ec0] sm:$0xff]  ;;  %v1258_v44 = vld [vmem:[%s6696_s4 + $0x1ed0] sm:$0xff]  ;;  %v1261_v47 = vld [vmem:[%s6696_s4 + $0x1ee8] sm:$0xff] }
  0x7f   : > { %v1260_v53 = vld [vmem:[%s6696_s4 + $0x1ee0] sm:$0xff]  ;;  %v1262_v55 = vld [vmem:[%s6696_s4 + $0x1ef0] sm:$0xff]  ;;  %v369_v56 = vld [vmem:[%s6696_s4 + $0x308] sm:$0xff] }
  0x80   : > { %4579 = vmatpush1.bf16.msra.mxu1 %v4578_v4  ;;  %v353_v4 = vld [vmem:[%s6696_s4 + $0x288] sm:$0xff]  ;;  %v371_v57 = vld [vmem:[%s6696_s4 + $0x318] sm:$0xff]  ;;  %v368_v62 = vld [vmem:[%s6696_s4 + $0x300] sm:$0xff] }
  0x81   : > { %5475 = vmatpush1.bf16.msra.mxu0 %v5474_v5  ;;  %4581 = vmatprep.subr.bf16.mxu1 %v4580_v6  ;;  %v355_v5 = vld [vmem:[%s6696_s4 + $0x298] sm:$0xff]  ;;  %v1249_v6 = vld [vmem:[%s6696_s4 + $0x1e88] sm:$0xff]  ;;  %v370_v0 = vld [vmem:[%s6696_s4 + $0x310] sm:$0xff] }
  0x82   : > { %5477 = vmatprep.subr.bf16.mxu0 %v5476_v10  ;;  %v4600_v10 = vpack.c.bf16 %v355_v5, %v353_v4  ;;  %v5496_v15 = vpack.c.bf16 %v1251_v7, %v1249_v6  ;;  %v1264_v1 = vld [vmem:[%s6696_s4 + $0x1f00] sm:$0xff]  ;;  %v1266_v3 = vld [vmem:[%s6696_s4 + $0x1f10] sm:$0xff]  ;;  %v373_v4 = vld [vmem:[%s6696_s4 + $0x328] sm:$0xff] }
  0x83   : > { %v375_v5 = vld [vmem:[%s6696_s4 + $0x338] sm:$0xff]  ;;  %v1269_v6 = vld [vmem:[%s6696_s4 + $0x1f28] sm:$0xff]  ;;  %v1268_v14 = vld [vmem:[%s6696_s4 + $0x1f20] sm:$0xff] }
  0x84   : > { %4583 = vmatpush1.bf16.msra.mxu1 %v4582_v19  ;;  %v1253_v19 = vld [vmem:[%s6696_s4 + $0x1ea8] sm:$0xff]  ;;  %v1271_v7 = vld [vmem:[%s6696_s4 + $0x1f38] sm:$0xff]  ;;  %v1270_v16 = vld [vmem:[%s6696_s4 + $0x1f30] sm:$0xff] }
  0x85   : > { %5479 = vmatpush1.bf16.msra.mxu0 %v5478_v20  ;;  %4585 = vmatprep.subr.bf16.mxu1 %v4584_v21  ;;  %v1255_v20 = vld [vmem:[%s6696_s4 + $0x1eb8] sm:$0xff]  ;;  %v4602_v21 = vpack.c.bf16 %v354_v13, %v352_v11  ;;  %v372_v11 = vld [vmem:[%s6696_s4 + $0x320] sm:$0xff]  ;;  %v374_v13 = vld [vmem:[%s6696_s4 + $0x330] sm:$0xff] }
  0x86   : > { %5481 = vmatprep.subr.bf16.mxu0 %v5480_v25  ;;  %v358_v25 = vld [vmem:[%s6696_s4 + $0x2b0] sm:$0xff]  ;;  %v5500_v28 = vpack.c.bf16 %v1255_v20, %v1253_v19  ;;  %v377_v17 = vld [vmem:[%s6696_s4 + $0x348] sm:$0xff]  ;;  %v379_v18 = vld [vmem:[%s6696_s4 + $0x358] sm:$0xff] }
  0x87   : > { %2437 = vmatmul.mubr.f32.vlgmr.msra.gmra.mrb[0].mxu1 %v6832_v26  ;;  %v346_v26 = vld [vmem:[%s6696_s4 + $0x250] sm:$0xff]  ;;  %v1273_v19 = vld [vmem:[%s6696_s4 + $0x1f48] sm:$0xff]  ;;  %v1275_v20 = vld [vmem:[%s6696_s4 + $0x1f58] sm:$0xff] }
  0x88   : > { %4587 = vmatpush1.bf16.msra.mxu1 %v4586_v35  ;;  %3431 = vmatmul.mubr.f32.vlgmr.msra.gmra.mrb[0].mxu0 %v6839_v29  ;;  %v1245_v29 = vld [vmem:[%s6696_s4 + $0x1e68] sm:$0xff]  ;;  %v4594_v59 = vpack.c.bf16 %v346_v26, %v344_v52  ;;  %v364_v52 = vld [vmem:[%s6696_s4 + $0x2e0] sm:$0xff]  ;;  %v366_v26 = vld [vmem:[%s6696_s4 + $0x2f0] sm:$0xff] }
  0x89   : > { %5483 = vmatpush1.bf16.msra.mxu0 %v5482_v36  ;;  %4589 = vmatprep.subr.bf16.mxu1 %v4588_v37  ;;  %v5492_v2 = vpack.c.bf16 %v1247_v58, %v1245_v29  ;;  %v1257_v35 = vld [vmem:[%s6696_s4 + $0x1ec8] sm:$0xff]  ;;  %v1259_v36 = vld [vmem:[%s6696_s4 + $0x1ed8] sm:$0xff]  ;;  %v4606_v37 = vpack.c.bf16 %v358_v25, %v356_v24  ;;  %v376_v24 = vld [vmem:[%s6696_s4 + $0x340] sm:$0xff] }
  0x8a   : > { %5485 = vmatprep.subr.bf16.mxu0 %v5484_v41  ;;  %2507 = vmatprep.mubr.f32.mxu1 %v2094_v45  ;;  %v362_v41 = vld [vmem:[%s6696_s4 + $0x2d0] sm:$0xff]  ;;  %v5504_v43 = vpack.c.bf16 %v1259_v36, %v1257_v35  ;;  %v365_v45 = vld [vmem:[%s6696_s4 + $0x2e8] sm:$0xff]  ;;  %v1267_v58 = vld [vmem:[%s6696_s4 + $0x1f18] sm:$0xff] }
  0x8b   : > { %3501 = vmatprep.mubr.f32.mxu0 %v2213_v48  ;;  %v1263_v48 = vld [vmem:[%s6696_s4 + $0x1ef8] sm:$0xff]  ;;  %v1265_v29 = vld [vmem:[%s6696_s4 + $0x1f08] sm:$0xff]  ;;  %v378_v25 = vld [vmem:[%s6696_s4 + $0x350] sm:$0xff] }
  0x8c   : > { %4591 = vmatpush1.bf16.msra.mxu1 %v4590_v49  ;;  %v4610_v49 = vpack.c.bf16 %v362_v41, %v360_v40  ;;  %v1272_v27 = vld [vmem:[%s6696_s4 + $0x1f40] sm:$0xff]  ;;  %v1274_v30 = vld [vmem:[%s6696_s4 + $0x1f50] sm:$0xff]  ;;  %v381_v32 = vld [vmem:[%s6696_s4 + $0x368] sm:$0xff] }
  0x8d   : > { %5487 = vmatpush1.bf16.msra.mxu0 %v5486_v50  ;;  %4593 = vmatprep.subr.bf16.mxu1 %v4592_v51  ;;  %v5506_v50 = vpack.c.bf16 %v1258_v44, %v1256_v42  ;;  %v4612_v51 = vpack.c.bf16 %v367_v46, %v365_v45  ;;  %v383_v33 = vld [vmem:[%s6696_s4 + $0x378] sm:$0xff]  ;;  %v1277_v35 = vld [vmem:[%s6696_s4 + $0x1f68] sm:$0xff]  ;;  %v380_v40 = vld [vmem:[%s6696_s4 + $0x360] sm:$0xff] }
  0x8e   : > { %5489 = vmatprep.subr.bf16.mxu0 %v5488_v54  ;;  %v5508_v54 = vpack.c.bf16 %v1263_v48, %v1261_v47  ;;  %v1279_v36 = vld [vmem:[%s6696_s4 + $0x1f78] sm:$0xff]  ;;  %v382_v41 = vld [vmem:[%s6696_s4 + $0x370] sm:$0xff]  ;;  %v1276_v42 = vld [vmem:[%s6696_s4 + $0x1f60] sm:$0xff] }
  0x8f   : > { %v1278_v44 = vld [vmem:[%s6696_s4 + $0x1f70] sm:$0xff]  ;;  %v385_v45 = vld [vmem:[%s6696_s4 + $0x388] sm:$0xff]  ;;  %v387_v46 = vld [vmem:[%s6696_s4 + $0x398] sm:$0xff] }
  0x90   : > { %4595 = vmatpush1.bf16.msra.mxu1 %v4594_v59  ;;  %v4614_v59 = vpack.c.bf16 %v366_v26, %v364_v52  ;;  %v1281_v47 = vld [vmem:[%s6696_s4 + $0x1f88] sm:$0xff]  ;;  %v1283_v48 = vld [vmem:[%s6696_s4 + $0x1f98] sm:$0xff]  ;;  %v384_v52 = vld [vmem:[%s6696_s4 + $0x380] sm:$0xff] }
  0x91   : > { %5491 = vmatpush1.bf16.msra.mxu0 %v5490_v60  ;;  %4597 = vmatprep.subr.bf16.mxu1 %v4596_v61  ;;  %v5510_v60 = vpack.c.bf16 %v1262_v55, %v1260_v53  ;;  %v4616_v61 = vpack.c.bf16 %v371_v57, %v369_v56  ;;  %v386_v26 = vld [vmem:[%s6696_s4 + $0x390] sm:$0xff]  ;;  %v1280_v53 = vld [vmem:[%s6696_s4 + $0x1f80] sm:$0xff]  ;;  %v389_v56 = vld [vmem:[%s6696_s4 + $0x3a8] sm:$0xff] }
  0x92   : > { %5493 = vmatprep.subr.bf16.mxu0 %v5492_v2  ;;  %v5512_v2 = vpack.c.bf16 %v1267_v58, %v1265_v29  ;;  %v1282_v55 = vld [vmem:[%s6696_s4 + $0x1f90] sm:$0xff]  ;;  %v391_v57 = vld [vmem:[%s6696_s4 + $0x3b8] sm:$0xff]  ;;  %v1285_v29 = vld [vmem:[%s6696_s4 + $0x1fa8] sm:$0xff] }
  0x93   : > { %v1287_v58 = vld [vmem:[%s6696_s4 + $0x1fb8] sm:$0xff] }
  0x94   : > { %4599 = vmatpush1.bf16.msra.mxu1 %v4598_v8  ;;  %v4618_v8 = vpack.c.bf16 %v370_v0, %v368_v62  ;;  %v388_v62 = vld [vmem:[%s6696_s4 + $0x3a0] sm:$0xff]  ;;  %v390_v0 = vld [vmem:[%s6696_s4 + $0x3b0] sm:$0xff] }
  0x95   : > { %5495 = vmatpush1.bf16.msra.mxu0 %v5494_v9  ;;  %4601 = vmatprep.subr.bf16.mxu1 %v4600_v10  ;;  %v5514_v9 = vpack.c.bf16 %v1266_v3, %v1264_v1  ;;  %v4620_v10 = vpack.c.bf16 %v375_v5, %v373_v4  ;;  %v1284_v1 = vld [vmem:[%s6696_s4 + $0x1fa0] sm:$0xff]  ;;  %v1286_v3 = vld [vmem:[%s6696_s4 + $0x1fb0] sm:$0xff]  ;;  %v393_v4 = vld [vmem:[%s6696_s4 + $0x3c8] sm:$0xff] }
  0x96   : > { %5497 = vmatprep.subr.bf16.mxu0 %v5496_v15  ;;  %v5516_v15 = vpack.c.bf16 %v1271_v7, %v1269_v6  ;;  %v395_v5 = vld [vmem:[%s6696_s4 + $0x3d8] sm:$0xff]  ;;  %v1289_v6 = vld [vmem:[%s6696_s4 + $0x1fc8] sm:$0xff] }
  0x97   : > { %v1291_v7 = vld [vmem:[%s6696_s4 + $0x1fd8] sm:$0xff] }
  0x98   : > { %4603 = vmatpush1.bf16.msra.mxu1 %v4602_v21  ;;  %v4622_v21 = vpack.c.bf16 %v374_v13, %v372_v11  ;;  %v392_v11 = vld [vmem:[%s6696_s4 + $0x3c0] sm:$0xff]  ;;  %v394_v13 = vld [vmem:[%s6696_s4 + $0x3d0] sm:$0xff] }
  0x99   : > { %5499 = vmatpush1.bf16.msra.mxu0 %v5498_v22  ;;  %4605 = vmatprep.subr.bf16.mxu1 %v4604_v23  ;;  %v5518_v22 = vpack.c.bf16 %v1270_v16, %v1268_v14  ;;  %v4624_v23 = vpack.c.bf16 %v379_v18, %v377_v17  ;;  %v1288_v14 = vld [vmem:[%s6696_s4 + $0x1fc0] sm:$0xff]  ;;  %v1290_v16 = vld [vmem:[%s6696_s4 + $0x1fd0] sm:$0xff]  ;;  %v397_v17 = vld [vmem:[%s6696_s4 + $0x3e8] sm:$0xff] }
  0x9a   : > { %5501 = vmatprep.subr.bf16.mxu0 %v5500_v28  ;;  %v5520_v28 = vpack.c.bf16 %v1275_v20, %v1273_v19  ;;  %v399_v18 = vld [vmem:[%s6696_s4 + $0x3f8] sm:$0xff]  ;;  %v1293_v19 = vld [vmem:[%s6696_s4 + $0x1fe8] sm:$0xff] }
  0x9b   : > { %v1295_v20 = vld [vmem:[%s6696_s4 + $0x1ff8] sm:$0xff] }
  0x9c   : > { %4607 = vmatpush1.bf16.msra.mxu1 %v4606_v37  ;;  %v4626_v37 = vpack.c.bf16 %v378_v25, %v376_v24  ;;  %v396_v24 = vld [vmem:[%s6696_s4 + $0x3e0] sm:$0xff]  ;;  %v398_v25 = vld [vmem:[%s6696_s4 + $0x3f0] sm:$0xff] }
  0x9d   : > { %5503 = vmatpush1.bf16.msra.mxu0 %v5502_v38  ;;  %4609 = vmatprep.subr.bf16.mxu1 %v4608_v39  ;;  %v5522_v38 = vpack.c.bf16 %v1274_v30, %v1272_v27  ;;  %v4628_v39 = vpack.c.bf16 %v383_v33, %v381_v32  ;;  %v1292_v27 = vld [vmem:[%s6696_s4 + $0x1fe0] sm:$0xff]  ;;  %v1294_v30 = vld [vmem:[%s6696_s4 + $0x1ff0] sm:$0xff]  ;;  %v401_v32 = vld [vmem:[%s6696_s4 + $0x408] sm:$0xff] }
  0x9e   : > { %5505 = vmatprep.subr.bf16.mxu0 %v5504_v43  ;;  %v5524_v43 = vpack.c.bf16 %v1279_v36, %v1277_v35  ;;  %v403_v33 = vld [vmem:[%s6696_s4 + $0x418] sm:$0xff]  ;;  %v1297_v35 = vld [vmem:[%s6696_s4 + $0x2008] sm:$0xff] }
  0x9f   : > { %v1299_v36 = vld [vmem:[%s6696_s4 + $0x2018] sm:$0xff] }
  0xa0   : > { %4611 = vmatpush1.bf16.msra.mxu1 %v4610_v49  ;;  %v4630_v49 = vpack.c.bf16 %v382_v41, %v380_v40  ;;  %v400_v40 = vld [vmem:[%s6696_s4 + $0x400] sm:$0xff]  ;;  %v402_v41 = vld [vmem:[%s6696_s4 + $0x410] sm:$0xff] }
  0xa1   : > { %5507 = vmatpush1.bf16.msra.mxu0 %v5506_v50  ;;  %4613 = vmatprep.subr.bf16.mxu1 %v4612_v51  ;;  %v5526_v50 = vpack.c.bf16 %v1278_v44, %v1276_v42  ;;  %v4632_v51 = vpack.c.bf16 %v387_v46, %v385_v45  ;;  %v1296_v42 = vld [vmem:[%s6696_s4 + $0x2000] sm:$0xff]  ;;  %v1298_v44 = vld [vmem:[%s6696_s4 + $0x2010] sm:$0xff]  ;;  %v405_v45 = vld [vmem:[%s6696_s4 + $0x428] sm:$0xff] }
  0xa2   : > { %5509 = vmatprep.subr.bf16.mxu0 %v5508_v54  ;;  %v5528_v54 = vpack.c.bf16 %v1283_v48, %v1281_v47  ;;  %v407_v46 = vld [vmem:[%s6696_s4 + $0x438] sm:$0xff]  ;;  %v1301_v47 = vld [vmem:[%s6696_s4 + $0x2028] sm:$0xff] }
  0xa3   : > { %v1303_v48 = vld [vmem:[%s6696_s4 + $0x2038] sm:$0xff] }
  0xa4   : > { %4615 = vmatpush1.bf16.msra.mxu1 %v4614_v59  ;;  %v4634_v59 = vpack.c.bf16 %v386_v26, %v384_v52  ;;  %v5546_v52 = vpack.c.bf16 %v1298_v44, %v1296_v42  ;;  %v4652_v26 = vpack.c.bf16 %v407_v46, %v405_v45  ;;  %v420_v44 = vld [vmem:[%s6696_s4 + $0x4a0] sm:$0xff]  ;;  %v422_v45 = vld [vmem:[%s6696_s4 + $0x4b0] sm:$0xff] }
  0xa5   : > { %5511 = vmatpush1.bf16.msra.mxu0 %v5510_v60  ;;  %4617 = vmatprep.subr.bf16.mxu1 %v4616_v61  ;;  %v5530_v60 = vpack.c.bf16 %v1282_v55, %v1280_v53  ;;  %v4636_v61 = vpack.c.bf16 %v391_v57, %v389_v56  ;;  %v406_v53 = vld [vmem:[%s6696_s4 + $0x430] sm:$0xff]  ;;  %v7040_v56 = vld [vmem:[%s6719_s20 + $0x40] sm:$0xff]  ;;  %v5548_v57 = vpack.c.bf16 %v1303_v48, %v1301_v47 }
  0xa6   : > { %5513 = vmatprep.subr.bf16.mxu0 %v5512_v2  ;;  %v5532_v2 = vpack.c.bf16 %v1287_v58, %v1285_v29  ;;  %v1302_v29 = vld [vmem:[%s6696_s4 + $0x2030] sm:$0xff]  ;;  %v409_v58 = vld [vmem:[%s6696_s4 + $0x448] sm:$0xff]  ;;  %v1316_v46 = vld [vmem:[%s6696_s4 + $0x20a0] sm:$0xff] }
  0xa7   : > { %v1318_v48 = vld [vmem:[%s6696_s4 + $0x20b0] sm:$0xff] }
  0xa8   : > { %4619 = vmatpush1.bf16.msra.mxu1 %v4618_v8  ;;  %v4638_v8 = vpack.c.bf16 %v390_v0, %v388_v62  ;;  %v1307_v62 = vld [vmem:[%s6696_s4 + $0x2058] sm:$0xff] }
  0xa9   : > { %5515 = vmatpush1.bf16.msra.mxu0 %v5514_v9  ;;  %4621 = vmatprep.subr.bf16.mxu1 %v4620_v10  ;;  %v5534_v9 = vpack.c.bf16 %v1286_v3, %v1284_v1  ;;  %v4640_v10 = vpack.c.bf16 %v395_v5, %v393_v4  ;;  %v408_v4 = vld [vmem:[%s6696_s4 + $0x440] sm:$0xff]  ;;  %v410_v5 = vld [vmem:[%s6696_s4 + $0x450] sm:$0xff] }
  0xaa   : > { %5517 = vmatprep.subr.bf16.mxu0 %v5516_v15  ;;  %v5536_v15 = vpack.c.bf16 %v1291_v7, %v1289_v6  ;;  %v1304_v6 = vld [vmem:[%s6696_s4 + $0x2040] sm:$0xff] }
  0xac   : > { %4623 = vmatpush1.bf16.msra.mxu1 %v4622_v21  ;;  %v4642_v21 = vpack.c.bf16 %v394_v13, %v392_v11  ;;  %v1311_v11 = vld [vmem:[%s6696_s4 + $0x2078] sm:$0xff]  ;;  %v4658_v13 = vpack.c.bf16 %v410_v5, %v408_v4 }
  0xad   : > { %5519 = vmatpush1.bf16.msra.mxu0 %v5518_v22  ;;  %4625 = vmatprep.subr.bf16.mxu1 %v4624_v23  ;;  %v5538_v22 = vpack.c.bf16 %v1290_v16, %v1288_v14  ;;  %v4644_v23 = vpack.c.bf16 %v399_v18, %v397_v17  ;;  %v412_v16 = vld [vmem:[%s6696_s4 + $0x460] sm:$0xff]  ;;  %v414_v17 = vld [vmem:[%s6696_s4 + $0x470] sm:$0xff] }
  0xae   : > { %5521 = vmatprep.subr.bf16.mxu0 %v5520_v28  ;;  %v5540_v28 = vpack.c.bf16 %v1295_v20, %v1293_v19  ;;  %v1308_v18 = vld [vmem:[%s6696_s4 + $0x2060] sm:$0xff]  ;;  %v1310_v20 = vld [vmem:[%s6696_s4 + $0x2070] sm:$0xff] }
  0xb0   : > { %4627 = vmatpush1.bf16.msra.mxu1 %v4626_v37  ;;  %v4646_v37 = vpack.c.bf16 %v398_v25, %v396_v24  ;;  %v1315_v24 = vld [vmem:[%s6696_s4 + $0x2098] sm:$0xff]  ;;  %v4662_v25 = vpack.c.bf16 %v414_v17, %v412_v16 }
  0xb1   : > { %5523 = vmatpush1.bf16.msra.mxu0 %v5522_v38  ;;  %4629 = vmatprep.subr.bf16.mxu1 %v4628_v39  ;;  %v5542_v38 = vpack.c.bf16 %v1294_v30, %v1292_v27  ;;  %v4648_v39 = vpack.c.bf16 %v403_v33, %v401_v32  ;;  %v5558_v27 = vpack.c.bf16 %v1310_v20, %v1308_v18  ;;  %v416_v30 = vld [vmem:[%s6696_s4 + $0x480] sm:$0xff]  ;;  %v418_v32 = vld [vmem:[%s6696_s4 + $0x490] sm:$0xff] }
  0xb2   : > { %5525 = vmatprep.subr.bf16.mxu0 %v5524_v43  ;;  %v5544_v43 = vpack.c.bf16 %v1299_v36, %v1297_v35  ;;  %v1312_v33 = vld [vmem:[%s6696_s4 + $0x2080] sm:$0xff]  ;;  %v1314_v36 = vld [vmem:[%s6696_s4 + $0x2090] sm:$0xff] }
  0xb3   : > { %v5562_v42 = vpack.c.bf16 %v1314_v36, %v1312_v33  ;;  %v432_v18 = vld [vmem:[%s6696_s4 + $0x500] sm:$0xff] }
  0xb4   : > { %4631 = vmatpush1.bf16.msra.mxu1 %v4630_v49  ;;  %v4650_v49 = vpack.c.bf16 %v402_v41, %v400_v40  ;;  %v1319_v40 = vld [vmem:[%s6696_s4 + $0x20b8] sm:$0xff]  ;;  %v4666_v41 = vpack.c.bf16 %v418_v32, %v416_v30  ;;  %v1328_v20 = vld [vmem:[%s6696_s4 + $0x2100] sm:$0xff] }
  0xb5   : > { %5527 = vmatpush1.bf16.msra.mxu0 %v5526_v50  ;;  %4633 = vmatprep.subr.bf16.mxu1 %v4632_v51  ;;  %v404_v50 = vld [vmem:[%s6696_s4 + $0x420] sm:$0xff] }
  0xb6   : > { %5529 = vmatprep.subr.bf16.mxu0 %v5528_v54  ;;  %v7031_v51 = vld [vmem:[%s6719_s20 + $0x8] sm:$0xff]  ;;  %v4654_v1 = vpack.c.bf16 %v406_v53, %v404_v50  ;;  %v427_v50 = vld [vmem:[%s6696_s4 + $0x4d8] sm:$0xff]  ;;  %v4670_v53 = vpack.c.bf16 %v422_v45, %v420_v44 }
  0xb7   : > { %v1300_v54 = vld [vmem:[%s6696_s4 + $0x2020] sm:$0xff]  ;;  %v7037_v55 = vrot.slane %v7031_v51, %v6817_v12 }
  0xb8   : > { %4635 = vmatpush1.bf16.msra.mxu1 %v4634_v59  ;;  %v411_v59 = vld [vmem:[%s6696_s4 + $0x458] sm:$0xff]  ;;  %v436_v33 = vld [vmem:[%s6696_s4 + $0x520] sm:$0xff] }
  0xb9   : > { %5531 = vmatpush1.bf16.msra.mxu0 %v5530_v60  ;;  %4637 = vmatprep.subr.bf16.mxu1 %v4636_v61  ;;  %v7047_v60 = vrot.slane %v7040_v56, %v6817_v12  ;;  %v1305_v61 = vld [vmem:[%s6696_s4 + $0x2048] sm:$0xff]  ;;  %v2110_v0 = vcombine.high %v7037_v55, %v7037_v55  ;;  %v4656_v3 = vpack.c.bf16 %v411_v59, %v409_v58  ;;  %v426_v58 = vld [vmem:[%s6696_s4 + $0x4d0] sm:$0xff]  ;;  %v1320_v59 = vld [vmem:[%s6696_s4 + $0x20c0] sm:$0xff] }
  0xba   : > { %5533 = vmatprep.subr.bf16.mxu0 %v5532_v2  ;;  %v5552_v7 = vpack.c.bf16 %v1307_v62, %v1305_v61  ;;  %v1322_v62 = vld [vmem:[%s6696_s4 + $0x20d0] sm:$0xff]  ;;  %v1332_v36 = vld [vmem:[%s6696_s4 + $0x2120] sm:$0xff] }
  0xbb   : > { %v2229_v2 = vcombine.high %v7047_v60, %v7047_v60  ;;  %v5570_v4 = vpack.c.bf16 %v1322_v62, %v1320_v59  ;;  %v444_v59 = vld [vmem:[%s6696_s4 + $0x560] sm:$0xff] }
  0xbc   : > { %4639 = vmatpush1.bf16.msra.mxu1 %v4638_v8  ;;  %v1306_v8 = vld [vmem:[%s6696_s4 + $0x2050] sm:$0xff]  ;;  %v1340_v62 = vld [vmem:[%s6696_s4 + $0x2160] sm:$0xff] }
  0xbd   : > { %5535 = vmatpush1.bf16.msra.mxu0 %v5534_v9  ;;  %4641 = vmatprep.subr.bf16.mxu1 %v4640_v10  ;;  %v415_v9 = vld [vmem:[%s6696_s4 + $0x478] sm:$0xff]  ;;  %v1309_v10 = vld [vmem:[%s6696_s4 + $0x2068] sm:$0xff]  ;;  %v5554_v14 = vpack.c.bf16 %v1306_v8, %v1304_v6  ;;  %v428_v6 = vld [vmem:[%s6696_s4 + $0x4e0] sm:$0xff] }
  0xbe   : > { %5537 = vmatprep.subr.bf16.mxu0 %v5536_v15  ;;  %v5556_v19 = vpack.c.bf16 %v1311_v11, %v1309_v10  ;;  %v1324_v8 = vld [vmem:[%s6696_s4 + $0x20e0] sm:$0xff]  ;;  %v433_v10 = vld [vmem:[%s6696_s4 + $0x508] sm:$0xff]  ;;  %v435_v11 = vld [vmem:[%s6696_s4 + $0x518] sm:$0xff] }
  0xbf   : > { %v4680_v17 = vpack.c.bf16 %v435_v11, %v433_v10  ;;  %v1346_v11 = vld [vmem:[%s6696_s4 + $0x2190] sm:$0xff] }
  0xc0   : > { %4643 = vmatpush1.bf16.msra.mxu1 %v4642_v21  ;;  %v417_v21 = vld [vmem:[%s6696_s4 + $0x488] sm:$0xff] }
  0xc1   : > { %5539 = vmatpush1.bf16.msra.mxu0 %v5538_v22  ;;  %4645 = vmatprep.subr.bf16.mxu1 %v4644_v23  ;;  %v419_v22 = vld [vmem:[%s6696_s4 + $0x498] sm:$0xff]  ;;  %v1313_v23 = vld [vmem:[%s6696_s4 + $0x2088] sm:$0xff] }
  0xc2   : > { %5541 = vmatprep.subr.bf16.mxu0 %v5540_v28  ;;  %v4664_v28 = vpack.c.bf16 %v419_v22, %v417_v21  ;;  %v5560_v35 = vpack.c.bf16 %v1315_v24, %v1313_v23  ;;  %v1330_v22 = vld [vmem:[%s6696_s4 + $0x2110] sm:$0xff]  ;;  %v437_v23 = vld [vmem:[%s6696_s4 + $0x528] sm:$0xff]  ;;  %v439_v24 = vld [vmem:[%s6696_s4 + $0x538] sm:$0xff] }
  0xc3   : > { %v5578_v30 = vpack.c.bf16 %v1330_v22, %v1328_v20  ;;  %v4684_v32 = vpack.c.bf16 %v439_v24, %v437_v23  ;;  %v452_v20 = vld [vmem:[%s6696_s4 + $0x5a0] sm:$0xff]  ;;  %v1350_v24 = vld [vmem:[%s6696_s4 + $0x21b0] sm:$0xff] }
  0xc4   : > { %4647 = vmatpush1.bf16.msra.mxu1 %v4646_v37  ;;  %v421_v37 = vld [vmem:[%s6696_s4 + $0x4a8] sm:$0xff]  ;;  %v1348_v22 = vld [vmem:[%s6696_s4 + $0x21a0] sm:$0xff] }
  0xc5   : > { %5543 = vmatpush1.bf16.msra.mxu0 %v5542_v38  ;;  %4649 = vmatprep.subr.bf16.mxu1 %v4648_v39  ;;  %v423_v38 = vld [vmem:[%s6696_s4 + $0x4b8] sm:$0xff]  ;;  %v1317_v39 = vld [vmem:[%s6696_s4 + $0x20a8] sm:$0xff] }
  0xc6   : > { %5545 = vmatprep.subr.bf16.mxu0 %v5544_v43  ;;  %v4668_v43 = vpack.c.bf16 %v423_v38, %v421_v37  ;;  %v5564_v47 = vpack.c.bf16 %v1319_v40, %v1317_v39  ;;  %v1334_v38 = vld [vmem:[%s6696_s4 + $0x2130] sm:$0xff]  ;;  %v441_v39 = vld [vmem:[%s6696_s4 + $0x548] sm:$0xff]  ;;  %v443_v40 = vld [vmem:[%s6696_s4 + $0x558] sm:$0xff] }
  0xc7   : > { %2508 = vmatmul.mubr.f32.vlgmr.msra.gmra.mrb[0].mxu1 %v6888_v31  ;;  %v5550_v31 = vpack.c.bf16 %v1302_v29, %v1300_v54  ;;  %v5566_v54 = vpack.c.bf16 %v1318_v48, %v1316_v46  ;;  %v424_v29 = vld [vmem:[%s6696_s4 + $0x4c0] sm:$0xff]  ;;  %v5582_v44 = vpack.c.bf16 %v1334_v38, %v1332_v36  ;;  %v4688_v45 = vpack.c.bf16 %v443_v40, %v441_v39  ;;  %v1354_v40 = vld [vmem:[%s6696_s4 + $0x21d0] sm:$0xff] }
  0xc8   : > { %4651 = vmatpush1.bf16.msra.mxu1 %v4650_v49  ;;  %3502 = vmatmul.mubr.f32.vlgmr.msra.gmra.mrb[0].mxu0 %v6893_v34  ;;  %v413_v34 = vld [vmem:[%s6696_s4 + $0x468] sm:$0xff]  ;;  %v440_v46 = vld [vmem:[%s6696_s4 + $0x540] sm:$0xff] }
  0xc9   : > { %5547 = vmatpush1.bf16.msra.mxu0 %v5546_v52  ;;  %4653 = vmatprep.subr.bf16.mxu1 %v4652_v26  ;;  %v4660_v15 = vpack.c.bf16 %v415_v9, %v413_v34  ;;  %v425_v49 = vld [vmem:[%s6696_s4 + $0x4c8] sm:$0xff]  ;;  %v1323_v26 = vld [vmem:[%s6696_s4 + $0x20d8] sm:$0xff]  ;;  %v1326_v9 = vld [vmem:[%s6696_s4 + $0x20f0] sm:$0xff] }
  0xca   : > { %5549 = vmatprep.subr.bf16.mxu0 %v5548_v57  ;;  %2578 = vmatprep.mubr.f32.mxu1 %v2110_v0  ;;  %v1321_v52 = vld [vmem:[%s6696_s4 + $0x20c8] sm:$0xff]  ;;  %v4672_v57 = vpack.c.bf16 %v427_v50, %v425_v49  ;;  %v5574_v16 = vpack.c.bf16 %v1326_v9, %v1324_v8  ;;  %v1336_v48 = vld [vmem:[%s6696_s4 + $0x2140] sm:$0xff]  ;;  %v1338_v50 = vld [vmem:[%s6696_s4 + $0x2150] sm:$0xff] }
  0xcb   : > { %3572 = vmatprep.mubr.f32.mxu0 %v2229_v2  ;;  %v5568_v61 = vpack.c.bf16 %v1323_v26, %v1321_v52  ;;  %v429_v0 = vld [vmem:[%s6696_s4 + $0x4e8] sm:$0xff]  ;;  %v447_v26 = vld [vmem:[%s6696_s4 + $0x578] sm:$0xff]  ;;  %v448_v8 = vld [vmem:[%s6696_s4 + $0x580] sm:$0xff] }
  0xcc   : > { %4655 = vmatpush1.bf16.msra.mxu1 %v4654_v1  ;;  %v431_v1 = vld [vmem:[%s6696_s4 + $0x4f8] sm:$0xff]  ;;  %v1325_v2 = vld [vmem:[%s6696_s4 + $0x20e8] sm:$0xff]  ;;  %v1344_v9 = vld [vmem:[%s6696_s4 + $0x2180] sm:$0xff] }
  0xcd   : > { %5551 = vmatpush1.bf16.msra.mxu0 %v5550_v31  ;;  %4657 = vmatprep.subr.bf16.mxu1 %v4656_v3  ;;  %v1327_v31 = vld [vmem:[%s6696_s4 + $0x20f8] sm:$0xff]  ;;  %v4674_v3 = vpack.c.bf16 %v426_v58, %v424_v29  ;;  %v4676_v5 = vpack.c.bf16 %v431_v1, %v429_v0  ;;  %v445_v52 = vld [vmem:[%s6696_s4 + $0x568] sm:$0xff]  ;;  %v5586_v29 = vpack.c.bf16 %v1338_v50, %v1336_v48  ;;  %v1342_v1 = vld [vmem:[%s6696_s4 + $0x2170] sm:$0xff] }
  0xce   : > { %5553 = vmatprep.subr.bf16.mxu0 %v5552_v7  ;;  %v430_v7 = vld [vmem:[%s6696_s4 + $0x4f0] sm:$0xff]  ;;  %v5572_v34 = vpack.c.bf16 %v1327_v31, %v1325_v2  ;;  %v4692_v58 = vpack.c.bf16 %v447_v26, %v445_v52  ;;  %v449_v2 = vld [vmem:[%s6696_s4 + $0x588] sm:$0xff]  ;;  %v451_v31 = vld [vmem:[%s6696_s4 + $0x598] sm:$0xff] }
  0xcf   : > { %v456_v36 = vld [vmem:[%s6696_s4 + $0x5c0] sm:$0xff]  ;;  %v1358_v26 = vld [vmem:[%s6696_s4 + $0x21f0] sm:$0xff] }
  0xd0   : > { %4659 = vmatpush1.bf16.msra.mxu1 %v4658_v13  ;;  %v1329_v13 = vld [vmem:[%s6696_s4 + $0x2108] sm:$0xff]  ;;  %v1352_v38 = vld [vmem:[%s6696_s4 + $0x21c0] sm:$0xff] }
  0xd1   : > { %5555 = vmatpush1.bf16.msra.mxu0 %v5554_v14  ;;  %4661 = vmatprep.subr.bf16.mxu1 %v4660_v15  ;;  %v1331_v14 = vld [vmem:[%s6696_s4 + $0x2118] sm:$0xff]  ;;  %v4678_v15 = vpack.c.bf16 %v430_v7, %v428_v6  ;;  %v5590_v6 = vpack.c.bf16 %v1342_v1, %v1340_v62  ;;  %v4696_v7 = vpack.c.bf16 %v451_v31, %v449_v2  ;;  %v460_v48 = vld [vmem:[%s6696_s4 + $0x5e0] sm:$0xff]  ;;  %v466_v2 = vld [vmem:[%s6696_s4 + $0x610] sm:$0xff] }
  0xd2   : > { %5557 = vmatprep.subr.bf16.mxu0 %v5556_v19  ;;  %v434_v19 = vld [vmem:[%s6696_s4 + $0x510] sm:$0xff]  ;;  %v5576_v21 = vpack.c.bf16 %v1331_v14, %v1329_v13  ;;  %v453_v13 = vld [vmem:[%s6696_s4 + $0x5a8] sm:$0xff]  ;;  %v455_v14 = vld [vmem:[%s6696_s4 + $0x5b8] sm:$0xff] }
  0xd3   : > { %v1356_v50 = vld [vmem:[%s6696_s4 + $0x21e0] sm:$0xff] }
  0xd4   : > { %4663 = vmatpush1.bf16.msra.mxu1 %v4662_v25  ;;  %v1333_v25 = vld [vmem:[%s6696_s4 + $0x2128] sm:$0xff]  ;;  %v5606_v62 = vpack.c.bf16 %v1358_v26, %v1356_v50  ;;  %v464_v1 = vld [vmem:[%s6696_s4 + $0x600] sm:$0xff] }
  0xd5   : > { %5559 = vmatpush1.bf16.msra.mxu0 %v5558_v27  ;;  %4665 = vmatprep.subr.bf16.mxu1 %v4664_v28  ;;  %v1335_v27 = vld [vmem:[%s6696_s4 + $0x2138] sm:$0xff]  ;;  %v4682_v28 = vpack.c.bf16 %v434_v19, %v432_v18  ;;  %v5594_v18 = vpack.c.bf16 %v1346_v11, %v1344_v9  ;;  %v4700_v19 = vpack.c.bf16 %v455_v14, %v453_v13  ;;  %v1360_v31 = vld [vmem:[%s6696_s4 + $0x2200] sm:$0xff]  ;;  %v470_v13 = vld [vmem:[%s6696_s4 + $0x630] sm:$0xff] }
  0xd6   : > { %5561 = vmatprep.subr.bf16.mxu0 %v5560_v35  ;;  %v438_v35 = vld [vmem:[%s6696_s4 + $0x530] sm:$0xff]  ;;  %v5580_v37 = vpack.c.bf16 %v1335_v27, %v1333_v25  ;;  %v457_v25 = vld [vmem:[%s6696_s4 + $0x5c8] sm:$0xff]  ;;  %v459_v27 = vld [vmem:[%s6696_s4 + $0x5d8] sm:$0xff] }
  0xd7   : > { %v468_v11 = vld [vmem:[%s6696_s4 + $0x620] sm:$0xff] }
  0xd8   : > { %4667 = vmatpush1.bf16.msra.mxu1 %v4666_v41  ;;  %v1337_v41 = vld [vmem:[%s6696_s4 + $0x2148] sm:$0xff]  ;;  %v1364_v14 = vld [vmem:[%s6696_s4 + $0x2220] sm:$0xff] }
  0xd9   : > { %5563 = vmatpush1.bf16.msra.mxu0 %v5562_v42  ;;  %4669 = vmatprep.subr.bf16.mxu1 %v4668_v43  ;;  %v1339_v42 = vld [vmem:[%s6696_s4 + $0x2158] sm:$0xff]  ;;  %v4686_v43 = vpack.c.bf16 %v438_v35, %v436_v33  ;;  %v5598_v33 = vpack.c.bf16 %v1350_v24, %v1348_v22  ;;  %v4704_v35 = vpack.c.bf16 %v459_v27, %v457_v25  ;;  %v472_v27 = vld [vmem:[%s6696_s4 + $0x640] sm:$0xff] }
  0xda   : > { %5565 = vmatprep.subr.bf16.mxu0 %v5564_v47  ;;  %v442_v47 = vld [vmem:[%s6696_s4 + $0x550] sm:$0xff]  ;;  %v5584_v49 = vpack.c.bf16 %v1339_v42, %v1337_v41  ;;  %v461_v41 = vld [vmem:[%s6696_s4 + $0x5e8] sm:$0xff]  ;;  %v463_v42 = vld [vmem:[%s6696_s4 + $0x5f8] sm:$0xff] }
  0xdb   : > { %v480_v26 = vld [vmem:[%s6696_s4 + $0x680] sm:$0xff] }
  0xdc   : > { %4671 = vmatpush1.bf16.msra.mxu1 %v4670_v53  ;;  %v1341_v53 = vld [vmem:[%s6696_s4 + $0x2168] sm:$0xff] }
  0xdd   : > { %5567 = vmatpush1.bf16.msra.mxu0 %v5566_v54  ;;  %4673 = vmatprep.subr.bf16.mxu1 %v4672_v57  ;;  %v1343_v54 = vld [vmem:[%s6696_s4 + $0x2178] sm:$0xff]  ;;  %v4690_v57 = vpack.c.bf16 %v442_v47, %v440_v46  ;;  %v5602_v46 = vpack.c.bf16 %v1354_v40, %v1352_v38  ;;  %v4708_v47 = vpack.c.bf16 %v463_v42, %v461_v41  ;;  %v476_v40 = vld [vmem:[%s6696_s4 + $0x660] sm:$0xff]  ;;  %v478_v41 = vld [vmem:[%s6696_s4 + $0x670] sm:$0xff] }
  0xde   : > { %5569 = vmatprep.subr.bf16.mxu0 %v5568_v61  ;;  %v446_v61 = vld [vmem:[%s6696_s4 + $0x570] sm:$0xff]  ;;  %v5588_v0 = vpack.c.bf16 %v1343_v54, %v1341_v53  ;;  %v465_v53 = vld [vmem:[%s6696_s4 + $0x608] sm:$0xff]  ;;  %v467_v54 = vld [vmem:[%s6696_s4 + $0x618] sm:$0xff] }
  0xdf   : > { %v1372_v42 = vld [vmem:[%s6696_s4 + $0x2260] sm:$0xff] }
  0xe0   : > { %4675 = vmatpush1.bf16.msra.mxu1 %v4674_v3  ;;  %v1345_v3 = vld [vmem:[%s6696_s4 + $0x2188] sm:$0xff] }
  0xe1   : > { %5571 = vmatpush1.bf16.msra.mxu0 %v5570_v4  ;;  %4677 = vmatprep.subr.bf16.mxu1 %v4676_v5  ;;  %v1347_v4 = vld [vmem:[%s6696_s4 + $0x2198] sm:$0xff]  ;;  %v4694_v5 = vpack.c.bf16 %v446_v61, %v444_v59  ;;  %v2214_v59 = vcombine.high %v7040_v56, %v7040_v56 }
  0xe2   : > { %5573 = vmatprep.subr.bf16.mxu0 %v5572_v34  ;;  %v450_v34 = vld [vmem:[%s6696_s4 + $0x590] sm:$0xff]  ;;  %v5592_v10 = vpack.c.bf16 %v1347_v4, %v1345_v3  ;;  %v469_v4 = vld [vmem:[%s6696_s4 + $0x628] sm:$0xff] }
  0xe3   : > { %v1362_v3 = vld [vmem:[%s6696_s4 + $0x2210] sm:$0xff] }
  0xe4   : > { %4679 = vmatpush1.bf16.msra.mxu1 %v4678_v15  ;;  %v1349_v15 = vld [vmem:[%s6696_s4 + $0x21a8] sm:$0xff]  ;;  %v5610_v9 = vpack.c.bf16 %v1362_v3, %v1360_v31  ;;  %v484_v31 = vld [vmem:[%s6696_s4 + $0x6a0] sm:$0xff] }
  0xe5   : > { %5575 = vmatpush1.bf16.msra.mxu0 %v5574_v16  ;;  %4681 = vmatprep.subr.bf16.mxu1 %v4680_v17  ;;  %v1351_v16 = vld [vmem:[%s6696_s4 + $0x21b8] sm:$0xff]  ;;  %v4698_v17 = vpack.c.bf16 %v450_v34, %v448_v8  ;;  %v7185_v8 = vrot.slane %v2214_v59, %v6817_v12  ;;  %v4714_v34 = vpack.c.bf16 %v466_v2, %v464_v1  ;;  %v1380_v3 = vld [vmem:[%s6696_s4 + $0x22a0] sm:$0xff] }
  0xe6   : > { %5577 = vmatprep.subr.bf16.mxu0 %v5576_v21  ;;  %v454_v21 = vld [vmem:[%s6696_s4 + $0x5b0] sm:$0xff]  ;;  %v5596_v23 = vpack.c.bf16 %v1351_v16, %v1349_v15  ;;  %v487_v59 = vld [vmem:[%s6696_s4 + $0x6b8] sm:$0xff] }
  0xe7   : > { %v1366_v16 = vld [vmem:[%s6696_s4 + $0x2230] sm:$0xff]  ;;  %v2230_v22 = vcombine.high %v7185_v8, %v7185_v8 }
  0xe8   : > { %4683 = vmatpush1.bf16.msra.mxu1 %v4682_v28  ;;  %v1353_v28 = vld [vmem:[%s6696_s4 + $0x21c8] sm:$0xff]  ;;  %v5614_v24 = vpack.c.bf16 %v1366_v16, %v1364_v14  ;;  %v488_v14 = vld [vmem:[%s6696_s4 + $0x6c0] sm:$0xff] }
  0xe9   : > { %5579 = vmatpush1.bf16.msra.mxu0 %v5578_v30  ;;  %4685 = vmatprep.subr.bf16.mxu1 %v4684_v32  ;;  %v1355_v30 = vld [vmem:[%s6696_s4 + $0x21d8] sm:$0xff]  ;;  %v4702_v32 = vpack.c.bf16 %v454_v21, %v452_v20  ;;  %v1369_v20 = vld [vmem:[%s6696_s4 + $0x2248] sm:$0xff]  ;;  %v1384_v16 = vld [vmem:[%s6696_s4 + $0x22c0] sm:$0xff] }
  0xea   : > { %5581 = vmatprep.subr.bf16.mxu0 %v5580_v37  ;;  %v458_v37 = vld [vmem:[%s6696_s4 + $0x5d0] sm:$0xff]  ;;  %v5600_v39 = vpack.c.bf16 %v1355_v30, %v1353_v28  ;;  %v1371_v21 = vld [vmem:[%s6696_s4 + $0x2258] sm:$0xff]  ;;  %v1368_v28 = vld [vmem:[%s6696_s4 + $0x2240] sm:$0xff] }
  0xeb   : > { %v5616_v30 = vpack.c.bf16 %v1371_v21, %v1369_v20  ;;  %v495_v20 = vld [vmem:[%s6696_s4 + $0x6f8] sm:$0xff]  ;;  %v1389_v21 = vld [vmem:[%s6696_s4 + $0x22e8] sm:$0xff] }
  0xec   : > { %4687 = vmatpush1.bf16.msra.mxu1 %v4686_v43  ;;  %v1357_v43 = vld [vmem:[%s6696_s4 + $0x21e8] sm:$0xff] }
  0xed   : > { %5583 = vmatpush1.bf16.msra.mxu0 %v5582_v44  ;;  %4689 = vmatprep.subr.bf16.mxu1 %v4688_v45  ;;  %v1359_v44 = vld [vmem:[%s6696_s4 + $0x21f8] sm:$0xff]  ;;  %v4706_v45 = vpack.c.bf16 %v458_v37, %v456_v36 }
  0xee   : > { %5585 = vmatprep.subr.bf16.mxu0 %v5584_v49  ;;  %v462_v49 = vld [vmem:[%s6696_s4 + $0x5f0] sm:$0xff]  ;;  %v5604_v52 = vpack.c.bf16 %v1359_v44, %v1357_v43  ;;  %v1375_v36 = vld [vmem:[%s6696_s4 + $0x2278] sm:$0xff] }
  0xef   : > { %v4710_v61 = vpack.c.bf16 %v462_v49, %v460_v48  ;;  %v1374_v44 = vld [vmem:[%s6696_s4 + $0x2270] sm:$0xff]  ;;  %v1379_v48 = vld [vmem:[%s6696_s4 + $0x2298] sm:$0xff]  ;;  %v4726_v49 = vpack.c.bf16 %v478_v41, %v476_v40  ;;  %v496_v40 = vld [vmem:[%s6696_s4 + $0x700] sm:$0xff] }
  0xf0   : > { %4691 = vmatpush1.bf16.msra.mxu1 %v4690_v57  ;;  %v2095_v57 = vcombine.high %v7031_v51, %v7031_v51  ;;  %v5622_v50 = vpack.c.bf16 %v1374_v44, %v1372_v42  ;;  %v498_v41 = vld [vmem:[%s6696_s4 + $0x710] sm:$0xff]  ;;  %v1392_v42 = vld [vmem:[%s6696_s4 + $0x2300] sm:$0xff] }
  0xf1   : > { %5587 = vmatpush1.bf16.msra.mxu0 %v5586_v29  ;;  %4693 = vmatprep.subr.bf16.mxu1 %v4692_v58  ;;  %v1361_v29 = vld [vmem:[%s6696_s4 + $0x2208] sm:$0xff]  ;;  %v1363_v58 = vld [vmem:[%s6696_s4 + $0x2218] sm:$0xff]  ;;  %v1394_v44 = vld [vmem:[%s6696_s4 + $0x2310] sm:$0xff] }
  0xf2   : > { %5589 = vmatprep.subr.bf16.mxu0 %v5588_v0  ;;  %v4712_v0 = vpack.c.bf16 %v467_v54, %v465_v53  ;;  %v5608_v51 = vpack.c.bf16 %v1363_v58, %v1361_v29  ;;  %v7180_v56 = vrot.slane %v2095_v57, %v6817_v12  ;;  %v482_v53 = vld [vmem:[%s6696_s4 + $0x690] sm:$0xff]  ;;  %v1376_v54 = vld [vmem:[%s6696_s4 + $0x2280] sm:$0xff]  ;;  %v485_v58 = vld [vmem:[%s6696_s4 + $0x6a8] sm:$0xff] }
  0xf3   : > { %v1378_v29 = vld [vmem:[%s6696_s4 + $0x2290] sm:$0xff]  ;;  %v4732_v2 = vpack.c.bf16 %v487_v59, %v485_v58  ;;  %v505_v58 = vld [vmem:[%s6696_s4 + $0x748] sm:$0xff]  ;;  %v507_v59 = vld [vmem:[%s6696_s4 + $0x758] sm:$0xff] }
  0xf4   : > { %4695 = vmatpush1.bf16.msra.mxu1 %v4694_v5  ;;  %v471_v5 = vld [vmem:[%s6696_s4 + $0x638] sm:$0xff]  ;;  %v5626_v1 = vpack.c.bf16 %v1378_v29, %v1376_v54  ;;  %v1396_v54 = vld [vmem:[%s6696_s4 + $0x2320] sm:$0xff]  ;;  %v1398_v29 = vld [vmem:[%s6696_s4 + $0x2330] sm:$0xff] }
  0xf5   : > { %5591 = vmatpush1.bf16.msra.mxu0 %v5590_v6  ;;  %4697 = vmatprep.subr.bf16.mxu1 %v4696_v7  ;;  %v1365_v6 = vld [vmem:[%s6696_s4 + $0x2228] sm:$0xff]  ;;  %v1367_v7 = vld [vmem:[%s6696_s4 + $0x2238] sm:$0xff] }
  0xf6   : > { %5593 = vmatprep.subr.bf16.mxu0 %v5592_v10  ;;  %v4716_v10 = vpack.c.bf16 %v471_v5, %v469_v4  ;;  %v5612_v15 = vpack.c.bf16 %v1367_v7, %v1365_v6  ;;  %v1382_v5 = vld [vmem:[%s6696_s4 + $0x22b0] sm:$0xff]  ;;  %v489_v6 = vld [vmem:[%s6696_s4 + $0x6c8] sm:$0xff]  ;;  %v491_v7 = vld [vmem:[%s6696_s4 + $0x6d8] sm:$0xff] }
  0xf8   : > { %4699 = vmatpush1.bf16.msra.mxu1 %v4698_v17  ;;  %v473_v17 = vld [vmem:[%s6696_s4 + $0x648] sm:$0xff] }
  0xf9   : > { %5595 = vmatpush1.bf16.msra.mxu0 %v5594_v18  ;;  %4701 = vmatprep.subr.bf16.mxu1 %v4700_v19  ;;  %v475_v18 = vld [vmem:[%s6696_s4 + $0x658] sm:$0xff]  ;;  %v2111_v19 = vcombine.high %v7180_v56, %v7180_v56 }
  0xfa   : > { %5597 = vmatprep.subr.bf16.mxu0 %v5596_v23  ;;  %v4718_v23 = vpack.c.bf16 %v470_v13, %v468_v11  ;;  %v4720_v25 = vpack.c.bf16 %v475_v18, %v473_v17  ;;  %v5630_v11 = vpack.c.bf16 %v1382_v5, %v1380_v3  ;;  %v4736_v13 = vpack.c.bf16 %v491_v7, %v489_v6  ;;  %v1386_v18 = vld [vmem:[%s6696_s4 + $0x22d0] sm:$0xff]  ;;  %v1400_v3 = vld [vmem:[%s6696_s4 + $0x2340] sm:$0xff]  ;;  %v509_v6 = vld [vmem:[%s6696_s4 + $0x768] sm:$0xff] }
  0xfb   : > { %v1402_v5 = vld [vmem:[%s6696_s4 + $0x2350] sm:$0xff]  ;;  %v511_v7 = vld [vmem:[%s6696_s4 + $0x778] sm:$0xff] }
  0xfc   : > { %4703 = vmatpush1.bf16.msra.mxu1 %v4702_v32  ;;  %v1370_v32 = vld [vmem:[%s6696_s4 + $0x2250] sm:$0xff] }
  0xfd   : > { %5599 = vmatpush1.bf16.msra.mxu0 %v5598_v33  ;;  %4705 = vmatprep.subr.bf16.mxu1 %v4704_v35  ;;  %v477_v33 = vld [vmem:[%s6696_s4 + $0x668] sm:$0xff]  ;;  %v479_v35 = vld [vmem:[%s6696_s4 + $0x678] sm:$0xff]  ;;  %v5618_v38 = vpack.c.bf16 %v1370_v32, %v1368_v28  ;;  %v1388_v28 = vld [vmem:[%s6696_s4 + $0x22e0] sm:$0xff] }
  0xfe   : > { %5601 = vmatprep.subr.bf16.mxu0 %v5600_v39  ;;  %v4724_v39 = vpack.c.bf16 %v479_v35, %v477_v33  ;;  %v1390_v32 = vld [vmem:[%s6696_s4 + $0x22f0] sm:$0xff]  ;;  %v497_v33 = vld [vmem:[%s6696_s4 + $0x708] sm:$0xff]  ;;  %v499_v35 = vld [vmem:[%s6696_s4 + $0x718] sm:$0xff] }
 0x100   : > { %4707 = vmatpush1.bf16.msra.mxu1 %v4706_v45  ;;  %v481_v45 = vld [vmem:[%s6696_s4 + $0x688] sm:$0xff] }
 0x101   : > { %5603 = vmatpush1.bf16.msra.mxu0 %v5602_v46  ;;  %4709 = vmatprep.subr.bf16.mxu1 %v4708_v47  ;;  %v483_v46 = vld [vmem:[%s6696_s4 + $0x698] sm:$0xff]  ;;  %v1377_v47 = vld [vmem:[%s6696_s4 + $0x2288] sm:$0xff] }
 0x102   : > { %5605 = vmatprep.subr.bf16.mxu0 %v5604_v52  ;;  %v4728_v52 = vpack.c.bf16 %v483_v46, %v481_v45  ;;  %v5624_v57 = vpack.c.bf16 %v1379_v48, %v1377_v47  ;;  %v501_v45 = vld [vmem:[%s6696_s4 + $0x728] sm:$0xff]  ;;  %v503_v46 = vld [vmem:[%s6696_s4 + $0x738] sm:$0xff] }
 0x103   : > { %v1397_v47 = vld [vmem:[%s6696_s4 + $0x2328] sm:$0xff]  ;;  %v1399_v48 = vld [vmem:[%s6696_s4 + $0x2338] sm:$0xff] }
 0x104   : > { %4711 = vmatpush1.bf16.msra.mxu1 %v4710_v61  ;;  %v1381_v61 = vld [vmem:[%s6696_s4 + $0x22a8] sm:$0xff] }
 0x105   : > { %5607 = vmatpush1.bf16.msra.mxu0 %v5606_v62  ;;  %4713 = vmatprep.subr.bf16.mxu1 %v4712_v0  ;;  %v1383_v62 = vld [vmem:[%s6696_s4 + $0x22b8] sm:$0xff]  ;;  %v4730_v0 = vpack.c.bf16 %v482_v53, %v480_v26  ;;  %v500_v26 = vld [vmem:[%s6696_s4 + $0x720] sm:$0xff]  ;;  %v502_v53 = vld [vmem:[%s6696_s4 + $0x730] sm:$0xff] }
 0x106   : > { %5609 = vmatprep.subr.bf16.mxu0 %v5608_v51  ;;  %v486_v51 = vld [vmem:[%s6696_s4 + $0x6b0] sm:$0xff]  ;;  %v5628_v4 = vpack.c.bf16 %v1383_v62, %v1381_v61  ;;  %v1401_v61 = vld [vmem:[%s6696_s4 + $0x2348] sm:$0xff]  ;;  %v1403_v62 = vld [vmem:[%s6696_s4 + $0x2358] sm:$0xff] }
 0x107   : > { %2579 = vmatmul.mubr.f32.vlgmr.msra.gmra.mrb[0].mxu1 %v7037_v55  ;;  %v474_v55 = vld [vmem:[%s6696_s4 + $0x650] sm:$0xff] }
 0x108   : > { %4715 = vmatpush1.bf16.msra.mxu1 %v4714_v34  ;;  %3573 = vmatmul.mubr.f32.vlgmr.msra.gmra.mrb[0].mxu0 %v7047_v60  ;;  %v1373_v60 = vld [vmem:[%s6696_s4 + $0x2268] sm:$0xff]  ;;  %v4722_v37 = vpack.c.bf16 %v474_v55, %v472_v27  ;;  %v492_v27 = vld [vmem:[%s6696_s4 + $0x6e0] sm:$0xff]  ;;  %v494_v55 = vld [vmem:[%s6696_s4 + $0x6f0] sm:$0xff] }
 0x109   : > { %5611 = vmatpush1.bf16.msra.mxu0 %v5610_v9  ;;  %4717 = vmatprep.subr.bf16.mxu1 %v4716_v10  ;;  %v5620_v43 = vpack.c.bf16 %v1375_v36, %v1373_v60  ;;  %v1385_v34 = vld [vmem:[%s6696_s4 + $0x22c8] sm:$0xff]  ;;  %v1387_v9 = vld [vmem:[%s6696_s4 + $0x22d8] sm:$0xff]  ;;  %v4734_v10 = vpack.c.bf16 %v486_v51, %v484_v31  ;;  %v504_v31 = vld [vmem:[%s6696_s4 + $0x740] sm:$0xff] }
 0x10a   : > { %5613 = vmatprep.subr.bf16.mxu0 %v5612_v15  ;;  %2649 = vmatprep.mubr.f32.mxu1 %v2111_v19  ;;  %v490_v15 = vld [vmem:[%s6696_s4 + $0x6d0] sm:$0xff]  ;;  %v5632_v17 = vpack.c.bf16 %v1387_v9, %v1385_v34  ;;  %v493_v19 = vld [vmem:[%s6696_s4 + $0x6e8] sm:$0xff]  ;;  %v1395_v36 = vld [vmem:[%s6696_s4 + $0x2318] sm:$0xff] }
 0x10b   : > { %3643 = vmatprep.mubr.f32.mxu0 %v2230_v22  ;;  %v1391_v22 = vld [vmem:[%s6696_s4 + $0x22f8] sm:$0xff]  ;;  %v1393_v60 = vld [vmem:[%s6696_s4 + $0x2308] sm:$0xff]  ;;  %v506_v51 = vld [vmem:[%s6696_s4 + $0x750] sm:$0xff] }
 0x10c   : > { %4719 = vmatpush1.bf16.msra.mxu1 %v4718_v23  ;;  %v4738_v23 = vpack.c.bf16 %v490_v15, %v488_v14  ;;  %v1405_v34 = vld [vmem:[%s6696_s4 + $0x2368] sm:$0xff]  ;;  %v1407_v9 = vld [vmem:[%s6696_s4 + $0x2378] sm:$0xff]  ;;  %v508_v14 = vld [vmem:[%s6696_s4 + $0x760] sm:$0xff] }
 0x10d   : > { %5615 = vmatpush1.bf16.msra.mxu0 %v5614_v24  ;;  %4721 = vmatprep.subr.bf16.mxu1 %v4720_v25  ;;  %v5634_v24 = vpack.c.bf16 %v1386_v18, %v1384_v16  ;;  %v4740_v25 = vpack.c.bf16 %v495_v20, %v493_v19  ;;  %v510_v15 = vld [vmem:[%s6696_s4 + $0x770] sm:$0xff]  ;;  %v1404_v16 = vld [vmem:[%s6696_s4 + $0x2360] sm:$0xff]  ;;  %v513_v19 = vld [vmem:[%s6696_s4 + $0x788] sm:$0xff] }
 0x10e   : > { %5617 = vmatprep.subr.bf16.mxu0 %v5616_v30  ;;  %v5636_v30 = vpack.c.bf16 %v1391_v22, %v1389_v21  ;;  %v1406_v18 = vld [vmem:[%s6696_s4 + $0x2370] sm:$0xff]  ;;  %v515_v20 = vld [vmem:[%s6696_s4 + $0x798] sm:$0xff]  ;;  %v1409_v21 = vld [vmem:[%s6696_s4 + $0x2388] sm:$0xff] }
 0x10f   : > { %v1411_v22 = vld [vmem:[%s6696_s4 + $0x2398] sm:$0xff] }
 0x110   : > { %4723 = vmatpush1.bf16.msra.mxu1 %v4722_v37  ;;  %v4742_v37 = vpack.c.bf16 %v494_v55, %v492_v27  ;;  %v512_v27 = vld [vmem:[%s6696_s4 + $0x780] sm:$0xff]  ;;  %v514_v55 = vld [vmem:[%s6696_s4 + $0x790] sm:$0xff] }
 0x111   : > { %5619 = vmatpush1.bf16.msra.mxu0 %v5618_v38  ;;  %4725 = vmatprep.subr.bf16.mxu1 %v4724_v39  ;;  %v5638_v38 = vpack.c.bf16 %v1390_v32, %v1388_v28  ;;  %v4744_v39 = vpack.c.bf16 %v499_v35, %v497_v33  ;;  %v1408_v28 = vld [vmem:[%s6696_s4 + $0x2380] sm:$0xff]  ;;  %v1410_v32 = vld [vmem:[%s6696_s4 + $0x2390] sm:$0xff]  ;;  %v517_v33 = vld [vmem:[%s6696_s4 + $0x7a8] sm:$0xff] }
 0x112   : > { %5621 = vmatprep.subr.bf16.mxu0 %v5620_v43  ;;  %v5640_v43 = vpack.c.bf16 %v1395_v36, %v1393_v60  ;;  %v519_v35 = vld [vmem:[%s6696_s4 + $0x7b8] sm:$0xff]  ;;  %v1413_v60 = vld [vmem:[%s6696_s4 + $0x23a8] sm:$0xff] }
 0x113   : > { %v1415_v36 = vld [vmem:[%s6696_s4 + $0x23b8] sm:$0xff] }
 0x114   : > { %4727 = vmatpush1.bf16.msra.mxu1 %v4726_v49  ;;  %v4746_v49 = vpack.c.bf16 %v498_v41, %v496_v40  ;;  %v516_v40 = vld [vmem:[%s6696_s4 + $0x7a0] sm:$0xff]  ;;  %v518_v41 = vld [vmem:[%s6696_s4 + $0x7b0] sm:$0xff] }
 0x115   : > { %5623 = vmatpush1.bf16.msra.mxu0 %v5622_v50  ;;  %4729 = vmatprep.subr.bf16.mxu1 %v4728_v52  ;;  %v5642_v50 = vpack.c.bf16 %v1394_v44, %v1392_v42  ;;  %v4748_v52 = vpack.c.bf16 %v503_v46, %v501_v45  ;;  %v1412_v42 = vld [vmem:[%s6696_s4 + $0x23a0] sm:$0xff]  ;;  %v1414_v44 = vld [vmem:[%s6696_s4 + $0x23b0] sm:$0xff]  ;;  %v521_v45 = vld [vmem:[%s6696_s4 + $0x7c8] sm:$0xff] }
 0x116   : > { %5625 = vmatprep.subr.bf16.mxu0 %v5624_v57  ;;  %v5644_v57 = vpack.c.bf16 %v1399_v48, %v1397_v47  ;;  %v523_v46 = vld [vmem:[%s6696_s4 + $0x7d8] sm:$0xff]  ;;  %v1417_v47 = vld [vmem:[%s6696_s4 + $0x23c8] sm:$0xff] }
 0x117   : > { %v1419_v48 = vld [vmem:[%s6696_s4 + $0x23d8] sm:$0xff] }
 0x118   : > { %4731 = vmatpush1.bf16.msra.mxu1 %v4730_v0  ;;  %v4750_v0 = vpack.c.bf16 %v502_v53, %v500_v26  ;;  %v520_v26 = vld [vmem:[%s6696_s4 + $0x7c0] sm:$0xff]  ;;  %v522_v53 = vld [vmem:[%s6696_s4 + $0x7d0] sm:$0xff] }
 0x119   : > { %5627 = vmatpush1.bf16.msra.mxu0 %v5626_v1  ;;  %4733 = vmatprep.subr.bf16.mxu1 %v4732_v2  ;;  %v5646_v1 = vpack.c.bf16 %v1398_v29, %v1396_v54  ;;  %v4752_v2 = vpack.c.bf16 %v507_v59, %v505_v58  ;;  %v1416_v54 = vld [vmem:[%s6696_s4 + $0x23c0] sm:$0xff]  ;;  %v1418_v29 = vld [vmem:[%s6696_s4 + $0x23d0] sm:$0xff]  ;;  %v525_v58 = vld [vmem:[%s6696_s4 + $0x7e8] sm:$0xff] }
 0x11a   : > { %5629 = vmatprep.subr.bf16.mxu0 %v5628_v4  ;;  %v5648_v4 = vpack.c.bf16 %v1403_v62, %v1401_v61  ;;  %v527_v59 = vld [vmem:[%s6696_s4 + $0x7f8] sm:$0xff]  ;;  %v1421_v61 = vld [vmem:[%s6696_s4 + $0x23e8] sm:$0xff] }
 0x11b   : > { %v1423_v62 = vld [vmem:[%s6696_s4 + $0x23f8] sm:$0xff] }
 0x11c   : > { %4735 = vmatpush1.bf16.msra.mxu1 %v4734_v10  ;;  %v4754_v10 = vpack.c.bf16 %v506_v51, %v504_v31  ;;  %v524_v31 = vld [vmem:[%s6696_s4 + $0x7e0] sm:$0xff]  ;;  %v526_v51 = vld [vmem:[%s6696_s4 + $0x7f0] sm:$0xff] }
 0x11d   : > { %5631 = vmatpush1.bf16.msra.mxu0 %v5630_v11  ;;  %4737 = vmatprep.subr.bf16.mxu1 %v4736_v13  ;;  %v5650_v11 = vpack.c.bf16 %v1402_v5, %v1400_v3  ;;  %v4756_v13 = vpack.c.bf16 %v511_v7, %v509_v6  ;;  %v1420_v3 = vld [vmem:[%s6696_s4 + $0x23e0] sm:$0xff]  ;;  %v1422_v5 = vld [vmem:[%s6696_s4 + $0x23f0] sm:$0xff]  ;;  %v529_v6 = vld [vmem:[%s6696_s4 + $0x808] sm:$0xff] }
 0x11e   : > { %5633 = vmatprep.subr.bf16.mxu0 %v5632_v17  ;;  %v5652_v17 = vpack.c.bf16 %v1407_v9, %v1405_v34  ;;  %v531_v7 = vld [vmem:[%s6696_s4 + $0x818] sm:$0xff]  ;;  %v1425_v34 = vld [vmem:[%s6696_s4 + $0x2408] sm:$0xff] }
 0x11f   : > { %v1427_v9 = vld [vmem:[%s6696_s4 + $0x2418] sm:$0xff] }
 0x120   : > { %4739 = vmatpush1.bf16.msra.mxu1 %v4738_v23  ;;  %v4758_v23 = vpack.c.bf16 %v510_v15, %v508_v14  ;;  %v5670_v14 = vpack.c.bf16 %v1422_v5, %v1420_v3  ;;  %v4776_v15 = vpack.c.bf16 %v531_v7, %v529_v6  ;;  %v544_v5 = vld [vmem:[%s6696_s4 + $0x880] sm:$0xff]  ;;  %v546_v6 = vld [vmem:[%s6696_s4 + $0x890] sm:$0xff] }
 0x121   : > { %5635 = vmatpush1.bf16.msra.mxu0 %v5634_v24  ;;  %4741 = vmatprep.subr.bf16.mxu1 %v4740_v25  ;;  %v5654_v24 = vpack.c.bf16 %v1406_v18, %v1404_v16  ;;  %v4760_v25 = vpack.c.bf16 %v515_v20, %v513_v19  ;;  %v528_v16 = vld [vmem:[%s6696_s4 + $0x800] sm:$0xff]  ;;  %v5672_v19 = vpack.c.bf16 %v1427_v9, %v1425_v34  ;;  %v1426_v20 = vld [vmem:[%s6696_s4 + $0x2410] sm:$0xff] }
 0x122   : > { %5637 = vmatprep.subr.bf16.mxu0 %v5636_v30  ;;  %v5656_v30 = vpack.c.bf16 %v1411_v22, %v1409_v21  ;;  %v1424_v18 = vld [vmem:[%s6696_s4 + $0x2400] sm:$0xff]  ;;  %v533_v21 = vld [vmem:[%s6696_s4 + $0x828] sm:$0xff]  ;;  %v535_v22 = vld [vmem:[%s6696_s4 + $0x838] sm:$0xff] }
 0x123   : > { %v1440_v7 = vld [vmem:[%s6696_s4 + $0x2480] sm:$0xff]  ;;  %v1442_v9 = vld [vmem:[%s6696_s4 + $0x2490] sm:$0xff] }
 0x124   : > { %4743 = vmatpush1.bf16.msra.mxu1 %v4742_v37  ;;  %v4762_v37 = vpack.c.bf16 %v514_v55, %v512_v27 }
 0x125   : > { %5639 = vmatpush1.bf16.msra.mxu0 %v5638_v38  ;;  %4745 = vmatprep.subr.bf16.mxu1 %v4744_v39  ;;  %v5658_v38 = vpack.c.bf16 %v1410_v32, %v1408_v28  ;;  %v4764_v39 = vpack.c.bf16 %v519_v35, %v517_v33  ;;  %v5674_v28 = vpack.c.bf16 %v1426_v20, %v1424_v18  ;;  %v532_v32 = vld [vmem:[%s6696_s4 + $0x820] sm:$0xff]  ;;  %v534_v33 = vld [vmem:[%s6696_s4 + $0x830] sm:$0xff] }
 0x126   : > { %5641 = vmatprep.subr.bf16.mxu0 %v5640_v43  ;;  %v5660_v43 = vpack.c.bf16 %v1415_v36, %v1413_v60  ;;  %v1428_v35 = vld [vmem:[%s6696_s4 + $0x2420] sm:$0xff]  ;;  %v1430_v36 = vld [vmem:[%s6696_s4 + $0x2430] sm:$0xff]  ;;  %v5690_v18 = vpack.c.bf16 %v1442_v9, %v1440_v7 }
 0x127   : > { %v548_v20 = vld [vmem:[%s6696_s4 + $0x8a0] sm:$0xff] }
 0x128   : > { %4747 = vmatpush1.bf16.msra.mxu1 %v4746_v49  ;;  %v4766_v49 = vpack.c.bf16 %v518_v41, %v516_v40  ;;  %v1433_v40 = vld [vmem:[%s6696_s4 + $0x2448] sm:$0xff]  ;;  %v1435_v41 = vld [vmem:[%s6696_s4 + $0x2458] sm:$0xff]  ;;  %v564_v7 = vld [vmem:[%s6696_s4 + $0x920] sm:$0xff] }
 0x129   : > { %5643 = vmatpush1.bf16.msra.mxu0 %v5642_v50  ;;  %4749 = vmatprep.subr.bf16.mxu1 %v4748_v52  ;;  %v5662_v50 = vpack.c.bf16 %v1414_v44, %v1412_v42  ;;  %v4768_v52 = vpack.c.bf16 %v523_v46, %v521_v45  ;;  %v5678_v44 = vpack.c.bf16 %v1430_v36, %v1428_v35  ;;  %v536_v46 = vld [vmem:[%s6696_s4 + $0x840] sm:$0xff] }
 0x12a   : > { %5645 = vmatprep.subr.bf16.mxu0 %v5644_v57  ;;  %v5664_v57 = vpack.c.bf16 %v1419_v48, %v1417_v47  ;;  %v1432_v47 = vld [vmem:[%s6696_s4 + $0x2440] sm:$0xff]  ;;  %v5680_v48 = vpack.c.bf16 %v1435_v41, %v1433_v40  ;;  %v1450_v40 = vld [vmem:[%s6696_s4 + $0x24d0] sm:$0xff]  ;;  %v557_v41 = vld [vmem:[%s6696_s4 + $0x8e8] sm:$0xff] }
 0x12b   : > { %v552_v36 = vld [vmem:[%s6696_s4 + $0x8c0] sm:$0xff] }
 0x12c   : > { %4751 = vmatpush1.bf16.msra.mxu1 %v4750_v0  ;;  %v4770_v0 = vpack.c.bf16 %v522_v53, %v520_v26  ;;  %v1439_v26 = vld [vmem:[%s6696_s4 + $0x2478] sm:$0xff]  ;;  %v1460_v9 = vld [vmem:[%s6696_s4 + $0x2520] sm:$0xff] }
 0x12d   : > { %5647 = vmatpush1.bf16.msra.mxu0 %v5646_v1  ;;  %4753 = vmatprep.subr.bf16.mxu1 %v4752_v2  ;;  %v5666_v1 = vpack.c.bf16 %v1418_v29, %v1416_v54  ;;  %v4772_v2 = vpack.c.bf16 %v527_v59, %v525_v58  ;;  %v540_v29 = vld [vmem:[%s6696_s4 + $0x860] sm:$0xff]  ;;  %v542_v58 = vld [vmem:[%s6696_s4 + $0x870] sm:$0xff] }
 0x12e   : > { %5649 = vmatprep.subr.bf16.mxu0 %v5648_v4  ;;  %v5668_v4 = vpack.c.bf16 %v1423_v62, %v1421_v61  ;;  %v1436_v59 = vld [vmem:[%s6696_s4 + $0x2460] sm:$0xff]  ;;  %v1438_v62 = vld [vmem:[%s6696_s4 + $0x2470] sm:$0xff] }
 0x12f   : > { %v5686_v3 = vpack.c.bf16 %v1438_v62, %v1436_v59  ;;  %v560_v59 = vld [vmem:[%s6696_s4 + $0x900] sm:$0xff] }
 0x130   : > { %4755 = vmatpush1.bf16.msra.mxu1 %v4754_v10  ;;  %v7314_v10 = vld [vmem:[%s6719_s20 + $0x10] sm:$0xff]  ;;  %v1456_v62 = vld [vmem:[%s6696_s4 + $0x2500] sm:$0xff] }
 0x131   : > { %5651 = vmatpush1.bf16.msra.mxu0 %v5650_v11  ;;  %4757 = vmatprep.subr.bf16.mxu1 %v4756_v13  ;;  %v4774_v11 = vpack.c.bf16 %v526_v51, %v524_v31  ;;  %v7317_v13 = vld [vmem:[%s6719_s20 + $0x48] sm:$0xff]  ;;  %v1443_v31 = vld [vmem:[%s6696_s4 + $0x2498] sm:$0xff]  ;;  %v4790_v51 = vpack.c.bf16 %v542_v58, %v540_v29 }
 0x132   : > { %5653 = vmatprep.subr.bf16.mxu0 %v5652_v17  ;;  %v530_v17 = vld [vmem:[%s6696_s4 + $0x810] sm:$0xff]  ;;  %v7333_v27 = vrot.slane %v7317_v13, %v6817_v12 }
 0x133   : > { %v4778_v55 = vpack.c.bf16 %v530_v17, %v528_v16  ;;  %v1447_v16 = vld [vmem:[%s6696_s4 + $0x24b8] sm:$0xff]  ;;  %v4794_v17 = vpack.c.bf16 %v546_v6, %v544_v5 }
 0x134   : > { %4759 = vmatpush1.bf16.msra.mxu1 %v4758_v23  ;;  %v7327_v23 = vrot.slane %v7314_v10, %v6817_v12  ;;  %v2246_v42 = vcombine.high %v7333_v27, %v7333_v27 }
 0x135   : > { %5655 = vmatpush1.bf16.msra.mxu0 %v5654_v24  ;;  %4761 = vmatprep.subr.bf16.mxu1 %v4760_v25  ;;  %v1429_v24 = vld [vmem:[%s6696_s4 + $0x2428] sm:$0xff]  ;;  %v1431_v25 = vld [vmem:[%s6696_s4 + $0x2438] sm:$0xff] }
 0x136   : > { %5657 = vmatprep.subr.bf16.mxu0 %v5656_v30  ;;  %v4780_v30 = vpack.c.bf16 %v535_v22, %v533_v21  ;;  %v5676_v60 = vpack.c.bf16 %v1431_v25, %v1429_v24  ;;  %v550_v21 = vld [vmem:[%s6696_s4 + $0x8b0] sm:$0xff]  ;;  %v1444_v22 = vld [vmem:[%s6696_s4 + $0x24a0] sm:$0xff] }
 0x137   : > { %v1446_v25 = vld [vmem:[%s6696_s4 + $0x24b0] sm:$0xff] }
 0x138   : > { %4763 = vmatpush1.bf16.msra.mxu1 %v4762_v37  ;;  %v537_v37 = vld [vmem:[%s6696_s4 + $0x848] sm:$0xff]  ;;  %v5694_v35 = vpack.c.bf16 %v1446_v25, %v1444_v22  ;;  %v568_v22 = vld [vmem:[%s6696_s4 + $0x940] sm:$0xff] }
 0x139   : > { %5659 = vmatpush1.bf16.msra.mxu0 %v5658_v38  ;;  %4765 = vmatprep.subr.bf16.mxu1 %v4764_v39  ;;  %v539_v38 = vld [vmem:[%s6696_s4 + $0x858] sm:$0xff]  ;;  %v2127_v39 = vcombine.high %v7327_v23, %v7327_v23  ;;  %v1464_v25 = vld [vmem:[%s6696_s4 + $0x2540] sm:$0xff] }
 0x13a   : > { %5661 = vmatprep.subr.bf16.mxu0 %v5660_v43  ;;  %v4782_v43 = vpack.c.bf16 %v534_v33, %v532_v32  ;;  %v4784_v45 = vpack.c.bf16 %v539_v38, %v537_v37  ;;  %v1451_v32 = vld [vmem:[%s6696_s4 + $0x24d8] sm:$0xff]  ;;  %v4798_v33 = vpack.c.bf16 %v550_v21, %v548_v20  ;;  %v554_v37 = vld [vmem:[%s6696_s4 + $0x8d0] sm:$0xff]  ;;  %v1448_v38 = vld [vmem:[%s6696_s4 + $0x24c0] sm:$0xff] }
 0x13c   : > { %4767 = vmatpush1.bf16.msra.mxu1 %v4766_v49  ;;  %v1434_v49 = vld [vmem:[%s6696_s4 + $0x2450] sm:$0xff] }
 0x13d   : > { %5663 = vmatpush1.bf16.msra.mxu0 %v5662_v50  ;;  %4769 = vmatprep.subr.bf16.mxu1 %v4768_v52  ;;  %v541_v50 = vld [vmem:[%s6696_s4 + $0x868] sm:$0xff]  ;;  %v543_v52 = vld [vmem:[%s6696_s4 + $0x878] sm:$0xff]  ;;  %v5682_v54 = vpack.c.bf16 %v1434_v49, %v1432_v47  ;;  %v556_v47 = vld [vmem:[%s6696_s4 + $0x8e0] sm:$0xff] }
 0x13e   : > { %5665 = vmatprep.subr.bf16.mxu0 %v5664_v57  ;;  %v4788_v57 = vpack.c.bf16 %v543_v52, %v541_v50  ;;  %v1452_v49 = vld [vmem:[%s6696_s4 + $0x24e0] sm:$0xff]  ;;  %v1454_v52 = vld [vmem:[%s6696_s4 + $0x24f0] sm:$0xff] }
 0x13f   : > { %v5702_v29 = vpack.c.bf16 %v1454_v52, %v1452_v49  ;;  %v576_v49 = vld [vmem:[%s6696_s4 + $0x980] sm:$0xff] }
 0x140   : > { %4771 = vmatpush1.bf16.msra.mxu1 %v4770_v0  ;;  %v545_v0 = vld [vmem:[%s6696_s4 + $0x888] sm:$0xff]  ;;  %v1472_v52 = vld [vmem:[%s6696_s4 + $0x2580] sm:$0xff] }
 0x141   : > { %5667 = vmatpush1.bf16.msra.mxu0 %v5666_v1  ;;  %4773 = vmatprep.subr.bf16.mxu1 %v4772_v2  ;;  %v547_v1 = vld [vmem:[%s6696_s4 + $0x898] sm:$0xff]  ;;  %v1441_v2 = vld [vmem:[%s6696_s4 + $0x2488] sm:$0xff] }
 0x142   : > { %5669 = vmatprep.subr.bf16.mxu0 %v5668_v4  ;;  %v4792_v4 = vpack.c.bf16 %v547_v1, %v545_v0  ;;  %v5688_v34 = vpack.c.bf16 %v1443_v31, %v1441_v2  ;;  %v1458_v1 = vld [vmem:[%s6696_s4 + $0x2510] sm:$0xff]  ;;  %v565_v2 = vld [vmem:[%s6696_s4 + $0x928] sm:$0xff]  ;;  %v567_v31 = vld [vmem:[%s6696_s4 + $0x938] sm:$0xff] }
 0x143   : > { %v5706_v5 = vpack.c.bf16 %v1458_v1, %v1456_v62  ;;  %v4812_v6 = vpack.c.bf16 %v567_v31, %v565_v2  ;;  %v580_v62 = vld [vmem:[%s6696_s4 + $0x9a0] sm:$0xff]  ;;  %v1478_v31 = vld [vmem:[%s6696_s4 + $0x25b0] sm:$0xff] }
 0x144   : > { %4775 = vmatpush1.bf16.msra.mxu1 %v4774_v11  ;;  %v549_v11 = vld [vmem:[%s6696_s4 + $0x8a8] sm:$0xff]  ;;  %v1476_v1 = vld [vmem:[%s6696_s4 + $0x25a0] sm:$0xff] }
 0x145   : > { %5671 = vmatpush1.bf16.msra.mxu0 %v5670_v14  ;;  %4777 = vmatprep.subr.bf16.mxu1 %v4776_v15  ;;  %v551_v14 = vld [vmem:[%s6696_s4 + $0x8b8] sm:$0xff]  ;;  %v1445_v15 = vld [vmem:[%s6696_s4 + $0x24a8] sm:$0xff] }
 0x146   : > { %5673 = vmatprep.subr.bf16.mxu0 %v5672_v19  ;;  %v4796_v19 = vpack.c.bf16 %v551_v14, %v549_v11  ;;  %v5692_v24 = vpack.c.bf16 %v1447_v16, %v1445_v15  ;;  %v1462_v14 = vld [vmem:[%s6696_s4 + $0x2530] sm:$0xff]  ;;  %v569_v15 = vld [vmem:[%s6696_s4 + $0x948] sm:$0xff]  ;;  %v571_v16 = vld [vmem:[%s6696_s4 + $0x958] sm:$0xff] }
 0x147   : > { %2650 = vmatmul.mubr.f32.vlgmr.msra.gmra.mrb[0].mxu1 %v7180_v56  ;;  %v538_v56 = vld [vmem:[%s6696_s4 + $0x850] sm:$0xff]  ;;  %v5710_v20 = vpack.c.bf16 %v1462_v14, %v1460_v9  ;;  %v4816_v21 = vpack.c.bf16 %v571_v16, %v569_v15  ;;  %v584_v9 = vld [vmem:[%s6696_s4 + $0x9c0] sm:$0xff] }
 0x148   : > { %4779 = vmatpush1.bf16.msra.mxu1 %v4778_v55  ;;  %3644 = vmatmul.mubr.f32.vlgmr.msra.gmra.mrb[0].mxu0 %v7185_v8  ;;  %v1437_v8 = vld [vmem:[%s6696_s4 + $0x2468] sm:$0xff]  ;;  %v4786_v53 = vpack.c.bf16 %v538_v56, %v536_v46  ;;  %v5698_v46 = vpack.c.bf16 %v1450_v40, %v1448_v38  ;;  %v572_v38 = vld [vmem:[%s6696_s4 + $0x960] sm:$0xff]  ;;  %v1482_v16 = vld [vmem:[%s6696_s4 + $0x25d0] sm:$0xff] }
 0x149   : > { %5675 = vmatpush1.bf16.msra.mxu0 %v5674_v28  ;;  %4781 = vmatprep.subr.bf16.mxu1 %v4780_v30  ;;  %v5684_v61 = vpack.c.bf16 %v1439_v26, %v1437_v8  ;;  %v553_v55 = vld [vmem:[%s6696_s4 + $0x8c8] sm:$0xff]  ;;  %v555_v28 = vld [vmem:[%s6696_s4 + $0x8d8] sm:$0xff]  ;;  %v1468_v40 = vld [vmem:[%s6696_s4 + $0x2560] sm:$0xff] }
 0x14a   : > { %5677 = vmatprep.subr.bf16.mxu0 %v5676_v60  ;;  %2720 = vmatprep.mubr.f32.mxu1 %v2127_v39  ;;  %v1449_v30 = vld [vmem:[%s6696_s4 + $0x24c8] sm:$0xff]  ;;  %v4800_v60 = vpack.c.bf16 %v555_v28, %v553_v55  ;;  %v563_v26 = vld [vmem:[%s6696_s4 + $0x918] sm:$0xff]  ;;  %v1466_v28 = vld [vmem:[%s6696_s4 + $0x2550] sm:$0xff] }
 0x14b   : > { %3714 = vmatprep.mubr.f32.mxu0 %v2246_v42  ;;  %v5696_v39 = vpack.c.bf16 %v1451_v32, %v1449_v30  ;;  %v559_v42 = vld [vmem:[%s6696_s4 + $0x8f8] sm:$0xff]  ;;  %v561_v8 = vld [vmem:[%s6696_s4 + $0x908] sm:$0xff]  ;;  %v1480_v14 = vld [vmem:[%s6696_s4 + $0x25c0] sm:$0xff] }
 0x14c   : > { %4783 = vmatpush1.bf16.msra.mxu1 %v4782_v43  ;;  %v1453_v43 = vld [vmem:[%s6696_s4 + $0x24e8] sm:$0xff]  ;;  %v4804_v56 = vpack.c.bf16 %v559_v42, %v557_v41  ;;  %v4808_v58 = vpack.c.bf16 %v563_v26, %v561_v8  ;;  %v575_v32 = vld [vmem:[%s6696_s4 + $0x978] sm:$0xff]  ;;  %v1470_v42 = vld [vmem:[%s6696_s4 + $0x2570] sm:$0xff] }
 0x14d   : > { %5679 = vmatpush1.bf16.msra.mxu0 %v5678_v44  ;;  %4785 = vmatprep.subr.bf16.mxu1 %v4784_v45  ;;  %v1455_v44 = vld [vmem:[%s6696_s4 + $0x24f8] sm:$0xff]  ;;  %v4802_v45 = vpack.c.bf16 %v554_v37, %v552_v36  ;;  %v573_v30 = vld [vmem:[%s6696_s4 + $0x968] sm:$0xff]  ;;  %v5714_v36 = vpack.c.bf16 %v1466_v28, %v1464_v25  ;;  %v1474_v26 = vld [vmem:[%s6696_s4 + $0x2590] sm:$0xff] }
 0x14e   : > { %5681 = vmatprep.subr.bf16.mxu0 %v5680_v48  ;;  %v558_v48 = vld [vmem:[%s6696_s4 + $0x8f0] sm:$0xff]  ;;  %v5700_v50 = vpack.c.bf16 %v1455_v44, %v1453_v43  ;;  %v4820_v37 = vpack.c.bf16 %v575_v32, %v573_v30  ;;  %v577_v43 = vld [vmem:[%s6696_s4 + $0x988] sm:$0xff]  ;;  %v579_v44 = vld [vmem:[%s6696_s4 + $0x998] sm:$0xff] }
 0x14f   : > { %v588_v25 = vld [vmem:[%s6696_s4 + $0x9e0] sm:$0xff]  ;;  %v1486_v32 = vld [vmem:[%s6696_s4 + $0x25f0] sm:$0xff] }
 0x150   : > { %4787 = vmatpush1.bf16.msra.mxu1 %v4786_v53  ;;  %v1457_v53 = vld [vmem:[%s6696_s4 + $0x2508] sm:$0xff]  ;;  %v1484_v28 = vld [vmem:[%s6696_s4 + $0x25e0] sm:$0xff] }
 0x151   : > { %5683 = vmatpush1.bf16.msra.mxu0 %v5682_v54  ;;  %4789 = vmatprep.subr.bf16.mxu1 %v4788_v57  ;;  %v1459_v54 = vld [vmem:[%s6696_s4 + $0x2518] sm:$0xff]  ;;  %v4806_v57 = vpack.c.bf16 %v558_v48, %v556_v47  ;;  %v5718_v47 = vpack.c.bf16 %v1470_v42, %v1468_v40  ;;  %v4824_v48 = vpack.c.bf16 %v579_v44, %v577_v43  ;;  %v592_v42 = vld [vmem:[%s6696_s4 + $0xa00] sm:$0xff]  ;;  %v594_v43 = vld [vmem:[%s6696_s4 + $0xa10] sm:$0xff] }
 0x152   : > { %5685 = vmatprep.subr.bf16.mxu0 %v5684_v61  ;;  %v562_v61 = vld [vmem:[%s6696_s4 + $0x910] sm:$0xff]  ;;  %v5704_v0 = vpack.c.bf16 %v1459_v54, %v1457_v53  ;;  %v581_v53 = vld [vmem:[%s6696_s4 + $0x9a8] sm:$0xff]  ;;  %v583_v54 = vld [vmem:[%s6696_s4 + $0x9b8] sm:$0xff]  ;;  %v5734_v40 = vpack.c.bf16 %v1486_v32, %v1484_v28 }
 0x153   : > { %v1488_v44 = vld [vmem:[%s6696_s4 + $0x2600] sm:$0xff] }
 0x154   : > { %4791 = vmatpush1.bf16.msra.mxu1 %v4790_v51  ;;  %v1461_v51 = vld [vmem:[%s6696_s4 + $0x2528] sm:$0xff]  ;;  %v608_v32 = vld [vmem:[%s6696_s4 + $0xa80] sm:$0xff] }
 0x155   : > { %5687 = vmatpush1.bf16.msra.mxu0 %v5686_v3  ;;  %4793 = vmatprep.subr.bf16.mxu1 %v4792_v4  ;;  %v1463_v3 = vld [vmem:[%s6696_s4 + $0x2538] sm:$0xff]  ;;  %v4810_v4 = vpack.c.bf16 %v562_v61, %v560_v59  ;;  %v5722_v59 = vpack.c.bf16 %v1474_v26, %v1472_v52  ;;  %v4828_v61 = vpack.c.bf16 %v583_v54, %v581_v53  ;;  %v596_v26 = vld [vmem:[%s6696_s4 + $0xa20] sm:$0xff]  ;;  %v598_v53 = vld [vmem:[%s6696_s4 + $0xa30] sm:$0xff] }
 0x156   : > { %5689 = vmatprep.subr.bf16.mxu0 %v5688_v34  ;;  %v566_v34 = vld [vmem:[%s6696_s4 + $0x930] sm:$0xff]  ;;  %v5708_v11 = vpack.c.bf16 %v1463_v3, %v1461_v51  ;;  %v585_v51 = vld [vmem:[%s6696_s4 + $0x9c8] sm:$0xff]  ;;  %v587_v3 = vld [vmem:[%s6696_s4 + $0x9d8] sm:$0xff] }
 0x157   : > { %v1492_v54 = vld [vmem:[%s6696_s4 + $0x2620] sm:$0xff] }
 0x158   : > { %4795 = vmatpush1.bf16.msra.mxu1 %v4794_v17  ;;  %v1465_v17 = vld [vmem:[%s6696_s4 + $0x2548] sm:$0xff] }
 0x159   : > { %5691 = vmatpush1.bf16.msra.mxu0 %v5690_v18  ;;  %4797 = vmatprep.subr.bf16.mxu1 %v4796_v19  ;;  %v1467_v18 = vld [vmem:[%s6696_s4 + $0x2558] sm:$0xff]  ;;  %v4814_v19 = vpack.c.bf16 %v566_v34, %v564_v7  ;;  %v5726_v7 = vpack.c.bf16 %v1478_v31, %v1476_v1  ;;  %v4832_v34 = vpack.c.bf16 %v587_v3, %v585_v51  ;;  %v600_v3 = vld [vmem:[%s6696_s4 + $0xa40] sm:$0xff] }
 0x15a   : > { %5693 = vmatprep.subr.bf16.mxu0 %v5692_v24  ;;  %v570_v24 = vld [vmem:[%s6696_s4 + $0x950] sm:$0xff]  ;;  %v5712_v55 = vpack.c.bf16 %v1467_v18, %v1465_v17  ;;  %v589_v17 = vld [vmem:[%s6696_s4 + $0x9e8] sm:$0xff]  ;;  %v591_v18 = vld [vmem:[%s6696_s4 + $0x9f8] sm:$0xff] }
 0x15c   : > { %4799 = vmatpush1.bf16.msra.mxu1 %v4798_v33  ;;  %v1469_v33 = vld [vmem:[%s6696_s4 + $0x2568] sm:$0xff] }
 0x15d   : > { %5695 = vmatpush1.bf16.msra.mxu0 %v5694_v35  ;;  %4801 = vmatprep.subr.bf16.mxu1 %v4800_v60  ;;  %v1471_v35 = vld [vmem:[%s6696_s4 + $0x2578] sm:$0xff]  ;;  %v4818_v60 = vpack.c.bf16 %v570_v24, %v568_v22  ;;  %v5730_v22 = vpack.c.bf16 %v1482_v16, %v1480_v14  ;;  %v4836_v24 = vpack.c.bf16 %v591_v18, %v589_v17  ;;  %v604_v16 = vld [vmem:[%s6696_s4 + $0xa60] sm:$0xff]  ;;  %v606_v17 = vld [vmem:[%s6696_s4 + $0xa70] sm:$0xff] }
 0x15e   : > { %5697 = vmatprep.subr.bf16.mxu0 %v5696_v39  ;;  %v574_v39 = vld [vmem:[%s6696_s4 + $0x970] sm:$0xff]  ;;  %v5716_v41 = vpack.c.bf16 %v1471_v35, %v1469_v33  ;;  %v593_v33 = vld [vmem:[%s6696_s4 + $0xa08] sm:$0xff]  ;;  %v595_v35 = vld [vmem:[%s6696_s4 + $0xa18] sm:$0xff] }
 0x15f   : > { %v1500_v18 = vld [vmem:[%s6696_s4 + $0x2660] sm:$0xff] }
 0x160   : > { %4803 = vmatpush1.bf16.msra.mxu1 %v4802_v45  ;;  %v1473_v45 = vld [vmem:[%s6696_s4 + $0x2588] sm:$0xff] }
 0x161   : > { %5699 = vmatpush1.bf16.msra.mxu0 %v5698_v46  ;;  %4805 = vmatprep.subr.bf16.mxu1 %v4804_v56  ;;  %v1475_v46 = vld [vmem:[%s6696_s4 + $0x2598] sm:$0xff]  ;;  %v4822_v56 = vpack.c.bf16 %v574_v39, %v572_v38  ;;  %v2231_v38 = vcombine.high %v7317_v13, %v7317_v13 }
 0x162   : > { %5701 = vmatprep.subr.bf16.mxu0 %v5700_v50  ;;  %v578_v50 = vld [vmem:[%s6696_s4 + $0x990] sm:$0xff]  ;;  %v5720_v8 = vpack.c.bf16 %v1475_v46, %v1473_v45  ;;  %v597_v46 = vld [vmem:[%s6696_s4 + $0xa28] sm:$0xff] }
 0x163   : > { %v1490_v45 = vld [vmem:[%s6696_s4 + $0x2610] sm:$0xff] }
 0x164   : > { %4807 = vmatpush1.bf16.msra.mxu1 %v4806_v57  ;;  %v1477_v57 = vld [vmem:[%s6696_s4 + $0x25a8] sm:$0xff]  ;;  %v5738_v52 = vpack.c.bf16 %v1490_v45, %v1488_v44  ;;  %v612_v44 = vld [vmem:[%s6696_s4 + $0xaa0] sm:$0xff] }
 0x165   : > { %5703 = vmatpush1.bf16.msra.mxu0 %v5702_v29  ;;  %4809 = vmatprep.subr.bf16.mxu1 %v4808_v58  ;;  %v1479_v29 = vld [vmem:[%s6696_s4 + $0x25b8] sm:$0xff]  ;;  %v4826_v58 = vpack.c.bf16 %v578_v50, %v576_v49  ;;  %v7477_v49 = vrot.slane %v2231_v38, %v6817_v12  ;;  %v4842_v50 = vpack.c.bf16 %v594_v43, %v592_v42  ;;  %v1508_v45 = vld [vmem:[%s6696_s4 + $0x26a0] sm:$0xff] }
 0x166   : > { %5705 = vmatprep.subr.bf16.mxu0 %v5704_v0  ;;  %v582_v0 = vld [vmem:[%s6696_s4 + $0x9b0] sm:$0xff]  ;;  %v5724_v2 = vpack.c.bf16 %v1479_v29, %v1477_v57  ;;  %v615_v38 = vld [vmem:[%s6696_s4 + $0xab8] sm:$0xff] }
 0x167   : > { %v1494_v29 = vld [vmem:[%s6696_s4 + $0x2630] sm:$0xff]  ;;  %v2247_v1 = vcombine.high %v7477_v49, %v7477_v49 }
 0x168   : > { %4811 = vmatpush1.bf16.msra.mxu1 %v4810_v4  ;;  %v1481_v4 = vld [vmem:[%s6696_s4 + $0x25c8] sm:$0xff]  ;;  %v5742_v31 = vpack.c.bf16 %v1494_v29, %v1492_v54  ;;  %v616_v54 = vld [vmem:[%s6696_s4 + $0xac0] sm:$0xff] }
 0x169   : > { %5707 = vmatpush1.bf16.msra.mxu0 %v5706_v5  ;;  %4813 = vmatprep.subr.bf16.mxu1 %v4812_v6  ;;  %v1483_v5 = vld [vmem:[%s6696_s4 + $0x25d8] sm:$0xff]  ;;  %v4830_v6 = vpack.c.bf16 %v582_v0, %v580_v62  ;;  %v1497_v62 = vld [vmem:[%s6696_s4 + $0x2648] sm:$0xff]  ;;  %v1512_v29 = vld [vmem:[%s6696_s4 + $0x26c0] sm:$0xff] }
 0x16a   : > { %5709 = vmatprep.subr.bf16.mxu0 %v5708_v11  ;;  %v586_v11 = vld [vmem:[%s6696_s4 + $0x9d0] sm:$0xff]  ;;  %v5728_v15 = vpack.c.bf16 %v1483_v5, %v1481_v4  ;;  %v1499_v0 = vld [vmem:[%s6696_s4 + $0x2658] sm:$0xff]  ;;  %v1496_v4 = vld [vmem:[%s6696_s4 + $0x2640] sm:$0xff] }
 0x16b   : > { %v5744_v5 = vpack.c.bf16 %v1499_v0, %v1497_v62  ;;  %v623_v62 = vld [vmem:[%s6696_s4 + $0xaf8] sm:$0xff]  ;;  %v1517_v0 = vld [vmem:[%s6696_s4 + $0x26e8] sm:$0xff] }
 0x16c   : > { %4815 = vmatpush1.bf16.msra.mxu1 %v4814_v19  ;;  %v1485_v19 = vld [vmem:[%s6696_s4 + $0x25e8] sm:$0xff] }
 0x16d   : > { %5711 = vmatpush1.bf16.msra.mxu0 %v5710_v20  ;;  %4817 = vmatprep.subr.bf16.mxu1 %v4816_v21  ;;  %v1487_v20 = vld [vmem:[%s6696_s4 + $0x25f8] sm:$0xff]  ;;  %v4834_v21 = vpack.c.bf16 %v586_v11, %v584_v9 }
 0x16e   : > { %5713 = vmatprep.subr.bf16.mxu0 %v5712_v55  ;;  %v590_v55 = vld [vmem:[%s6696_s4 + $0x9f0] sm:$0xff]  ;;  %v5732_v30 = vpack.c.bf16 %v1487_v20, %v1485_v19  ;;  %v1503_v9 = vld [vmem:[%s6696_s4 + $0x2678] sm:$0xff] }
 0x16f   : > { %v4838_v39 = vpack.c.bf16 %v590_v55, %v588_v25  ;;  %v1502_v20 = vld [vmem:[%s6696_s4 + $0x2670] sm:$0xff]  ;;  %v1507_v25 = vld [vmem:[%s6696_s4 + $0x2698] sm:$0xff]  ;;  %v4854_v55 = vpack.c.bf16 %v606_v17, %v604_v16  ;;  %v624_v16 = vld [vmem:[%s6696_s4 + $0xb00] sm:$0xff] }
 0x170   : > { %4819 = vmatpush1.bf16.msra.mxu1 %v4818_v60  ;;  %v2112_v60 = vcombine.high %v7314_v10, %v7314_v10  ;;  %v5750_v28 = vpack.c.bf16 %v1502_v20, %v1500_v18  ;;  %v626_v17 = vld [vmem:[%s6696_s4 + $0xb10] sm:$0xff]  ;;  %v1520_v18 = vld [vmem:[%s6696_s4 + $0x2700] sm:$0xff] }
 0x171   : > { %5715 = vmatpush1.bf16.msra.mxu0 %v5714_v36  ;;  %4821 = vmatprep.subr.bf16.mxu1 %v4820_v37  ;;  %v1489_v36 = vld [vmem:[%s6696_s4 + $0x2608] sm:$0xff]  ;;  %v1491_v37 = vld [vmem:[%s6696_s4 + $0x2618] sm:$0xff]  ;;  %v1522_v20 = vld [vmem:[%s6696_s4 + $0x2710] sm:$0xff] }
 0x172   : > { %5717 = vmatprep.subr.bf16.mxu0 %v5716_v41  ;;  %v4840_v41 = vpack.c.bf16 %v595_v35, %v593_v33  ;;  %v5736_v10 = vpack.c.bf16 %v1491_v37, %v1489_v36  ;;  %v7472_v13 = vrot.slane %v2112_v60, %v6817_v12  ;;  %v610_v33 = vld [vmem:[%s6696_s4 + $0xa90] sm:$0xff]  ;;  %v1504_v35 = vld [vmem:[%s6696_s4 + $0x2680] sm:$0xff]  ;;  %v613_v37 = vld [vmem:[%s6696_s4 + $0xaa8] sm:$0xff] }
 0x173   : > { %v1506_v36 = vld [vmem:[%s6696_s4 + $0x2690] sm:$0xff]  ;;  %v4860_v43 = vpack.c.bf16 %v615_v38, %v613_v37  ;;  %v633_v37 = vld [vmem:[%s6696_s4 + $0xb48] sm:$0xff]  ;;  %v635_v38 = vld [vmem:[%s6696_s4 + $0xb58] sm:$0xff] }
 0x174   : > { %4823 = vmatpush1.bf16.msra.mxu1 %v4822_v56  ;;  %v599_v56 = vld [vmem:[%s6696_s4 + $0xa38] sm:$0xff]  ;;  %v5754_v42 = vpack.c.bf16 %v1506_v36, %v1504_v35  ;;  %v1524_v35 = vld [vmem:[%s6696_s4 + $0x2720] sm:$0xff]  ;;  %v1526_v36 = vld [vmem:[%s6696_s4 + $0x2730] sm:$0xff] }
 0x175   : > { %5719 = vmatpush1.bf16.msra.mxu0 %v5718_v47  ;;  %4825 = vmatprep.subr.bf16.mxu1 %v4824_v48  ;;  %v1493_v47 = vld [vmem:[%s6696_s4 + $0x2628] sm:$0xff]  ;;  %v1495_v48 = vld [vmem:[%s6696_s4 + $0x2638] sm:$0xff] }
 0x176   : > { %5721 = vmatprep.subr.bf16.mxu0 %v5720_v8  ;;  %v4844_v8 = vpack.c.bf16 %v599_v56, %v597_v46  ;;  %v5740_v57 = vpack.c.bf16 %v1495_v48, %v1493_v47  ;;  %v1510_v56 = vld [vmem:[%s6696_s4 + $0x26b0] sm:$0xff]  ;;  %v617_v47 = vld [vmem:[%s6696_s4 + $0xac8] sm:$0xff]  ;;  %v619_v48 = vld [vmem:[%s6696_s4 + $0xad8] sm:$0xff] }
 0x178   : > { %4827 = vmatpush1.bf16.msra.mxu1 %v4826_v58  ;;  %v601_v58 = vld [vmem:[%s6696_s4 + $0xa48] sm:$0xff] }
 0x179   : > { %5723 = vmatpush1.bf16.msra.mxu0 %v5722_v59  ;;  %4829 = vmatprep.subr.bf16.mxu1 %v4828_v61  ;;  %v603_v59 = vld [vmem:[%s6696_s4 + $0xa58] sm:$0xff]  ;;  %v2128_v61 = vcombine.high %v7472_v13, %v7472_v13 }
 0x17a   : > { %5725 = vmatprep.subr.bf16.mxu0 %v5724_v2  ;;  %v4846_v2 = vpack.c.bf16 %v598_v53, %v596_v26  ;;  %v4848_v51 = vpack.c.bf16 %v603_v59, %v601_v58  ;;  %v5758_v26 = vpack.c.bf16 %v1510_v56, %v1508_v45  ;;  %v4864_v53 = vpack.c.bf16 %v619_v48, %v617_v47  ;;  %v1514_v59 = vld [vmem:[%s6696_s4 + $0x26d0] sm:$0xff]  ;;  %v1528_v45 = vld [vmem:[%s6696_s4 + $0x2740] sm:$0xff]  ;;  %v637_v47 = vld [vmem:[%s6696_s4 + $0xb68] sm:$0xff] }
 0x17b   : > { %v1530_v56 = vld [vmem:[%s6696_s4 + $0x2750] sm:$0xff]  ;;  %v639_v48 = vld [vmem:[%s6696_s4 + $0xb78] sm:$0xff] }
 0x17c   : > { %4831 = vmatpush1.bf16.msra.mxu1 %v4830_v6  ;;  %v1498_v6 = vld [vmem:[%s6696_s4 + $0x2650] sm:$0xff] }
 0x17d   : > { %5727 = vmatpush1.bf16.msra.mxu0 %v5726_v7  ;;  %4833 = vmatprep.subr.bf16.mxu1 %v4832_v34  ;;  %v605_v7 = vld [vmem:[%s6696_s4 + $0xa68] sm:$0xff]  ;;  %v607_v34 = vld [vmem:[%s6696_s4 + $0xa78] sm:$0xff]  ;;  %v5746_v14 = vpack.c.bf16 %v1498_v6, %v1496_v4  ;;  %v1516_v4 = vld [vmem:[%s6696_s4 + $0x26e0] sm:$0xff] }
 0x17e   : > { %5729 = vmatprep.subr.bf16.mxu0 %v5728_v15  ;;  %v4852_v15 = vpack.c.bf16 %v607_v34, %v605_v7  ;;  %v1518_v6 = vld [vmem:[%s6696_s4 + $0x26f0] sm:$0xff]  ;;  %v625_v7 = vld [vmem:[%s6696_s4 + $0xb08] sm:$0xff]  ;;  %v627_v34 = vld [vmem:[%s6696_s4 + $0xb18] sm:$0xff] }
 0x180   : > { %4835 = vmatpush1.bf16.msra.mxu1 %v4834_v21  ;;  %v609_v21 = vld [vmem:[%s6696_s4 + $0xa88] sm:$0xff] }
 0x181   : > { %5731 = vmatpush1.bf16.msra.mxu0 %v5730_v22  ;;  %4837 = vmatprep.subr.bf16.mxu1 %v4836_v24  ;;  %v611_v22 = vld [vmem:[%s6696_s4 + $0xa98] sm:$0xff]  ;;  %v1505_v24 = vld [vmem:[%s6696_s4 + $0x2688] sm:$0xff] }
 0x182   : > { %5733 = vmatprep.subr.bf16.mxu0 %v5732_v30  ;;  %v4856_v30 = vpack.c.bf16 %v611_v22, %v609_v21  ;;  %v5752_v60 = vpack.c.bf16 %v1507_v25, %v1505_v24  ;;  %v629_v21 = vld [vmem:[%s6696_s4 + $0xb28] sm:$0xff]  ;;  %v631_v22 = vld [vmem:[%s6696_s4 + $0xb38] sm:$0xff] }
 0x183   : > { %v1525_v24 = vld [vmem:[%s6696_s4 + $0x2728] sm:$0xff]  ;;  %v1527_v25 = vld [vmem:[%s6696_s4 + $0x2738] sm:$0xff] }
 0x184   : > { %4839 = vmatpush1.bf16.msra.mxu1 %v4838_v39  ;;  %v1509_v39 = vld [vmem:[%s6696_s4 + $0x26a8] sm:$0xff] }
 0x185   : > { %5735 = vmatpush1.bf16.msra.mxu0 %v5734_v40  ;;  %4841 = vmatprep.subr.bf16.mxu1 %v4840_v41  ;;  %v1511_v40 = vld [vmem:[%s6696_s4 + $0x26b8] sm:$0xff]  ;;  %v4858_v41 = vpack.c.bf16 %v610_v33, %v608_v32  ;;  %v628_v32 = vld [vmem:[%s6696_s4 + $0xb20] sm:$0xff]  ;;  %v630_v33 = vld [vmem:[%s6696_s4 + $0xb30] sm:$0xff] }
 0x186   : > { %5737 = vmatprep.subr.bf16.mxu0 %v5736_v10  ;;  %v614_v10 = vld [vmem:[%s6696_s4 + $0xab0] sm:$0xff]  ;;  %v5756_v46 = vpack.c.bf16 %v1511_v40, %v1509_v39  ;;  %v1529_v39 = vld [vmem:[%s6696_s4 + $0x2748] sm:$0xff]  ;;  %v1531_v40 = vld [vmem:[%s6696_s4 + $0x2758] sm:$0xff] }
 0x187   : > { %2721 = vmatmul.mubr.f32.vlgmr.msra.gmra.mrb[0].mxu1 %v7327_v23  ;;  %v602_v23 = vld [vmem:[%s6696_s4 + $0xa50] sm:$0xff] }
 0x188   : > { %4843 = vmatpush1.bf16.msra.mxu1 %v4842_v50  ;;  %3715 = vmatmul.mubr.f32.vlgmr.msra.gmra.mrb[0].mxu0 %v7333_v27  ;;  %v1501_v27 = vld [vmem:[%s6696_s4 + $0x2668] sm:$0xff]  ;;  %v4850_v11 = vpack.c.bf16 %v602_v23, %v600_v3  ;;  %v620_v3 = vld [vmem:[%s6696_s4 + $0xae0] sm:$0xff]  ;;  %v622_v23 = vld [vmem:[%s6696_s4 + $0xaf0] sm:$0xff] }
 0x189   : > { %5739 = vmatpush1.bf16.msra.mxu0 %v5738_v52  ;;  %4845 = vmatprep.subr.bf16.mxu1 %v4844_v8  ;;  %v5748_v19 = vpack.c.bf16 %v1503_v9, %v1501_v27  ;;  %v1513_v50 = vld [vmem:[%s6696_s4 + $0x26c8] sm:$0xff]  ;;  %v1515_v52 = vld [vmem:[%s6696_s4 + $0x26d8] sm:$0xff]  ;;  %v4862_v8 = vpack.c.bf16 %v614_v10, %v612_v44  ;;  %v632_v44 = vld [vmem:[%s6696_s4 + $0xb40] sm:$0xff] }
 0x18a   : > { %5741 = vmatprep.subr.bf16.mxu0 %v5740_v57  ;;  %2791 = vmatprep.mubr.f32.mxu1 %v2128_v61  ;;  %v618_v57 = vld [vmem:[%s6696_s4 + $0xad0] sm:$0xff]  ;;  %v5760_v58 = vpack.c.bf16 %v1515_v52, %v1513_v50  ;;  %v621_v61 = vld [vmem:[%s6696_s4 + $0xae8] sm:$0xff]  ;;  %v1523_v9 = vld [vmem:[%s6696_s4 + $0x2718] sm:$0xff] }
 0x18b   : > { %3785 = vmatprep.mubr.f32.mxu0 %v2247_v1  ;;  %v1519_v1 = vld [vmem:[%s6696_s4 + $0x26f8] sm:$0xff]  ;;  %v1521_v27 = vld [vmem:[%s6696_s4 + $0x2708] sm:$0xff]  ;;  %v634_v10 = vld [vmem:[%s6696_s4 + $0xb50] sm:$0xff] }
 0x18c   : > { %4847 = vmatpush1.bf16.msra.mxu1 %v4846_v2  ;;  %v4866_v2 = vpack.c.bf16 %v618_v57, %v616_v54  ;;  %v1533_v50 = vld [vmem:[%s6696_s4 + $0x2768] sm:$0xff]  ;;  %v1535_v52 = vld [vmem:[%s6696_s4 + $0x2778] sm:$0xff]  ;;  %v636_v54 = vld [vmem:[%s6696_s4 + $0xb60] sm:$0xff] }
 0x18d   : > { %5743 = vmatpush1.bf16.msra.mxu0 %v5742_v31  ;;  %4849 = vmatprep.subr.bf16.mxu1 %v4848_v51  ;;  %v5762_v31 = vpack.c.bf16 %v1514_v59, %v1512_v29  ;;  %v4868_v51 = vpack.c.bf16 %v623_v62, %v621_v61  ;;  %v638_v57 = vld [vmem:[%s6696_s4 + $0xb70] sm:$0xff]  ;;  %v1532_v29 = vld [vmem:[%s6696_s4 + $0x2760] sm:$0xff]  ;;  %v641_v61 = vld [vmem:[%s6696_s4 + $0xb88] sm:$0xff] }
 0x18e   : > { %5745 = vmatprep.subr.bf16.mxu0 %v5744_v5  ;;  %v5764_v5 = vpack.c.bf16 %v1519_v1, %v1517_v0  ;;  %v1534_v59 = vld [vmem:[%s6696_s4 + $0x2770] sm:$0xff]  ;;  %v643_v62 = vld [vmem:[%s6696_s4 + $0xb98] sm:$0xff]  ;;  %v1537_v0 = vld [vmem:[%s6696_s4 + $0x2788] sm:$0xff] }
 0x18f   : > { %v1539_v1 = vld [vmem:[%s6696_s4 + $0x2798] sm:$0xff] }
 0x190   : > { %4851 = vmatpush1.bf16.msra.mxu1 %v4850_v11  ;;  %v4870_v11 = vpack.c.bf16 %v622_v23, %v620_v3  ;;  %v640_v3 = vld [vmem:[%s6696_s4 + $0xb80] sm:$0xff]  ;;  %v642_v23 = vld [vmem:[%s6696_s4 + $0xb90] sm:$0xff] }
 0x191   : > { %5747 = vmatpush1.bf16.msra.mxu0 %v5746_v14  ;;  %4853 = vmatprep.subr.bf16.mxu1 %v4852_v15  ;;  %v5766_v14 = vpack.c.bf16 %v1518_v6, %v1516_v4  ;;  %v4872_v15 = vpack.c.bf16 %v627_v34, %v625_v7  ;;  %v1536_v4 = vld [vmem:[%s6696_s4 + $0x2780] sm:$0xff]  ;;  %v1538_v6 = vld [vmem:[%s6696_s4 + $0x2790] sm:$0xff]  ;;  %v645_v7 = vld [vmem:[%s6696_s4 + $0xba8] sm:$0xff] }
 0x192   : > { %5749 = vmatprep.subr.bf16.mxu0 %v5748_v19  ;;  %v5768_v19 = vpack.c.bf16 %v1523_v9, %v1521_v27  ;;  %v647_v34 = vld [vmem:[%s6696_s4 + $0xbb8] sm:$0xff]  ;;  %v1541_v27 = vld [vmem:[%s6696_s4 + $0x27a8] sm:$0xff] }
 0x193   : > { %v1543_v9 = vld [vmem:[%s6696_s4 + $0x27b8] sm:$0xff] }
 0x194   : > { %4855 = vmatpush1.bf16.msra.mxu1 %v4854_v55  ;;  %v4874_v55 = vpack.c.bf16 %v626_v17, %v624_v16  ;;  %v644_v16 = vld [vmem:[%s6696_s4 + $0xba0] sm:$0xff]  ;;  %v646_v17 = vld [vmem:[%s6696_s4 + $0xbb0] sm:$0xff] }
 0x195   : > { %5751 = vmatpush1.bf16.msra.mxu0 %v5750_v28  ;;  %4857 = vmatprep.subr.bf16.mxu1 %v4856_v30  ;;  %v5770_v28 = vpack.c.bf16 %v1522_v20, %v1520_v18  ;;  %v4876_v30 = vpack.c.bf16 %v631_v22, %v629_v21  ;;  %v1540_v18 = vld [vmem:[%s6696_s4 + $0x27a0] sm:$0xff]  ;;  %v1542_v20 = vld [vmem:[%s6696_s4 + $0x27b0] sm:$0xff]  ;;  %v649_v21 = vld [vmem:[%s6696_s4 + $0xbc8] sm:$0xff] }
 0x196   : > { %5753 = vmatprep.subr.bf16.mxu0 %v5752_v60  ;;  %v5772_v60 = vpack.c.bf16 %v1527_v25, %v1525_v24  ;;  %v651_v22 = vld [vmem:[%s6696_s4 + $0xbd8] sm:$0xff]  ;;  %v1545_v24 = vld [vmem:[%s6696_s4 + $0x27c8] sm:$0xff] }
 0x197   : > { %v1547_v25 = vld [vmem:[%s6696_s4 + $0x27d8] sm:$0xff] }
 0x198   : > { %4859 = vmatpush1.bf16.msra.mxu1 %v4858_v41  ;;  %v4878_v41 = vpack.c.bf16 %v630_v33, %v628_v32  ;;  %v648_v32 = vld [vmem:[%s6696_s4 + $0xbc0] sm:$0xff]  ;;  %v650_v33 = vld [vmem:[%s6696_s4 + $0xbd0] sm:$0xff] }
 0x199   : > { %5755 = vmatpush1.bf16.msra.mxu0 %v5754_v42  ;;  %4861 = vmatprep.subr.bf16.mxu1 %v4860_v43  ;;  %v5774_v42 = vpack.c.bf16 %v1526_v36, %v1524_v35  ;;  %v4880_v43 = vpack.c.bf16 %v635_v38, %v633_v37  ;;  %v1544_v35 = vld [vmem:[%s6696_s4 + $0x27c0] sm:$0xff]  ;;  %v1546_v36 = vld [vmem:[%s6696_s4 + $0x27d0] sm:$0xff]  ;;  %v653_v37 = vld [vmem:[%s6696_s4 + $0xbe8] sm:$0xff] }
 0x19a   : > { %5757 = vmatprep.subr.bf16.mxu0 %v5756_v46  ;;  %v5776_v46 = vpack.c.bf16 %v1531_v40, %v1529_v39  ;;  %v655_v38 = vld [vmem:[%s6696_s4 + $0xbf8] sm:$0xff]  ;;  %v1549_v39 = vld [vmem:[%s6696_s4 + $0x27e8] sm:$0xff] }
 0x19b   : > { %v1551_v40 = vld [vmem:[%s6696_s4 + $0x27f8] sm:$0xff] }
 0x19c   : > { %4863 = vmatpush1.bf16.msra.mxu1 %v4862_v8  ;;  %v4882_v8 = vpack.c.bf16 %v634_v10, %v632_v44  ;;  %v652_v44 = vld [vmem:[%s6696_s4 + $0xbe0] sm:$0xff]  ;;  %v654_v10 = vld [vmem:[%s6696_s4 + $0xbf0] sm:$0xff] }
 0x19d   : > { %5759 = vmatpush1.bf16.msra.mxu0 %v5758_v26  ;;  %4865 = vmatprep.subr.bf16.mxu1 %v4864_v53  ;;  %v5778_v26 = vpack.c.bf16 %v1530_v56, %v1528_v45  ;;  %v4884_v53 = vpack.c.bf16 %v639_v48, %v637_v47  ;;  %v1548_v45 = vld [vmem:[%s6696_s4 + $0x27e0] sm:$0xff]  ;;  %v1550_v56 = vld [vmem:[%s6696_s4 + $0x27f0] sm:$0xff]  ;;  %v657_v47 = vld [vmem:[%s6696_s4 + $0xc08] sm:$0xff] }
 0x19e   : > { %5761 = vmatprep.subr.bf16.mxu0 %v5760_v58  ;;  %v5780_v58 = vpack.c.bf16 %v1535_v52, %v1533_v50  ;;  %v659_v48 = vld [vmem:[%s6696_s4 + $0xc18] sm:$0xff]  ;;  %v1553_v50 = vld [vmem:[%s6696_s4 + $0x2808] sm:$0xff] }
 0x19f   : > { %v1555_v52 = vld [vmem:[%s6696_s4 + $0x2818] sm:$0xff] }
 0x1a0   : > { %4867 = vmatpush1.bf16.msra.mxu1 %v4866_v2  ;;  %v4886_v2 = vpack.c.bf16 %v638_v57, %v636_v54  ;;  %v5798_v54 = vpack.c.bf16 %v1550_v56, %v1548_v45  ;;  %v4904_v57 = vpack.c.bf16 %v659_v48, %v657_v47  ;;  %v672_v56 = vld [vmem:[%s6696_s4 + $0xc80] sm:$0xff]  ;;  %v674_v47 = vld [vmem:[%s6696_s4 + $0xc90] sm:$0xff] }
 0x1a1   : > { %5763 = vmatpush1.bf16.msra.mxu0 %v5762_v31  ;;  %4869 = vmatprep.subr.bf16.mxu1 %v4868_v51  ;;  %v5782_v31 = vpack.c.bf16 %v1534_v59, %v1532_v29  ;;  %v4888_v51 = vpack.c.bf16 %v643_v62, %v641_v61  ;;  %v656_v29 = vld [vmem:[%s6696_s4 + $0xc00] sm:$0xff]  ;;  %v5800_v61 = vpack.c.bf16 %v1555_v52, %v1553_v50  ;;  %v1554_v62 = vld [vmem:[%s6696_s4 + $0x2810] sm:$0xff] }
 0x1a2   : > { %5765 = vmatprep.subr.bf16.mxu0 %v5764_v5  ;;  %v5784_v5 = vpack.c.bf16 %v1539_v1, %v1537_v0  ;;  %v1552_v59 = vld [vmem:[%s6696_s4 + $0x2800] sm:$0xff]  ;;  %v661_v0 = vld [vmem:[%s6696_s4 + $0xc28] sm:$0xff]  ;;  %v663_v1 = vld [vmem:[%s6696_s4 + $0xc38] sm:$0xff] }
 0x1a3   : > { %v1568_v48 = vld [vmem:[%s6696_s4 + $0x2880] sm:$0xff]  ;;  %v1570_v52 = vld [vmem:[%s6696_s4 + $0x2890] sm:$0xff] }
 0x1a4   : > { %4871 = vmatpush1.bf16.msra.mxu1 %v4870_v11  ;;  %v4890_v11 = vpack.c.bf16 %v642_v23, %v640_v3 }
 0x1a5   : > { %5767 = vmatpush1.bf16.msra.mxu0 %v5766_v14  ;;  %4873 = vmatprep.subr.bf16.mxu1 %v4872_v15  ;;  %v5786_v14 = vpack.c.bf16 %v1538_v6, %v1536_v4  ;;  %v4892_v15 = vpack.c.bf16 %v647_v34, %v645_v7  ;;  %v5802_v4 = vpack.c.bf16 %v1554_v62, %v1552_v59  ;;  %v660_v6 = vld [vmem:[%s6696_s4 + $0xc20] sm:$0xff]  ;;  %v662_v7 = vld [vmem:[%s6696_s4 + $0xc30] sm:$0xff] }
 0x1a6   : > { %5769 = vmatprep.subr.bf16.mxu0 %v5768_v19  ;;  %v5788_v19 = vpack.c.bf16 %v1543_v9, %v1541_v27  ;;  %v1556_v34 = vld [vmem:[%s6696_s4 + $0x2820] sm:$0xff]  ;;  %v1558_v9 = vld [vmem:[%s6696_s4 + $0x2830] sm:$0xff]  ;;  %v5818_v59 = vpack.c.bf16 %v1570_v52, %v1568_v48 }
 0x1a7   : > { %v676_v62 = vld [vmem:[%s6696_s4 + $0xca0] sm:$0xff] }
 0x1a8   : > { %4875 = vmatpush1.bf16.msra.mxu1 %v4874_v55  ;;  %v4894_v55 = vpack.c.bf16 %v646_v17, %v644_v16  ;;  %v1561_v16 = vld [vmem:[%s6696_s4 + $0x2848] sm:$0xff]  ;;  %v1563_v17 = vld [vmem:[%s6696_s4 + $0x2858] sm:$0xff]  ;;  %v692_v48 = vld [vmem:[%s6696_s4 + $0xd20] sm:$0xff] }
 0x1a9   : > { %5771 = vmatpush1.bf16.msra.mxu0 %v5770_v28  ;;  %4877 = vmatprep.subr.bf16.mxu1 %v4876_v30  ;;  %v5790_v28 = vpack.c.bf16 %v1542_v20, %v1540_v18  ;;  %v4896_v30 = vpack.c.bf16 %v651_v22, %v649_v21  ;;  %v5806_v20 = vpack.c.bf16 %v1558_v9, %v1556_v34  ;;  %v664_v22 = vld [vmem:[%s6696_s4 + $0xc40] sm:$0xff] }
 0x1aa   : > { %5773 = vmatprep.subr.bf16.mxu0 %v5772_v60  ;;  %v5792_v60 = vpack.c.bf16 %v1547_v25, %v1545_v24  ;;  %v1560_v24 = vld [vmem:[%s6696_s4 + $0x2840] sm:$0xff]  ;;  %v5808_v25 = vpack.c.bf16 %v1563_v17, %v1561_v16  ;;  %v1578_v16 = vld [vmem:[%s6696_s4 + $0x28d0] sm:$0xff]  ;;  %v685_v17 = vld [vmem:[%s6696_s4 + $0xce8] sm:$0xff] }
 0x1ab   : > { %v680_v9 = vld [vmem:[%s6696_s4 + $0xcc0] sm:$0xff] }
 0x1ac   : > { %4879 = vmatpush1.bf16.msra.mxu1 %v4878_v41  ;;  %v4898_v41 = vpack.c.bf16 %v650_v33, %v648_v32  ;;  %v1567_v32 = vld [vmem:[%s6696_s4 + $0x2878] sm:$0xff]  ;;  %v1588_v52 = vld [vmem:[%s6696_s4 + $0x2920] sm:$0xff] }
 0x1ad   : > { %5775 = vmatpush1.bf16.msra.mxu0 %v5774_v42  ;;  %4881 = vmatprep.subr.bf16.mxu1 %v4880_v43  ;;  %v5794_v42 = vpack.c.bf16 %v1546_v36, %v1544_v35  ;;  %v4900_v43 = vpack.c.bf16 %v655_v38, %v653_v37  ;;  %v668_v36 = vld [vmem:[%s6696_s4 + $0xc60] sm:$0xff]  ;;  %v670_v37 = vld [vmem:[%s6696_s4 + $0xc70] sm:$0xff] }
 0x1ae   : > { %5777 = vmatprep.subr.bf16.mxu0 %v5776_v46  ;;  %v5796_v46 = vpack.c.bf16 %v1551_v40, %v1549_v39  ;;  %v1564_v38 = vld [vmem:[%s6696_s4 + $0x2860] sm:$0xff]  ;;  %v1566_v40 = vld [vmem:[%s6696_s4 + $0x2870] sm:$0xff] }
 0x1af   : > { %v5814_v45 = vpack.c.bf16 %v1566_v40, %v1564_v38  ;;  %v688_v38 = vld [vmem:[%s6696_s4 + $0xd00] sm:$0xff] }
 0x1b0   : > { %4883 = vmatpush1.bf16.msra.mxu1 %v4882_v8  ;;  %v7606_v8 = vld [vmem:[%s6719_s20 + $0x18] sm:$0xff]  ;;  %v1584_v40 = vld [vmem:[%s6696_s4 + $0x2900] sm:$0xff] }
 0x1b1   : > { %5779 = vmatpush1.bf16.msra.mxu0 %v5778_v26  ;;  %4885 = vmatprep.subr.bf16.mxu1 %v4884_v53  ;;  %v4902_v26 = vpack.c.bf16 %v654_v10, %v652_v44  ;;  %v7609_v53 = vld [vmem:[%s6719_s20 + $0x50] sm:$0xff]  ;;  %v1571_v44 = vld [vmem:[%s6696_s4 + $0x2898] sm:$0xff]  ;;  %v4918_v10 = vpack.c.bf16 %v670_v37, %v668_v36 }
 0x1b2   : > { %5781 = vmatprep.subr.bf16.mxu0 %v5780_v58  ;;  %v658_v58 = vld [vmem:[%s6696_s4 + $0xc10] sm:$0xff]  ;;  %v7625_v3 = vrot.slane %v7609_v53, %v6817_v12 }
 0x1b3   : > { %v4906_v23 = vpack.c.bf16 %v658_v58, %v656_v29  ;;  %v1575_v29 = vld [vmem:[%s6696_s4 + $0x28b8] sm:$0xff]  ;;  %v4922_v58 = vpack.c.bf16 %v674_v47, %v672_v56 }
 0x1b4   : > { %4887 = vmatpush1.bf16.msra.mxu1 %v4886_v2  ;;  %v7619_v2 = vrot.slane %v7606_v8, %v6817_v12  ;;  %v2263_v18 = vcombine.high %v7625_v3, %v7625_v3 }
 0x1b5   : > { %5783 = vmatpush1.bf16.msra.mxu0 %v5782_v31  ;;  %4889 = vmatprep.subr.bf16.mxu1 %v4888_v51  ;;  %v1557_v31 = vld [vmem:[%s6696_s4 + $0x2828] sm:$0xff]  ;;  %v1559_v51 = vld [vmem:[%s6696_s4 + $0x2838] sm:$0xff] }
 0x1b6   : > { %5785 = vmatprep.subr.bf16.mxu0 %v5784_v5  ;;  %v4908_v5 = vpack.c.bf16 %v663_v1, %v661_v0  ;;  %v5804_v27 = vpack.c.bf16 %v1559_v51, %v1557_v31  ;;  %v678_v0 = vld [vmem:[%s6696_s4 + $0xcb0] sm:$0xff]  ;;  %v1572_v1 = vld [vmem:[%s6696_s4 + $0x28a0] sm:$0xff] }
 0x1b7   : > { %v1574_v51 = vld [vmem:[%s6696_s4 + $0x28b0] sm:$0xff] }
 0x1b8   : > { %4891 = vmatpush1.bf16.msra.mxu1 %v4890_v11  ;;  %v665_v11 = vld [vmem:[%s6696_s4 + $0xc48] sm:$0xff]  ;;  %v5822_v34 = vpack.c.bf16 %v1574_v51, %v1572_v1  ;;  %v696_v1 = vld [vmem:[%s6696_s4 + $0xd40] sm:$0xff] }
 0x1b9   : > { %5787 = vmatpush1.bf16.msra.mxu0 %v5786_v14  ;;  %4893 = vmatprep.subr.bf16.mxu1 %v4892_v15  ;;  %v667_v14 = vld [vmem:[%s6696_s4 + $0xc58] sm:$0xff]  ;;  %v2144_v15 = vcombine.high %v7619_v2, %v7619_v2  ;;  %v1592_v51 = vld [vmem:[%s6696_s4 + $0x2940] sm:$0xff] }
 0x1ba   : > { %5789 = vmatprep.subr.bf16.mxu0 %v5788_v19  ;;  %v4910_v19 = vpack.c.bf16 %v662_v7, %v660_v6  ;;  %v4912_v21 = vpack.c.bf16 %v667_v14, %v665_v11  ;;  %v1579_v6 = vld [vmem:[%s6696_s4 + $0x28d8] sm:$0xff]  ;;  %v4926_v7 = vpack.c.bf16 %v678_v0, %v676_v62  ;;  %v682_v11 = vld [vmem:[%s6696_s4 + $0xcd0] sm:$0xff]  ;;  %v1576_v14 = vld [vmem:[%s6696_s4 + $0x28c0] sm:$0xff] }
 0x1bc   : > { %4895 = vmatpush1.bf16.msra.mxu1 %v4894_v55  ;;  %v1562_v55 = vld [vmem:[%s6696_s4 + $0x2850] sm:$0xff] }
 0x1bd   : > { %5791 = vmatpush1.bf16.msra.mxu0 %v5790_v28  ;;  %4897 = vmatprep.subr.bf16.mxu1 %v4896_v30  ;;  %v669_v28 = vld [vmem:[%s6696_s4 + $0xc68] sm:$0xff]  ;;  %v671_v30 = vld [vmem:[%s6696_s4 + $0xc78] sm:$0xff]  ;;  %v5810_v35 = vpack.c.bf16 %v1562_v55, %v1560_v24  ;;  %v684_v24 = vld [vmem:[%s6696_s4 + $0xce0] sm:$0xff] }
 0x1be   : > { %5793 = vmatprep.subr.bf16.mxu0 %v5792_v60  ;;  %v4916_v60 = vpack.c.bf16 %v671_v30, %v669_v28  ;;  %v1580_v55 = vld [vmem:[%s6696_s4 + $0x28e0] sm:$0xff]  ;;  %v1582_v30 = vld [vmem:[%s6696_s4 + $0x28f0] sm:$0xff] }
 0x1bf   : > { %v5830_v36 = vpack.c.bf16 %v1582_v30, %v1580_v55  ;;  %v704_v55 = vld [vmem:[%s6696_s4 + $0xd80] sm:$0xff] }
 0x1c0   : > { %4899 = vmatpush1.bf16.msra.mxu1 %v4898_v41  ;;  %v673_v41 = vld [vmem:[%s6696_s4 + $0xc88] sm:$0xff]  ;;  %v1600_v30 = vld [vmem:[%s6696_s4 + $0x2980] sm:$0xff] }
 0x1c1   : > { %5795 = vmatpush1.bf16.msra.mxu0 %v5794_v42  ;;  %4901 = vmatprep.subr.bf16.mxu1 %v4900_v43  ;;  %v675_v42 = vld [vmem:[%s6696_s4 + $0xc98] sm:$0xff]  ;;  %v1569_v43 = vld [vmem:[%s6696_s4 + $0x2888] sm:$0xff] }
 0x1c2   : > { %5797 = vmatprep.subr.bf16.mxu0 %v5796_v46  ;;  %v4920_v46 = vpack.c.bf16 %v675_v42, %v673_v41  ;;  %v5816_v50 = vpack.c.bf16 %v1571_v44, %v1569_v43  ;;  %v1586_v42 = vld [vmem:[%s6696_s4 + $0x2910] sm:$0xff]  ;;  %v693_v43 = vld [vmem:[%s6696_s4 + $0xd28] sm:$0xff]  ;;  %v695_v44 = vld [vmem:[%s6696_s4 + $0xd38] sm:$0xff] }
 0x1c3   : > { %v5834_v56 = vpack.c.bf16 %v1586_v42, %v1584_v40  ;;  %v4940_v47 = vpack.c.bf16 %v695_v44, %v693_v43  ;;  %v708_v40 = vld [vmem:[%s6696_s4 + $0xda0] sm:$0xff]  ;;  %v1606_v44 = vld [vmem:[%s6696_s4 + $0x29b0] sm:$0xff] }
 0x1c4   : > { %4903 = vmatpush1.bf16.msra.mxu1 %v4902_v26  ;;  %v677_v26 = vld [vmem:[%s6696_s4 + $0xca8] sm:$0xff]  ;;  %v1604_v42 = vld [vmem:[%s6696_s4 + $0x29a0] sm:$0xff] }
 0x1c5   : > { %5799 = vmatpush1.bf16.msra.mxu0 %v5798_v54  ;;  %4905 = vmatprep.subr.bf16.mxu1 %v4904_v57  ;;  %v679_v54 = vld [vmem:[%s6696_s4 + $0xcb8] sm:$0xff]  ;;  %v1573_v57 = vld [vmem:[%s6696_s4 + $0x28a8] sm:$0xff] }
 0x1c6   : > { %5801 = vmatprep.subr.bf16.mxu0 %v5800_v61  ;;  %v4924_v61 = vpack.c.bf16 %v679_v54, %v677_v26  ;;  %v5820_v31 = vpack.c.bf16 %v1575_v29, %v1573_v57  ;;  %v1590_v54 = vld [vmem:[%s6696_s4 + $0x2930] sm:$0xff]  ;;  %v697_v57 = vld [vmem:[%s6696_s4 + $0xd48] sm:$0xff]  ;;  %v699_v29 = vld [vmem:[%s6696_s4 + $0xd58] sm:$0xff] }
 0x1c7   : > { %2792 = vmatmul.mubr.f32.vlgmr.msra.gmra.mrb[0].mxu1 %v7472_v13  ;;  %v666_v13 = vld [vmem:[%s6696_s4 + $0xc50] sm:$0xff]  ;;  %v5838_v62 = vpack.c.bf16 %v1590_v54, %v1588_v52  ;;  %v4944_v0 = vpack.c.bf16 %v699_v29, %v697_v57  ;;  %v712_v52 = vld [vmem:[%s6696_s4 + $0xdc0] sm:$0xff] }
 0x1c8   : > { %4907 = vmatpush1.bf16.msra.mxu1 %v4906_v23  ;;  %3786 = vmatmul.mubr.f32.vlgmr.msra.gmra.mrb[0].mxu0 %v7477_v49  ;;  %v1565_v49 = vld [vmem:[%s6696_s4 + $0x2868] sm:$0xff]  ;;  %v4914_v33 = vpack.c.bf16 %v666_v13, %v664_v22  ;;  %v5826_v22 = vpack.c.bf16 %v1578_v16, %v1576_v14  ;;  %v700_v14 = vld [vmem:[%s6696_s4 + $0xd60] sm:$0xff]  ;;  %v1610_v29 = vld [vmem:[%s6696_s4 + $0x29d0] sm:$0xff] }
 0x1c9   : > { %5803 = vmatpush1.bf16.msra.mxu0 %v5802_v4  ;;  %4909 = vmatprep.subr.bf16.mxu1 %v4908_v5  ;;  %v5812_v39 = vpack.c.bf16 %v1567_v32, %v1565_v49  ;;  %v681_v23 = vld [vmem:[%s6696_s4 + $0xcc8] sm:$0xff]  ;;  %v683_v4 = vld [vmem:[%s6696_s4 + $0xcd8] sm:$0xff]  ;;  %v1596_v16 = vld [vmem:[%s6696_s4 + $0x2960] sm:$0xff] }
 0x1ca   : > { %5805 = vmatprep.subr.bf16.mxu0 %v5804_v27  ;;  %2862 = vmatprep.mubr.f32.mxu1 %v2144_v15  ;;  %v1577_v5 = vld [vmem:[%s6696_s4 + $0x28c8] sm:$0xff]  ;;  %v4928_v27 = vpack.c.bf16 %v683_v4, %v681_v23  ;;  %v691_v32 = vld [vmem:[%s6696_s4 + $0xd18] sm:$0xff]  ;;  %v1594_v4 = vld [vmem:[%s6696_s4 + $0x2950] sm:$0xff] }
 0x1cb   : > { %3856 = vmatprep.mubr.f32.mxu0 %v2263_v18  ;;  %v5824_v15 = vpack.c.bf16 %v1579_v6, %v1577_v5  ;;  %v687_v18 = vld [vmem:[%s6696_s4 + $0xcf8] sm:$0xff]  ;;  %v689_v49 = vld [vmem:[%s6696_s4 + $0xd08] sm:$0xff]  ;;  %v1608_v54 = vld [vmem:[%s6696_s4 + $0x29c0] sm:$0xff] }
 0x1cc   : > { %4911 = vmatpush1.bf16.msra.mxu1 %v4910_v19  ;;  %v1581_v19 = vld [vmem:[%s6696_s4 + $0x28e8] sm:$0xff]  ;;  %v4932_v13 = vpack.c.bf16 %v687_v18, %v685_v17  ;;  %v4936_v37 = vpack.c.bf16 %v691_v32, %v689_v49  ;;  %v703_v6 = vld [vmem:[%s6696_s4 + $0xd78] sm:$0xff]  ;;  %v1598_v18 = vld [vmem:[%s6696_s4 + $0x2970] sm:$0xff] }
 0x1cd   : > { %5807 = vmatpush1.bf16.msra.mxu0 %v5806_v20  ;;  %4913 = vmatprep.subr.bf16.mxu1 %v4912_v21  ;;  %v1583_v20 = vld [vmem:[%s6696_s4 + $0x28f8] sm:$0xff]  ;;  %v4930_v21 = vpack.c.bf16 %v682_v11, %v680_v9  ;;  %v701_v5 = vld [vmem:[%s6696_s4 + $0xd68] sm:$0xff]  ;;  %v5842_v9 = vpack.c.bf16 %v1594_v4, %v1592_v51  ;;  %v1602_v32 = vld [vmem:[%s6696_s4 + $0x2990] sm:$0xff] }
 0x1ce   : > { %5809 = vmatprep.subr.bf16.mxu0 %v5808_v25  ;;  %v686_v25 = vld [vmem:[%s6696_s4 + $0xcf0] sm:$0xff]  ;;  %v5828_v28 = vpack.c.bf16 %v1583_v20, %v1581_v19  ;;  %v4948_v11 = vpack.c.bf16 %v703_v6, %v701_v5  ;;  %v705_v19 = vld [vmem:[%s6696_s4 + $0xd88] sm:$0xff]  ;;  %v707_v20 = vld [vmem:[%s6696_s4 + $0xd98] sm:$0xff] }
 0x1cf   : > { %v716_v51 = vld [vmem:[%s6696_s4 + $0xde0] sm:$0xff]  ;;  %v1614_v6 = vld [vmem:[%s6696_s4 + $0x29f0] sm:$0xff] }
 0x1d0   : > { %4915 = vmatpush1.bf16.msra.mxu1 %v4914_v33  ;;  %v1585_v33 = vld [vmem:[%s6696_s4 + $0x2908] sm:$0xff]  ;;  %v1612_v4 = vld [vmem:[%s6696_s4 + $0x29e0] sm:$0xff] }
 0x1d1   : > { %5811 = vmatpush1.bf16.msra.mxu0 %v5810_v35  ;;  %4917 = vmatprep.subr.bf16.mxu1 %v4916_v60  ;;  %v1587_v35 = vld [vmem:[%s6696_s4 + $0x2918] sm:$0xff]  ;;  %v4934_v60 = vpack.c.bf16 %v686_v25, %v684_v24  ;;  %v5846_v24 = vpack.c.bf16 %v1598_v18, %v1596_v16  ;;  %v4952_v25 = vpack.c.bf16 %v707_v20, %v705_v19  ;;  %v720_v18 = vld [vmem:[%s6696_s4 + $0xe00] sm:$0xff]  ;;  %v722_v19 = vld [vmem:[%s6696_s4 + $0xe10] sm:$0xff] }
 0x1d2   : > { %5813 = vmatprep.subr.bf16.mxu0 %v5812_v39  ;;  %v690_v39 = vld [vmem:[%s6696_s4 + $0xd10] sm:$0xff]  ;;  %v5832_v41 = vpack.c.bf16 %v1587_v35, %v1585_v33  ;;  %v709_v33 = vld [vmem:[%s6696_s4 + $0xda8] sm:$0xff]  ;;  %v711_v35 = vld [vmem:[%s6696_s4 + $0xdb8] sm:$0xff]  ;;  %v5862_v16 = vpack.c.bf16 %v1614_v6, %v1612_v4 }
 0x1d3   : > { %v1616_v20 = vld [vmem:[%s6696_s4 + $0x2a00] sm:$0xff] }
 0x1d4   : > { %4919 = vmatpush1.bf16.msra.mxu1 %v4918_v10  ;;  %v1589_v10 = vld [vmem:[%s6696_s4 + $0x2928] sm:$0xff]  ;;  %v736_v6 = vld [vmem:[%s6696_s4 + $0xe80] sm:$0xff] }
 0x1d5   : > { %5815 = vmatpush1.bf16.msra.mxu0 %v5814_v45  ;;  %4921 = vmatprep.subr.bf16.mxu1 %v4920_v46  ;;  %v1591_v45 = vld [vmem:[%s6696_s4 + $0x2938] sm:$0xff]  ;;  %v4938_v46 = vpack.c.bf16 %v690_v39, %v688_v38  ;;  %v5850_v38 = vpack.c.bf16 %v1602_v32, %v1600_v30  ;;  %v4956_v39 = vpack.c.bf16 %v711_v35, %v709_v33  ;;  %v724_v32 = vld [vmem:[%s6696_s4 + $0xe20] sm:$0xff]  ;;  %v726_v33 = vld [vmem:[%s6696_s4 + $0xe30] sm:$0xff] }
 0x1d6   : > { %5817 = vmatprep.subr.bf16.mxu0 %v5816_v50  ;;  %v694_v50 = vld [vmem:[%s6696_s4 + $0xd30] sm:$0xff]  ;;  %v5836_v26 = vpack.c.bf16 %v1591_v45, %v1589_v10  ;;  %v713_v10 = vld [vmem:[%s6696_s4 + $0xdc8] sm:$0xff]  ;;  %v715_v45 = vld [vmem:[%s6696_s4 + $0xdd8] sm:$0xff] }
 0x1d7   : > { %v1620_v35 = vld [vmem:[%s6696_s4 + $0x2a20] sm:$0xff] }
 0x1d8   : > { %4923 = vmatpush1.bf16.msra.mxu1 %v4922_v58  ;;  %v1593_v58 = vld [vmem:[%s6696_s4 + $0x2948] sm:$0xff] }
 0x1d9   : > { %5819 = vmatpush1.bf16.msra.mxu0 %v5818_v59  ;;  %4925 = vmatprep.subr.bf16.mxu1 %v4924_v61  ;;  %v1595_v59 = vld [vmem:[%s6696_s4 + $0x2958] sm:$0xff]  ;;  %v4942_v61 = vpack.c.bf16 %v694_v50, %v692_v48  ;;  %v5854_v48 = vpack.c.bf16 %v1606_v44, %v1604_v42  ;;  %v4960_v50 = vpack.c.bf16 %v715_v45, %v713_v10  ;;  %v728_v45 = vld [vmem:[%s6696_s4 + $0xe40] sm:$0xff] }
 0x1da   : > { %5821 = vmatprep.subr.bf16.mxu0 %v5820_v31  ;;  %v698_v31 = vld [vmem:[%s6696_s4 + $0xd50] sm:$0xff]  ;;  %v5840_v23 = vpack.c.bf16 %v1595_v59, %v1593_v58  ;;  %v717_v58 = vld [vmem:[%s6696_s4 + $0xde8] sm:$0xff]  ;;  %v719_v59 = vld [vmem:[%s6696_s4 + $0xdf8] sm:$0xff] }
 0x1dc   : > { %4927 = vmatpush1.bf16.msra.mxu1 %v4926_v7  ;;  %v1597_v7 = vld [vmem:[%s6696_s4 + $0x2968] sm:$0xff] }
 0x1dd   : > { %5823 = vmatpush1.bf16.msra.mxu0 %v5822_v34  ;;  %4929 = vmatprep.subr.bf16.mxu1 %v4928_v27  ;;  %v1599_v34 = vld [vmem:[%s6696_s4 + $0x2978] sm:$0xff]  ;;  %v4946_v27 = vpack.c.bf16 %v698_v31, %v696_v1  ;;  %v5858_v1 = vpack.c.bf16 %v1610_v29, %v1608_v54  ;;  %v4964_v31 = vpack.c.bf16 %v719_v59, %v717_v58  ;;  %v732_v29 = vld [vmem:[%s6696_s4 + $0xe60] sm:$0xff]  ;;  %v734_v58 = vld [vmem:[%s6696_s4 + $0xe70] sm:$0xff] }
 0x1de   : > { %5825 = vmatprep.subr.bf16.mxu0 %v5824_v15  ;;  %v702_v15 = vld [vmem:[%s6696_s4 + $0xd70] sm:$0xff]  ;;  %v5844_v17 = vpack.c.bf16 %v1599_v34, %v1597_v7  ;;  %v721_v7 = vld [vmem:[%s6696_s4 + $0xe08] sm:$0xff]  ;;  %v723_v34 = vld [vmem:[%s6696_s4 + $0xe18] sm:$0xff] }
 0x1df   : > { %v1628_v59 = vld [vmem:[%s6696_s4 + $0x2a60] sm:$0xff] }
 0x1e0   : > { %4931 = vmatpush1.bf16.msra.mxu1 %v4930_v21  ;;  %v1601_v21 = vld [vmem:[%s6696_s4 + $0x2988] sm:$0xff] }
 0x1e1   : > { %5827 = vmatpush1.bf16.msra.mxu0 %v5826_v22  ;;  %4933 = vmatprep.subr.bf16.mxu1 %v4932_v13  ;;  %v1603_v22 = vld [vmem:[%s6696_s4 + $0x2998] sm:$0xff]  ;;  %v4950_v13 = vpack.c.bf16 %v702_v15, %v700_v14  ;;  %v2248_v14 = vcombine.high %v7609_v53, %v7609_v53 }
 0x1e2   : > { %5829 = vmatprep.subr.bf16.mxu0 %v5828_v28  ;;  %v706_v28 = vld [vmem:[%s6696_s4 + $0xd90] sm:$0xff]  ;;  %v5848_v49 = vpack.c.bf16 %v1603_v22, %v1601_v21  ;;  %v725_v22 = vld [vmem:[%s6696_s4 + $0xe28] sm:$0xff] }
 0x1e3   : > { %v1618_v21 = vld [vmem:[%s6696_s4 + $0x2a10] sm:$0xff] }
 0x1e4   : > { %4935 = vmatpush1.bf16.msra.mxu1 %v4934_v60  ;;  %v1605_v60 = vld [vmem:[%s6696_s4 + $0x29a8] sm:$0xff]  ;;  %v5866_v30 = vpack.c.bf16 %v1618_v21, %v1616_v20  ;;  %v740_v20 = vld [vmem:[%s6696_s4 + $0xea0] sm:$0xff] }
 0x1e5   : > { %5831 = vmatpush1.bf16.msra.mxu0 %v5830_v36  ;;  %4937 = vmatprep.subr.bf16.mxu1 %v4936_v37  ;;  %v1607_v36 = vld [vmem:[%s6696_s4 + $0x29b8] sm:$0xff]  ;;  %v4954_v37 = vpack.c.bf16 %v706_v28, %v704_v55  ;;  %v7769_v55 = vrot.slane %v2248_v14, %v6817_v12  ;;  %v4970_v28 = vpack.c.bf16 %v722_v19, %v720_v18  ;;  %v1636_v21 = vld [vmem:[%s6696_s4 + $0x2aa0] sm:$0xff] }
 0x1e6   : > { %5833 = vmatprep.subr.bf16.mxu0 %v5832_v41  ;;  %v710_v41 = vld [vmem:[%s6696_s4 + $0xdb0] sm:$0xff]  ;;  %v5852_v43 = vpack.c.bf16 %v1607_v36, %v1605_v60  ;;  %v743_v14 = vld [vmem:[%s6696_s4 + $0xeb8] sm:$0xff] }
 0x1e7   : > { %v1622_v36 = vld [vmem:[%s6696_s4 + $0x2a30] sm:$0xff]  ;;  %v2264_v42 = vcombine.high %v7769_v55, %v7769_v55 }
 0x1e8   : > { %4939 = vmatpush1.bf16.msra.mxu1 %v4938_v46  ;;  %v1609_v46 = vld [vmem:[%s6696_s4 + $0x29c8] sm:$0xff]  ;;  %v5870_v44 = vpack.c.bf16 %v1622_v36, %v1620_v35  ;;  %v744_v35 = vld [vmem:[%s6696_s4 + $0xec0] sm:$0xff] }
 0x1e9   : > { %5835 = vmatpush1.bf16.msra.mxu0 %v5834_v56  ;;  %4941 = vmatprep.subr.bf16.mxu1 %v4940_v47  ;;  %v1611_v56 = vld [vmem:[%s6696_s4 + $0x29d8] sm:$0xff]  ;;  %v4958_v47 = vpack.c.bf16 %v710_v41, %v708_v40  ;;  %v1625_v40 = vld [vmem:[%s6696_s4 + $0x2a48] sm:$0xff]  ;;  %v1640_v36 = vld [vmem:[%s6696_s4 + $0x2ac0] sm:$0xff] }
 0x1ea   : > { %5837 = vmatprep.subr.bf16.mxu0 %v5836_v26  ;;  %v714_v26 = vld [vmem:[%s6696_s4 + $0xdd0] sm:$0xff]  ;;  %v5856_v57 = vpack.c.bf16 %v1611_v56, %v1609_v46  ;;  %v1627_v41 = vld [vmem:[%s6696_s4 + $0x2a58] sm:$0xff]  ;;  %v1624_v46 = vld [vmem:[%s6696_s4 + $0x2a40] sm:$0xff] }
 0x1eb   : > { %v5872_v56 = vpack.c.bf16 %v1627_v41, %v1625_v40  ;;  %v751_v40 = vld [vmem:[%s6696_s4 + $0xef8] sm:$0xff]  ;;  %v1645_v41 = vld [vmem:[%s6696_s4 + $0x2ae8] sm:$0xff] }
 0x1ec   : > { %4943 = vmatpush1.bf16.msra.mxu1 %v4942_v61  ;;  %v1613_v61 = vld [vmem:[%s6696_s4 + $0x29e8] sm:$0xff] }
 0x1ed   : > { %5839 = vmatpush1.bf16.msra.mxu0 %v5838_v62  ;;  %4945 = vmatprep.subr.bf16.mxu1 %v4944_v0  ;;  %v1615_v62 = vld [vmem:[%s6696_s4 + $0x29f8] sm:$0xff]  ;;  %v4962_v0 = vpack.c.bf16 %v714_v26, %v712_v52 }
 0x1ee   : > { %5841 = vmatprep.subr.bf16.mxu0 %v5840_v23  ;;  %v718_v23 = vld [vmem:[%s6696_s4 + $0xdf0] sm:$0xff]  ;;  %v5860_v5 = vpack.c.bf16 %v1615_v62, %v1613_v61  ;;  %v1631_v52 = vld [vmem:[%s6696_s4 + $0x2a78] sm:$0xff] }
 0x1ef   : > { %v4966_v15 = vpack.c.bf16 %v718_v23, %v716_v51  ;;  %v1630_v62 = vld [vmem:[%s6696_s4 + $0x2a70] sm:$0xff]  ;;  %v1635_v51 = vld [vmem:[%s6696_s4 + $0x2a98] sm:$0xff]  ;;  %v4982_v23 = vpack.c.bf16 %v734_v58, %v732_v29  ;;  %v752_v29 = vld [vmem:[%s6696_s4 + $0xf00] sm:$0xff] }
 0x1f0   : > { %4947 = vmatpush1.bf16.msra.mxu1 %v4946_v27  ;;  %v2129_v27 = vcombine.high %v7606_v8, %v7606_v8  ;;  %v5878_v4 = vpack.c.bf16 %v1630_v62, %v1628_v59  ;;  %v754_v58 = vld [vmem:[%s6696_s4 + $0xf10] sm:$0xff]  ;;  %v1648_v59 = vld [vmem:[%s6696_s4 + $0x2b00] sm:$0xff] }
 0x1f1   : > { %5843 = vmatpush1.bf16.msra.mxu0 %v5842_v9  ;;  %4949 = vmatprep.subr.bf16.mxu1 %v4948_v11  ;;  %v1617_v9 = vld [vmem:[%s6696_s4 + $0x2a08] sm:$0xff]  ;;  %v1619_v11 = vld [vmem:[%s6696_s4 + $0x2a18] sm:$0xff]  ;;  %v1650_v62 = vld [vmem:[%s6696_s4 + $0x2b10] sm:$0xff] }
 0x1f2   : > { %5845 = vmatprep.subr.bf16.mxu0 %v5844_v17  ;;  %v4968_v17 = vpack.c.bf16 %v723_v34, %v721_v7  ;;  %v5864_v8 = vpack.c.bf16 %v1619_v11, %v1617_v9  ;;  %v7764_v53 = vrot.slane %v2129_v27, %v6817_v12  ;;  %v738_v7 = vld [vmem:[%s6696_s4 + $0xe90] sm:$0xff]  ;;  %v1632_v34 = vld [vmem:[%s6696_s4 + $0x2a80] sm:$0xff]  ;;  %v741_v11 = vld [vmem:[%s6696_s4 + $0xea8] sm:$0xff] }
 0x1f3   : > { %v1634_v9 = vld [vmem:[%s6696_s4 + $0x2a90] sm:$0xff]  ;;  %v4988_v19 = vpack.c.bf16 %v743_v14, %v741_v11  ;;  %v761_v11 = vld [vmem:[%s6696_s4 + $0xf48] sm:$0xff]  ;;  %v763_v14 = vld [vmem:[%s6696_s4 + $0xf58] sm:$0xff] }
 0x1f4   : > { %4951 = vmatpush1.bf16.msra.mxu1 %v4950_v13  ;;  %v727_v13 = vld [vmem:[%s6696_s4 + $0xe38] sm:$0xff]  ;;  %v5882_v18 = vpack.c.bf16 %v1634_v9, %v1632_v34  ;;  %v1652_v34 = vld [vmem:[%s6696_s4 + $0x2b20] sm:$0xff]  ;;  %v1654_v9 = vld [vmem:[%s6696_s4 + $0x2b30] sm:$0xff] }
 0x1f5   : > { %5847 = vmatpush1.bf16.msra.mxu0 %v5846_v24  ;;  %4953 = vmatprep.subr.bf16.mxu1 %v4952_v25  ;;  %v1621_v24 = vld [vmem:[%s6696_s4 + $0x2a28] sm:$0xff]  ;;  %v1623_v25 = vld [vmem:[%s6696_s4 + $0x2a38] sm:$0xff] }
 0x1f6   : > { %5849 = vmatprep.subr.bf16.mxu0 %v5848_v49  ;;  %v4972_v49 = vpack.c.bf16 %v727_v13, %v725_v22  ;;  %v5868_v60 = vpack.c.bf16 %v1623_v25, %v1621_v24  ;;  %v1638_v13 = vld [vmem:[%s6696_s4 + $0x2ab0] sm:$0xff]  ;;  %v745_v24 = vld [vmem:[%s6696_s4 + $0xec8] sm:$0xff]  ;;  %v747_v25 = vld [vmem:[%s6696_s4 + $0xed8] sm:$0xff] }
 0x1f8   : > { %4955 = vmatpush1.bf16.msra.mxu1 %v4954_v37  ;;  %v729_v37 = vld [vmem:[%s6696_s4 + $0xe48] sm:$0xff] }
 0x1f9   : > { %5851 = vmatpush1.bf16.msra.mxu0 %v5850_v38  ;;  %4957 = vmatprep.subr.bf16.mxu1 %v4956_v39  ;;  %v731_v38 = vld [vmem:[%s6696_s4 + $0xe58] sm:$0xff]  ;;  %v2145_v39 = vcombine.high %v7764_v53, %v7764_v53 }
 0x1fa   : > { %5853 = vmatprep.subr.bf16.mxu0 %v5852_v43  ;;  %v4974_v43 = vpack.c.bf16 %v726_v33, %v724_v32  ;;  %v4976_v10 = vpack.c.bf16 %v731_v38, %v729_v37  ;;  %v5886_v32 = vpack.c.bf16 %v1638_v13, %v1636_v21  ;;  %v4992_v33 = vpack.c.bf16 %v747_v25, %v745_v24  ;;  %v1642_v38 = vld [vmem:[%s6696_s4 + $0x2ad0] sm:$0xff]  ;;  %v1656_v21 = vld [vmem:[%s6696_s4 + $0x2b40] sm:$0xff]  ;;  %v765_v24 = vld [vmem:[%s6696_s4 + $0xf68] sm:$0xff] }
 0x1fb   : > { %v1658_v13 = vld [vmem:[%s6696_s4 + $0x2b50] sm:$0xff]  ;;  %v767_v25 = vld [vmem:[%s6696_s4 + $0xf78] sm:$0xff] }
 0x1fc   : > { %4959 = vmatpush1.bf16.msra.mxu1 %v4958_v47  ;;  %v1626_v47 = vld [vmem:[%s6696_s4 + $0x2a50] sm:$0xff] }
 0x1fd   : > { %5855 = vmatpush1.bf16.msra.mxu0 %v5854_v48  ;;  %4961 = vmatprep.subr.bf16.mxu1 %v4960_v50  ;;  %v733_v48 = vld [vmem:[%s6696_s4 + $0xe68] sm:$0xff]  ;;  %v735_v50 = vld [vmem:[%s6696_s4 + $0xe78] sm:$0xff]  ;;  %v5874_v54 = vpack.c.bf16 %v1626_v47, %v1624_v46  ;;  %v1644_v46 = vld [vmem:[%s6696_s4 + $0x2ae0] sm:$0xff] }
 0x1fe   : > { %5857 = vmatprep.subr.bf16.mxu0 %v5856_v57  ;;  %v4980_v57 = vpack.c.bf16 %v735_v50, %v733_v48  ;;  %v1646_v47 = vld [vmem:[%s6696_s4 + $0x2af0] sm:$0xff]  ;;  %v753_v48 = vld [vmem:[%s6696_s4 + $0xf08] sm:$0xff]  ;;  %v755_v50 = vld [vmem:[%s6696_s4 + $0xf18] sm:$0xff] }
 0x200   : > { %4963 = vmatpush1.bf16.msra.mxu1 %v4962_v0  ;;  %v737_v0 = vld [vmem:[%s6696_s4 + $0xe88] sm:$0xff] }
 0x201   : > { %5859 = vmatpush1.bf16.msra.mxu0 %v5858_v1  ;;  %4965 = vmatprep.subr.bf16.mxu1 %v4964_v31  ;;  %v739_v1 = vld [vmem:[%s6696_s4 + $0xe98] sm:$0xff]  ;;  %v1633_v31 = vld [vmem:[%s6696_s4 + $0x2a88] sm:$0xff] }
 0x202   : > { %5861 = vmatprep.subr.bf16.mxu0 %v5860_v5  ;;  %v4984_v5 = vpack.c.bf16 %v739_v1, %v737_v0  ;;  %v5880_v27 = vpack.c.bf16 %v1635_v51, %v1633_v31  ;;  %v757_v0 = vld [vmem:[%s6696_s4 + $0xf28] sm:$0xff]  ;;  %v759_v1 = vld [vmem:[%s6696_s4 + $0xf38] sm:$0xff] }
 0x203   : > { %v1653_v31 = vld [vmem:[%s6696_s4 + $0x2b28] sm:$0xff]  ;;  %v1655_v51 = vld [vmem:[%s6696_s4 + $0x2b38] sm:$0xff] }
 0x204   : > { %4967 = vmatpush1.bf16.msra.mxu1 %v4966_v15  ;;  %v1637_v15 = vld [vmem:[%s6696_s4 + $0x2aa8] sm:$0xff] }
 0x205   : > { %5863 = vmatpush1.bf16.msra.mxu0 %v5862_v16  ;;  %4969 = vmatprep.subr.bf16.mxu1 %v4968_v17  ;;  %v1639_v16 = vld [vmem:[%s6696_s4 + $0x2ab8] sm:$0xff]  ;;  %v4986_v17 = vpack.c.bf16 %v738_v7, %v736_v6  ;;  %v756_v6 = vld [vmem:[%s6696_s4 + $0xf20] sm:$0xff]  ;;  %v758_v7 = vld [vmem:[%s6696_s4 + $0xf30] sm:$0xff] }
 0x206   : > { %5865 = vmatprep.subr.bf16.mxu0 %v5864_v8  ;;  %v742_v8 = vld [vmem:[%s6696_s4 + $0xeb0] sm:$0xff]  ;;  %v5884_v22 = vpack.c.bf16 %v1639_v16, %v1637_v15  ;;  %v1657_v15 = vld [vmem:[%s6696_s4 + $0x2b48] sm:$0xff]  ;;  %v1659_v16 = vld [vmem:[%s6696_s4 + $0x2b58] sm:$0xff] }
 0x207   : > { %2863 = vmatmul.mubr.f32.vlgmr.msra.gmra.mrb[0].mxu1 %v7619_v2  ;;  %v730_v2 = vld [vmem:[%s6696_s4 + $0xe50] sm:$0xff] }
 0x208   : > { %4971 = vmatpush1.bf16.msra.mxu1 %v4970_v28  ;;  %3857 = vmatmul.mubr.f32.vlgmr.msra.gmra.mrb[0].mxu0 %v7625_v3  ;;  %v1629_v3 = vld [vmem:[%s6696_s4 + $0x2a68] sm:$0xff]  ;;  %v4978_v26 = vpack.c.bf16 %v730_v2, %v728_v45  ;;  %v748_v45 = vld [vmem:[%s6696_s4 + $0xee0] sm:$0xff]  ;;  %v750_v2 = vld [vmem:[%s6696_s4 + $0xef0] sm:$0xff] }
 0x209   : > { %5867 = vmatpush1.bf16.msra.mxu0 %v5866_v30  ;;  %4973 = vmatprep.subr.bf16.mxu1 %v4972_v49  ;;  %v5876_v61 = vpack.c.bf16 %v1631_v52, %v1629_v3  ;;  %v1641_v28 = vld [vmem:[%s6696_s4 + $0x2ac8] sm:$0xff]  ;;  %v1643_v30 = vld [vmem:[%s6696_s4 + $0x2ad8] sm:$0xff]  ;;  %v4990_v49 = vpack.c.bf16 %v742_v8, %v740_v20  ;;  %v760_v20 = vld [vmem:[%s6696_s4 + $0xf40] sm:$0xff] }
 0x20a   : > { %5869 = vmatprep.subr.bf16.mxu0 %v5868_v60  ;;  %2933 = vmatprep.mubr.f32.mxu1 %v2145_v39  ;;  %v746_v60 = vld [vmem:[%s6696_s4 + $0xed0] sm:$0xff]  ;;  %v5888_v37 = vpack.c.bf16 %v1643_v30, %v1641_v28  ;;  %v749_v39 = vld [vmem:[%s6696_s4 + $0xee8] sm:$0xff]  ;;  %v1651_v52 = vld [vmem:[%s6696_s4 + $0x2b18] sm:$0xff] }
 0x20b   : > { %3927 = vmatprep.mubr.f32.mxu0 %v2264_v42  ;;  %v1647_v42 = vld [vmem:[%s6696_s4 + $0x2af8] sm:$0xff]  ;;  %v1649_v3 = vld [vmem:[%s6696_s4 + $0x2b08] sm:$0xff]  ;;  %v762_v8 = vld [vmem:[%s6696_s4 + $0xf50] sm:$0xff] }
 0x20c   : > { %4975 = vmatpush1.bf16.msra.mxu1 %v4974_v43  ;;  %v4994_v43 = vpack.c.bf16 %v746_v60, %v744_v35  ;;  %v1661_v28 = vld [vmem:[%s6696_s4 + $0x2b68] sm:$0xff]  ;;  %v1663_v30 = vld [vmem:[%s6696_s4 + $0x2b78] sm:$0xff]  ;;  %v764_v35 = vld [vmem:[%s6696_s4 + $0xf60] sm:$0xff] }
 0x20d   : > { %5871 = vmatpush1.bf16.msra.mxu0 %v5870_v44  ;;  %4977 = vmatprep.subr.bf16.mxu1 %v4976_v10  ;;  %v5890_v44 = vpack.c.bf16 %v1642_v38, %v1640_v36  ;;  %v4996_v10 = vpack.c.bf16 %v751_v40, %v749_v39  ;;  %v766_v60 = vld [vmem:[%s6696_s4 + $0xf70] sm:$0xff]  ;;  %v1660_v36 = vld [vmem:[%s6696_s4 + $0x2b60] sm:$0xff]  ;;  %v769_v39 = vld [vmem:[%s6696_s4 + $0xf88] sm:$0xff] }
 0x20e   : > { %5873 = vmatprep.subr.bf16.mxu0 %v5872_v56  ;;  %v5892_v56 = vpack.c.bf16 %v1647_v42, %v1645_v41  ;;  %v1662_v38 = vld [vmem:[%s6696_s4 + $0x2b70] sm:$0xff]  ;;  %v771_v40 = vld [vmem:[%s6696_s4 + $0xf98] sm:$0xff]  ;;  %v1665_v41 = vld [vmem:[%s6696_s4 + $0x2b88] sm:$0xff] }
 0x20f   : > { %v1667_v42 = vld [vmem:[%s6696_s4 + $0x2b98] sm:$0xff] }
 0x210   : > { %4979 = vmatpush1.bf16.msra.mxu1 %v4978_v26  ;;  %v4998_v26 = vpack.c.bf16 %v750_v2, %v748_v45  ;;  %v768_v45 = vld [vmem:[%s6696_s4 + $0xf80] sm:$0xff]  ;;  %v770_v2 = vld [vmem:[%s6696_s4 + $0xf90] sm:$0xff] }
 0x211   : > { %5875 = vmatpush1.bf16.msra.mxu0 %v5874_v54  ;;  %4981 = vmatprep.subr.bf16.mxu1 %v4980_v57  ;;  %v5894_v54 = vpack.c.bf16 %v1646_v47, %v1644_v46  ;;  %v5000_v57 = vpack.c.bf16 %v755_v50, %v753_v48  ;;  %v1664_v46 = vld [vmem:[%s6696_s4 + $0x2b80] sm:$0xff]  ;;  %v1666_v47 = vld [vmem:[%s6696_s4 + $0x2b90] sm:$0xff]  ;;  %v773_v48 = vld [vmem:[%s6696_s4 + $0xfa8] sm:$0xff] }
 0x212   : > { %5877 = vmatprep.subr.bf16.mxu0 %v5876_v61  ;;  %v5896_v61 = vpack.c.bf16 %v1651_v52, %v1649_v3  ;;  %v775_v50 = vld [vmem:[%s6696_s4 + $0xfb8] sm:$0xff]  ;;  %v1669_v3 = vld [vmem:[%s6696_s4 + $0x2ba8] sm:$0xff] }
 0x213   : > { %v1671_v52 = vld [vmem:[%s6696_s4 + $0x2bb8] sm:$0xff] }
 0x214   : > { %4983 = vmatpush1.bf16.msra.mxu1 %v4982_v23  ;;  %v5002_v23 = vpack.c.bf16 %v754_v58, %v752_v29  ;;  %v772_v29 = vld [vmem:[%s6696_s4 + $0xfa0] sm:$0xff]  ;;  %v774_v58 = vld [vmem:[%s6696_s4 + $0xfb0] sm:$0xff] }
 0x215   : > { %5879 = vmatpush1.bf16.msra.mxu0 %v5878_v4  ;;  %4985 = vmatprep.subr.bf16.mxu1 %v4984_v5  ;;  %v5898_v4 = vpack.c.bf16 %v1650_v62, %v1648_v59  ;;  %v5004_v5 = vpack.c.bf16 %v759_v1, %v757_v0  ;;  %v1668_v59 = vld [vmem:[%s6696_s4 + $0x2ba0] sm:$0xff]  ;;  %v1670_v62 = vld [vmem:[%s6696_s4 + $0x2bb0] sm:$0xff]  ;;  %v777_v0 = vld [vmem:[%s6696_s4 + $0xfc8] sm:$0xff] }
 0x216   : > { %5881 = vmatprep.subr.bf16.mxu0 %v5880_v27  ;;  %v5900_v27 = vpack.c.bf16 %v1655_v51, %v1653_v31  ;;  %v779_v1 = vld [vmem:[%s6696_s4 + $0xfd8] sm:$0xff]  ;;  %v1673_v31 = vld [vmem:[%s6696_s4 + $0x2bc8] sm:$0xff] }
 0x217   : > { %v1675_v51 = vld [vmem:[%s6696_s4 + $0x2bd8] sm:$0xff] }
 0x218   : > { %4987 = vmatpush1.bf16.msra.mxu1 %v4986_v17  ;;  %v5006_v17 = vpack.c.bf16 %v758_v7, %v756_v6  ;;  %v776_v6 = vld [vmem:[%s6696_s4 + $0xfc0] sm:$0xff]  ;;  %v778_v7 = vld [vmem:[%s6696_s4 + $0xfd0] sm:$0xff] }
 0x219   : > { %5883 = vmatpush1.bf16.msra.mxu0 %v5882_v18  ;;  %4989 = vmatprep.subr.bf16.mxu1 %v4988_v19  ;;  %v5902_v18 = vpack.c.bf16 %v1654_v9, %v1652_v34  ;;  %v5008_v19 = vpack.c.bf16 %v763_v14, %v761_v11  ;;  %v1672_v34 = vld [vmem:[%s6696_s4 + $0x2bc0] sm:$0xff]  ;;  %v1674_v9 = vld [vmem:[%s6696_s4 + $0x2bd0] sm:$0xff]  ;;  %v781_v11 = vld [vmem:[%s6696_s4 + $0xfe8] sm:$0xff] }
 0x21a   : > { %5885 = vmatprep.subr.bf16.mxu0 %v5884_v22  ;;  %v5904_v22 = vpack.c.bf16 %v1659_v16, %v1657_v15  ;;  %v783_v14 = vld [vmem:[%s6696_s4 + $0xff8] sm:$0xff]  ;;  %v1677_v15 = vld [vmem:[%s6696_s4 + $0x2be8] sm:$0xff] }
 0x21b   : > { %v1679_v16 = vld [vmem:[%s6696_s4 + $0x2bf8] sm:$0xff] }
 0x21c   : > { %4991 = vmatpush1.bf16.msra.mxu1 %v4990_v49  ;;  %v5010_v49 = vpack.c.bf16 %v762_v8, %v760_v20  ;;  %v780_v20 = vld [vmem:[%s6696_s4 + $0xfe0] sm:$0xff]  ;;  %v782_v8 = vld [vmem:[%s6696_s4 + $0xff0] sm:$0xff] }
 0x21d   : > { %5887 = vmatpush1.bf16.msra.mxu0 %v5886_v32  ;;  %4993 = vmatprep.subr.bf16.mxu1 %v4992_v33  ;;  %v5906_v32 = vpack.c.bf16 %v1658_v13, %v1656_v21  ;;  %v5012_v33 = vpack.c.bf16 %v767_v25, %v765_v24  ;;  %v1676_v21 = vld [vmem:[%s6696_s4 + $0x2be0] sm:$0xff]  ;;  %v1678_v13 = vld [vmem:[%s6696_s4 + $0x2bf0] sm:$0xff]  ;;  %v785_v24 = vld [vmem:[%s6696_s4 + $0x1008] sm:$0xff] }
 0x21e   : > { %5889 = vmatprep.subr.bf16.mxu0 %v5888_v37  ;;  %v5908_v37 = vpack.c.bf16 %v1663_v30, %v1661_v28  ;;  %v787_v25 = vld [vmem:[%s6696_s4 + $0x1018] sm:$0xff]  ;;  %v1681_v28 = vld [vmem:[%s6696_s4 + $0x2c08] sm:$0xff] }
 0x21f   : > { %v1683_v30 = vld [vmem:[%s6696_s4 + $0x2c18] sm:$0xff] }
 0x220   : > { %4995 = vmatpush1.bf16.msra.mxu1 %v4994_v43  ;;  %v5014_v43 = vpack.c.bf16 %v766_v60, %v764_v35  ;;  %v5926_v35 = vpack.c.bf16 %v1678_v13, %v1676_v21  ;;  %v5032_v60 = vpack.c.bf16 %v787_v25, %v785_v24  ;;  %v800_v13 = vld [vmem:[%s6696_s4 + $0x1080] sm:$0xff]  ;;  %v802_v24 = vld [vmem:[%s6696_s4 + $0x1090] sm:$0xff] }
 0x221   : > { %5891 = vmatpush1.bf16.msra.mxu0 %v5890_v44  ;;  %4997 = vmatprep.subr.bf16.mxu1 %v4996_v10  ;;  %v5910_v44 = vpack.c.bf16 %v1662_v38, %v1660_v36  ;;  %v5016_v10 = vpack.c.bf16 %v771_v40, %v769_v39  ;;  %v784_v36 = vld [vmem:[%s6696_s4 + $0x1000] sm:$0xff]  ;;  %v5928_v39 = vpack.c.bf16 %v1683_v30, %v1681_v28  ;;  %v1682_v40 = vld [vmem:[%s6696_s4 + $0x2c10] sm:$0xff] }
 0x222   : > { %5893 = vmatprep.subr.bf16.mxu0 %v5892_v56  ;;  %v5912_v56 = vpack.c.bf16 %v1667_v42, %v1665_v41  ;;  %v1680_v38 = vld [vmem:[%s6696_s4 + $0x2c00] sm:$0xff]  ;;  %v789_v41 = vld [vmem:[%s6696_s4 + $0x1028] sm:$0xff]  ;;  %v791_v42 = vld [vmem:[%s6696_s4 + $0x1038] sm:$0xff] }
 0x223   : > { %v1696_v25 = vld [vmem:[%s6696_s4 + $0x2c80] sm:$0xff]  ;;  %v1698_v30 = vld [vmem:[%s6696_s4 + $0x2c90] sm:$0xff] }
 0x224   : > { %4999 = vmatpush1.bf16.msra.mxu1 %v4998_v26  ;;  %v5018_v26 = vpack.c.bf16 %v770_v2, %v768_v45 }
 0x225   : > { %5895 = vmatpush1.bf16.msra.mxu0 %v5894_v54  ;;  %5001 = vmatprep.subr.bf16.mxu1 %v5000_v57  ;;  %v5914_v54 = vpack.c.bf16 %v1666_v47, %v1664_v46  ;;  %v5020_v57 = vpack.c.bf16 %v775_v50, %v773_v48  ;;  %v5930_v46 = vpack.c.bf16 %v1682_v40, %v1680_v38  ;;  %v788_v47 = vld [vmem:[%s6696_s4 + $0x1020] sm:$0xff]  ;;  %v790_v48 = vld [vmem:[%s6696_s4 + $0x1030] sm:$0xff] }
 0x226   : > { %5897 = vmatprep.subr.bf16.mxu0 %v5896_v61  ;;  %v5916_v61 = vpack.c.bf16 %v1671_v52, %v1669_v3  ;;  %v1684_v50 = vld [vmem:[%s6696_s4 + $0x2c20] sm:$0xff]  ;;  %v1686_v52 = vld [vmem:[%s6696_s4 + $0x2c30] sm:$0xff]  ;;  %v5946_v38 = vpack.c.bf16 %v1698_v30, %v1696_v25 }
 0x227   : > { %v804_v40 = vld [vmem:[%s6696_s4 + $0x10a0] sm:$0xff] }
 0x228   : > { %5003 = vmatpush1.bf16.msra.mxu1 %v5002_v23  ;;  %v5022_v23 = vpack.c.bf16 %v774_v58, %v772_v29  ;;  %v1689_v29 = vld [vmem:[%s6696_s4 + $0x2c48] sm:$0xff]  ;;  %v1691_v58 = vld [vmem:[%s6696_s4 + $0x2c58] sm:$0xff]  ;;  %v820_v25 = vld [vmem:[%s6696_s4 + $0x1120] sm:$0xff] }
 0x229   : > { %5899 = vmatpush1.bf16.msra.mxu0 %v5898_v4  ;;  %5005 = vmatprep.subr.bf16.mxu1 %v5004_v5  ;;  %v5918_v4 = vpack.c.bf16 %v1670_v62, %v1668_v59  ;;  %v5024_v5 = vpack.c.bf16 %v779_v1, %v777_v0  ;;  %v5934_v62 = vpack.c.bf16 %v1686_v52, %v1684_v50  ;;  %v792_v1 = vld [vmem:[%s6696_s4 + $0x1040] sm:$0xff] }
 0x22a   : > { %5901 = vmatprep.subr.bf16.mxu0 %v5900_v27  ;;  %v5920_v27 = vpack.c.bf16 %v1675_v51, %v1673_v31  ;;  %v1688_v31 = vld [vmem:[%s6696_s4 + $0x2c40] sm:$0xff]  ;;  %v5936_v51 = vpack.c.bf16 %v1691_v58, %v1689_v29  ;;  %v1706_v29 = vld [vmem:[%s6696_s4 + $0x2cd0] sm:$0xff]  ;;  %v813_v58 = vld [vmem:[%s6696_s4 + $0x10e8] sm:$0xff] }
 0x22b   : > { %v808_v52 = vld [vmem:[%s6696_s4 + $0x10c0] sm:$0xff] }
 0x22c   : > { %5007 = vmatpush1.bf16.msra.mxu1 %v5006_v17  ;;  %v5026_v17 = vpack.c.bf16 %v778_v7, %v776_v6  ;;  %v1695_v6 = vld [vmem:[%s6696_s4 + $0x2c78] sm:$0xff]  ;;  %v1716_v30 = vld [vmem:[%s6696_s4 + $0x2d20] sm:$0xff] }
 0x22d   : > { %5903 = vmatpush1.bf16.msra.mxu0 %v5902_v18  ;;  %5009 = vmatprep.subr.bf16.mxu1 %v5008_v19  ;;  %v5922_v18 = vpack.c.bf16 %v1674_v9, %v1672_v34  ;;  %v5028_v19 = vpack.c.bf16 %v783_v14, %v781_v11  ;;  %v796_v9 = vld [vmem:[%s6696_s4 + $0x1060] sm:$0xff]  ;;  %v798_v11 = vld [vmem:[%s6696_s4 + $0x1070] sm:$0xff] }
 0x22e   : > { %5905 = vmatprep.subr.bf16.mxu0 %v5904_v22  ;;  %v5924_v22 = vpack.c.bf16 %v1679_v16, %v1677_v15  ;;  %v1692_v14 = vld [vmem:[%s6696_s4 + $0x2c60] sm:$0xff]  ;;  %v1694_v16 = vld [vmem:[%s6696_s4 + $0x2c70] sm:$0xff] }
 0x22f   : > { %v5942_v21 = vpack.c.bf16 %v1694_v16, %v1692_v14  ;;  %v816_v14 = vld [vmem:[%s6696_s4 + $0x1100] sm:$0xff] }
 0x230   : > { %5011 = vmatpush1.bf16.msra.mxu1 %v5010_v49  ;;  %v7898_v49 = vld [vmem:[%s6719_s20 + $0x20] sm:$0xff] }
 0x231   : > { %5907 = vmatpush1.bf16.msra.mxu0 %v5906_v32  ;;  %5013 = vmatprep.subr.bf16.mxu1 %v5012_v33  ;;  %v5030_v32 = vpack.c.bf16 %v782_v8, %v780_v20  ;;  %v7901_v33 = vld [vmem:[%s6719_s20 + $0x58] sm:$0xff]  ;;  %v5046_v8 = vpack.c.bf16 %v798_v11, %v796_v9  ;;  %v1712_v16 = vld [vmem:[%s6696_s4 + $0x2d00] sm:$0xff] }
 0x232   : > { %5909 = vmatprep.subr.bf16.mxu0 %v5908_v37  ;;  %v786_v37 = vld [vmem:[%s6696_s4 + $0x1010] sm:$0xff]  ;;  %v7917_v45 = vrot.slane %v7901_v33, %v6817_v12  ;;  %v1699_v20 = vld [vmem:[%s6696_s4 + $0x2c98] sm:$0xff] }
 0x233   : > { %v5034_v2 = vpack.c.bf16 %v786_v37, %v784_v36  ;;  %v1703_v36 = vld [vmem:[%s6696_s4 + $0x2cb8] sm:$0xff]  ;;  %v5050_v37 = vpack.c.bf16 %v802_v24, %v800_v13 }
 0x234   : > { %5015 = vmatpush1.bf16.msra.mxu1 %v5014_v43  ;;  %v7911_v43 = vrot.slane %v7898_v49, %v6817_v12  ;;  %v2280_v59 = vcombine.high %v7917_v45, %v7917_v45 }
 0x235   : > { %5911 = vmatpush1.bf16.msra.mxu0 %v5910_v44  ;;  %5017 = vmatprep.subr.bf16.mxu1 %v5016_v10  ;;  %v1685_v44 = vld [vmem:[%s6696_s4 + $0x2c28] sm:$0xff]  ;;  %v1687_v10 = vld [vmem:[%s6696_s4 + $0x2c38] sm:$0xff] }
 0x236   : > { %5913 = vmatprep.subr.bf16.mxu0 %v5912_v56  ;;  %v5036_v56 = vpack.c.bf16 %v791_v42, %v789_v41  ;;  %v5932_v3 = vpack.c.bf16 %v1687_v10, %v1685_v44  ;;  %v806_v41 = vld [vmem:[%s6696_s4 + $0x10b0] sm:$0xff]  ;;  %v1700_v42 = vld [vmem:[%s6696_s4 + $0x2ca0] sm:$0xff] }
 0x237   : > { %v1702_v10 = vld [vmem:[%s6696_s4 + $0x2cb0] sm:$0xff] }
 0x238   : > { %5019 = vmatpush1.bf16.msra.mxu1 %v5018_v26  ;;  %v793_v26 = vld [vmem:[%s6696_s4 + $0x1048] sm:$0xff]  ;;  %v5950_v50 = vpack.c.bf16 %v1702_v10, %v1700_v42  ;;  %v824_v42 = vld [vmem:[%s6696_s4 + $0x1140] sm:$0xff] }
 0x239   : > { %5915 = vmatpush1.bf16.msra.mxu0 %v5914_v54  ;;  %5021 = vmatprep.subr.bf16.mxu1 %v5020_v57  ;;  %v795_v54 = vld [vmem:[%s6696_s4 + $0x1058] sm:$0xff]  ;;  %v2161_v57 = vcombine.high %v7911_v43, %v7911_v43  ;;  %v1720_v10 = vld [vmem:[%s6696_s4 + $0x2d40] sm:$0xff] }
 0x23a   : > { %5917 = vmatprep.subr.bf16.mxu0 %v5916_v61  ;;  %v5038_v61 = vpack.c.bf16 %v790_v48, %v788_v47  ;;  %v5040_v0 = vpack.c.bf16 %v795_v54, %v793_v26  ;;  %v1707_v47 = vld [vmem:[%s6696_s4 + $0x2cd8] sm:$0xff]  ;;  %v5054_v48 = vpack.c.bf16 %v806_v41, %v804_v40  ;;  %v810_v26 = vld [vmem:[%s6696_s4 + $0x10d0] sm:$0xff]  ;;  %v1704_v54 = vld [vmem:[%s6696_s4 + $0x2cc0] sm:$0xff] }
 0x23c   : > { %5023 = vmatpush1.bf16.msra.mxu1 %v5022_v23  ;;  %v1690_v23 = vld [vmem:[%s6696_s4 + $0x2c50] sm:$0xff] }
 0x23d   : > { %5919 = vmatpush1.bf16.msra.mxu0 %v5918_v4  ;;  %5025 = vmatprep.subr.bf16.mxu1 %v5024_v5  ;;  %v797_v4 = vld [vmem:[%s6696_s4 + $0x1068] sm:$0xff]  ;;  %v799_v5 = vld [vmem:[%s6696_s4 + $0x1078] sm:$0xff]  ;;  %v5938_v34 = vpack.c.bf16 %v1690_v23, %v1688_v31  ;;  %v812_v31 = vld [vmem:[%s6696_s4 + $0x10e0] sm:$0xff] }
 0x23e   : > { %5921 = vmatprep.subr.bf16.mxu0 %v5920_v27  ;;  %v5044_v27 = vpack.c.bf16 %v799_v5, %v797_v4  ;;  %v1708_v23 = vld [vmem:[%s6696_s4 + $0x2ce0] sm:$0xff]  ;;  %v1710_v5 = vld [vmem:[%s6696_s4 + $0x2cf0] sm:$0xff] }
 0x23f   : > { %v5958_v9 = vpack.c.bf16 %v1710_v5, %v1708_v23  ;;  %v832_v23 = vld [vmem:[%s6696_s4 + $0x1180] sm:$0xff] }
 0x240   : > { %5027 = vmatpush1.bf16.msra.mxu1 %v5026_v17  ;;  %v801_v17 = vld [vmem:[%s6696_s4 + $0x1088] sm:$0xff]  ;;  %v1728_v5 = vld [vmem:[%s6696_s4 + $0x2d80] sm:$0xff] }
 0x241   : > { %5923 = vmatpush1.bf16.msra.mxu0 %v5922_v18  ;;  %5029 = vmatprep.subr.bf16.mxu1 %v5028_v19  ;;  %v803_v18 = vld [vmem:[%s6696_s4 + $0x1098] sm:$0xff]  ;;  %v1697_v19 = vld [vmem:[%s6696_s4 + $0x2c88] sm:$0xff] }
 0x242   : > { %5925 = vmatprep.subr.bf16.mxu0 %v5924_v22  ;;  %v5048_v22 = vpack.c.bf16 %v803_v18, %v801_v17  ;;  %v5944_v28 = vpack.c.bf16 %v1699_v20, %v1697_v19  ;;  %v1714_v18 = vld [vmem:[%s6696_s4 + $0x2d10] sm:$0xff]  ;;  %v821_v19 = vld [vmem:[%s6696_s4 + $0x1128] sm:$0xff]  ;;  %v823_v20 = vld [vmem:[%s6696_s4 + $0x1138] sm:$0xff] }
 0x243   : > { %v5962_v13 = vpack.c.bf16 %v1714_v18, %v1712_v16  ;;  %v5068_v24 = vpack.c.bf16 %v823_v20, %v821_v19  ;;  %v836_v16 = vld [vmem:[%s6696_s4 + $0x11a0] sm:$0xff]  ;;  %v1734_v20 = vld [vmem:[%s6696_s4 + $0x2db0] sm:$0xff] }
 0x244   : > { %5031 = vmatpush1.bf16.msra.mxu1 %v5030_v32  ;;  %v805_v32 = vld [vmem:[%s6696_s4 + $0x10a8] sm:$0xff]  ;;  %v1732_v18 = vld [vmem:[%s6696_s4 + $0x2da0] sm:$0xff] }
 0x245   : > { %5927 = vmatpush1.bf16.msra.mxu0 %v5926_v35  ;;  %5033 = vmatprep.subr.bf16.mxu1 %v5032_v60  ;;  %v807_v35 = vld [vmem:[%s6696_s4 + $0x10b8] sm:$0xff]  ;;  %v1701_v60 = vld [vmem:[%s6696_s4 + $0x2ca8] sm:$0xff] }
 0x246   : > { %5929 = vmatprep.subr.bf16.mxu0 %v5928_v39  ;;  %v5052_v39 = vpack.c.bf16 %v807_v35, %v805_v32  ;;  %v5948_v44 = vpack.c.bf16 %v1703_v36, %v1701_v60  ;;  %v1718_v35 = vld [vmem:[%s6696_s4 + $0x2d30] sm:$0xff]  ;;  %v825_v60 = vld [vmem:[%s6696_s4 + $0x1148] sm:$0xff]  ;;  %v827_v36 = vld [vmem:[%s6696_s4 + $0x1158] sm:$0xff] }
 0x247   : > { %2934 = vmatmul.mubr.f32.vlgmr.msra.gmra.mrb[0].mxu1 %v7764_v53  ;;  %v794_v53 = vld [vmem:[%s6696_s4 + $0x1050] sm:$0xff]  ;;  %v5966_v40 = vpack.c.bf16 %v1718_v35, %v1716_v30  ;;  %v5072_v41 = vpack.c.bf16 %v827_v36, %v825_v60  ;;  %v840_v30 = vld [vmem:[%s6696_s4 + $0x11c0] sm:$0xff] }
 0x248   : > { %5035 = vmatpush1.bf16.msra.mxu1 %v5034_v2  ;;  %3928 = vmatmul.mubr.f32.vlgmr.msra.gmra.mrb[0].mxu0 %v7769_v55  ;;  %v1693_v55 = vld [vmem:[%s6696_s4 + $0x2c68] sm:$0xff]  ;;  %v5042_v7 = vpack.c.bf16 %v794_v53, %v792_v1  ;;  %v5954_v1 = vpack.c.bf16 %v1706_v29, %v1704_v54  ;;  %v828_v54 = vld [vmem:[%s6696_s4 + $0x1160] sm:$0xff]  ;;  %v1738_v36 = vld [vmem:[%s6696_s4 + $0x2dd0] sm:$0xff] }
 0x249   : > { %5931 = vmatpush1.bf16.msra.mxu0 %v5930_v46  ;;  %5037 = vmatprep.subr.bf16.mxu1 %v5036_v56  ;;  %v5940_v15 = vpack.c.bf16 %v1695_v6, %v1693_v55  ;;  %v809_v2 = vld [vmem:[%s6696_s4 + $0x10c8] sm:$0xff]  ;;  %v811_v46 = vld [vmem:[%s6696_s4 + $0x10d8] sm:$0xff]  ;;  %v1724_v29 = vld [vmem:[%s6696_s4 + $0x2d60] sm:$0xff] }
 0x24a   : > { %5933 = vmatprep.subr.bf16.mxu0 %v5932_v3  ;;  %3004 = vmatprep.mubr.f32.mxu1 %v2161_v57  ;;  %v1705_v56 = vld [vmem:[%s6696_s4 + $0x2cc8] sm:$0xff]  ;;  %v5056_v3 = vpack.c.bf16 %v811_v46, %v809_v2  ;;  %v819_v6 = vld [vmem:[%s6696_s4 + $0x1118] sm:$0xff]  ;;  %v1722_v46 = vld [vmem:[%s6696_s4 + $0x2d50] sm:$0xff] }
 0x24b   : > { %3998 = vmatprep.mubr.f32.mxu0 %v2280_v59  ;;  %v5952_v57 = vpack.c.bf16 %v1707_v47, %v1705_v56  ;;  %v815_v59 = vld [vmem:[%s6696_s4 + $0x10f8] sm:$0xff]  ;;  %v817_v55 = vld [vmem:[%s6696_s4 + $0x1108] sm:$0xff]  ;;  %v1736_v35 = vld [vmem:[%s6696_s4 + $0x2dc0] sm:$0xff] }
 0x24c   : > { %5039 = vmatpush1.bf16.msra.mxu1 %v5038_v61  ;;  %v1709_v61 = vld [vmem:[%s6696_s4 + $0x2ce8] sm:$0xff]  ;;  %v5060_v53 = vpack.c.bf16 %v815_v59, %v813_v58  ;;  %v5064_v11 = vpack.c.bf16 %v819_v6, %v817_v55  ;;  %v831_v47 = vld [vmem:[%s6696_s4 + $0x1178] sm:$0xff]  ;;  %v1726_v59 = vld [vmem:[%s6696_s4 + $0x2d70] sm:$0xff] }
 0x24d   : > { %5935 = vmatpush1.bf16.msra.mxu0 %v5934_v62  ;;  %5041 = vmatprep.subr.bf16.mxu1 %v5040_v0  ;;  %v1711_v62 = vld [vmem:[%s6696_s4 + $0x2cf8] sm:$0xff]  ;;  %v5058_v0 = vpack.c.bf16 %v810_v26, %v808_v52  ;;  %v829_v56 = vld [vmem:[%s6696_s4 + $0x1168] sm:$0xff]  ;;  %v5970_v52 = vpack.c.bf16 %v1722_v46, %v1720_v10  ;;  %v1730_v6 = vld [vmem:[%s6696_s4 + $0x2d90] sm:$0xff] }
 0x24e   : > { %5937 = vmatprep.subr.bf16.mxu0 %v5936_v51  ;;  %v814_v51 = vld [vmem:[%s6696_s4 + $0x10f0] sm:$0xff]  ;;  %v5956_v4 = vpack.c.bf16 %v1711_v62, %v1709_v61  ;;  %v5076_v26 = vpack.c.bf16 %v831_v47, %v829_v56  ;;  %v833_v61 = vld [vmem:[%s6696_s4 + $0x1188] sm:$0xff]  ;;  %v835_v62 = vld [vmem:[%s6696_s4 + $0x1198] sm:$0xff] }
 0x24f   : > { %v844_v10 = vld [vmem:[%s6696_s4 + $0x11e0] sm:$0xff]  ;;  %v1742_v47 = vld [vmem:[%s6696_s4 + $0x2df0] sm:$0xff] }
 0x250   : > { %5043 = vmatpush1.bf16.msra.mxu1 %v5042_v7  ;;  %v1713_v7 = vld [vmem:[%s6696_s4 + $0x2d08] sm:$0xff]  ;;  %v1740_v46 = vld [vmem:[%s6696_s4 + $0x2de0] sm:$0xff] }
 0x251   : > { %5939 = vmatpush1.bf16.msra.mxu0 %v5938_v34  ;;  %5045 = vmatprep.subr.bf16.mxu1 %v5044_v27  ;;  %v1715_v34 = vld [vmem:[%s6696_s4 + $0x2d18] sm:$0xff]  ;;  %v5062_v27 = vpack.c.bf16 %v814_v51, %v812_v31  ;;  %v5974_v31 = vpack.c.bf16 %v1726_v59, %v1724_v29  ;;  %v5080_v51 = vpack.c.bf16 %v835_v62, %v833_v61  ;;  %v848_v59 = vld [vmem:[%s6696_s4 + $0x1200] sm:$0xff]  ;;  %v850_v61 = vld [vmem:[%s6696_s4 + $0x1210] sm:$0xff] }
 0x252   : > { %5941 = vmatprep.subr.bf16.mxu0 %v5940_v15  ;;  %v818_v15 = vld [vmem:[%s6696_s4 + $0x1110] sm:$0xff]  ;;  %v5960_v17 = vpack.c.bf16 %v1715_v34, %v1713_v7  ;;  %v837_v7 = vld [vmem:[%s6696_s4 + $0x11a8] sm:$0xff]  ;;  %v839_v34 = vld [vmem:[%s6696_s4 + $0x11b8] sm:$0xff]  ;;  %v5990_v29 = vpack.c.bf16 %v1742_v47, %v1740_v46 }
 0x253   : > { %v1744_v62 = vld [vmem:[%s6696_s4 + $0x2e00] sm:$0xff] }
 0x254   : > { %5047 = vmatpush1.bf16.msra.mxu1 %v5046_v8  ;;  %v1717_v8 = vld [vmem:[%s6696_s4 + $0x2d28] sm:$0xff]  ;;  %v864_v47 = vld [vmem:[%s6696_s4 + $0x1280] sm:$0xff] }
 0x255   : > { %5943 = vmatpush1.bf16.msra.mxu0 %v5942_v21  ;;  %5049 = vmatprep.subr.bf16.mxu1 %v5048_v22  ;;  %v1719_v21 = vld [vmem:[%s6696_s4 + $0x2d38] sm:$0xff]  ;;  %v5066_v22 = vpack.c.bf16 %v818_v15, %v816_v14  ;;  %v5978_v14 = vpack.c.bf16 %v1730_v6, %v1728_v5  ;;  %v5084_v15 = vpack.c.bf16 %v839_v34, %v837_v7  ;;  %v852_v6 = vld [vmem:[%s6696_s4 + $0x1220] sm:$0xff]  ;;  %v854_v7 = vld [vmem:[%s6696_s4 + $0x1230] sm:$0xff] }
 0x256   : > { %5945 = vmatprep.subr.bf16.mxu0 %v5944_v28  ;;  %v822_v28 = vld [vmem:[%s6696_s4 + $0x1130] sm:$0xff]  ;;  %v5964_v32 = vpack.c.bf16 %v1719_v21, %v1717_v8  ;;  %v841_v8 = vld [vmem:[%s6696_s4 + $0x11c8] sm:$0xff]  ;;  %v843_v21 = vld [vmem:[%s6696_s4 + $0x11d8] sm:$0xff] }
 0x257   : > { %v1748_v34 = vld [vmem:[%s6696_s4 + $0x2e20] sm:$0xff] }
 0x258   : > { %5051 = vmatpush1.bf16.msra.mxu1 %v5050_v37  ;;  %v1721_v37 = vld [vmem:[%s6696_s4 + $0x2d48] sm:$0xff] }
 0x259   : > { %5947 = vmatpush1.bf16.msra.mxu0 %v5946_v38  ;;  %5053 = vmatprep.subr.bf16.mxu1 %v5052_v39  ;;  %v1723_v38 = vld [vmem:[%s6696_s4 + $0x2d58] sm:$0xff]  ;;  %v5070_v39 = vpack.c.bf16 %v822_v28, %v820_v25  ;;  %v5982_v25 = vpack.c.bf16 %v1734_v20, %v1732_v18  ;;  %v5088_v28 = vpack.c.bf16 %v843_v21, %v841_v8  ;;  %v856_v21 = vld [vmem:[%s6696_s4 + $0x1240] sm:$0xff] }
 0x25a   : > { %5949 = vmatprep.subr.bf16.mxu0 %v5948_v44  ;;  %v826_v44 = vld [vmem:[%s6696_s4 + $0x1150] sm:$0xff]  ;;  %v5968_v2 = vpack.c.bf16 %v1723_v38, %v1721_v37  ;;  %v845_v37 = vld [vmem:[%s6696_s4 + $0x11e8] sm:$0xff]  ;;  %v847_v38 = vld [vmem:[%s6696_s4 + $0x11f8] sm:$0xff] }
 0x25c   : > { %5055 = vmatpush1.bf16.msra.mxu1 %v5054_v48  ;;  %v1725_v48 = vld [vmem:[%s6696_s4 + $0x2d68] sm:$0xff] }
 0x25d   : > { %5951 = vmatpush1.bf16.msra.mxu0 %v5950_v50  ;;  %5057 = vmatprep.subr.bf16.mxu1 %v5056_v3  ;;  %v1727_v50 = vld [vmem:[%s6696_s4 + $0x2d78] sm:$0xff]  ;;  %v5074_v3 = vpack.c.bf16 %v826_v44, %v824_v42  ;;  %v5986_v42 = vpack.c.bf16 %v1738_v36, %v1736_v35  ;;  %v5092_v44 = vpack.c.bf16 %v847_v38, %v845_v37  ;;  %v860_v36 = vld [vmem:[%s6696_s4 + $0x1260] sm:$0xff]  ;;  %v862_v37 = vld [vmem:[%s6696_s4 + $0x1270] sm:$0xff] }
 0x25e   : > { %5953 = vmatprep.subr.bf16.mxu0 %v5952_v57  ;;  %v830_v57 = vld [vmem:[%s6696_s4 + $0x1170] sm:$0xff]  ;;  %v5972_v58 = vpack.c.bf16 %v1727_v50, %v1725_v48  ;;  %v849_v48 = vld [vmem:[%s6696_s4 + $0x1208] sm:$0xff]  ;;  %v851_v50 = vld [vmem:[%s6696_s4 + $0x1218] sm:$0xff] }
 0x25f   : > { %v1756_v38 = vld [vmem:[%s6696_s4 + $0x2e60] sm:$0xff] }
 0x260   : > { %5059 = vmatpush1.bf16.msra.mxu1 %v5058_v0  ;;  %v1729_v0 = vld [vmem:[%s6696_s4 + $0x2d88] sm:$0xff] }
 0x261   : > { %5955 = vmatpush1.bf16.msra.mxu0 %v5954_v1  ;;  %5061 = vmatprep.subr.bf16.mxu1 %v5060_v53  ;;  %v1731_v1 = vld [vmem:[%s6696_s4 + $0x2d98] sm:$0xff]  ;;  %v5078_v53 = vpack.c.bf16 %v830_v57, %v828_v54  ;;  %v2265_v54 = vcombine.high %v7901_v33, %v7901_v33 }
 0x262   : > { %5957 = vmatprep.subr.bf16.mxu0 %v5956_v4  ;;  %v834_v4 = vld [vmem:[%s6696_s4 + $0x1190] sm:$0xff]  ;;  %v5976_v55 = vpack.c.bf16 %v1731_v1, %v1729_v0  ;;  %v853_v1 = vld [vmem:[%s6696_s4 + $0x1228] sm:$0xff] }
 0x263   : > { %v1746_v0 = vld [vmem:[%s6696_s4 + $0x2e10] sm:$0xff] }
 0x264   : > { %5063 = vmatpush1.bf16.msra.mxu1 %v5062_v27  ;;  %v1733_v27 = vld [vmem:[%s6696_s4 + $0x2da8] sm:$0xff]  ;;  %v5994_v5 = vpack.c.bf16 %v1746_v0, %v1744_v62  ;;  %v868_v62 = vld [vmem:[%s6696_s4 + $0x12a0] sm:$0xff] }
 0x265   : > { %5959 = vmatpush1.bf16.msra.mxu0 %v5958_v9  ;;  %5065 = vmatprep.subr.bf16.mxu1 %v5064_v11  ;;  %v1735_v9 = vld [vmem:[%s6696_s4 + $0x2db8] sm:$0xff]  ;;  %v5082_v11 = vpack.c.bf16 %v834_v4, %v832_v23  ;;  %v8061_v23 = vrot.slane %v2265_v54, %v6817_v12  ;;  %v5098_v4 = vpack.c.bf16 %v850_v61, %v848_v59  ;;  %v1764_v0 = vld [vmem:[%s6696_s4 + $0x2ea0] sm:$0xff] }
 0x266   : > { %5961 = vmatprep.subr.bf16.mxu0 %v5960_v17  ;;  %v838_v17 = vld [vmem:[%s6696_s4 + $0x11b0] sm:$0xff]  ;;  %v5980_v19 = vpack.c.bf16 %v1735_v9, %v1733_v27  ;;  %v871_v54 = vld [vmem:[%s6696_s4 + $0x12b8] sm:$0xff] }
 0x267   : > { %v1750_v9 = vld [vmem:[%s6696_s4 + $0x2e30] sm:$0xff]  ;;  %v2281_v18 = vcombine.high %v8061_v23, %v8061_v23 }
 0x268   : > { %5067 = vmatpush1.bf16.msra.mxu1 %v5066_v22  ;;  %v1737_v22 = vld [vmem:[%s6696_s4 + $0x2dc8] sm:$0xff]  ;;  %v5998_v20 = vpack.c.bf16 %v1750_v9, %v1748_v34  ;;  %v872_v34 = vld [vmem:[%s6696_s4 + $0x12c0] sm:$0xff] }
 0x269   : > { %5963 = vmatpush1.bf16.msra.mxu0 %v5962_v13  ;;  %5069 = vmatprep.subr.bf16.mxu1 %v5068_v24  ;;  %v1739_v13 = vld [vmem:[%s6696_s4 + $0x2dd8] sm:$0xff]  ;;  %v5086_v24 = vpack.c.bf16 %v838_v17, %v836_v16  ;;  %v1753_v16 = vld [vmem:[%s6696_s4 + $0x2e48] sm:$0xff]  ;;  %v1768_v9 = vld [vmem:[%s6696_s4 + $0x2ec0] sm:$0xff] }
 0x26a   : > { %5965 = vmatprep.subr.bf16.mxu0 %v5964_v32  ;;  %v842_v32 = vld [vmem:[%s6696_s4 + $0x11d0] sm:$0xff]  ;;  %v5984_v60 = vpack.c.bf16 %v1739_v13, %v1737_v22  ;;  %v1755_v17 = vld [vmem:[%s6696_s4 + $0x2e58] sm:$0xff]  ;;  %v1752_v22 = vld [vmem:[%s6696_s4 + $0x2e40] sm:$0xff] }
 0x26b   : > { %v6000_v13 = vpack.c.bf16 %v1755_v17, %v1753_v16  ;;  %v879_v16 = vld [vmem:[%s6696_s4 + $0x12f8] sm:$0xff]  ;;  %v1773_v17 = vld [vmem:[%s6696_s4 + $0x2ee8] sm:$0xff] }
 0x26c   : > { %5071 = vmatpush1.bf16.msra.mxu1 %v5070_v39  ;;  %v1741_v39 = vld [vmem:[%s6696_s4 + $0x2de8] sm:$0xff] }
 0x26d   : > { %5967 = vmatpush1.bf16.msra.mxu0 %v5966_v40  ;;  %5073 = vmatprep.subr.bf16.mxu1 %v5072_v41  ;;  %v1743_v40 = vld [vmem:[%s6696_s4 + $0x2df8] sm:$0xff]  ;;  %v5090_v41 = vpack.c.bf16 %v842_v32, %v840_v30 }
 0x26e   : > { %5969 = vmatprep.subr.bf16.mxu0 %v5968_v2  ;;  %v846_v2 = vld [vmem:[%s6696_s4 + $0x11f0] sm:$0xff]  ;;  %v5988_v56 = vpack.c.bf16 %v1743_v40, %v1741_v39  ;;  %v1759_v30 = vld [vmem:[%s6696_s4 + $0x2e78] sm:$0xff] }
 0x26f   : > { %v5094_v57 = vpack.c.bf16 %v846_v2, %v844_v10  ;;  %v1758_v40 = vld [vmem:[%s6696_s4 + $0x2e70] sm:$0xff]  ;;  %v1763_v10 = vld [vmem:[%s6696_s4 + $0x2e98] sm:$0xff]  ;;  %v5110_v2 = vpack.c.bf16 %v862_v37, %v860_v36  ;;  %v880_v36 = vld [vmem:[%s6696_s4 + $0x1300] sm:$0xff] }
 0x270   : > { %5075 = vmatpush1.bf16.msra.mxu1 %v5074_v3  ;;  %v2146_v3 = vcombine.high %v7898_v49, %v7898_v49  ;;  %v6006_v46 = vpack.c.bf16 %v1758_v40, %v1756_v38  ;;  %v882_v37 = vld [vmem:[%s6696_s4 + $0x1310] sm:$0xff]  ;;  %v1776_v38 = vld [vmem:[%s6696_s4 + $0x2f00] sm:$0xff] }
 0x271   : > { %5971 = vmatpush1.bf16.msra.mxu0 %v5970_v52  ;;  %5077 = vmatprep.subr.bf16.mxu1 %v5076_v26  ;;  %v1745_v52 = vld [vmem:[%s6696_s4 + $0x2e08] sm:$0xff]  ;;  %v1747_v26 = vld [vmem:[%s6696_s4 + $0x2e18] sm:$0xff]  ;;  %v1778_v40 = vld [vmem:[%s6696_s4 + $0x2f10] sm:$0xff] }
 0x272   : > { %5973 = vmatprep.subr.bf16.mxu0 %v5972_v58  ;;  %v5096_v58 = vpack.c.bf16 %v851_v50, %v849_v48  ;;  %v5992_v49 = vpack.c.bf16 %v1747_v26, %v1745_v52  ;;  %v8056_v33 = vrot.slane %v2146_v3, %v6817_v12  ;;  %v866_v48 = vld [vmem:[%s6696_s4 + $0x1290] sm:$0xff]  ;;  %v1760_v50 = vld [vmem:[%s6696_s4 + $0x2e80] sm:$0xff]  ;;  %v869_v26 = vld [vmem:[%s6696_s4 + $0x12a8] sm:$0xff] }
 0x273   : > { %v1762_v52 = vld [vmem:[%s6696_s4 + $0x2e90] sm:$0xff]  ;;  %v5116_v61 = vpack.c.bf16 %v871_v54, %v869_v26  ;;  %v889_v26 = vld [vmem:[%s6696_s4 + $0x1348] sm:$0xff]  ;;  %v891_v54 = vld [vmem:[%s6696_s4 + $0x1358] sm:$0xff] }
 0x274   : > { %5079 = vmatpush1.bf16.msra.mxu1 %v5078_v53  ;;  %v855_v53 = vld [vmem:[%s6696_s4 + $0x1238] sm:$0xff]  ;;  %v6010_v59 = vpack.c.bf16 %v1762_v52, %v1760_v50  ;;  %v1780_v50 = vld [vmem:[%s6696_s4 + $0x2f20] sm:$0xff]  ;;  %v1782_v52 = vld [vmem:[%s6696_s4 + $0x2f30] sm:$0xff] }
 0x275   : > { %5975 = vmatpush1.bf16.msra.mxu0 %v5974_v31  ;;  %5081 = vmatprep.subr.bf16.mxu1 %v5080_v51  ;;  %v1749_v31 = vld [vmem:[%s6696_s4 + $0x2e28] sm:$0xff]  ;;  %v1751_v51 = vld [vmem:[%s6696_s4 + $0x2e38] sm:$0xff] }
 0x276   : > { %5977 = vmatprep.subr.bf16.mxu0 %v5976_v55  ;;  %v5100_v55 = vpack.c.bf16 %v855_v53, %v853_v1  ;;  %v5996_v27 = vpack.c.bf16 %v1751_v51, %v1749_v31  ;;  %v1766_v53 = vld [vmem:[%s6696_s4 + $0x2eb0] sm:$0xff]  ;;  %v873_v31 = vld [vmem:[%s6696_s4 + $0x12c8] sm:$0xff]  ;;  %v875_v51 = vld [vmem:[%s6696_s4 + $0x12d8] sm:$0xff] }
 0x278   : > { %5083 = vmatpush1.bf16.msra.mxu1 %v5082_v11  ;;  %v857_v11 = vld [vmem:[%s6696_s4 + $0x1248] sm:$0xff] }
 0x279   : > { %5979 = vmatpush1.bf16.msra.mxu0 %v5978_v14  ;;  %5085 = vmatprep.subr.bf16.mxu1 %v5084_v15  ;;  %v859_v14 = vld [vmem:[%s6696_s4 + $0x1258] sm:$0xff]  ;;  %v2162_v15 = vcombine.high %v8056_v33, %v8056_v33 }
 0x27a   : > { %5981 = vmatprep.subr.bf16.mxu0 %v5980_v19  ;;  %v5102_v19 = vpack.c.bf16 %v854_v7, %v852_v6  ;;  %v5104_v8 = vpack.c.bf16 %v859_v14, %v857_v11  ;;  %v6014_v6 = vpack.c.bf16 %v1766_v53, %v1764_v0  ;;  %v5120_v7 = vpack.c.bf16 %v875_v51, %v873_v31  ;;  %v1770_v14 = vld [vmem:[%s6696_s4 + $0x2ed0] sm:$0xff]  ;;  %v1784_v0 = vld [vmem:[%s6696_s4 + $0x2f40] sm:$0xff]  ;;  %v893_v31 = vld [vmem:[%s6696_s4 + $0x1368] sm:$0xff] }
 0x27b   : > { %v1786_v53 = vld [vmem:[%s6696_s4 + $0x2f50] sm:$0xff]  ;;  %v895_v51 = vld [vmem:[%s6696_s4 + $0x1378] sm:$0xff] }
 0x27c   : > { %5087 = vmatpush1.bf16.msra.mxu1 %v5086_v24  ;;  %v1754_v24 = vld [vmem:[%s6696_s4 + $0x2e50] sm:$0xff] }
 0x27d   : > { %5983 = vmatpush1.bf16.msra.mxu0 %v5982_v25  ;;  %5089 = vmatprep.subr.bf16.mxu1 %v5088_v28  ;;  %v861_v25 = vld [vmem:[%s6696_s4 + $0x1268] sm:$0xff]  ;;  %v863_v28 = vld [vmem:[%s6696_s4 + $0x1278] sm:$0xff]  ;;  %v6002_v35 = vpack.c.bf16 %v1754_v24, %v1752_v22  ;;  %v1772_v22 = vld [vmem:[%s6696_s4 + $0x2ee0] sm:$0xff] }
 0x27e   : > { %5985 = vmatprep.subr.bf16.mxu0 %v5984_v60  ;;  %v5108_v60 = vpack.c.bf16 %v863_v28, %v861_v25  ;;  %v1774_v24 = vld [vmem:[%s6696_s4 + $0x2ef0] sm:$0xff]  ;;  %v881_v25 = vld [vmem:[%s6696_s4 + $0x1308] sm:$0xff]  ;;  %v883_v28 = vld [vmem:[%s6696_s4 + $0x1318] sm:$0xff] }
 0x280   : > { %5091 = vmatpush1.bf16.msra.mxu1 %v5090_v41  ;;  %v865_v41 = vld [vmem:[%s6696_s4 + $0x1288] sm:$0xff] }
 0x281   : > { %5987 = vmatpush1.bf16.msra.mxu0 %v5986_v42  ;;  %5093 = vmatprep.subr.bf16.mxu1 %v5092_v44  ;;  %v867_v42 = vld [vmem:[%s6696_s4 + $0x1298] sm:$0xff]  ;;  %v1761_v44 = vld [vmem:[%s6696_s4 + $0x2e88] sm:$0xff] }
 0x282   : > { %5989 = vmatprep.subr.bf16.mxu0 %v5988_v56  ;;  %v5112_v56 = vpack.c.bf16 %v867_v42, %v865_v41  ;;  %v6008_v3 = vpack.c.bf16 %v1763_v10, %v1761_v44  ;;  %v885_v41 = vld [vmem:[%s6696_s4 + $0x1328] sm:$0xff]  ;;  %v887_v42 = vld [vmem:[%s6696_s4 + $0x1338] sm:$0xff] }
 0x283   : > { %v1781_v44 = vld [vmem:[%s6696_s4 + $0x2f28] sm:$0xff]  ;;  %v1783_v10 = vld [vmem:[%s6696_s4 + $0x2f38] sm:$0xff] }
 0x284   : > { %5095 = vmatpush1.bf16.msra.mxu1 %v5094_v57  ;;  %v1765_v57 = vld [vmem:[%s6696_s4 + $0x2ea8] sm:$0xff] }
 0x285   : > { %5991 = vmatpush1.bf16.msra.mxu0 %v5990_v29  ;;  %5097 = vmatprep.subr.bf16.mxu1 %v5096_v58  ;;  %v1767_v29 = vld [vmem:[%s6696_s4 + $0x2eb8] sm:$0xff]  ;;  %v5114_v58 = vpack.c.bf16 %v866_v48, %v864_v47  ;;  %v884_v47 = vld [vmem:[%s6696_s4 + $0x1320] sm:$0xff]  ;;  %v886_v48 = vld [vmem:[%s6696_s4 + $0x1330] sm:$0xff] }
 0x286   : > { %5993 = vmatprep.subr.bf16.mxu0 %v5992_v49  ;;  %v870_v49 = vld [vmem:[%s6696_s4 + $0x12b0] sm:$0xff]  ;;  %v6012_v1 = vpack.c.bf16 %v1767_v29, %v1765_v57  ;;  %v1785_v57 = vld [vmem:[%s6696_s4 + $0x2f48] sm:$0xff]  ;;  %v1787_v29 = vld [vmem:[%s6696_s4 + $0x2f58] sm:$0xff] }
 0x287   : > { %3005 = vmatmul.mubr.f32.vlgmr.msra.gmra.mrb[0].mxu1 %v7911_v43  ;;  %v858_v43 = vld [vmem:[%s6696_s4 + $0x1250] sm:$0xff] }
 0x288   : > { %5099 = vmatpush1.bf16.msra.mxu1 %v5098_v4  ;;  %3999 = vmatmul.mubr.f32.vlgmr.msra.gmra.mrb[0].mxu0 %v7917_v45  ;;  %v1757_v45 = vld [vmem:[%s6696_s4 + $0x2e68] sm:$0xff]  ;;  %v5106_v32 = vpack.c.bf16 %v858_v43, %v856_v21  ;;  %v876_v21 = vld [vmem:[%s6696_s4 + $0x12e0] sm:$0xff]  ;;  %v878_v43 = vld [vmem:[%s6696_s4 + $0x12f0] sm:$0xff] }
 0x289   : > { %5995 = vmatpush1.bf16.msra.mxu0 %v5994_v5  ;;  %5101 = vmatprep.subr.bf16.mxu1 %v5100_v55  ;;  %v6004_v39 = vpack.c.bf16 %v1759_v30, %v1757_v45  ;;  %v1769_v4 = vld [vmem:[%s6696_s4 + $0x2ec8] sm:$0xff]  ;;  %v1771_v5 = vld [vmem:[%s6696_s4 + $0x2ed8] sm:$0xff]  ;;  %v5118_v55 = vpack.c.bf16 %v870_v49, %v868_v62  ;;  %v888_v62 = vld [vmem:[%s6696_s4 + $0x1340] sm:$0xff] }
 0x28a   : > { %5997 = vmatprep.subr.bf16.mxu0 %v5996_v27  ;;  %3075 = vmatprep.mubr.f32.mxu1 %v2162_v15  ;;  %v874_v27 = vld [vmem:[%s6696_s4 + $0x12d0] sm:$0xff]  ;;  %v6016_v11 = vpack.c.bf16 %v1771_v5, %v1769_v4  ;;  %v877_v15 = vld [vmem:[%s6696_s4 + $0x12e8] sm:$0xff]  ;;  %v1779_v30 = vld [vmem:[%s6696_s4 + $0x2f18] sm:$0xff] }
 0x28b   : > { %4069 = vmatprep.mubr.f32.mxu0 %v2281_v18  ;;  %v1775_v18 = vld [vmem:[%s6696_s4 + $0x2ef8] sm:$0xff]  ;;  %v1777_v45 = vld [vmem:[%s6696_s4 + $0x2f08] sm:$0xff]  ;;  %v890_v49 = vld [vmem:[%s6696_s4 + $0x1350] sm:$0xff] }
 0x28c   : > { %5103 = vmatpush1.bf16.msra.mxu1 %v5102_v19  ;;  %v5122_v19 = vpack.c.bf16 %v874_v27, %v872_v34  ;;  %v1789_v4 = vld [vmem:[%s6696_s4 + $0x2f68] sm:$0xff]  ;;  %v1791_v5 = vld [vmem:[%s6696_s4 + $0x2f78] sm:$0xff]  ;;  %v892_v34 = vld [vmem:[%s6696_s4 + $0x1360] sm:$0xff] }
 0x28d   : > { %5999 = vmatpush1.bf16.msra.mxu0 %v5998_v20  ;;  %5105 = vmatprep.subr.bf16.mxu1 %v5104_v8  ;;  %v6018_v20 = vpack.c.bf16 %v1770_v14, %v1768_v9  ;;  %v5124_v8 = vpack.c.bf16 %v879_v16, %v877_v15  ;;  %v894_v27 = vld [vmem:[%s6696_s4 + $0x1370] sm:$0xff]  ;;  %v1788_v9 = vld [vmem:[%s6696_s4 + $0x2f60] sm:$0xff]  ;;  %v897_v15 = vld [vmem:[%s6696_s4 + $0x1388] sm:$0xff] }
 0x28e   : > { %6001 = vmatprep.subr.bf16.mxu0 %v6000_v13  ;;  %v6020_v13 = vpack.c.bf16 %v1775_v18, %v1773_v17  ;;  %v1790_v14 = vld [vmem:[%s6696_s4 + $0x2f70] sm:$0xff]  ;;  %v899_v16 = vld [vmem:[%s6696_s4 + $0x1398] sm:$0xff]  ;;  %v1793_v17 = vld [vmem:[%s6696_s4 + $0x2f88] sm:$0xff] }
 0x28f   : > { %v1795_v18 = vld [vmem:[%s6696_s4 + $0x2f98] sm:$0xff] }
 0x290   : > { %5107 = vmatpush1.bf16.msra.mxu1 %v5106_v32  ;;  %v5126_v32 = vpack.c.bf16 %v878_v43, %v876_v21  ;;  %v896_v21 = vld [vmem:[%s6696_s4 + $0x1380] sm:$0xff]  ;;  %v898_v43 = vld [vmem:[%s6696_s4 + $0x1390] sm:$0xff] }
 0x291   : > { %6003 = vmatpush1.bf16.msra.mxu0 %v6002_v35  ;;  %5109 = vmatprep.subr.bf16.mxu1 %v5108_v60  ;;  %v6022_v35 = vpack.c.bf16 %v1774_v24, %v1772_v22  ;;  %v5128_v60 = vpack.c.bf16 %v883_v28, %v881_v25  ;;  %v1792_v22 = vld [vmem:[%s6696_s4 + $0x2f80] sm:$0xff]  ;;  %v1794_v24 = vld [vmem:[%s6696_s4 + $0x2f90] sm:$0xff]  ;;  %v901_v25 = vld [vmem:[%s6696_s4 + $0x13a8] sm:$0xff] }
 0x292   : > { %6005 = vmatprep.subr.bf16.mxu0 %v6004_v39  ;;  %v6024_v39 = vpack.c.bf16 %v1779_v30, %v1777_v45  ;;  %v903_v28 = vld [vmem:[%s6696_s4 + $0x13b8] sm:$0xff]  ;;  %v1797_v45 = vld [vmem:[%s6696_s4 + $0x2fa8] sm:$0xff] }
 0x293   : > { %v1799_v30 = vld [vmem:[%s6696_s4 + $0x2fb8] sm:$0xff] }
 0x294   : > { %5111 = vmatpush1.bf16.msra.mxu1 %v5110_v2  ;;  %v5130_v2 = vpack.c.bf16 %v882_v37, %v880_v36  ;;  %v900_v36 = vld [vmem:[%s6696_s4 + $0x13a0] sm:$0xff]  ;;  %v902_v37 = vld [vmem:[%s6696_s4 + $0x13b0] sm:$0xff] }
 0x295   : > { %6007 = vmatpush1.bf16.msra.mxu0 %v6006_v46  ;;  %5113 = vmatprep.subr.bf16.mxu1 %v5112_v56  ;;  %v6026_v46 = vpack.c.bf16 %v1778_v40, %v1776_v38  ;;  %v5132_v56 = vpack.c.bf16 %v887_v42, %v885_v41  ;;  %v1796_v38 = vld [vmem:[%s6696_s4 + $0x2fa0] sm:$0xff]  ;;  %v1798_v40 = vld [vmem:[%s6696_s4 + $0x2fb0] sm:$0xff]  ;;  %v905_v41 = vld [vmem:[%s6696_s4 + $0x13c8] sm:$0xff] }
 0x296   : > { %6009 = vmatprep.subr.bf16.mxu0 %v6008_v3  ;;  %v6028_v3 = vpack.c.bf16 %v1783_v10, %v1781_v44  ;;  %v907_v42 = vld [vmem:[%s6696_s4 + $0x13d8] sm:$0xff]  ;;  %v1801_v44 = vld [vmem:[%s6696_s4 + $0x2fc8] sm:$0xff] }
 0x297   : > { %v1803_v10 = vld [vmem:[%s6696_s4 + $0x2fd8] sm:$0xff] }
 0x298   : > { %5115 = vmatpush1.bf16.msra.mxu1 %v5114_v58  ;;  %v5134_v58 = vpack.c.bf16 %v886_v48, %v884_v47  ;;  %v904_v47 = vld [vmem:[%s6696_s4 + $0x13c0] sm:$0xff]  ;;  %v906_v48 = vld [vmem:[%s6696_s4 + $0x13d0] sm:$0xff] }
 0x299   : > { %6011 = vmatpush1.bf16.msra.mxu0 %v6010_v59  ;;  %5117 = vmatprep.subr.bf16.mxu1 %v5116_v61  ;;  %v6030_v59 = vpack.c.bf16 %v1782_v52, %v1780_v50  ;;  %v5136_v61 = vpack.c.bf16 %v891_v54, %v889_v26  ;;  %v1800_v50 = vld [vmem:[%s6696_s4 + $0x2fc0] sm:$0xff]  ;;  %v1802_v52 = vld [vmem:[%s6696_s4 + $0x2fd0] sm:$0xff]  ;;  %v909_v26 = vld [vmem:[%s6696_s4 + $0x13e8] sm:$0xff] }
 0x29a   : > { %6013 = vmatprep.subr.bf16.mxu0 %v6012_v1  ;;  %v6032_v1 = vpack.c.bf16 %v1787_v29, %v1785_v57  ;;  %v911_v54 = vld [vmem:[%s6696_s4 + $0x13f8] sm:$0xff]  ;;  %v1805_v57 = vld [vmem:[%s6696_s4 + $0x2fe8] sm:$0xff] }
 0x29b   : > { %v1807_v29 = vld [vmem:[%s6696_s4 + $0x2ff8] sm:$0xff] }
 0x29c   : > { %5119 = vmatpush1.bf16.msra.mxu1 %v5118_v55  ;;  %v5138_v55 = vpack.c.bf16 %v890_v49, %v888_v62  ;;  %v908_v62 = vld [vmem:[%s6696_s4 + $0x13e0] sm:$0xff]  ;;  %v910_v49 = vld [vmem:[%s6696_s4 + $0x13f0] sm:$0xff] }
 0x29d   : > { %6015 = vmatpush1.bf16.msra.mxu0 %v6014_v6  ;;  %5121 = vmatprep.subr.bf16.mxu1 %v5120_v7  ;;  %v6034_v6 = vpack.c.bf16 %v1786_v53, %v1784_v0  ;;  %v5140_v7 = vpack.c.bf16 %v895_v51, %v893_v31  ;;  %v1804_v0 = vld [vmem:[%s6696_s4 + $0x2fe0] sm:$0xff]  ;;  %v1806_v53 = vld [vmem:[%s6696_s4 + $0x2ff0] sm:$0xff]  ;;  %v913_v31 = vld [vmem:[%s6696_s4 + $0x1408] sm:$0xff] }
 0x29e   : > { %6017 = vmatprep.subr.bf16.mxu0 %v6016_v11  ;;  %v6036_v11 = vpack.c.bf16 %v1791_v5, %v1789_v4  ;;  %v915_v51 = vld [vmem:[%s6696_s4 + $0x1418] sm:$0xff]  ;;  %v1809_v4 = vld [vmem:[%s6696_s4 + $0x3008] sm:$0xff] }
 0x29f   : > { %v1811_v5 = vld [vmem:[%s6696_s4 + $0x3018] sm:$0xff] }
 0x2a0   : > { %5123 = vmatpush1.bf16.msra.mxu1 %v5122_v19  ;;  %v5142_v19 = vpack.c.bf16 %v894_v27, %v892_v34  ;;  %v6054_v34 = vpack.c.bf16 %v1806_v53, %v1804_v0  ;;  %v5160_v27 = vpack.c.bf16 %v915_v51, %v913_v31  ;;  %v928_v53 = vld [vmem:[%s6696_s4 + $0x1480] sm:$0xff]  ;;  %v930_v31 = vld [vmem:[%s6696_s4 + $0x1490] sm:$0xff] }
 0x2a1   : > { %6019 = vmatpush1.bf16.msra.mxu0 %v6018_v20  ;;  %5125 = vmatprep.subr.bf16.mxu1 %v5124_v8  ;;  %v6038_v20 = vpack.c.bf16 %v1790_v14, %v1788_v9  ;;  %v5144_v8 = vpack.c.bf16 %v899_v16, %v897_v15  ;;  %v912_v9 = vld [vmem:[%s6696_s4 + $0x1400] sm:$0xff]  ;;  %v6056_v15 = vpack.c.bf16 %v1811_v5, %v1809_v4  ;;  %v1810_v16 = vld [vmem:[%s6696_s4 + $0x3010] sm:$0xff] }
 0x2a2   : > { %6021 = vmatprep.subr.bf16.mxu0 %v6020_v13  ;;  %v6040_v13 = vpack.c.bf16 %v1795_v18, %v1793_v17  ;;  %v1808_v14 = vld [vmem:[%s6696_s4 + $0x3000] sm:$0xff]  ;;  %v917_v17 = vld [vmem:[%s6696_s4 + $0x1428] sm:$0xff]  ;;  %v919_v18 = vld [vmem:[%s6696_s4 + $0x1438] sm:$0xff] }
 0x2a3   : > { %v1824_v51 = vld [vmem:[%s6696_s4 + $0x3080] sm:$0xff]  ;;  %v1826_v5 = vld [vmem:[%s6696_s4 + $0x3090] sm:$0xff] }
 0x2a4   : > { %5127 = vmatpush1.bf16.msra.mxu1 %v5126_v32  ;;  %v5146_v32 = vpack.c.bf16 %v898_v43, %v896_v21 }
 0x2a5   : > { %6023 = vmatpush1.bf16.msra.mxu0 %v6022_v35  ;;  %5129 = vmatprep.subr.bf16.mxu1 %v5128_v60  ;;  %v6042_v35 = vpack.c.bf16 %v1794_v24, %v1792_v22  ;;  %v5148_v60 = vpack.c.bf16 %v903_v28, %v901_v25  ;;  %v6058_v22 = vpack.c.bf16 %v1810_v16, %v1808_v14  ;;  %v916_v24 = vld [vmem:[%s6696_s4 + $0x1420] sm:$0xff]  ;;  %v918_v25 = vld [vmem:[%s6696_s4 + $0x1430] sm:$0xff] }
 0x2a6   : > { %6025 = vmatprep.subr.bf16.mxu0 %v6024_v39  ;;  %v6044_v39 = vpack.c.bf16 %v1799_v30, %v1797_v45  ;;  %v1812_v28 = vld [vmem:[%s6696_s4 + $0x3020] sm:$0xff]  ;;  %v1814_v30 = vld [vmem:[%s6696_s4 + $0x3030] sm:$0xff]  ;;  %v6074_v14 = vpack.c.bf16 %v1826_v5, %v1824_v51 }
 0x2a7   : > { %v932_v16 = vld [vmem:[%s6696_s4 + $0x14a0] sm:$0xff] }
 0x2a8   : > { %5131 = vmatpush1.bf16.msra.mxu1 %v5130_v2  ;;  %v5150_v2 = vpack.c.bf16 %v902_v37, %v900_v36  ;;  %v1817_v36 = vld [vmem:[%s6696_s4 + $0x3048] sm:$0xff]  ;;  %v1819_v37 = vld [vmem:[%s6696_s4 + $0x3058] sm:$0xff]  ;;  %v948_v51 = vld [vmem:[%s6696_s4 + $0x1520] sm:$0xff] }
 0x2a9   : > { %6027 = vmatpush1.bf16.msra.mxu0 %v6026_v46  ;;  %5133 = vmatprep.subr.bf16.mxu1 %v5132_v56  ;;  %v6046_v46 = vpack.c.bf16 %v1798_v40, %v1796_v38  ;;  %v5152_v56 = vpack.c.bf16 %v907_v42, %v905_v41  ;;  %v6062_v40 = vpack.c.bf16 %v1814_v30, %v1812_v28  ;;  %v920_v42 = vld [vmem:[%s6696_s4 + $0x1440] sm:$0xff] }
 0x2aa   : > { %6029 = vmatprep.subr.bf16.mxu0 %v6028_v3  ;;  %v6048_v3 = vpack.c.bf16 %v1803_v10, %v1801_v44  ;;  %v1816_v44 = vld [vmem:[%s6696_s4 + $0x3040] sm:$0xff]  ;;  %v6064_v10 = vpack.c.bf16 %v1819_v37, %v1817_v36  ;;  %v1834_v36 = vld [vmem:[%s6696_s4 + $0x30d0] sm:$0xff]  ;;  %v941_v37 = vld [vmem:[%s6696_s4 + $0x14e8] sm:$0xff] }
 0x2ab   : > { %v936_v30 = vld [vmem:[%s6696_s4 + $0x14c0] sm:$0xff] }
 0x2ac   : > { %5135 = vmatpush1.bf16.msra.mxu1 %v5134_v58  ;;  %v5154_v58 = vpack.c.bf16 %v906_v48, %v904_v47  ;;  %v1823_v47 = vld [vmem:[%s6696_s4 + $0x3078] sm:$0xff]  ;;  %v1844_v5 = vld [vmem:[%s6696_s4 + $0x3120] sm:$0xff] }
 0x2ad   : > { %6031 = vmatpush1.bf16.msra.mxu0 %v6030_v59  ;;  %5137 = vmatprep.subr.bf16.mxu1 %v5136_v61  ;;  %v6050_v59 = vpack.c.bf16 %v1802_v52, %v1800_v50  ;;  %v5156_v61 = vpack.c.bf16 %v911_v54, %v909_v26  ;;  %v924_v52 = vld [vmem:[%s6696_s4 + $0x1460] sm:$0xff]  ;;  %v926_v26 = vld [vmem:[%s6696_s4 + $0x1470] sm:$0xff] }
 0x2ae   : > { %6033 = vmatprep.subr.bf16.mxu0 %v6032_v1  ;;  %v6052_v1 = vpack.c.bf16 %v1807_v29, %v1805_v57  ;;  %v1820_v54 = vld [vmem:[%s6696_s4 + $0x3060] sm:$0xff]  ;;  %v1822_v29 = vld [vmem:[%s6696_s4 + $0x3070] sm:$0xff] }
 0x2af   : > { %v6070_v0 = vpack.c.bf16 %v1822_v29, %v1820_v54  ;;  %v944_v54 = vld [vmem:[%s6696_s4 + $0x1500] sm:$0xff] }
 0x2b0   : > { %5139 = vmatpush1.bf16.msra.mxu1 %v5138_v55  ;;  %v8190_v55 = vld [vmem:[%s6719_s20 + $0x28] sm:$0xff] }
 0x2b1   : > { %6035 = vmatpush1.bf16.msra.mxu0 %v6034_v6  ;;  %5141 = vmatprep.subr.bf16.mxu1 %v5140_v7  ;;  %v5158_v6 = vpack.c.bf16 %v910_v49, %v908_v62  ;;  %v8193_v7 = vld [vmem:[%s6719_s20 + $0x60] sm:$0xff]  ;;  %v5174_v49 = vpack.c.bf16 %v926_v26, %v924_v52 }
 0x2b2   : > { %6037 = vmatprep.subr.bf16.mxu0 %v6036_v11  ;;  %v914_v11 = vld [vmem:[%s6696_s4 + $0x1410] sm:$0xff]  ;;  %v8209_v21 = vrot.slane %v8193_v7, %v6817_v12  ;;  %v1827_v62 = vld [vmem:[%s6696_s4 + $0x3098] sm:$0xff]  ;;  %v1840_v29 = vld [vmem:[%s6696_s4 + $0x3100] sm:$0xff] }
 0x2b3   : > { %v5162_v43 = vpack.c.bf16 %v914_v11, %v912_v9  ;;  %v1831_v9 = vld [vmem:[%s6696_s4 + $0x30b8] sm:$0xff]  ;;  %v5178_v11 = vpack.c.bf16 %v930_v31, %v928_v53 }
 0x2b4   : > { %5143 = vmatpush1.bf16.msra.mxu1 %v5142_v19  ;;  %v8203_v19 = vrot.slane %v8190_v55, %v6817_v12  ;;  %v2297_v38 = vcombine.high %v8209_v21, %v8209_v21 }
 0x2b5   : > { %6039 = vmatpush1.bf16.msra.mxu0 %v6038_v20  ;;  %5145 = vmatprep.subr.bf16.mxu1 %v5144_v8  ;;  %v1813_v20 = vld [vmem:[%s6696_s4 + $0x3028] sm:$0xff]  ;;  %v1815_v8 = vld [vmem:[%s6696_s4 + $0x3038] sm:$0xff] }
 0x2b6   : > { %6041 = vmatprep.subr.bf16.mxu0 %v6040_v13  ;;  %v5164_v13 = vpack.c.bf16 %v919_v18, %v917_v17  ;;  %v6060_v45 = vpack.c.bf16 %v1815_v8, %v1813_v20  ;;  %v934_v17 = vld [vmem:[%s6696_s4 + $0x14b0] sm:$0xff]  ;;  %v1828_v18 = vld [vmem:[%s6696_s4 + $0x30a0] sm:$0xff] }
 0x2b7   : > { %v1830_v8 = vld [vmem:[%s6696_s4 + $0x30b0] sm:$0xff] }
 0x2b8   : > { %5147 = vmatpush1.bf16.msra.mxu1 %v5146_v32  ;;  %v921_v32 = vld [vmem:[%s6696_s4 + $0x1448] sm:$0xff]  ;;  %v6078_v28 = vpack.c.bf16 %v1830_v8, %v1828_v18  ;;  %v952_v18 = vld [vmem:[%s6696_s4 + $0x1540] sm:$0xff] }
 0x2b9   : > { %6043 = vmatpush1.bf16.msra.mxu0 %v6042_v35  ;;  %5149 = vmatprep.subr.bf16.mxu1 %v5148_v60  ;;  %v923_v35 = vld [vmem:[%s6696_s4 + $0x1458] sm:$0xff]  ;;  %v2178_v60 = vcombine.high %v8203_v19, %v8203_v19  ;;  %v1848_v8 = vld [vmem:[%s6696_s4 + $0x3140] sm:$0xff] }
 0x2ba   : > { %6045 = vmatprep.subr.bf16.mxu0 %v6044_v39  ;;  %v5166_v39 = vpack.c.bf16 %v918_v25, %v916_v24  ;;  %v5168_v41 = vpack.c.bf16 %v923_v35, %v921_v32  ;;  %v1835_v24 = vld [vmem:[%s6696_s4 + $0x30d8] sm:$0xff]  ;;  %v5182_v25 = vpack.c.bf16 %v934_v17, %v932_v16  ;;  %v938_v32 = vld [vmem:[%s6696_s4 + $0x14d0] sm:$0xff]  ;;  %v1832_v35 = vld [vmem:[%s6696_s4 + $0x30c0] sm:$0xff] }
 0x2bc   : > { %5151 = vmatpush1.bf16.msra.mxu1 %v5150_v2  ;;  %v1818_v2 = vld [vmem:[%s6696_s4 + $0x3050] sm:$0xff] }
 0x2bd   : > { %6047 = vmatpush1.bf16.msra.mxu0 %v6046_v46  ;;  %5153 = vmatprep.subr.bf16.mxu1 %v5152_v56  ;;  %v925_v46 = vld [vmem:[%s6696_s4 + $0x1468] sm:$0xff]  ;;  %v927_v56 = vld [vmem:[%s6696_s4 + $0x1478] sm:$0xff]  ;;  %v6066_v50 = vpack.c.bf16 %v1818_v2, %v1816_v44  ;;  %v940_v44 = vld [vmem:[%s6696_s4 + $0x14e0] sm:$0xff] }
 0x2be   : > { %6049 = vmatprep.subr.bf16.mxu0 %v6048_v3  ;;  %v5172_v3 = vpack.c.bf16 %v927_v56, %v925_v46  ;;  %v1836_v2 = vld [vmem:[%s6696_s4 + $0x30e0] sm:$0xff]  ;;  %v1838_v56 = vld [vmem:[%s6696_s4 + $0x30f0] sm:$0xff] }
 0x2bf   : > { %v6086_v52 = vpack.c.bf16 %v1838_v56, %v1836_v2  ;;  %v960_v2 = vld [vmem:[%s6696_s4 + $0x1580] sm:$0xff] }
 0x2c0   : > { %5155 = vmatpush1.bf16.msra.mxu1 %v5154_v58  ;;  %v929_v58 = vld [vmem:[%s6696_s4 + $0x1488] sm:$0xff]  ;;  %v1856_v56 = vld [vmem:[%s6696_s4 + $0x3180] sm:$0xff] }
 0x2c1   : > { %6051 = vmatpush1.bf16.msra.mxu0 %v6050_v59  ;;  %5157 = vmatprep.subr.bf16.mxu1 %v5156_v61  ;;  %v931_v59 = vld [vmem:[%s6696_s4 + $0x1498] sm:$0xff]  ;;  %v1825_v61 = vld [vmem:[%s6696_s4 + $0x3088] sm:$0xff] }
 0x2c2   : > { %6053 = vmatprep.subr.bf16.mxu0 %v6052_v1  ;;  %v5176_v1 = vpack.c.bf16 %v931_v59, %v929_v58  ;;  %v6072_v4 = vpack.c.bf16 %v1827_v62, %v1825_v61  ;;  %v1842_v59 = vld [vmem:[%s6696_s4 + $0x3110] sm:$0xff]  ;;  %v949_v61 = vld [vmem:[%s6696_s4 + $0x1528] sm:$0xff]  ;;  %v951_v62 = vld [vmem:[%s6696_s4 + $0x1538] sm:$0xff] }
 0x2c3   : > { %v6090_v53 = vpack.c.bf16 %v1842_v59, %v1840_v29  ;;  %v5196_v31 = vpack.c.bf16 %v951_v62, %v949_v61  ;;  %v964_v29 = vld [vmem:[%s6696_s4 + $0x15a0] sm:$0xff]  ;;  %v1862_v62 = vld [vmem:[%s6696_s4 + $0x31b0] sm:$0xff] }
 0x2c4   : > { %5159 = vmatpush1.bf16.msra.mxu1 %v5158_v6  ;;  %v933_v6 = vld [vmem:[%s6696_s4 + $0x14a8] sm:$0xff]  ;;  %v1860_v59 = vld [vmem:[%s6696_s4 + $0x31a0] sm:$0xff] }
 0x2c5   : > { %6055 = vmatpush1.bf16.msra.mxu0 %v6054_v34  ;;  %5161 = vmatprep.subr.bf16.mxu1 %v5160_v27  ;;  %v935_v34 = vld [vmem:[%s6696_s4 + $0x14b8] sm:$0xff]  ;;  %v1829_v27 = vld [vmem:[%s6696_s4 + $0x30a8] sm:$0xff] }
 0x2c6   : > { %6057 = vmatprep.subr.bf16.mxu0 %v6056_v15  ;;  %v5180_v15 = vpack.c.bf16 %v935_v34, %v933_v6  ;;  %v6076_v20 = vpack.c.bf16 %v1831_v9, %v1829_v27  ;;  %v1846_v34 = vld [vmem:[%s6696_s4 + $0x3130] sm:$0xff]  ;;  %v953_v27 = vld [vmem:[%s6696_s4 + $0x1548] sm:$0xff]  ;;  %v955_v9 = vld [vmem:[%s6696_s4 + $0x1558] sm:$0xff] }
 0x2c7   : > { %3076 = vmatmul.mubr.f32.vlgmr.msra.gmra.mrb[0].mxu1 %v8056_v33  ;;  %v922_v33 = vld [vmem:[%s6696_s4 + $0x1450] sm:$0xff]  ;;  %v6094_v16 = vpack.c.bf16 %v1846_v34, %v1844_v5  ;;  %v5200_v17 = vpack.c.bf16 %v955_v9, %v953_v27  ;;  %v968_v5 = vld [vmem:[%s6696_s4 + $0x15c0] sm:$0xff] }
 0x2c8   : > { %5163 = vmatpush1.bf16.msra.mxu1 %v5162_v43  ;;  %4070 = vmatmul.mubr.f32.vlgmr.msra.gmra.mrb[0].mxu0 %v8061_v23  ;;  %v1821_v23 = vld [vmem:[%s6696_s4 + $0x3068] sm:$0xff]  ;;  %v5170_v48 = vpack.c.bf16 %v922_v33, %v920_v42  ;;  %v6082_v42 = vpack.c.bf16 %v1834_v36, %v1832_v35  ;;  %v956_v35 = vld [vmem:[%s6696_s4 + $0x1560] sm:$0xff]  ;;  %v1866_v9 = vld [vmem:[%s6696_s4 + $0x31d0] sm:$0xff] }
 0x2c9   : > { %6059 = vmatpush1.bf16.msra.mxu0 %v6058_v22  ;;  %5165 = vmatprep.subr.bf16.mxu1 %v5164_v13  ;;  %v6068_v57 = vpack.c.bf16 %v1823_v47, %v1821_v23  ;;  %v937_v43 = vld [vmem:[%s6696_s4 + $0x14c8] sm:$0xff]  ;;  %v939_v22 = vld [vmem:[%s6696_s4 + $0x14d8] sm:$0xff]  ;;  %v1852_v36 = vld [vmem:[%s6696_s4 + $0x3160] sm:$0xff] }
 0x2ca   : > { %6061 = vmatprep.subr.bf16.mxu0 %v6060_v45  ;;  %3146 = vmatprep.mubr.f32.mxu1 %v2178_v60  ;;  %v1833_v13 = vld [vmem:[%s6696_s4 + $0x30c8] sm:$0xff]  ;;  %v5184_v45 = vpack.c.bf16 %v939_v22, %v937_v43  ;;  %v947_v47 = vld [vmem:[%s6696_s4 + $0x1518] sm:$0xff]  ;;  %v1850_v22 = vld [vmem:[%s6696_s4 + $0x3150] sm:$0xff] }
 0x2cb   : > { %4140 = vmatprep.mubr.f32.mxu0 %v2297_v38  ;;  %v6080_v60 = vpack.c.bf16 %v1835_v24, %v1833_v13  ;;  %v943_v38 = vld [vmem:[%s6696_s4 + $0x14f8] sm:$0xff]  ;;  %v945_v23 = vld [vmem:[%s6696_s4 + $0x1508] sm:$0xff]  ;;  %v1864_v34 = vld [vmem:[%s6696_s4 + $0x31c0] sm:$0xff] }
 0x2cc   : > { %5167 = vmatpush1.bf16.msra.mxu1 %v5166_v39  ;;  %v1837_v39 = vld [vmem:[%s6696_s4 + $0x30e8] sm:$0xff]  ;;  %v5188_v33 = vpack.c.bf16 %v943_v38, %v941_v37  ;;  %v5192_v26 = vpack.c.bf16 %v947_v47, %v945_v23  ;;  %v959_v24 = vld [vmem:[%s6696_s4 + $0x1578] sm:$0xff]  ;;  %v1854_v38 = vld [vmem:[%s6696_s4 + $0x3170] sm:$0xff] }
 0x2cd   : > { %6063 = vmatpush1.bf16.msra.mxu0 %v6062_v40  ;;  %5169 = vmatprep.subr.bf16.mxu1 %v5168_v41  ;;  %v1839_v40 = vld [vmem:[%s6696_s4 + $0x30f8] sm:$0xff]  ;;  %v5186_v41 = vpack.c.bf16 %v938_v32, %v936_v30  ;;  %v957_v13 = vld [vmem:[%s6696_s4 + $0x1568] sm:$0xff]  ;;  %v6098_v30 = vpack.c.bf16 %v1850_v22, %v1848_v8  ;;  %v1858_v47 = vld [vmem:[%s6696_s4 + $0x3190] sm:$0xff] }
 0x2ce   : > { %6065 = vmatprep.subr.bf16.mxu0 %v6064_v10  ;;  %v942_v10 = vld [vmem:[%s6696_s4 + $0x14f0] sm:$0xff]  ;;  %v6084_v46 = vpack.c.bf16 %v1839_v40, %v1837_v39  ;;  %v5204_v32 = vpack.c.bf16 %v959_v24, %v957_v13  ;;  %v961_v39 = vld [vmem:[%s6696_s4 + $0x1588] sm:$0xff]  ;;  %v963_v40 = vld [vmem:[%s6696_s4 + $0x1598] sm:$0xff] }
 0x2cf   : > { %v972_v8 = vld [vmem:[%s6696_s4 + $0x15e0] sm:$0xff]  ;;  %v1870_v24 = vld [vmem:[%s6696_s4 + $0x31f0] sm:$0xff] }
 0x2d0   : > { %5171 = vmatpush1.bf16.msra.mxu1 %v5170_v48  ;;  %v1841_v48 = vld [vmem:[%s6696_s4 + $0x3108] sm:$0xff]  ;;  %v1868_v22 = vld [vmem:[%s6696_s4 + $0x31e0] sm:$0xff] }
 0x2d1   : > { %6067 = vmatpush1.bf16.msra.mxu0 %v6066_v50  ;;  %5173 = vmatprep.subr.bf16.mxu1 %v5172_v3  ;;  %v1843_v50 = vld [vmem:[%s6696_s4 + $0x3118] sm:$0xff]  ;;  %v5190_v3 = vpack.c.bf16 %v942_v10, %v940_v44  ;;  %v6102_v44 = vpack.c.bf16 %v1854_v38, %v1852_v36  ;;  %v5208_v10 = vpack.c.bf16 %v963_v40, %v961_v39  ;;  %v976_v38 = vld [vmem:[%s6696_s4 + $0x1600] sm:$0xff]  ;;  %v978_v39 = vld [vmem:[%s6696_s4 + $0x1610] sm:$0xff] }
 0x2d2   : > { %6069 = vmatprep.subr.bf16.mxu0 %v6068_v57  ;;  %v946_v57 = vld [vmem:[%s6696_s4 + $0x1510] sm:$0xff]  ;;  %v6088_v58 = vpack.c.bf16 %v1843_v50, %v1841_v48  ;;  %v965_v48 = vld [vmem:[%s6696_s4 + $0x15a8] sm:$0xff]  ;;  %v967_v50 = vld [vmem:[%s6696_s4 + $0x15b8] sm:$0xff]  ;;  %v6118_v36 = vpack.c.bf16 %v1870_v24, %v1868_v22 }
 0x2d3   : > { %v1872_v40 = vld [vmem:[%s6696_s4 + $0x3200] sm:$0xff] }
 0x2d4   : > { %5175 = vmatpush1.bf16.msra.mxu1 %v5174_v49  ;;  %v1845_v49 = vld [vmem:[%s6696_s4 + $0x3128] sm:$0xff]  ;;  %v992_v24 = vld [vmem:[%s6696_s4 + $0x1680] sm:$0xff] }
 0x2d5   : > { %6071 = vmatpush1.bf16.msra.mxu0 %v6070_v0  ;;  %5177 = vmatprep.subr.bf16.mxu1 %v5176_v1  ;;  %v1847_v0 = vld [vmem:[%s6696_s4 + $0x3138] sm:$0xff]  ;;  %v5194_v1 = vpack.c.bf16 %v946_v57, %v944_v54  ;;  %v6106_v54 = vpack.c.bf16 %v1858_v47, %v1856_v56  ;;  %v5212_v57 = vpack.c.bf16 %v967_v50, %v965_v48  ;;  %v980_v47 = vld [vmem:[%s6696_s4 + $0x1620] sm:$0xff]  ;;  %v982_v48 = vld [vmem:[%s6696_s4 + $0x1630] sm:$0xff] }
 0x2d6   : > { %6073 = vmatprep.subr.bf16.mxu0 %v6072_v4  ;;  %v950_v4 = vld [vmem:[%s6696_s4 + $0x1530] sm:$0xff]  ;;  %v6092_v6 = vpack.c.bf16 %v1847_v0, %v1845_v49  ;;  %v969_v49 = vld [vmem:[%s6696_s4 + $0x15c8] sm:$0xff]  ;;  %v971_v0 = vld [vmem:[%s6696_s4 + $0x15d8] sm:$0xff] }
 0x2d7   : > { %v1876_v50 = vld [vmem:[%s6696_s4 + $0x3220] sm:$0xff] }
 0x2d8   : > { %5179 = vmatpush1.bf16.msra.mxu1 %v5178_v11  ;;  %v1849_v11 = vld [vmem:[%s6696_s4 + $0x3148] sm:$0xff] }
 0x2d9   : > { %6075 = vmatpush1.bf16.msra.mxu0 %v6074_v14  ;;  %5181 = vmatprep.subr.bf16.mxu1 %v5180_v15  ;;  %v1851_v14 = vld [vmem:[%s6696_s4 + $0x3158] sm:$0xff]  ;;  %v5198_v15 = vpack.c.bf16 %v950_v4, %v948_v51  ;;  %v6110_v51 = vpack.c.bf16 %v1862_v62, %v1860_v59  ;;  %v5216_v4 = vpack.c.bf16 %v971_v0, %v969_v49  ;;  %v984_v0 = vld [vmem:[%s6696_s4 + $0x1640] sm:$0xff] }
 0x2da   : > { %6077 = vmatprep.subr.bf16.mxu0 %v6076_v20  ;;  %v954_v20 = vld [vmem:[%s6696_s4 + $0x1550] sm:$0xff]  ;;  %v6096_v43 = vpack.c.bf16 %v1851_v14, %v1849_v11  ;;  %v973_v11 = vld [vmem:[%s6696_s4 + $0x15e8] sm:$0xff]  ;;  %v975_v14 = vld [vmem:[%s6696_s4 + $0x15f8] sm:$0xff] }
 0x2dc   : > { %5183 = vmatpush1.bf16.msra.mxu1 %v5182_v25  ;;  %v1853_v25 = vld [vmem:[%s6696_s4 + $0x3168] sm:$0xff] }
 0x2dd   : > { %6079 = vmatpush1.bf16.msra.mxu0 %v6078_v28  ;;  %5185 = vmatprep.subr.bf16.mxu1 %v5184_v45  ;;  %v1855_v28 = vld [vmem:[%s6696_s4 + $0x3178] sm:$0xff]  ;;  %v5202_v45 = vpack.c.bf16 %v954_v20, %v952_v18  ;;  %v6114_v18 = vpack.c.bf16 %v1866_v9, %v1864_v34  ;;  %v5220_v20 = vpack.c.bf16 %v975_v14, %v973_v11  ;;  %v988_v9 = vld [vmem:[%s6696_s4 + $0x1660] sm:$0xff]  ;;  %v990_v11 = vld [vmem:[%s6696_s4 + $0x1670] sm:$0xff] }
 0x2de   : > { %6081 = vmatprep.subr.bf16.mxu0 %v6080_v60  ;;  %v958_v60 = vld [vmem:[%s6696_s4 + $0x1570] sm:$0xff]  ;;  %v6100_v37 = vpack.c.bf16 %v1855_v28, %v1853_v25  ;;  %v977_v25 = vld [vmem:[%s6696_s4 + $0x1608] sm:$0xff]  ;;  %v979_v28 = vld [vmem:[%s6696_s4 + $0x1618] sm:$0xff] }
 0x2df   : > { %v1884_v14 = vld [vmem:[%s6696_s4 + $0x3260] sm:$0xff] }
 0x2e0   : > { %5187 = vmatpush1.bf16.msra.mxu1 %v5186_v41  ;;  %v1857_v41 = vld [vmem:[%s6696_s4 + $0x3188] sm:$0xff] }
 0x2e1   : > { %6083 = vmatpush1.bf16.msra.mxu0 %v6082_v42  ;;  %5189 = vmatprep.subr.bf16.mxu1 %v5188_v33  ;;  %v1859_v42 = vld [vmem:[%s6696_s4 + $0x3198] sm:$0xff]  ;;  %v5206_v33 = vpack.c.bf16 %v958_v60, %v956_v35  ;;  %v2282_v35 = vcombine.high %v8193_v7, %v8193_v7 }
 0x2e2   : > { %6085 = vmatprep.subr.bf16.mxu0 %v6084_v46  ;;  %v962_v46 = vld [vmem:[%s6696_s4 + $0x1590] sm:$0xff]  ;;  %v6104_v23 = vpack.c.bf16 %v1859_v42, %v1857_v41  ;;  %v981_v42 = vld [vmem:[%s6696_s4 + $0x1628] sm:$0xff] }
 0x2e3   : > { %v1874_v41 = vld [vmem:[%s6696_s4 + $0x3210] sm:$0xff] }
 0x2e4   : > { %5191 = vmatpush1.bf16.msra.mxu1 %v5190_v3  ;;  %v1861_v3 = vld [vmem:[%s6696_s4 + $0x31a8] sm:$0xff]  ;;  %v6122_v56 = vpack.c.bf16 %v1874_v41, %v1872_v40  ;;  %v996_v40 = vld [vmem:[%s6696_s4 + $0x16a0] sm:$0xff] }
 0x2e5   : > { %6087 = vmatpush1.bf16.msra.mxu0 %v6086_v52  ;;  %5193 = vmatprep.subr.bf16.mxu1 %v5192_v26  ;;  %v1863_v52 = vld [vmem:[%s6696_s4 + $0x31b8] sm:$0xff]  ;;  %v5210_v26 = vpack.c.bf16 %v962_v46, %v960_v2  ;;  %v8353_v2 = vrot.slane %v2282_v35, %v6817_v12  ;;  %v5226_v46 = vpack.c.bf16 %v978_v39, %v976_v38  ;;  %v1892_v41 = vld [vmem:[%s6696_s4 + $0x32a0] sm:$0xff] }
 0x2e6   : > { %6089 = vmatprep.subr.bf16.mxu0 %v6088_v58  ;;  %v966_v58 = vld [vmem:[%s6696_s4 + $0x15b0] sm:$0xff]  ;;  %v6108_v61 = vpack.c.bf16 %v1863_v52, %v1861_v3  ;;  %v999_v35 = vld [vmem:[%s6696_s4 + $0x16b8] sm:$0xff] }
 0x2e7   : > { %v1878_v52 = vld [vmem:[%s6696_s4 + $0x3230] sm:$0xff]  ;;  %v2298_v59 = vcombine.high %v8353_v2, %v8353_v2 }
 0x2e8   : > { %5195 = vmatpush1.bf16.msra.mxu1 %v5194_v1  ;;  %v1865_v1 = vld [vmem:[%s6696_s4 + $0x31c8] sm:$0xff]  ;;  %v6126_v62 = vpack.c.bf16 %v1878_v52, %v1876_v50  ;;  %v1000_v50 = vld [vmem:[%s6696_s4 + $0x16c0] sm:$0xff] }
 0x2e9   : > { %6091 = vmatpush1.bf16.msra.mxu0 %v6090_v53  ;;  %5197 = vmatprep.subr.bf16.mxu1 %v5196_v31  ;;  %v1867_v53 = vld [vmem:[%s6696_s4 + $0x31d8] sm:$0xff]  ;;  %v5214_v31 = vpack.c.bf16 %v966_v58, %v964_v29  ;;  %v1881_v29 = vld [vmem:[%s6696_s4 + $0x3248] sm:$0xff]  ;;  %v1896_v52 = vld [vmem:[%s6696_s4 + $0x32c0] sm:$0xff] }
 0x2ea   : > { %6093 = vmatprep.subr.bf16.mxu0 %v6092_v6  ;;  %v970_v6 = vld [vmem:[%s6696_s4 + $0x15d0] sm:$0xff]  ;;  %v6112_v27 = vpack.c.bf16 %v1867_v53, %v1865_v1  ;;  %v1883_v58 = vld [vmem:[%s6696_s4 + $0x3258] sm:$0xff]  ;;  %v1880_v1 = vld [vmem:[%s6696_s4 + $0x3240] sm:$0xff] }
 0x2eb   : > { %v6128_v53 = vpack.c.bf16 %v1883_v58, %v1881_v29  ;;  %v1007_v29 = vld [vmem:[%s6696_s4 + $0x16f8] sm:$0xff]  ;;  %v1901_v58 = vld [vmem:[%s6696_s4 + $0x32e8] sm:$0xff] }
 0x2ec   : > { %5199 = vmatpush1.bf16.msra.mxu1 %v5198_v15  ;;  %v1869_v15 = vld [vmem:[%s6696_s4 + $0x31e8] sm:$0xff] }
 0x2ed   : > { %6095 = vmatpush1.bf16.msra.mxu0 %v6094_v16  ;;  %5201 = vmatprep.subr.bf16.mxu1 %v5200_v17  ;;  %v1871_v16 = vld [vmem:[%s6696_s4 + $0x31f8] sm:$0xff]  ;;  %v5218_v17 = vpack.c.bf16 %v970_v6, %v968_v5 }
 0x2ee   : > { %6097 = vmatprep.subr.bf16.mxu0 %v6096_v43  ;;  %v974_v43 = vld [vmem:[%s6696_s4 + $0x15f0] sm:$0xff]  ;;  %v6116_v13 = vpack.c.bf16 %v1871_v16, %v1869_v15  ;;  %v1887_v5 = vld [vmem:[%s6696_s4 + $0x3278] sm:$0xff] }
 0x2ef   : > { %v5222_v60 = vpack.c.bf16 %v974_v43, %v972_v8  ;;  %v1886_v16 = vld [vmem:[%s6696_s4 + $0x3270] sm:$0xff]  ;;  %v1891_v8 = vld [vmem:[%s6696_s4 + $0x3298] sm:$0xff]  ;;  %v5238_v43 = vpack.c.bf16 %v990_v11, %v988_v9  ;;  %v1008_v9 = vld [vmem:[%s6696_s4 + $0x1700] sm:$0xff] }
 0x2f0   : > { %5203 = vmatpush1.bf16.msra.mxu1 %v5202_v45  ;;  %v2163_v45 = vcombine.high %v8190_v55, %v8190_v55  ;;  %v6134_v22 = vpack.c.bf16 %v1886_v16, %v1884_v14  ;;  %v1010_v11 = vld [vmem:[%s6696_s4 + $0x1710] sm:$0xff]  ;;  %v1904_v14 = vld [vmem:[%s6696_s4 + $0x3300] sm:$0xff] }
 0x2f1   : > { %6099 = vmatpush1.bf16.msra.mxu0 %v6098_v30  ;;  %5205 = vmatprep.subr.bf16.mxu1 %v5204_v32  ;;  %v1873_v30 = vld [vmem:[%s6696_s4 + $0x3208] sm:$0xff]  ;;  %v1875_v32 = vld [vmem:[%s6696_s4 + $0x3218] sm:$0xff]  ;;  %v1906_v16 = vld [vmem:[%s6696_s4 + $0x3310] sm:$0xff] }
 0x2f2   : > { %6101 = vmatprep.subr.bf16.mxu0 %v6100_v37  ;;  %v5224_v37 = vpack.c.bf16 %v979_v28, %v977_v25  ;;  %v6120_v55 = vpack.c.bf16 %v1875_v32, %v1873_v30  ;;  %v8348_v7 = vrot.slane %v2163_v45, %v6817_v12  ;;  %v994_v25 = vld [vmem:[%s6696_s4 + $0x1690] sm:$0xff]  ;;  %v1888_v28 = vld [vmem:[%s6696_s4 + $0x3280] sm:$0xff]  ;;  %v997_v32 = vld [vmem:[%s6696_s4 + $0x16a8] sm:$0xff] }
 0x2f3   : > { %v1890_v30 = vld [vmem:[%s6696_s4 + $0x3290] sm:$0xff]  ;;  %v5244_v39 = vpack.c.bf16 %v999_v35, %v997_v32  ;;  %v1017_v32 = vld [vmem:[%s6696_s4 + $0x1748] sm:$0xff]  ;;  %v1019_v35 = vld [vmem:[%s6696_s4 + $0x1758] sm:$0xff] }
 0x2f4   : > { %5207 = vmatpush1.bf16.msra.mxu1 %v5206_v33  ;;  %v983_v33 = vld [vmem:[%s6696_s4 + $0x1638] sm:$0xff]  ;;  %v6138_v38 = vpack.c.bf16 %v1890_v30, %v1888_v28  ;;  %v1908_v28 = vld [vmem:[%s6696_s4 + $0x3320] sm:$0xff]  ;;  %v1910_v30 = vld [vmem:[%s6696_s4 + $0x3330] sm:$0xff] }
 0x2f5   : > { %6103 = vmatpush1.bf16.msra.mxu0 %v6102_v44  ;;  %5209 = vmatprep.subr.bf16.mxu1 %v5208_v10  ;;  %v1877_v44 = vld [vmem:[%s6696_s4 + $0x3228] sm:$0xff]  ;;  %v1879_v10 = vld [vmem:[%s6696_s4 + $0x3238] sm:$0xff] }
 0x2f6   : > { %6105 = vmatprep.subr.bf16.mxu0 %v6104_v23  ;;  %v5228_v23 = vpack.c.bf16 %v983_v33, %v981_v42  ;;  %v6124_v3 = vpack.c.bf16 %v1879_v10, %v1877_v44  ;;  %v1894_v33 = vld [vmem:[%s6696_s4 + $0x32b0] sm:$0xff]  ;;  %v1001_v44 = vld [vmem:[%s6696_s4 + $0x16c8] sm:$0xff]  ;;  %v1003_v10 = vld [vmem:[%s6696_s4 + $0x16d8] sm:$0xff] }
 0x2f8   : > { %5211 = vmatpush1.bf16.msra.mxu1 %v5210_v26  ;;  %v985_v26 = vld [vmem:[%s6696_s4 + $0x1648] sm:$0xff] }
 0x2f9   : > { %6107 = vmatpush1.bf16.msra.mxu0 %v6106_v54  ;;  %5213 = vmatprep.subr.bf16.mxu1 %v5212_v57  ;;  %v987_v54 = vld [vmem:[%s6696_s4 + $0x1658] sm:$0xff]  ;;  %v2179_v57 = vcombine.high %v8348_v7, %v8348_v7 }
 0x2fa   : > { %6109 = vmatprep.subr.bf16.mxu0 %v6108_v61  ;;  %v5230_v61 = vpack.c.bf16 %v982_v48, %v980_v47  ;;  %v5232_v49 = vpack.c.bf16 %v987_v54, %v985_v26  ;;  %v6142_v47 = vpack.c.bf16 %v1894_v33, %v1892_v41  ;;  %v5248_v48 = vpack.c.bf16 %v1003_v10, %v1001_v44  ;;  %v1898_v54 = vld [vmem:[%s6696_s4 + $0x32d0] sm:$0xff]  ;;  %v1912_v41 = vld [vmem:[%s6696_s4 + $0x3340] sm:$0xff]  ;;  %v1021_v44 = vld [vmem:[%s6696_s4 + $0x1768] sm:$0xff] }
 0x2fb   : > { %v1914_v33 = vld [vmem:[%s6696_s4 + $0x3350] sm:$0xff]  ;;  %v1023_v10 = vld [vmem:[%s6696_s4 + $0x1778] sm:$0xff] }
 0x2fc   : > { %5215 = vmatpush1.bf16.msra.mxu1 %v5214_v31  ;;  %v1882_v31 = vld [vmem:[%s6696_s4 + $0x3250] sm:$0xff] }
 0x2fd   : > { %6111 = vmatpush1.bf16.msra.mxu0 %v6110_v51  ;;  %5217 = vmatprep.subr.bf16.mxu1 %v5216_v4  ;;  %v989_v51 = vld [vmem:[%s6696_s4 + $0x1668] sm:$0xff]  ;;  %v991_v4 = vld [vmem:[%s6696_s4 + $0x1678] sm:$0xff]  ;;  %v6130_v34 = vpack.c.bf16 %v1882_v31, %v1880_v1  ;;  %v1900_v1 = vld [vmem:[%s6696_s4 + $0x32e0] sm:$0xff] }
 0x2fe   : > { %6113 = vmatprep.subr.bf16.mxu0 %v6112_v27  ;;  %v5236_v27 = vpack.c.bf16 %v991_v4, %v989_v51  ;;  %v1902_v31 = vld [vmem:[%s6696_s4 + $0x32f0] sm:$0xff]  ;;  %v1009_v51 = vld [vmem:[%s6696_s4 + $0x1708] sm:$0xff]  ;;  %v1011_v4 = vld [vmem:[%s6696_s4 + $0x1718] sm:$0xff] }
 0x300   : > { %5219 = vmatpush1.bf16.msra.mxu1 %v5218_v17  ;;  %v993_v17 = vld [vmem:[%s6696_s4 + $0x1688] sm:$0xff] }
 0x301   : > { %6115 = vmatpush1.bf16.msra.mxu0 %v6114_v18  ;;  %5221 = vmatprep.subr.bf16.mxu1 %v5220_v20  ;;  %v995_v18 = vld [vmem:[%s6696_s4 + $0x1698] sm:$0xff]  ;;  %v1889_v20 = vld [vmem:[%s6696_s4 + $0x3288] sm:$0xff] }
 0x302   : > { %6117 = vmatprep.subr.bf16.mxu0 %v6116_v13  ;;  %v5240_v13 = vpack.c.bf16 %v995_v18, %v993_v17  ;;  %v6136_v45 = vpack.c.bf16 %v1891_v8, %v1889_v20  ;;  %v1013_v17 = vld [vmem:[%s6696_s4 + $0x1728] sm:$0xff]  ;;  %v1015_v18 = vld [vmem:[%s6696_s4 + $0x1738] sm:$0xff] }
 0x303   : > { %v1909_v20 = vld [vmem:[%s6696_s4 + $0x3328] sm:$0xff]  ;;  %v1911_v8 = vld [vmem:[%s6696_s4 + $0x3338] sm:$0xff] }
 0x304   : > { %5223 = vmatpush1.bf16.msra.mxu1 %v5222_v60  ;;  %v1893_v60 = vld [vmem:[%s6696_s4 + $0x32a8] sm:$0xff] }
 0x305   : > { %6119 = vmatpush1.bf16.msra.mxu0 %v6118_v36  ;;  %5225 = vmatprep.subr.bf16.mxu1 %v5224_v37  ;;  %v1895_v36 = vld [vmem:[%s6696_s4 + $0x32b8] sm:$0xff]  ;;  %v5242_v37 = vpack.c.bf16 %v994_v25, %v992_v24  ;;  %v1012_v24 = vld [vmem:[%s6696_s4 + $0x1720] sm:$0xff]  ;;  %v1014_v25 = vld [vmem:[%s6696_s4 + $0x1730] sm:$0xff] }
 0x306   : > { %6121 = vmatprep.subr.bf16.mxu0 %v6120_v55  ;;  %v998_v55 = vld [vmem:[%s6696_s4 + $0x16b0] sm:$0xff]  ;;  %v6140_v42 = vpack.c.bf16 %v1895_v36, %v1893_v60  ;;  %v1913_v60 = vld [vmem:[%s6696_s4 + $0x3348] sm:$0xff]  ;;  %v1915_v36 = vld [vmem:[%s6696_s4 + $0x3358] sm:$0xff] }
 0x307   : > { %3147 = vmatmul.mubr.f32.vlgmr.msra.gmra.mrb[0].mxu1 %v8203_v19  ;;  %v986_v19 = vld [vmem:[%s6696_s4 + $0x1650] sm:$0xff] }
 0x308   : > { %5227 = vmatpush1.bf16.msra.mxu1 %v5226_v46  ;;  %4141 = vmatmul.mubr.f32.vlgmr.msra.gmra.mrb[0].mxu0 %v8209_v21  ;;  %v1885_v21 = vld [vmem:[%s6696_s4 + $0x3268] sm:$0xff]  ;;  %v5234_v6 = vpack.c.bf16 %v986_v19, %v984_v0  ;;  %v1004_v0 = vld [vmem:[%s6696_s4 + $0x16e0] sm:$0xff]  ;;  %v1006_v19 = vld [vmem:[%s6696_s4 + $0x16f0] sm:$0xff] }
 0x309   : > { %6123 = vmatpush1.bf16.msra.mxu0 %v6122_v56  ;;  %5229 = vmatprep.subr.bf16.mxu1 %v5228_v23  ;;  %v6132_v15 = vpack.c.bf16 %v1887_v5, %v1885_v21  ;;  %v1897_v46 = vld [vmem:[%s6696_s4 + $0x32c8] sm:$0xff]  ;;  %v1899_v56 = vld [vmem:[%s6696_s4 + $0x32d8] sm:$0xff]  ;;  %v5246_v23 = vpack.c.bf16 %v998_v55, %v996_v40  ;;  %v1016_v40 = vld [vmem:[%s6696_s4 + $0x1740] sm:$0xff] }
 0x30a   : > { %6125 = vmatprep.subr.bf16.mxu0 %v6124_v3  ;;  %3217 = vmatprep.mubr.f32.mxu1 %v2179_v57  ;;  %v1002_v3 = vld [vmem:[%s6696_s4 + $0x16d0] sm:$0xff]  ;;  %v6144_v26 = vpack.c.bf16 %v1899_v56, %v1897_v46  ;;  %v1005_v57 = vld [vmem:[%s6696_s4 + $0x16e8] sm:$0xff]  ;;  %v1907_v5 = vld [vmem:[%s6696_s4 + $0x3318] sm:$0xff] }
 0x30b   : > { %4211 = vmatprep.mubr.f32.mxu0 %v2298_v59  ;;  %v1903_v59 = vld [vmem:[%s6696_s4 + $0x32f8] sm:$0xff]  ;;  %v1905_v21 = vld [vmem:[%s6696_s4 + $0x3308] sm:$0xff]  ;;  %v1018_v55 = vld [vmem:[%s6696_s4 + $0x1750] sm:$0xff] }
 0x30c   : > { %5231 = vmatpush1.bf16.msra.mxu1 %v5230_v61  ;;  %v5250_v61 = vpack.c.bf16 %v1002_v3, %v1000_v50  ;;  %v1917_v46 = vld [vmem:[%s6696_s4 + $0x3368] sm:$0xff]  ;;  %v1919_v56 = vld [vmem:[%s6696_s4 + $0x3378] sm:$0xff]  ;;  %v1020_v50 = vld [vmem:[%s6696_s4 + $0x1760] sm:$0xff] }
 0x30d   : > { %6127 = vmatpush1.bf16.msra.mxu0 %v6126_v62  ;;  %5233 = vmatprep.subr.bf16.mxu1 %v5232_v49  ;;  %v6146_v62 = vpack.c.bf16 %v1898_v54, %v1896_v52  ;;  %v5252_v49 = vpack.c.bf16 %v1007_v29, %v1005_v57  ;;  %v1022_v3 = vld [vmem:[%s6696_s4 + $0x1770] sm:$0xff]  ;;  %v1916_v52 = vld [vmem:[%s6696_s4 + $0x3360] sm:$0xff]  ;;  %v1025_v57 = vld [vmem:[%s6696_s4 + $0x1788] sm:$0xff] }
 0x30e   : > { %6129 = vmatprep.subr.bf16.mxu0 %v6128_v53  ;;  %v6148_v53 = vpack.c.bf16 %v1903_v59, %v1901_v58  ;;  %v1918_v54 = vld [vmem:[%s6696_s4 + $0x3370] sm:$0xff]  ;;  %v1027_v29 = vld [vmem:[%s6696_s4 + $0x1798] sm:$0xff]  ;;  %v1921_v58 = vld [vmem:[%s6696_s4 + $0x3388] sm:$0xff] }
 0x30f   : > { %v1923_v59 = vld [vmem:[%s6696_s4 + $0x3398] sm:$0xff] }
 0x310   : > { %5235 = vmatpush1.bf16.msra.mxu1 %v5234_v6  ;;  %v5254_v6 = vpack.c.bf16 %v1006_v19, %v1004_v0  ;;  %v1024_v0 = vld [vmem:[%s6696_s4 + $0x1780] sm:$0xff]  ;;  %v1026_v19 = vld [vmem:[%s6696_s4 + $0x1790] sm:$0xff] }
 0x311   : > { %6131 = vmatpush1.bf16.msra.mxu0 %v6130_v34  ;;  %5237 = vmatprep.subr.bf16.mxu1 %v5236_v27  ;;  %v6150_v34 = vpack.c.bf16 %v1902_v31, %v1900_v1  ;;  %v5256_v27 = vpack.c.bf16 %v1011_v4, %v1009_v51  ;;  %v1920_v1 = vld [vmem:[%s6696_s4 + $0x3380] sm:$0xff]  ;;  %v1922_v31 = vld [vmem:[%s6696_s4 + $0x3390] sm:$0xff]  ;;  %v1029_v51 = vld [vmem:[%s6696_s4 + $0x17a8] sm:$0xff] }
 0x312   : > { %6133 = vmatprep.subr.bf16.mxu0 %v6132_v15  ;;  %v6152_v15 = vpack.c.bf16 %v1907_v5, %v1905_v21  ;;  %v1031_v4 = vld [vmem:[%s6696_s4 + $0x17b8] sm:$0xff]  ;;  %v1925_v21 = vld [vmem:[%s6696_s4 + $0x33a8] sm:$0xff] }
 0x313   : > { %v1927_v5 = vld [vmem:[%s6696_s4 + $0x33b8] sm:$0xff] }
 0x314   : > { %5239 = vmatpush1.bf16.msra.mxu1 %v5238_v43  ;;  %v5258_v43 = vpack.c.bf16 %v1010_v11, %v1008_v9  ;;  %v1028_v9 = vld [vmem:[%s6696_s4 + $0x17a0] sm:$0xff]  ;;  %v1030_v11 = vld [vmem:[%s6696_s4 + $0x17b0] sm:$0xff] }
 0x315   : > { %6135 = vmatpush1.bf16.msra.mxu0 %v6134_v22  ;;  %5241 = vmatprep.subr.bf16.mxu1 %v5240_v13  ;;  %v6154_v22 = vpack.c.bf16 %v1906_v16, %v1904_v14  ;;  %v5260_v13 = vpack.c.bf16 %v1015_v18, %v1013_v17  ;;  %v1924_v14 = vld [vmem:[%s6696_s4 + $0x33a0] sm:$0xff]  ;;  %v1926_v16 = vld [vmem:[%s6696_s4 + $0x33b0] sm:$0xff]  ;;  %v1033_v17 = vld [vmem:[%s6696_s4 + $0x17c8] sm:$0xff] }
 0x316   : > { %6137 = vmatprep.subr.bf16.mxu0 %v6136_v45  ;;  %v6156_v45 = vpack.c.bf16 %v1911_v8, %v1909_v20  ;;  %v1035_v18 = vld [vmem:[%s6696_s4 + $0x17d8] sm:$0xff]  ;;  %v1929_v20 = vld [vmem:[%s6696_s4 + $0x33c8] sm:$0xff] }
 0x317   : > { %v1931_v8 = vld [vmem:[%s6696_s4 + $0x33d8] sm:$0xff] }
 0x318   : > { %5243 = vmatpush1.bf16.msra.mxu1 %v5242_v37  ;;  %v5262_v37 = vpack.c.bf16 %v1014_v25, %v1012_v24  ;;  %v1032_v24 = vld [vmem:[%s6696_s4 + $0x17c0] sm:$0xff]  ;;  %v1034_v25 = vld [vmem:[%s6696_s4 + $0x17d0] sm:$0xff] }
 0x319   : > { %6139 = vmatpush1.bf16.msra.mxu0 %v6138_v38  ;;  %5245 = vmatprep.subr.bf16.mxu1 %v5244_v39  ;;  %v6158_v38 = vpack.c.bf16 %v1910_v30, %v1908_v28  ;;  %v5264_v39 = vpack.c.bf16 %v1019_v35, %v1017_v32  ;;  %v1928_v28 = vld [vmem:[%s6696_s4 + $0x33c0] sm:$0xff]  ;;  %v1930_v30 = vld [vmem:[%s6696_s4 + $0x33d0] sm:$0xff]  ;;  %v1037_v32 = vld [vmem:[%s6696_s4 + $0x17e8] sm:$0xff] }
 0x31a   : > { %6141 = vmatprep.subr.bf16.mxu0 %v6140_v42  ;;  %v6160_v42 = vpack.c.bf16 %v1915_v36, %v1913_v60  ;;  %v1039_v35 = vld [vmem:[%s6696_s4 + $0x17f8] sm:$0xff]  ;;  %v1933_v60 = vld [vmem:[%s6696_s4 + $0x33e8] sm:$0xff] }
 0x31b   : > { %v1935_v36 = vld [vmem:[%s6696_s4 + $0x33f8] sm:$0xff] }
 0x31c   : > { %5247 = vmatpush1.bf16.msra.mxu1 %v5246_v23  ;;  %v5266_v23 = vpack.c.bf16 %v1018_v55, %v1016_v40  ;;  %v1036_v40 = vld [vmem:[%s6696_s4 + $0x17e0] sm:$0xff]  ;;  %v1038_v55 = vld [vmem:[%s6696_s4 + $0x17f0] sm:$0xff] }
 0x31d   : > { %6143 = vmatpush1.bf16.msra.mxu0 %v6142_v47  ;;  %5249 = vmatprep.subr.bf16.mxu1 %v5248_v48  ;;  %v6162_v47 = vpack.c.bf16 %v1914_v33, %v1912_v41  ;;  %v5268_v48 = vpack.c.bf16 %v1023_v10, %v1021_v44  ;;  %v1932_v41 = vld [vmem:[%s6696_s4 + $0x33e0] sm:$0xff]  ;;  %v1934_v33 = vld [vmem:[%s6696_s4 + $0x33f0] sm:$0xff]  ;;  %v1041_v44 = vld [vmem:[%s6696_s4 + $0x1808] sm:$0xff] }
 0x31e   : > { %6145 = vmatprep.subr.bf16.mxu0 %v6144_v26  ;;  %v6164_v26 = vpack.c.bf16 %v1919_v56, %v1917_v46  ;;  %v1043_v10 = vld [vmem:[%s6696_s4 + $0x1818] sm:$0xff]  ;;  %v1937_v46 = vld [vmem:[%s6696_s4 + $0x3408] sm:$0xff] }
 0x31f   : > { %v1939_v56 = vld [vmem:[%s6696_s4 + $0x3418] sm:$0xff] }
 0x320   : > { %5251 = vmatpush1.bf16.msra.mxu1 %v5250_v61  ;;  %v5270_v61 = vpack.c.bf16 %v1022_v3, %v1020_v50  ;;  %v6182_v50 = vpack.c.bf16 %v1934_v33, %v1932_v41  ;;  %v5288_v3 = vpack.c.bf16 %v1043_v10, %v1041_v44  ;;  %v1056_v33 = vld [vmem:[%s6696_s4 + $0x1880] sm:$0xff]  ;;  %v1058_v44 = vld [vmem:[%s6696_s4 + $0x1890] sm:$0xff] }
 0x321   : > { %6147 = vmatpush1.bf16.msra.mxu0 %v6146_v62  ;;  %5253 = vmatprep.subr.bf16.mxu1 %v5252_v49  ;;  %v6166_v62 = vpack.c.bf16 %v1918_v54, %v1916_v52  ;;  %v5272_v49 = vpack.c.bf16 %v1027_v29, %v1025_v57  ;;  %v1040_v52 = vld [vmem:[%s6696_s4 + $0x1800] sm:$0xff]  ;;  %v6184_v57 = vpack.c.bf16 %v1939_v56, %v1937_v46  ;;  %v1938_v29 = vld [vmem:[%s6696_s4 + $0x3410] sm:$0xff] }
 0x322   : > { %6149 = vmatprep.subr.bf16.mxu0 %v6148_v53  ;;  %v6168_v53 = vpack.c.bf16 %v1923_v59, %v1921_v58  ;;  %v1936_v54 = vld [vmem:[%s6696_s4 + $0x3400] sm:$0xff]  ;;  %v1045_v58 = vld [vmem:[%s6696_s4 + $0x1828] sm:$0xff]  ;;  %v1047_v59 = vld [vmem:[%s6696_s4 + $0x1838] sm:$0xff] }
 0x323   : > { %v1952_v10 = vld [vmem:[%s6696_s4 + $0x3480] sm:$0xff]  ;;  %v1954_v56 = vld [vmem:[%s6696_s4 + $0x3490] sm:$0xff] }
 0x324   : > { %5255 = vmatpush1.bf16.msra.mxu1 %v5254_v6  ;;  %v5274_v6 = vpack.c.bf16 %v1026_v19, %v1024_v0 }
 0x325   : > { %6151 = vmatpush1.bf16.msra.mxu0 %v6150_v34  ;;  %5257 = vmatprep.subr.bf16.mxu1 %v5256_v27  ;;  %v6170_v34 = vpack.c.bf16 %v1922_v31, %v1920_v1  ;;  %v5276_v27 = vpack.c.bf16 %v1031_v4, %v1029_v51  ;;  %v6186_v1 = vpack.c.bf16 %v1938_v29, %v1936_v54  ;;  %v1044_v31 = vld [vmem:[%s6696_s4 + $0x1820] sm:$0xff]  ;;  %v1046_v51 = vld [vmem:[%s6696_s4 + $0x1830] sm:$0xff] }
 0x326   : > { %6153 = vmatprep.subr.bf16.mxu0 %v6152_v15  ;;  %v6172_v15 = vpack.c.bf16 %v1927_v5, %v1925_v21  ;;  %v1940_v4 = vld [vmem:[%s6696_s4 + $0x3420] sm:$0xff]  ;;  %v1942_v5 = vld [vmem:[%s6696_s4 + $0x3430] sm:$0xff]  ;;  %v6202_v54 = vpack.c.bf16 %v1954_v56, %v1952_v10 }
 0x327   : > { %v1060_v29 = vld [vmem:[%s6696_s4 + $0x18a0] sm:$0xff] }
 0x328   : > { %5259 = vmatpush1.bf16.msra.mxu1 %v5258_v43  ;;  %v5278_v43 = vpack.c.bf16 %v1030_v11, %v1028_v9  ;;  %v1945_v9 = vld [vmem:[%s6696_s4 + $0x3448] sm:$0xff]  ;;  %v1947_v11 = vld [vmem:[%s6696_s4 + $0x3458] sm:$0xff]  ;;  %v1076_v10 = vld [vmem:[%s6696_s4 + $0x1920] sm:$0xff] }
 0x329   : > { %6155 = vmatpush1.bf16.msra.mxu0 %v6154_v22  ;;  %5261 = vmatprep.subr.bf16.mxu1 %v5260_v13  ;;  %v6174_v22 = vpack.c.bf16 %v1926_v16, %v1924_v14  ;;  %v5280_v13 = vpack.c.bf16 %v1035_v18, %v1033_v17  ;;  %v6190_v16 = vpack.c.bf16 %v1942_v5, %v1940_v4  ;;  %v1048_v18 = vld [vmem:[%s6696_s4 + $0x1840] sm:$0xff] }
 0x32a   : > { %6157 = vmatprep.subr.bf16.mxu0 %v6156_v45  ;;  %v6176_v45 = vpack.c.bf16 %v1931_v8, %v1929_v20  ;;  %v1944_v20 = vld [vmem:[%s6696_s4 + $0x3440] sm:$0xff]  ;;  %v6192_v8 = vpack.c.bf16 %v1947_v11, %v1945_v9  ;;  %v1962_v9 = vld [vmem:[%s6696_s4 + $0x34d0] sm:$0xff]  ;;  %v1069_v11 = vld [vmem:[%s6696_s4 + $0x18e8] sm:$0xff] }
 0x32b   : > { %v1064_v5 = vld [vmem:[%s6696_s4 + $0x18c0] sm:$0xff] }
 0x32c   : > { %5263 = vmatpush1.bf16.msra.mxu1 %v5262_v37  ;;  %v5282_v37 = vpack.c.bf16 %v1034_v25, %v1032_v24  ;;  %v1951_v24 = vld [vmem:[%s6696_s4 + $0x3478] sm:$0xff]  ;;  %v1972_v56 = vld [vmem:[%s6696_s4 + $0x3520] sm:$0xff] }
 0x32d   : > { %6159 = vmatpush1.bf16.msra.mxu0 %v6158_v38  ;;  %5265 = vmatprep.subr.bf16.mxu1 %v5264_v39  ;;  %v6178_v38 = vpack.c.bf16 %v1930_v30, %v1928_v28  ;;  %v5284_v39 = vpack.c.bf16 %v1039_v35, %v1037_v32  ;;  %v1052_v30 = vld [vmem:[%s6696_s4 + $0x1860] sm:$0xff]  ;;  %v1054_v32 = vld [vmem:[%s6696_s4 + $0x1870] sm:$0xff] }
 0x32e   : > { %6161 = vmatprep.subr.bf16.mxu0 %v6160_v42  ;;  %v6180_v42 = vpack.c.bf16 %v1935_v36, %v1933_v60  ;;  %v1948_v35 = vld [vmem:[%s6696_s4 + $0x3460] sm:$0xff]  ;;  %v1950_v36 = vld [vmem:[%s6696_s4 + $0x3470] sm:$0xff] }
 0x32f   : > { %v6198_v41 = vpack.c.bf16 %v1950_v36, %v1948_v35  ;;  %v1072_v35 = vld [vmem:[%s6696_s4 + $0x1900] sm:$0xff] }
 0x330   : > { %5267 = vmatpush1.bf16.msra.mxu1 %v5266_v23  ;;  %v8482_v23 = vld [vmem:[%s6719_s20 + $0x30] sm:$0xff]  ;;  %v1968_v36 = vld [vmem:[%s6696_s4 + $0x3500] sm:$0xff] }
 0x331   : > { %6163 = vmatpush1.bf16.msra.mxu0 %v6162_v47  ;;  %5269 = vmatprep.subr.bf16.mxu1 %v5268_v48  ;;  %v5286_v47 = vpack.c.bf16 %v1038_v55, %v1036_v40  ;;  %v8485_v48 = vld [vmem:[%s6719_s20 + $0x68] sm:$0xff]  ;;  %v1955_v40 = vld [vmem:[%s6696_s4 + $0x3498] sm:$0xff]  ;;  %v5302_v55 = vpack.c.bf16 %v1054_v32, %v1052_v30 }
 0x332   : > { %6165 = vmatprep.subr.bf16.mxu0 %v6164_v26  ;;  %v1042_v26 = vld [vmem:[%s6696_s4 + $0x1810] sm:$0xff]  ;;  %v8501_v0 = vrot.slane %v8485_v48, %v6817_v12 }
 0x333   : > { %v5290_v19 = vpack.c.bf16 %v1042_v26, %v1040_v52  ;;  %v1959_v52 = vld [vmem:[%s6696_s4 + $0x34b8] sm:$0xff]  ;;  %v5306_v26 = vpack.c.bf16 %v1058_v44, %v1056_v33 }
 0x334   : > { %5271 = vmatpush1.bf16.msra.mxu1 %v5270_v61  ;;  %v8495_v61 = vrot.slane %v8482_v23, %v6817_v12  ;;  %v2314_v14 = vcombine.high %v8501_v0, %v8501_v0 }
 0x335   : > { %6167 = vmatpush1.bf16.msra.mxu0 %v6166_v62  ;;  %5273 = vmatprep.subr.bf16.mxu1 %v5272_v49  ;;  %v1941_v62 = vld [vmem:[%s6696_s4 + $0x3428] sm:$0xff]  ;;  %v1943_v49 = vld [vmem:[%s6696_s4 + $0x3438] sm:$0xff] }
 0x336   : > { %6169 = vmatprep.subr.bf16.mxu0 %v6168_v53  ;;  %v5292_v53 = vpack.c.bf16 %v1047_v59, %v1045_v58  ;;  %v6188_v21 = vpack.c.bf16 %v1943_v49, %v1941_v62  ;;  %v1062_v58 = vld [vmem:[%s6696_s4 + $0x18b0] sm:$0xff]  ;;  %v1956_v59 = vld [vmem:[%s6696_s4 + $0x34a0] sm:$0xff] }
 0x337   : > { %v1958_v49 = vld [vmem:[%s6696_s4 + $0x34b0] sm:$0xff] }
 0x338   : > { %5275 = vmatpush1.bf16.msra.mxu1 %v5274_v6  ;;  %v1049_v6 = vld [vmem:[%s6696_s4 + $0x1848] sm:$0xff]  ;;  %v6206_v4 = vpack.c.bf16 %v1958_v49, %v1956_v59  ;;  %v1080_v59 = vld [vmem:[%s6696_s4 + $0x1940] sm:$0xff] }
 0x339   : > { %6171 = vmatpush1.bf16.msra.mxu0 %v6170_v34  ;;  %5277 = vmatprep.subr.bf16.mxu1 %v5276_v27  ;;  %v1051_v34 = vld [vmem:[%s6696_s4 + $0x1858] sm:$0xff]  ;;  %v2195_v27 = vcombine.high %v8495_v61, %v8495_v61  ;;  %v1976_v49 = vld [vmem:[%s6696_s4 + $0x3540] sm:$0xff] }
 0x33a   : > { %6173 = vmatprep.subr.bf16.mxu0 %v6172_v15  ;;  %v5294_v15 = vpack.c.bf16 %v1046_v51, %v1044_v31  ;;  %v5296_v17 = vpack.c.bf16 %v1051_v34, %v1049_v6  ;;  %v1963_v31 = vld [vmem:[%s6696_s4 + $0x34d8] sm:$0xff]  ;;  %v5310_v51 = vpack.c.bf16 %v1062_v58, %v1060_v29  ;;  %v1066_v6 = vld [vmem:[%s6696_s4 + $0x18d0] sm:$0xff]  ;;  %v1960_v34 = vld [vmem:[%s6696_s4 + $0x34c0] sm:$0xff] }
 0x33c   : > { %5279 = vmatpush1.bf16.msra.mxu1 %v5278_v43  ;;  %v1946_v43 = vld [vmem:[%s6696_s4 + $0x3450] sm:$0xff] }
 0x33d   : > { %6175 = vmatpush1.bf16.msra.mxu0 %v6174_v22  ;;  %5281 = vmatprep.subr.bf16.mxu1 %v5280_v13  ;;  %v1053_v22 = vld [vmem:[%s6696_s4 + $0x1868] sm:$0xff]  ;;  %v1055_v13 = vld [vmem:[%s6696_s4 + $0x1878] sm:$0xff]  ;;  %v6194_v28 = vpack.c.bf16 %v1946_v43, %v1944_v20  ;;  %v1068_v20 = vld [vmem:[%s6696_s4 + $0x18e0] sm:$0xff] }
 0x33e   : > { %6177 = vmatprep.subr.bf16.mxu0 %v6176_v45  ;;  %v5300_v45 = vpack.c.bf16 %v1055_v13, %v1053_v22  ;;  %v1964_v43 = vld [vmem:[%s6696_s4 + $0x34e0] sm:$0xff]  ;;  %v1966_v13 = vld [vmem:[%s6696_s4 + $0x34f0] sm:$0xff] }
 0x33f   : > { %v6214_v30 = vpack.c.bf16 %v1966_v13, %v1964_v43  ;;  %v1088_v43 = vld [vmem:[%s6696_s4 + $0x1980] sm:$0xff] }
 0x340   : > { %5283 = vmatpush1.bf16.msra.mxu1 %v5282_v37  ;;  %v1057_v37 = vld [vmem:[%s6696_s4 + $0x1888] sm:$0xff]  ;;  %v1984_v13 = vld [vmem:[%s6696_s4 + $0x3580] sm:$0xff] }
 0x341   : > { %6179 = vmatpush1.bf16.msra.mxu0 %v6178_v38  ;;  %5285 = vmatprep.subr.bf16.mxu1 %v5284_v39  ;;  %v1059_v38 = vld [vmem:[%s6696_s4 + $0x1898] sm:$0xff]  ;;  %v1953_v39 = vld [vmem:[%s6696_s4 + $0x3488] sm:$0xff] }
 0x342   : > { %6181 = vmatprep.subr.bf16.mxu0 %v6180_v42  ;;  %v5304_v42 = vpack.c.bf16 %v1059_v38, %v1057_v37  ;;  %v6200_v46 = vpack.c.bf16 %v1955_v40, %v1953_v39  ;;  %v1970_v38 = vld [vmem:[%s6696_s4 + $0x3510] sm:$0xff]  ;;  %v1077_v39 = vld [vmem:[%s6696_s4 + $0x1928] sm:$0xff]  ;;  %v1079_v40 = vld [vmem:[%s6696_s4 + $0x1938] sm:$0xff] }
 0x343   : > { %v6218_v33 = vpack.c.bf16 %v1970_v38, %v1968_v36  ;;  %v5324_v44 = vpack.c.bf16 %v1079_v40, %v1077_v39  ;;  %v1092_v36 = vld [vmem:[%s6696_s4 + $0x19a0] sm:$0xff]  ;;  %v1990_v40 = vld [vmem:[%s6696_s4 + $0x35b0] sm:$0xff] }
 0x344   : > { %5287 = vmatpush1.bf16.msra.mxu1 %v5286_v47  ;;  %v1061_v47 = vld [vmem:[%s6696_s4 + $0x18a8] sm:$0xff]  ;;  %v1988_v38 = vld [vmem:[%s6696_s4 + $0x35a0] sm:$0xff] }
 0x345   : > { %6183 = vmatpush1.bf16.msra.mxu0 %v6182_v50  ;;  %5289 = vmatprep.subr.bf16.mxu1 %v5288_v3  ;;  %v1063_v50 = vld [vmem:[%s6696_s4 + $0x18b8] sm:$0xff]  ;;  %v1957_v3 = vld [vmem:[%s6696_s4 + $0x34a8] sm:$0xff] }
 0x346   : > { %6185 = vmatprep.subr.bf16.mxu0 %v6184_v57  ;;  %v5308_v57 = vpack.c.bf16 %v1063_v50, %v1061_v47  ;;  %v6204_v62 = vpack.c.bf16 %v1959_v52, %v1957_v3  ;;  %v1974_v50 = vld [vmem:[%s6696_s4 + $0x3530] sm:$0xff]  ;;  %v1081_v3 = vld [vmem:[%s6696_s4 + $0x1948] sm:$0xff]  ;;  %v1083_v52 = vld [vmem:[%s6696_s4 + $0x1958] sm:$0xff] }
 0x347   : > { %3218 = vmatmul.mubr.f32.vlgmr.msra.gmra.mrb[0].mxu1 %v8348_v7  ;;  %v1050_v7 = vld [vmem:[%s6696_s4 + $0x1850] sm:$0xff]  ;;  %v6222_v29 = vpack.c.bf16 %v1974_v50, %v1972_v56  ;;  %v5328_v58 = vpack.c.bf16 %v1083_v52, %v1081_v3  ;;  %v1096_v56 = vld [vmem:[%s6696_s4 + $0x19c0] sm:$0xff] }
 0x348   : > { %5291 = vmatpush1.bf16.msra.mxu1 %v5290_v19  ;;  %4212 = vmatmul.mubr.f32.vlgmr.msra.gmra.mrb[0].mxu0 %v8353_v2  ;;  %v1949_v2 = vld [vmem:[%s6696_s4 + $0x3468] sm:$0xff]  ;;  %v5298_v25 = vpack.c.bf16 %v1050_v7, %v1048_v18  ;;  %v6210_v18 = vpack.c.bf16 %v1962_v9, %v1960_v34  ;;  %v1084_v34 = vld [vmem:[%s6696_s4 + $0x1960] sm:$0xff]  ;;  %v1994_v52 = vld [vmem:[%s6696_s4 + $0x35d0] sm:$0xff] }
 0x349   : > { %6187 = vmatpush1.bf16.msra.mxu0 %v6186_v1  ;;  %5293 = vmatprep.subr.bf16.mxu1 %v5292_v53  ;;  %v6196_v60 = vpack.c.bf16 %v1951_v24, %v1949_v2  ;;  %v1065_v19 = vld [vmem:[%s6696_s4 + $0x18c8] sm:$0xff]  ;;  %v1067_v1 = vld [vmem:[%s6696_s4 + $0x18d8] sm:$0xff]  ;;  %v1980_v9 = vld [vmem:[%s6696_s4 + $0x3560] sm:$0xff] }
 0x34a   : > { %6189 = vmatprep.subr.bf16.mxu0 %v6188_v21  ;;  %3288 = vmatprep.mubr.f32.mxu1 %v2195_v27  ;;  %v1961_v53 = vld [vmem:[%s6696_s4 + $0x34c8] sm:$0xff]  ;;  %v5312_v21 = vpack.c.bf16 %v1067_v1, %v1065_v19  ;;  %v1075_v24 = vld [vmem:[%s6696_s4 + $0x1918] sm:$0xff]  ;;  %v1978_v1 = vld [vmem:[%s6696_s4 + $0x3550] sm:$0xff] }
 0x34b   : > { %4282 = vmatprep.mubr.f32.mxu0 %v2314_v14  ;;  %v6208_v27 = vpack.c.bf16 %v1963_v31, %v1961_v53  ;;  %v1071_v14 = vld [vmem:[%s6696_s4 + $0x18f8] sm:$0xff]  ;;  %v1073_v2 = vld [vmem:[%s6696_s4 + $0x1908] sm:$0xff]  ;;  %v1992_v50 = vld [vmem:[%s6696_s4 + $0x35c0] sm:$0xff] }
 0x34c   : > { %5295 = vmatpush1.bf16.msra.mxu1 %v5294_v15  ;;  %v1965_v15 = vld [vmem:[%s6696_s4 + $0x34e8] sm:$0xff]  ;;  %v5316_v7 = vpack.c.bf16 %v1071_v14, %v1069_v11  ;;  %v5320_v32 = vpack.c.bf16 %v1075_v24, %v1073_v2  ;;  %v1087_v31 = vld [vmem:[%s6696_s4 + $0x1978] sm:$0xff]  ;;  %v1982_v14 = vld [vmem:[%s6696_s4 + $0x3570] sm:$0xff] }
 0x34d   : > { %6191 = vmatpush1.bf16.msra.mxu0 %v6190_v16  ;;  %5297 = vmatprep.subr.bf16.mxu1 %v5296_v17  ;;  %v1967_v16 = vld [vmem:[%s6696_s4 + $0x34f8] sm:$0xff]  ;;  %v5314_v17 = vpack.c.bf16 %v1066_v6, %v1064_v5  ;;  %v1085_v53 = vld [vmem:[%s6696_s4 + $0x1968] sm:$0xff]  ;;  %v6226_v5 = vpack.c.bf16 %v1978_v1, %v1976_v49  ;;  %v1986_v24 = vld [vmem:[%s6696_s4 + $0x3590] sm:$0xff] }
 0x34e   : > { %6193 = vmatprep.subr.bf16.mxu0 %v6192_v8  ;;  %v1070_v8 = vld [vmem:[%s6696_s4 + $0x18f0] sm:$0xff]  ;;  %v6212_v22 = vpack.c.bf16 %v1967_v16, %v1965_v15  ;;  %v5332_v6 = vpack.c.bf16 %v1087_v31, %v1085_v53  ;;  %v1089_v15 = vld [vmem:[%s6696_s4 + $0x1988] sm:$0xff]  ;;  %v1091_v16 = vld [vmem:[%s6696_s4 + $0x1998] sm:$0xff] }
 0x34f   : > { %v1100_v49 = vld [vmem:[%s6696_s4 + $0x19e0] sm:$0xff]  ;;  %v1998_v31 = vld [vmem:[%s6696_s4 + $0x35f0] sm:$0xff] }
 0x350   : > { %5299 = vmatpush1.bf16.msra.mxu1 %v5298_v25  ;;  %v1969_v25 = vld [vmem:[%s6696_s4 + $0x3508] sm:$0xff]  ;;  %v1996_v1 = vld [vmem:[%s6696_s4 + $0x35e0] sm:$0xff] }
 0x351   : > { %6195 = vmatpush1.bf16.msra.mxu0 %v6194_v28  ;;  %5301 = vmatprep.subr.bf16.mxu1 %v5300_v45  ;;  %v1971_v28 = vld [vmem:[%s6696_s4 + $0x3518] sm:$0xff]  ;;  %v5318_v45 = vpack.c.bf16 %v1070_v8, %v1068_v20  ;;  %v6230_v20 = vpack.c.bf16 %v1982_v14, %v1980_v9  ;;  %v5336_v8 = vpack.c.bf16 %v1091_v16, %v1089_v15  ;;  %v1104_v14 = vld [vmem:[%s6696_s4 + $0x1a00] sm:$0xff]  ;;  %v1106_v15 = vld [vmem:[%s6696_s4 + $0x1a10] sm:$0xff] }
 0x352   : > { %6197 = vmatprep.subr.bf16.mxu0 %v6196_v60  ;;  %v1074_v60 = vld [vmem:[%s6696_s4 + $0x1910] sm:$0xff]  ;;  %v6216_v37 = vpack.c.bf16 %v1971_v28, %v1969_v25  ;;  %v1093_v25 = vld [vmem:[%s6696_s4 + $0x19a8] sm:$0xff]  ;;  %v1095_v28 = vld [vmem:[%s6696_s4 + $0x19b8] sm:$0xff]  ;;  %v6246_v9 = vpack.c.bf16 %v1998_v31, %v1996_v1 }
 0x353   : > { %v2000_v16 = vld [vmem:[%s6696_s4 + $0x3600] sm:$0xff] }
 0x354   : > { %5303 = vmatpush1.bf16.msra.mxu1 %v5302_v55  ;;  %v1973_v55 = vld [vmem:[%s6696_s4 + $0x3528] sm:$0xff]  ;;  %v1120_v31 = vld [vmem:[%s6696_s4 + $0x1a80] sm:$0xff] }
 0x355   : > { %6199 = vmatpush1.bf16.msra.mxu0 %v6198_v41  ;;  %5305 = vmatprep.subr.bf16.mxu1 %v5304_v42  ;;  %v1975_v41 = vld [vmem:[%s6696_s4 + $0x3538] sm:$0xff]  ;;  %v5322_v42 = vpack.c.bf16 %v1074_v60, %v1072_v35  ;;  %v6234_v35 = vpack.c.bf16 %v1986_v24, %v1984_v13  ;;  %v5340_v60 = vpack.c.bf16 %v1095_v28, %v1093_v25  ;;  %v1108_v24 = vld [vmem:[%s6696_s4 + $0x1a20] sm:$0xff]  ;;  %v1110_v25 = vld [vmem:[%s6696_s4 + $0x1a30] sm:$0xff] }
 0x356   : > { %6201 = vmatprep.subr.bf16.mxu0 %v6200_v46  ;;  %v1078_v46 = vld [vmem:[%s6696_s4 + $0x1930] sm:$0xff]  ;;  %v6220_v47 = vpack.c.bf16 %v1975_v41, %v1973_v55  ;;  %v1097_v55 = vld [vmem:[%s6696_s4 + $0x19c8] sm:$0xff]  ;;  %v1099_v41 = vld [vmem:[%s6696_s4 + $0x19d8] sm:$0xff] }
 0x357   : > { %v2004_v28 = vld [vmem:[%s6696_s4 + $0x3620] sm:$0xff] }
 0x358   : > { %5307 = vmatpush1.bf16.msra.mxu1 %v5306_v26  ;;  %v1977_v26 = vld [vmem:[%s6696_s4 + $0x3548] sm:$0xff] }
 0x359   : > { %6203 = vmatpush1.bf16.msra.mxu0 %v6202_v54  ;;  %5309 = vmatprep.subr.bf16.mxu1 %v5308_v57  ;;  %v1979_v54 = vld [vmem:[%s6696_s4 + $0x3558] sm:$0xff]  ;;  %v5326_v57 = vpack.c.bf16 %v1078_v46, %v1076_v10  ;;  %v6238_v10 = vpack.c.bf16 %v1990_v40, %v1988_v38  ;;  %v5344_v46 = vpack.c.bf16 %v1099_v41, %v1097_v55  ;;  %v1112_v41 = vld [vmem:[%s6696_s4 + $0x1a40] sm:$0xff] }
 0x35a   : > { %6205 = vmatprep.subr.bf16.mxu0 %v6204_v62  ;;  %v1082_v62 = vld [vmem:[%s6696_s4 + $0x1950] sm:$0xff]  ;;  %v6224_v19 = vpack.c.bf16 %v1979_v54, %v1977_v26  ;;  %v1101_v26 = vld [vmem:[%s6696_s4 + $0x19e8] sm:$0xff]  ;;  %v1103_v54 = vld [vmem:[%s6696_s4 + $0x19f8] sm:$0xff] }
 0x35c   : > { %5311 = vmatpush1.bf16.msra.mxu1 %v5310_v51  ;;  %v1981_v51 = vld [vmem:[%s6696_s4 + $0x3568] sm:$0xff] }
 0x35d   : > { %6207 = vmatpush1.bf16.msra.mxu0 %v6206_v4  ;;  %5313 = vmatprep.subr.bf16.mxu1 %v5312_v21  ;;  %v1983_v4 = vld [vmem:[%s6696_s4 + $0x3578] sm:$0xff]  ;;  %v5330_v21 = vpack.c.bf16 %v1082_v62, %v1080_v59  ;;  %v6242_v59 = vpack.c.bf16 %v1994_v52, %v1992_v50  ;;  %v5348_v62 = vpack.c.bf16 %v1103_v54, %v1101_v26  ;;  %v1116_v52 = vld [vmem:[%s6696_s4 + $0x1a60] sm:$0xff]  ;;  %v1118_v26 = vld [vmem:[%s6696_s4 + $0x1a70] sm:$0xff] }
 0x35e   : > { %6209 = vmatprep.subr.bf16.mxu0 %v6208_v27  ;;  %v1086_v27 = vld [vmem:[%s6696_s4 + $0x1970] sm:$0xff]  ;;  %v6228_v11 = vpack.c.bf16 %v1983_v4, %v1981_v51  ;;  %v1105_v51 = vld [vmem:[%s6696_s4 + $0x1a08] sm:$0xff]  ;;  %v1107_v4 = vld [vmem:[%s6696_s4 + $0x1a18] sm:$0xff] }
 0x35f   : > { %v2012_v54 = vld [vmem:[%s6696_s4 + $0x3660] sm:$0xff] }
 0x360   : > { %5315 = vmatpush1.bf16.msra.mxu1 %v5314_v17  ;;  %v1985_v17 = vld [vmem:[%s6696_s4 + $0x3588] sm:$0xff] }
 0x361   : > { %6211 = vmatpush1.bf16.msra.mxu0 %v6210_v18  ;;  %5317 = vmatprep.subr.bf16.mxu1 %v5316_v7  ;;  %v1987_v18 = vld [vmem:[%s6696_s4 + $0x3598] sm:$0xff]  ;;  %v5334_v7 = vpack.c.bf16 %v1086_v27, %v1084_v34  ;;  %v2299_v34 = vcombine.high %v8485_v48, %v8485_v48 }
 0x362   : > { %6213 = vmatprep.subr.bf16.mxu0 %v6212_v22  ;;  %v1090_v22 = vld [vmem:[%s6696_s4 + $0x1990] sm:$0xff]  ;;  %v6232_v2 = vpack.c.bf16 %v1987_v18, %v1985_v17  ;;  %v1109_v18 = vld [vmem:[%s6696_s4 + $0x1a28] sm:$0xff] }
 0x363   : > { %v2002_v17 = vld [vmem:[%s6696_s4 + $0x3610] sm:$0xff] }
 0x364   : > { %5319 = vmatpush1.bf16.msra.mxu1 %v5318_v45  ;;  %v1989_v45 = vld [vmem:[%s6696_s4 + $0x35a8] sm:$0xff]  ;;  %v6250_v13 = vpack.c.bf16 %v2002_v17, %v2000_v16  ;;  %v1124_v16 = vld [vmem:[%s6696_s4 + $0x1aa0] sm:$0xff] }
 0x365   : > { %6215 = vmatpush1.bf16.msra.mxu0 %v6214_v30  ;;  %5321 = vmatprep.subr.bf16.mxu1 %v5320_v32  ;;  %v1991_v30 = vld [vmem:[%s6696_s4 + $0x35b8] sm:$0xff]  ;;  %v5338_v32 = vpack.c.bf16 %v1090_v22, %v1088_v43  ;;  %v8645_v43 = vrot.slane %v2299_v34, %v6817_v12  ;;  %v5354_v22 = vpack.c.bf16 %v1106_v15, %v1104_v14  ;;  %v2020_v17 = vld [vmem:[%s6696_s4 + $0x36a0] sm:$0xff] }
 0x366   : > { %6217 = vmatprep.subr.bf16.mxu0 %v6216_v37  ;;  %v1094_v37 = vld [vmem:[%s6696_s4 + $0x19b0] sm:$0xff]  ;;  %v6236_v39 = vpack.c.bf16 %v1991_v30, %v1989_v45  ;;  %v1127_v34 = vld [vmem:[%s6696_s4 + $0x1ab8] sm:$0xff] }
 0x367   : > { %v2006_v30 = vld [vmem:[%s6696_s4 + $0x3630] sm:$0xff]  ;;  %v2315_v38 = vcombine.high %v8645_v43, %v8645_v43 }
 0x368   : > { %5323 = vmatpush1.bf16.msra.mxu1 %v5322_v42  ;;  %v1993_v42 = vld [vmem:[%s6696_s4 + $0x35c8] sm:$0xff]  ;;  %v6254_v40 = vpack.c.bf16 %v2006_v30, %v2004_v28  ;;  %v1128_v28 = vld [vmem:[%s6696_s4 + $0x1ac0] sm:$0xff] }
 0x369   : > { %6219 = vmatpush1.bf16.msra.mxu0 %v6218_v33  ;;  %5325 = vmatprep.subr.bf16.mxu1 %v5324_v44  ;;  %v1995_v33 = vld [vmem:[%s6696_s4 + $0x35d8] sm:$0xff]  ;;  %v5342_v44 = vpack.c.bf16 %v1094_v37, %v1092_v36  ;;  %v2009_v36 = vld [vmem:[%s6696_s4 + $0x3648] sm:$0xff]  ;;  %v2024_v30 = vld [vmem:[%s6696_s4 + $0x36c0] sm:$0xff] }
 0x36a   : > { %6221 = vmatprep.subr.bf16.mxu0 %v6220_v47  ;;  %v1098_v47 = vld [vmem:[%s6696_s4 + $0x19d0] sm:$0xff]  ;;  %v6240_v3 = vpack.c.bf16 %v1995_v33, %v1993_v42  ;;  %v2011_v37 = vld [vmem:[%s6696_s4 + $0x3658] sm:$0xff]  ;;  %v2008_v42 = vld [vmem:[%s6696_s4 + $0x3640] sm:$0xff] }
 0x36b   : > { %v6256_v33 = vpack.c.bf16 %v2011_v37, %v2009_v36  ;;  %v1135_v36 = vld [vmem:[%s6696_s4 + $0x1af8] sm:$0xff]  ;;  %v2029_v37 = vld [vmem:[%s6696_s4 + $0x36e8] sm:$0xff] }
 0x36c   : > { %5327 = vmatpush1.bf16.msra.mxu1 %v5326_v57  ;;  %v1997_v57 = vld [vmem:[%s6696_s4 + $0x35e8] sm:$0xff] }
 0x36d   : > { %6223 = vmatpush1.bf16.msra.mxu0 %v6222_v29  ;;  %5329 = vmatprep.subr.bf16.mxu1 %v5328_v58  ;;  %v1999_v29 = vld [vmem:[%s6696_s4 + $0x35f8] sm:$0xff]  ;;  %v5346_v58 = vpack.c.bf16 %v1098_v47, %v1096_v56 }
 0x36e   : > { %6225 = vmatprep.subr.bf16.mxu0 %v6224_v19  ;;  %v1102_v19 = vld [vmem:[%s6696_s4 + $0x19f0] sm:$0xff]  ;;  %v6244_v53 = vpack.c.bf16 %v1999_v29, %v1997_v57  ;;  %v2015_v56 = vld [vmem:[%s6696_s4 + $0x3678] sm:$0xff] }
 0x36f   : > { %v5350_v27 = vpack.c.bf16 %v1102_v19, %v1100_v49  ;;  %v2014_v29 = vld [vmem:[%s6696_s4 + $0x3670] sm:$0xff]  ;;  %v2019_v49 = vld [vmem:[%s6696_s4 + $0x3698] sm:$0xff]  ;;  %v5366_v19 = vpack.c.bf16 %v1118_v26, %v1116_v52  ;;  %v1136_v52 = vld [vmem:[%s6696_s4 + $0x1b00] sm:$0xff] }
 0x370   : > { %5331 = vmatpush1.bf16.msra.mxu1 %v5330_v21  ;;  %v2180_v21 = vcombine.high %v8482_v23, %v8482_v23  ;;  %v6262_v1 = vpack.c.bf16 %v2014_v29, %v2012_v54  ;;  %v1138_v26 = vld [vmem:[%s6696_s4 + $0x1b10] sm:$0xff]  ;;  %v2032_v54 = vld [vmem:[%s6696_s4 + $0x3700] sm:$0xff] }
 0x371   : > { %6227 = vmatpush1.bf16.msra.mxu0 %v6226_v5  ;;  %5333 = vmatprep.subr.bf16.mxu1 %v5332_v6  ;;  %v2001_v5 = vld [vmem:[%s6696_s4 + $0x3608] sm:$0xff]  ;;  %v2003_v6 = vld [vmem:[%s6696_s4 + $0x3618] sm:$0xff]  ;;  %v2034_v29 = vld [vmem:[%s6696_s4 + $0x3710] sm:$0xff] }
 0x372   : > { %6229 = vmatprep.subr.bf16.mxu0 %v6228_v11  ;;  %v5352_v11 = vpack.c.bf16 %v1107_v4, %v1105_v51  ;;  %v6248_v23 = vpack.c.bf16 %v2003_v6, %v2001_v5  ;;  %v8640_v48 = vrot.slane %v2180_v21, %v6817_v12  ;;  %v1122_v51 = vld [vmem:[%s6696_s4 + $0x1a90] sm:$0xff]  ;;  %v2016_v4 = vld [vmem:[%s6696_s4 + $0x3680] sm:$0xff]  ;;  %v1125_v6 = vld [vmem:[%s6696_s4 + $0x1aa8] sm:$0xff] }
 0x373   : > { %v2018_v5 = vld [vmem:[%s6696_s4 + $0x3690] sm:$0xff]  ;;  %v5372_v15 = vpack.c.bf16 %v1127_v34, %v1125_v6  ;;  %v1145_v6 = vld [vmem:[%s6696_s4 + $0x1b48] sm:$0xff]  ;;  %v1147_v34 = vld [vmem:[%s6696_s4 + $0x1b58] sm:$0xff] }
 0x374   : > { %5335 = vmatpush1.bf16.msra.mxu1 %v5334_v7  ;;  %v1111_v7 = vld [vmem:[%s6696_s4 + $0x1a38] sm:$0xff]  ;;  %v6266_v14 = vpack.c.bf16 %v2018_v5, %v2016_v4  ;;  %v2036_v4 = vld [vmem:[%s6696_s4 + $0x3720] sm:$0xff]  ;;  %v2038_v5 = vld [vmem:[%s6696_s4 + $0x3730] sm:$0xff] }
 0x375   : > { %6231 = vmatpush1.bf16.msra.mxu0 %v6230_v20  ;;  %5337 = vmatprep.subr.bf16.mxu1 %v5336_v8  ;;  %v2005_v20 = vld [vmem:[%s6696_s4 + $0x3628] sm:$0xff]  ;;  %v2007_v8 = vld [vmem:[%s6696_s4 + $0x3638] sm:$0xff] }
 0x376   : > { %6233 = vmatprep.subr.bf16.mxu0 %v6232_v2  ;;  %v5356_v2 = vpack.c.bf16 %v1111_v7, %v1109_v18  ;;  %v6252_v45 = vpack.c.bf16 %v2007_v8, %v2005_v20  ;;  %v2022_v7 = vld [vmem:[%s6696_s4 + $0x36b0] sm:$0xff]  ;;  %v1129_v20 = vld [vmem:[%s6696_s4 + $0x1ac8] sm:$0xff]  ;;  %v1131_v8 = vld [vmem:[%s6696_s4 + $0x1ad8] sm:$0xff] }
 0x378   : > { %5339 = vmatpush1.bf16.msra.mxu1 %v5338_v32  ;;  %v1113_v32 = vld [vmem:[%s6696_s4 + $0x1a48] sm:$0xff] }
 0x379   : > { %6235 = vmatpush1.bf16.msra.mxu0 %v6234_v35  ;;  %5341 = vmatprep.subr.bf16.mxu1 %v5340_v60  ;;  %v1115_v35 = vld [vmem:[%s6696_s4 + $0x1a58] sm:$0xff]  ;;  %v2196_v60 = vcombine.high %v8640_v48, %v8640_v48 }
 0x37a   : > { %6237 = vmatprep.subr.bf16.mxu0 %v6236_v39  ;;  %v5358_v39 = vpack.c.bf16 %v1110_v25, %v1108_v24  ;;  %v5360_v55 = vpack.c.bf16 %v1115_v35, %v1113_v32  ;;  %v6270_v24 = vpack.c.bf16 %v2022_v7, %v2020_v17  ;;  %v5376_v25 = vpack.c.bf16 %v1131_v8, %v1129_v20  ;;  %v2026_v35 = vld [vmem:[%s6696_s4 + $0x36d0] sm:$0xff]  ;;  %v2040_v17 = vld [vmem:[%s6696_s4 + $0x3740] sm:$0xff]  ;;  %v1149_v20 = vld [vmem:[%s6696_s4 + $0x1b68] sm:$0xff] }
 0x37b   : > { %v2042_v7 = vld [vmem:[%s6696_s4 + $0x3750] sm:$0xff]  ;;  %v1151_v8 = vld [vmem:[%s6696_s4 + $0x1b78] sm:$0xff] }
 0x37c   : > { %5343 = vmatpush1.bf16.msra.mxu1 %v5342_v44  ;;  %v2010_v44 = vld [vmem:[%s6696_s4 + $0x3650] sm:$0xff] }
 0x37d   : > { %6239 = vmatpush1.bf16.msra.mxu0 %v6238_v10  ;;  %5345 = vmatprep.subr.bf16.mxu1 %v5344_v46  ;;  %v1117_v10 = vld [vmem:[%s6696_s4 + $0x1a68] sm:$0xff]  ;;  %v1119_v46 = vld [vmem:[%s6696_s4 + $0x1a78] sm:$0xff]  ;;  %v6258_v50 = vpack.c.bf16 %v2010_v44, %v2008_v42  ;;  %v2028_v42 = vld [vmem:[%s6696_s4 + $0x36e0] sm:$0xff] }
 0x37e   : > { %6241 = vmatprep.subr.bf16.mxu0 %v6240_v3  ;;  %v5364_v3 = vpack.c.bf16 %v1119_v46, %v1117_v10  ;;  %v2030_v44 = vld [vmem:[%s6696_s4 + $0x36f0] sm:$0xff]  ;;  %v1137_v10 = vld [vmem:[%s6696_s4 + $0x1b08] sm:$0xff]  ;;  %v1139_v46 = vld [vmem:[%s6696_s4 + $0x1b18] sm:$0xff] }
 0x380   : > { %5347 = vmatpush1.bf16.msra.mxu1 %v5346_v58  ;;  %v1121_v58 = vld [vmem:[%s6696_s4 + $0x1a88] sm:$0xff] }
 0x381   : > { %6243 = vmatpush1.bf16.msra.mxu0 %v6242_v59  ;;  %5349 = vmatprep.subr.bf16.mxu1 %v5348_v62  ;;  %v1123_v59 = vld [vmem:[%s6696_s4 + $0x1a98] sm:$0xff]  ;;  %v2017_v62 = vld [vmem:[%s6696_s4 + $0x3688] sm:$0xff] }
 0x382   : > { %6245 = vmatprep.subr.bf16.mxu0 %v6244_v53  ;;  %v5368_v53 = vpack.c.bf16 %v1123_v59, %v1121_v58  ;;  %v6264_v21 = vpack.c.bf16 %v2019_v49, %v2017_v62  ;;  %v1141_v58 = vld [vmem:[%s6696_s4 + $0x1b28] sm:$0xff]  ;;  %v1143_v59 = vld [vmem:[%s6696_s4 + $0x1b38] sm:$0xff] }
 0x383   : > { %v2037_v62 = vld [vmem:[%s6696_s4 + $0x3728] sm:$0xff]  ;;  %v2039_v49 = vld [vmem:[%s6696_s4 + $0x3738] sm:$0xff] }
 0x384   : > { %5351 = vmatpush1.bf16.msra.mxu1 %v5350_v27  ;;  %v2021_v27 = vld [vmem:[%s6696_s4 + $0x36a8] sm:$0xff] }
 0x385   : > { %6247 = vmatpush1.bf16.msra.mxu0 %v6246_v9  ;;  %5353 = vmatprep.subr.bf16.mxu1 %v5352_v11  ;;  %v2023_v9 = vld [vmem:[%s6696_s4 + $0x36b8] sm:$0xff]  ;;  %v5370_v11 = vpack.c.bf16 %v1122_v51, %v1120_v31  ;;  %v1140_v31 = vld [vmem:[%s6696_s4 + $0x1b20] sm:$0xff]  ;;  %v1142_v51 = vld [vmem:[%s6696_s4 + $0x1b30] sm:$0xff] }
 0x386   : > { %6249 = vmatprep.subr.bf16.mxu0 %v6248_v23  ;;  %v1126_v23 = vld [vmem:[%s6696_s4 + $0x1ab0] sm:$0xff]  ;;  %v6268_v18 = vpack.c.bf16 %v2023_v9, %v2021_v27  ;;  %v2041_v27 = vld [vmem:[%s6696_s4 + $0x3748] sm:$0xff]  ;;  %v2043_v9 = vld [vmem:[%s6696_s4 + $0x3758] sm:$0xff] }
 0x387   : > { %3289 = vmatmul.mubr.f32.vlgmr.msra.gmra.mrb[0].mxu1 %v8495_v61  ;;  %v1114_v61 = vld [vmem:[%s6696_s4 + $0x1a50] sm:$0xff] }
 0x388   : > { %5355 = vmatpush1.bf16.msra.mxu1 %v5354_v22  ;;  %4283 = vmatmul.mubr.f32.vlgmr.msra.gmra.mrb[0].mxu0 %v8501_v0  ;;  %v2013_v0 = vld [vmem:[%s6696_s4 + $0x3668] sm:$0xff]  ;;  %v5362_v47 = vpack.c.bf16 %v1114_v61, %v1112_v41  ;;  %v1132_v41 = vld [vmem:[%s6696_s4 + $0x1ae0] sm:$0xff]  ;;  %v1134_v61 = vld [vmem:[%s6696_s4 + $0x1af0] sm:$0xff] }
 0x389   : > { %6251 = vmatpush1.bf16.msra.mxu0 %v6250_v13  ;;  %5357 = vmatprep.subr.bf16.mxu1 %v5356_v2  ;;  %v6260_v57 = vpack.c.bf16 %v2015_v56, %v2013_v0  ;;  %v2025_v22 = vld [vmem:[%s6696_s4 + $0x36c8] sm:$0xff]  ;;  %v2027_v13 = vld [vmem:[%s6696_s4 + $0x36d8] sm:$0xff]  ;;  %v5374_v2 = vpack.c.bf16 %v1126_v23, %v1124_v16  ;;  %v1144_v16 = vld [vmem:[%s6696_s4 + $0x1b40] sm:$0xff] }
 0x38a   : > { %6253 = vmatprep.subr.bf16.mxu0 %v6252_v45  ;;  %3359 = vmatprep.mubr.f32.mxu1 %v2196_v60  ;;  %v1130_v45 = vld [vmem:[%s6696_s4 + $0x1ad0] sm:$0xff]  ;;  %v6272_v32 = vpack.c.bf16 %v2027_v13, %v2025_v22  ;;  %v1133_v60 = vld [vmem:[%s6696_s4 + $0x1ae8] sm:$0xff]  ;;  %v2035_v56 = vld [vmem:[%s6696_s4 + $0x3718] sm:$0xff] }
 0x38b   : > { %4353 = vmatprep.mubr.f32.mxu0 %v2315_v38  ;;  %v2031_v38 = vld [vmem:[%s6696_s4 + $0x36f8] sm:$0xff]  ;;  %v2033_v0 = vld [vmem:[%s6696_s4 + $0x3708] sm:$0xff]  ;;  %v1146_v23 = vld [vmem:[%s6696_s4 + $0x1b50] sm:$0xff] }
 0x38c   : > { %5359 = vmatpush1.bf16.msra.mxu1 %v5358_v39  ;;  %v5378_v39 = vpack.c.bf16 %v1130_v45, %v1128_v28  ;;  %v2045_v22 = vld [vmem:[%s6696_s4 + $0x3768] sm:$0xff]  ;;  %v2047_v13 = vld [vmem:[%s6696_s4 + $0x3778] sm:$0xff]  ;;  %v1148_v28 = vld [vmem:[%s6696_s4 + $0x1b60] sm:$0xff] }
 0x38d   : > { %6255 = vmatpush1.bf16.msra.mxu0 %v6254_v40  ;;  %5361 = vmatprep.subr.bf16.mxu1 %v5360_v55  ;;  %v6274_v40 = vpack.c.bf16 %v2026_v35, %v2024_v30  ;;  %v5380_v55 = vpack.c.bf16 %v1135_v36, %v1133_v60  ;;  %v1150_v45 = vld [vmem:[%s6696_s4 + $0x1b70] sm:$0xff]  ;;  %v2044_v30 = vld [vmem:[%s6696_s4 + $0x3760] sm:$0xff]  ;;  %v1153_v60 = vld [vmem:[%s6696_s4 + $0x1b88] sm:$0xff] }
 0x38e   : > { %6257 = vmatprep.subr.bf16.mxu0 %v6256_v33  ;;  %v6276_v33 = vpack.c.bf16 %v2031_v38, %v2029_v37  ;;  %v2046_v35 = vld [vmem:[%s6696_s4 + $0x3770] sm:$0xff]  ;;  %v1155_v36 = vld [vmem:[%s6696_s4 + $0x1b98] sm:$0xff]  ;;  %v2049_v37 = vld [vmem:[%s6696_s4 + $0x3788] sm:$0xff] }
 0x38f   : > { %v2051_v38 = vld [vmem:[%s6696_s4 + $0x3798] sm:$0xff] }
 0x390   : > { %5363 = vmatpush1.bf16.msra.mxu1 %v5362_v47  ;;  %v5382_v47 = vpack.c.bf16 %v1134_v61, %v1132_v41  ;;  %v1152_v41 = vld [vmem:[%s6696_s4 + $0x1b80] sm:$0xff]  ;;  %v1154_v61 = vld [vmem:[%s6696_s4 + $0x1b90] sm:$0xff] }
 0x391   : > { %6259 = vmatpush1.bf16.msra.mxu0 %v6258_v50  ;;  %5365 = vmatprep.subr.bf16.mxu1 %v5364_v3  ;;  %v6278_v50 = vpack.c.bf16 %v2030_v44, %v2028_v42  ;;  %v5384_v3 = vpack.c.bf16 %v1139_v46, %v1137_v10  ;;  %v2048_v42 = vld [vmem:[%s6696_s4 + $0x3780] sm:$0xff]  ;;  %v2050_v44 = vld [vmem:[%s6696_s4 + $0x3790] sm:$0xff]  ;;  %v1157_v10 = vld [vmem:[%s6696_s4 + $0x1ba8] sm:$0xff] }
 0x392   : > { %6261 = vmatprep.subr.bf16.mxu0 %v6260_v57  ;;  %v6280_v57 = vpack.c.bf16 %v2035_v56, %v2033_v0  ;;  %v1159_v46 = vld [vmem:[%s6696_s4 + $0x1bb8] sm:$0xff]  ;;  %v2053_v0 = vld [vmem:[%s6696_s4 + $0x37a8] sm:$0xff] }
 0x393   : > { %v2055_v56 = vld [vmem:[%s6696_s4 + $0x37b8] sm:$0xff] }
 0x394   : > { %5367 = vmatpush1.bf16.msra.mxu1 %v5366_v19  ;;  %v5386_v19 = vpack.c.bf16 %v1138_v26, %v1136_v52  ;;  %v1156_v52 = vld [vmem:[%s6696_s4 + $0x1ba0] sm:$0xff]  ;;  %v1158_v26 = vld [vmem:[%s6696_s4 + $0x1bb0] sm:$0xff] }
 0x395   : > { %6263 = vmatpush1.bf16.msra.mxu0 %v6262_v1  ;;  %5369 = vmatprep.subr.bf16.mxu1 %v5368_v53  ;;  %v6282_v1 = vpack.c.bf16 %v2034_v29, %v2032_v54  ;;  %v5388_v53 = vpack.c.bf16 %v1143_v59, %v1141_v58  ;;  %v2052_v54 = vld [vmem:[%s6696_s4 + $0x37a0] sm:$0xff]  ;;  %v2054_v29 = vld [vmem:[%s6696_s4 + $0x37b0] sm:$0xff]  ;;  %v1161_v58 = vld [vmem:[%s6696_s4 + $0x1bc8] sm:$0xff] }
 0x396   : > { %6265 = vmatprep.subr.bf16.mxu0 %v6264_v21  ;;  %v6284_v21 = vpack.c.bf16 %v2039_v49, %v2037_v62  ;;  %v1163_v59 = vld [vmem:[%s6696_s4 + $0x1bd8] sm:$0xff]  ;;  %v2057_v62 = vld [vmem:[%s6696_s4 + $0x37c8] sm:$0xff] }
 0x397   : > { %v2059_v49 = vld [vmem:[%s6696_s4 + $0x37d8] sm:$0xff] }
 0x398   : > { %5371 = vmatpush1.bf16.msra.mxu1 %v5370_v11  ;;  %v5390_v11 = vpack.c.bf16 %v1142_v51, %v1140_v31  ;;  %v1160_v31 = vld [vmem:[%s6696_s4 + $0x1bc0] sm:$0xff]  ;;  %v1162_v51 = vld [vmem:[%s6696_s4 + $0x1bd0] sm:$0xff] }
 0x399   : > { %6267 = vmatpush1.bf16.msra.mxu0 %v6266_v14  ;;  %5373 = vmatprep.subr.bf16.mxu1 %v5372_v15  ;;  %v6286_v14 = vpack.c.bf16 %v2038_v5, %v2036_v4  ;;  %v5392_v15 = vpack.c.bf16 %v1147_v34, %v1145_v6  ;;  %v2056_v4 = vld [vmem:[%s6696_s4 + $0x37c0] sm:$0xff]  ;;  %v2058_v5 = vld [vmem:[%s6696_s4 + $0x37d0] sm:$0xff]  ;;  %v1165_v6 = vld [vmem:[%s6696_s4 + $0x1be8] sm:$0xff] }
 0x39a   : > { %6269 = vmatprep.subr.bf16.mxu0 %v6268_v18  ;;  %v6288_v18 = vpack.c.bf16 %v2043_v9, %v2041_v27  ;;  %v1167_v34 = vld [vmem:[%s6696_s4 + $0x1bf8] sm:$0xff]  ;;  %v2061_v27 = vld [vmem:[%s6696_s4 + $0x37e8] sm:$0xff] }
 0x39b   : > { %v2063_v9 = vld [vmem:[%s6696_s4 + $0x37f8] sm:$0xff] }
 0x39c   : > { %5375 = vmatpush1.bf16.msra.mxu1 %v5374_v2  ;;  %v5394_v2 = vpack.c.bf16 %v1146_v23, %v1144_v16  ;;  %v1164_v16 = vld [vmem:[%s6696_s4 + $0x1be0] sm:$0xff]  ;;  %v1166_v23 = vld [vmem:[%s6696_s4 + $0x1bf0] sm:$0xff] }
 0x39d   : > { %6271 = vmatpush1.bf16.msra.mxu0 %v6270_v24  ;;  %5377 = vmatprep.subr.bf16.mxu1 %v5376_v25  ;;  %v6290_v24 = vpack.c.bf16 %v2042_v7, %v2040_v17  ;;  %v5396_v25 = vpack.c.bf16 %v1151_v8, %v1149_v20  ;;  %v6308_v17 = vpack.c.bf16 %v2063_v9, %v2061_v27  ;;  %v2062_v7 = vld [vmem:[%s6696_s4 + $0x37f0] sm:$0xff] }
 0x39e   : > { %6273 = vmatprep.subr.bf16.mxu0 %v6272_v32  ;;  %v6292_v32 = vpack.c.bf16 %v2047_v13, %v2045_v22  ;;  %v5414_v20 = vpack.c.bf16 %v1166_v23, %v1164_v16 }
 0x3a0   : > { %5379 = vmatpush1.bf16.msra.mxu1 %v5378_v39  ;;  %v5398_v39 = vpack.c.bf16 %v1150_v45, %v1148_v28 }
 0x3a1   : > { %6275 = vmatpush1.bf16.msra.mxu0 %v6274_v40  ;;  %5381 = vmatprep.subr.bf16.mxu1 %v5380_v55  ;;  %v6294_v40 = vpack.c.bf16 %v2046_v35, %v2044_v30  ;;  %v5400_v55 = vpack.c.bf16 %v1155_v36, %v1153_v60  ;;  %v257_v30 = vld [vmem:[#allocation2] sm:$0xf]  ;;  %v4386_v60 = vsub.s32 (!%p4516_p6), 1, %v6806_v63 }
 0x3a2   : > { %6277 = vmatprep.subr.bf16.mxu0 %v6276_v33  ;;  %v6296_v33 = vpack.c.bf16 %v2051_v38, %v2049_v37 }
 0x3a4   : > { %5383 = vmatpush1.bf16.msra.mxu1 %v5382_v47  ;;  %v5402_v47 = vpack.c.bf16 %v1154_v61, %v1152_v41 }
 0x3a5   : > { %6279 = vmatpush1.bf16.msra.mxu0 %v6278_v50  ;;  %5385 = vmatprep.subr.bf16.mxu1 %v5384_v3  ;;  %v6298_v50 = vpack.c.bf16 %v2050_v44, %v2048_v42  ;;  %v5404_v3 = vpack.c.bf16 %v1159_v46, %v1157_v10 }
 0x3a6   : > { %6281 = vmatprep.subr.bf16.mxu0 %v6280_v57  ;;  %v6300_v57 = vpack.c.bf16 %v2055_v56, %v2053_v0 }
 0x3a8   : > { %5387 = vmatpush1.bf16.msra.mxu1 %v5386_v19  ;;  %v5406_v19 = vpack.c.bf16 %v1158_v26, %v1156_v52 }
 0x3a9   : > { %6283 = vmatpush1.bf16.msra.mxu0 %v6282_v1  ;;  %5389 = vmatprep.subr.bf16.mxu1 %v5388_v53  ;;  %v6302_v1 = vpack.c.bf16 %v2054_v29, %v2052_v54  ;;  %v5408_v53 = vpack.c.bf16 %v1163_v59, %v1161_v58 }
 0x3aa   : > { %6285 = vmatprep.subr.bf16.mxu0 %v6284_v21  ;;  %v6304_v21 = vpack.c.bf16 %v2059_v49, %v2057_v62 }
 0x3ac   : > { %5391 = vmatpush1.bf16.msra.mxu1 %v5390_v11  ;;  %v5410_v11 = vpack.c.bf16 %v1162_v51, %v1160_v31 }
 0x3ad   : > { %6287 = vmatpush1.bf16.msra.mxu0 %v6286_v14  ;;  %5393 = vmatprep.subr.bf16.mxu1 %v5392_v15  ;;  %v6306_v14 = vpack.c.bf16 %v2058_v5, %v2056_v4  ;;  %v5412_v15 = vpack.c.bf16 %v1167_v34, %v1165_v6 }
 0x3ae   : > { %6289 = vmatprep.subr.bf16.mxu0 %v6288_v18  ;;  %v2060_v18 = vld [vmem:[%s6696_s4 + $0x37e0] sm:$0xff] }
 0x3af   : > { %v6310_v8 = vpack.c.bf16 %v2062_v7, %v2060_v18 }
 0x3b0   : > { %5395 = vmatpush1.bf16.msra.mxu1 %v5394_v2 }
 0x3b1   : > { %6291 = vmatpush1.bf16.msra.mxu0 %v6290_v24  ;;  %5397 = vmatprep.subr.bf16.mxu1 %v5396_v25 }
 0x3b2   : > { %6293 = vmatprep.subr.bf16.mxu0 %v6292_v32 }
 0x3b4   : > { %5399 = vmatpush1.bf16.msra.mxu1 %v5398_v39 }
 0x3b5   : > { %6295 = vmatpush1.bf16.msra.mxu0 %v6294_v40  ;;  %5401 = vmatprep.subr.bf16.mxu1 %v5400_v55 }
 0x3b6   : > { %6297 = vmatprep.subr.bf16.mxu0 %v6296_v33 }
 0x3b8   : > { %5403 = vmatpush1.bf16.msra.mxu1 %v5402_v47 }
 0x3b9   : > { %6299 = vmatpush1.bf16.msra.mxu0 %v6298_v50  ;;  %5405 = vmatprep.subr.bf16.mxu1 %v5404_v3 }
 0x3ba   : > { %6301 = vmatprep.subr.bf16.mxu0 %v6300_v57 }
 0x3bc   : > { %5407 = vmatpush1.bf16.msra.mxu1 %v5406_v19 }
 0x3bd   : > { %6303 = vmatpush1.bf16.msra.mxu0 %v6302_v1  ;;  %5409 = vmatprep.subr.bf16.mxu1 %v5408_v53 }
 0x3be   : > { %6305 = vmatprep.subr.bf16.mxu0 %v6304_v21 }
 0x3c0   : > { %5411 = vmatpush1.bf16.msra.mxu1 %v5410_v11 }
 0x3c1   : > { %6307 = vmatpush1.bf16.msra.mxu0 %v6306_v14  ;;  %5413 = vmatprep.subr.bf16.mxu1 %v5412_v15 }
 0x3c2   : > { %6309 = vmatprep.subr.bf16.mxu0 %v6308_v17 }
 0x3c4   : > { %5415 = vmatpush1.bf16.msra.mxu1 %v5414_v20 }
 0x3c5   : > { %6311 = vmatpush1.bf16.msra.mxu0 %v6310_v8 }
 0x3c7   : > { %3360 = vmatmul.mubr.f32.vlgmr.msra.gmra.mrb[0].mxu1 %v8640_v48  ;;  %v4378_v48 = vld [vmem:[%s244_s6] sm:$0x3] (!%p4516_p6) }
 0x3c8   : > { %4354 = vmatmul.mubr.f32.vlgmr.msra.gmra.mrb[0].mxu0 %v8645_v43  ;;  %v4382_v43 = vsub.s32 (!%p4516_p6), 0, %v6806_v63  ;;  %v4387_v37 = vrot.slane (!%p4516_p6), %v4378_v48, %v4386_v60 }
 0x3ca   : > { %v4383_v36 = vrot.slane (!%p4516_p6), %v4378_v48, %v4382_v43 }
 0x3cc   : > { %v4388_v38 = vcombine.low (!%p4516_p6), %v4383_v36, %v4387_v37 }
 0x3ce   : > { %v4395_v40 = vrot.slane (!%p4516_p6), %v4388_v38, %v6817_v12 }
 0x49a   : > { %v3361_v22 = vpop.f32.mrb[0].mxu1 }
 0x49b   : > { %v4355_v13 = vpop.f32.mrb[0].mxu0  ;;  %v3363_v2 = vpop.f32.mrb[1].mxu1 }
 0x49c   : > { %v6312_v24 = vadd.f32 %v4355_v13, %v3361_v22  ;;  %v4357_v25 = vpop.f32.mrb[1].mxu0 }
 0x49d   : > { %v6313_v28 = vadd.f32 %v4357_v25, %v3363_v2 }
 0x49f   : > { %v4362_v45 = vcombine.low %v6312_v24, %v6313_v28  ;;  %4376 = sbr.rel (%p4516_p6) target bundleno = 1202 (0x4b2), region = 44 }
 0x4a1   : > { %v4369_v32 = vrot.slane %v4362_v45, %v6817_v12 }
 0x4a3   : > { %v4371_v35 = vadd.f32 %v4369_v32, %v257_v30 }
 0x4a5   : > { %4372 = vst [vmem:[#allocation2] sm:$0xf] %v4371_v35 }
 0x4ac   : > { %v4377_v39 = vld [vmem:[#allocation2] sm:$0xf] }
 0x4ad   : > { %v4397_v55 = vadd.f32 %v4395_v40, %v4377_v39 }
 0x4af   : > { %v4398_v41 = vmax.f32 %v4397_v55, 0.0 }
 0x4b1   : > { %4399 = vst [vmem:[%s6714_s11] sm:$0xf] %v4398_v41 }
 0x4b2 PF: > { %s16_s19 = sadd.s32 1, %s6554_s19   ;;  %s8813_s12 = smov %s6530_s13 }
 0x4b3   : > { %p13_p8 = scmp.ge.s32.totalorder %s16_s19, 30   ;;  %s8814_s13 = smov %s6534_s14 }
 0x4b4   : > { %s8815_s14 = smov %s6649_s5  ;;  %s8816_s15 = smov %s6546_s17 }
 0x4b5   : > { %s8817_s16 = smov %s6550_s18  ;;  %s8818_s17 = smov %s8821_s21 }
 0x4b6   : > { %s8819_s18 = smov %s8825_s22  ;;  %15 = sbr.rel (!%p13_p8) target bundleno = 5 (0x5), region = 86 }
 0x4bd   :  { %4422 = vsyncpa [#allocation4], 1 }
 0x4be   :  { %4424 = vsyncpa [#allocation4 + $0x1], 1 }

</bundles_post_ra>
